<compile_context>
chip_gen: v6e
topology: v6e:2x2x1
jax: 0.10.0
libtpu: 0.0.40
codegen_flags: <defaults>
</compile_context>

<pallas_src>
import functools

import jax
import jax.numpy as jnp
from jax import lax
from jax.experimental import pallas as pl
from jax.experimental.pallas import tpu as pltpu

BN_EPS = 1e-5
MAX_TN = 1024            # lane tile over points; multiple of 128
VMEM_LIMIT = 32 * 1024 * 1024


# ---------------------------------------------------------------------------
# Pallas kernels
# ---------------------------------------------------------------------------

def _fused_conv_max_kernel(*refs, final_relu, has_trans, n_total, mask_tail):
    """conv1+bn1+relu -> conv2+bn2+relu -> conv3+bn3(+relu) -> running max over N."""
    if has_trans:
        (x_ref, trans_ref, w1_ref, t1_ref, w2_ref, t2_ref,
         w3_ref, t3_ref, o_ref, acc_ref) = refs
    else:
        (x_ref, w1_ref, t1_ref, w2_ref, t2_ref,
         w3_ref, t3_ref, o_ref, acc_ref) = refs
        trans_ref = None

    _, C, tn = x_ref.shape
    b = pl.program_id(0)
    j = pl.program_id(1)

    @pl.when(j == 0)
    def _():
        acc_ref[...] = jnp.full(acc_ref.shape, -jnp.inf, acc_ref.dtype)

    x = x_ref[0].astype(jnp.float32)            # (C, tn), points on the lane axis
    w1 = w1_ref[...].astype(jnp.float32)        # (O1, C), BN1 scale pre-folded

    # conv1 on the VPU (C is tiny; a >=128-deep MXU contraction would waste >95%).
    # When has_trans, the input alignment x'[e,n] = sum_d x[d,n]*trans[d,e] is
    # folded into an effective per-batch weight: W1eff[:, d] = sum_e trans[d,e]*W1[:, e]
    # (9 scalar-vector FMAs; trans scalars are read from SMEM).
    cols = []
    for d in range(C):
        if has_trans:
            col = trans_ref[b, d * C + 0] * w1[:, 0:1]
            for e in range(1, C):
                col = col + trans_ref[b, d * C + e] * w1[:, e:e + 1]
        else:
            col = w1[:, d:d + 1]
        cols.append(col)
    h = cols[0] * x[0:1, :]
    for d in range(1, C):
        h = h + cols[d] * x[d:d + 1, :]
    h = jnp.maximum(h + t1_ref[...], 0.0)       # (O1, tn) f32: bias+BN shift+ReLU

    # conv2 / conv3 on the MXU (bf16 operands when weights are bf16, f32 accum).
    h = jnp.dot(w2_ref[...], h.astype(w2_ref.dtype),
                preferred_element_type=jnp.float32)
    h = jnp.maximum(h + t2_ref[...], 0.0)       # (O2, tn)

    y = jnp.dot(w3_ref[...], h.astype(w3_ref.dtype),
                preferred_element_type=jnp.float32)
    y = y + t3_ref[...]                         # (O3, tn)
    if final_relu:
        y = jnp.maximum(y, 0.0)

    if mask_tail:
        # Disable padded / ragged-tail point columns before the running max.
        col_idx = j * tn + lax.broadcasted_iota(jnp.int32, (1, tn), 1)
        y = y + jnp.where(col_idx < n_total, 0.0, -jnp.inf)

    # Lane-dense running max: per-step VPU maxima over the tn/128 lane slices;
    # the single cross-lane reduction is deferred to the per-batch epilogue.
    m = acc_ref[...]
    for k in range(tn // 128):
        m = jnp.maximum(m, y[:, k * 128:(k + 1) * 128])
    acc_ref[...] = m

    @pl.when(j == pl.num_programs(1) - 1)
    def _():
        # TODO(synk): a lane-dense (1, O3) output block (transpose acc once, then
        # reduce over sublanes) would avoid this lane-width-1 store; it only runs
        # once per batch so the cost is negligible.
        o_ref[0] = jnp.max(acc_ref[...], axis=1, keepdims=True).astype(o_ref.dtype)


def _fused_fc_kernel(x_ref, w1_ref, t1_ref, w2_ref, t2_ref, w3_ref, t3_ref, o_ref):
    """fc1+bn4+relu -> fc2+bn5+relu -> fc3 (+identity already folded into t3)."""
    h = jnp.dot(x_ref[...].astype(w1_ref.dtype), w1_ref[...],
                preferred_element_type=jnp.float32)
    h = jnp.maximum(h + t1_ref[...], 0.0)
    h = jnp.dot(h.astype(w2_ref.dtype), w2_ref[...],
                preferred_element_type=jnp.float32)
    h = jnp.maximum(h + t2_ref[...], 0.0)
    h = jnp.dot(h.astype(w3_ref.dtype), w3_ref[...],
                preferred_element_type=jnp.float32)
    o_ref[...] = (h + t3_ref[...]).astype(o_ref.dtype)


# ---------------------------------------------------------------------------
# pallas_call wrappers
# ---------------------------------------------------------------------------

def conv_stack_max(x, p, *, trans=None, final_relu):
    """Fused conv1/2/3 (+BN shifts, ReLU) + max-pool over N.  x: (B, C, N) -> (B, 1024).
    If `trans` (B, C, C) is given, the input alignment is fused into conv1."""
    B, C, N = x.shape
    w1, t1 = p["conv1"]
    w2, t2 = p["conv2"]
    w3, t3 = p["conv3"]
    O1, O2, O3 = w1.shape[0], w2.shape[0], w3.shape[0]

    n_pad = max(128, pl.cdiv(N, 128) * 128)     # lane-dense tiles
    if n_pad != N:
        x = jnp.pad(x, ((0, 0), (0, 0), (0, n_pad - N)))
    tn = min(n_pad, MAX_TN)
    n_tiles = pl.cdiv(n_pad, tn)
    mask_tail = (n_pad != N) or (n_pad % tn != 0)

    kernel = functools.partial(
        _fused_conv_max_kernel, final_relu=final_relu,
        has_trans=trans is not None, n_total=N, mask_tail=mask_tail)

    in_specs = [pl.BlockSpec((1, C, tn), lambda b, j: (b, 0, j))]
    args = [x]
    if trans is not None:
        in_specs.append(pl.BlockSpec(memory_space=pltpu.MemorySpace.SMEM))
        args.append(trans.reshape(B, C * C).astype(jnp.float32))
    in_specs += [
        pl.BlockSpec((O1, C), lambda b, j: (0, 0)),     # resident weights / shifts
        pl.BlockSpec((O1, 1), lambda b, j: (0, 0)),
        pl.BlockSpec((O2, O1), lambda b, j: (0, 0)),
        pl.BlockSpec((O2, 1), lambda b, j: (0, 0)),
        pl.BlockSpec((O3, O2), lambda b, j: (0, 0)),
        pl.BlockSpec((O3, 1), lambda b, j: (0, 0)),
    ]
    args += [w1, t1, w2, t2, w3, t3]

    out = pl.pallas_call(
        kernel,
        out_shape=jax.ShapeDtypeStruct((B, O3, 1), x.dtype),
        grid_spec=pltpu.PrefetchScalarGridSpec(
            num_scalar_prefetch=0,
            grid=(B, n_tiles),
            in_specs=in_specs,
            out_specs=pl.BlockSpec((1, O3, 1), lambda b, j: (b, 0, 0)),
            scratch_shapes=[pltpu.VMEM((O3, 128), jnp.float32)],
        ),
        compiler_params=pltpu.CompilerParams(
            dimension_semantics=("parallel", "arbitrary"),
            vmem_limit_bytes=VMEM_LIMIT),
    )(*args)
    return out[:, :, 0]


def stn_fc_head(h, p):
    """Fused fc1/fc2/fc3 head of STN3d.  h: (B, 1024) -> (B, 9) (identity folded)."""
    w1, t1 = p["fc1"]
    w2, t2 = p["fc2"]
    w3, t3 = p["fc3"]
    B = h.shape[0]
    vmem_specs = [pl.BlockSpec(memory_space=pltpu.MemorySpace.VMEM) for _ in range(7)]
    return pl.pallas_call(
        _fused_fc_kernel,
        out_shape=jax.ShapeDtypeStruct((B, w3.shape[1]), h.dtype),
        in_specs=vmem_specs,
        out_specs=pl.BlockSpec(memory_space=pltpu.MemorySpace.VMEM),
        compiler_params=pltpu.CompilerParams(vmem_limit_bytes=VMEM_LIMIT),
    )(h, w1, t1, w2, t2, w3, t3)


# ---------------------------------------------------------------------------
# PointNetEncoder forward (default configuration)
# ---------------------------------------------------------------------------

def stn3d_forward(x, p):
    B = x.shape[0]
    feat = conv_stack_max(x, p, final_relu=True)          # (B, 1024)
    t9 = stn_fc_head(feat, p)                              # (B, 9), + eye(3) folded
    return t9.reshape(B, 3, 3)


def pointnet_encoder_forward(x, p):
    """x: (B, 3, N) -> (global_feat (B, 1024), trans (B, 3, 3), None)."""
    trans = stn3d_forward(x, p["stn"])
    # Encoder conv stack with the 3x3 alignment fused into conv1; bn3 (no relu) + max.
    gfeat = conv_stack_max(x, p, trans=trans, final_relu=False)
    # TODO(synk): feature_transform=True (STNkd), global_feat=False point-feature
    # concat, D>3 (6/9-channel) input split and pool='mean' are not implemented
    # (module defaults are exercised here).
    return gfeat, trans, None


# ---------------------------------------------------------------------------
# Parameter init / folding and a pure-JAX reference
# ---------------------------------------------------------------------------

def _init_linear(key, fan_in, fan_out):
    kw, kb = jax.random.split(key)
    bound = 1.0 / (fan_in ** 0.5)
    w = jax.random.uniform(kw, (fan_out, fan_in), minval=-bound, maxval=bound,
                           dtype=jnp.float32)
    b = jax.random.uniform(kb, (fan_out,), minval=-bound, maxval=bound,
                           dtype=jnp.float32)
    return w, b


def _init_bn(key, c):
    k1, k2, k3, k4 = jax.random.split(key, 4)
    gamma = jax.random.uniform(k1, (c,), minval=0.5, maxval=1.5, dtype=jnp.float32)
    beta = 0.1 * jax.random.normal(k2, (c,), dtype=jnp.float32)
    mean = 0.1 * jax.random.normal(k3, (c,), dtype=jnp.float32)
    var = jax.random.uniform(k4, (c,), minval=0.5, maxval=1.5, dtype=jnp.float32)
    return gamma, beta, mean, var


def _init_layer(key, fan_in, fan_out, with_bn=True):
    k1, k2 = jax.random.split(key)
    w, b = _init_linear(k1, fan_in, fan_out)
    return (w, b, _init_bn(k2, fan_out) if with_bn else None)


def init_raw_params(key, channel=3):
    ks = jax.random.split(key, 9)
    stn = {
        "conv1": _init_layer(ks[0], channel, 64),
        "conv2": _init_layer(ks[1], 64, 128),
        "conv3": _init_layer(ks[2], 128, 1024),
        "fc1": _init_layer(ks[3], 1024, 512),
        "fc2": _init_layer(ks[4], 512, 256),
        "fc3": _init_layer(ks[5], 256, 9, with_bn=False),
    }
    return {
        "stn": stn,
        "conv1": _init_layer(ks[6], channel, 64),
        "conv2": _init_layer(ks[7], 64, 128),
        "conv3": _init_layer(ks[8], 128, 1024),
    }


def _fold_affine(layer):
    _, b, bn = layer
    if bn is None:
        return jnp.ones_like(b), b
    gamma, beta, mean, var = bn
    scale = gamma / jnp.sqrt(var + BN_EPS)
    return scale, beta + scale * (b - mean)


def fold_params(raw, param_dtype=jnp.float32):
    """Fold Linear bias + inference BatchNorm into the weights:
       conv layers -> (scale-folded W (O,C),  shift (O,1) f32)
       fc layers   -> (scale-folded W^T (K,O), shift (1,O) f32)  [pre-transposed]
    `param_dtype=jnp.bfloat16` enables bf16 MXU operands (f32 accumulation)."""

    def conv(layer):
        w = layer[0]
        scale, shift = _fold_affine(layer)
        return ((w * scale[:, None]).astype(param_dtype),
                shift.reshape(-1, 1).astype(jnp.float32))

    def fc(layer, extra_shift=None):
        w = layer[0]
        scale, shift = _fold_affine(layer)
        if extra_shift is not None:
            shift = shift + extra_shift
        return ((w * scale[:, None]).T.astype(param_dtype),
                shift.reshape(1, -1).astype(jnp.float32))

    iden9 = jnp.eye(3, dtype=jnp.float32).reshape(9)
    stn = raw["stn"]
    return {
        "stn": {
            "conv1": conv(stn["conv1"]),
            "conv2": conv(stn["conv2"]),
            "conv3": conv(stn["conv3"]),
            "fc1": fc(stn["fc1"]),
            "fc2": fc(stn["fc2"]),
            "fc3": fc(stn["fc3"], extra_shift=iden9),   # identity add folded in
        },
        "conv1": conv(raw["conv1"]),
        "conv2": conv(raw["conv2"]),
        "conv3": conv(raw["conv3"]),
    }


def _ref_conv_bn(x, w, b, bn, relu):
    y = jnp.einsum("oc,bcn->bon", w, x) + b[None, :, None]
    gamma, beta, mean, var = bn
    y = (gamma[None, :, None] * (y - mean[None, :, None])
         / jnp.sqrt(var[None, :, None] + BN_EPS) + beta[None, :, None])
    return jnp.maximum(y, 0.0) if relu else y


def _ref_dense(x, w, b, bn, relu):
    y = x @ w.T + b
    if bn is not None:
        gamma, beta, mean, var = bn
        y = gamma * (y - mean) / jnp.sqrt(var + BN_EPS) + beta
    return jnp.maximum(y, 0.0) if relu else y


def _ref_stn3d(x, p):
    B = x.shape[0]
    h = _ref_conv_bn(x, *p["conv1"], relu=True)
    h = _ref_conv_bn(h, *p["conv2"], relu=True)
    h = _ref_conv_bn(h, *p["conv3"], relu=True)
    h = jnp.max(h, axis=2)
    h = _ref_dense(h, *p["fc1"], relu=True)
    h = _ref_dense(h, *p["fc2"], relu=True)
    h = _ref_dense(h, *p["fc3"], relu=False)
    iden = jnp.eye(3, dtype=h.dtype).reshape(1, 9)
    return (h + iden).reshape(B, 3, 3)


def _ref_encoder(x, p):
    trans = _ref_stn3d(x, p["stn"])
    x = jnp.einsum("bdn,bde->ben", x, trans)
    h = _ref_conv_bn(x, *p["conv1"], relu=True)
    h = _ref_conv_bn(h, *p["conv2"], relu=True)
    h = _ref_conv_bn(h, *p["conv3"], relu=False)
    return jnp.max(h, axis=2), trans, None


# ---------------------------------------------------------------------------
# Demo
# ---------------------------------------------------------------------------

if __name__ == "__main__":
    B, C, N = 2, 3, 32          # batch=2, xyz channels, 32 points

    key = jax.random.PRNGKey(0)
    kx, kp = jax.random.split(key)

    x = jax.random.normal(kx, (B, C, N), dtype=jnp.float32)
    raw_params = init_raw_params(kp, channel=C)

    # Pure-JAX reference (unfolded BN) for correctness.
    ref_gfeat, ref_trans, _ = _ref_encoder(x, raw_params)

    fwd = jax.jit(pointnet_encoder_forward)

    # f32 parameters: strict numerical check.
    gfeat, trans, trans_feat = fwd(x, fold_params(raw_params, jnp.float32))
    gfeat = jax.block_until_ready(gfeat)
    trans = jax.block_until_ready(trans)
    assert gfeat.shape == (B, 1024) and trans.shape == (B, 3, 3)
    assert trans_feat is None
    assert jnp.allclose(trans, ref_trans, atol=2e-3, rtol=2e-3)
    assert jnp.allclose(gfeat, ref_gfeat, atol=2e-3, rtol=2e-3)

    # bf16 weights (f32 accumulation in-kernel): perf mode, loose sanity check.
    gfeat16, trans16, _ = fwd(x, fold_params(raw_params, jnp.bfloat16))
    gfeat16 = jax.block_until_ready(gfeat16)
    assert jnp.allclose(trans16.astype(jnp.float32), ref_trans, atol=5e-2, rtol=5e-2)
    assert jnp.allclose(gfeat16.astype(jnp.float32), ref_gfeat, atol=1e-1, rtol=1e-1)

    print("KERNEL_OK")
</pallas_src>

<mosaic_0001>
module attributes {stable_mosaic.version = 11 : i64} {
  func.func @_fused_fc_kernel(%arg0: memref<2x1024xf32, #tpu.memory_space<vmem>>, %arg1: memref<1024x512xf32, #tpu.memory_space<vmem>>, %arg2: memref<1x512xf32, #tpu.memory_space<vmem>>, %arg3: memref<512x256xf32, #tpu.memory_space<vmem>>, %arg4: memref<1x256xf32, #tpu.memory_space<vmem>>, %arg5: memref<256x9xf32, #tpu.memory_space<vmem>>, %arg6: memref<1x9xf32, #tpu.memory_space<vmem>>, %arg7: memref<2x9xf32, #tpu.memory_space<vmem>>) attributes {dimension_semantics = [], scalar_prefetch = 0 : i64, scratch_operands = 0 : i64, tpu.core_type = #tpu.core_type<tc>} {
    %c0 = arith.constant 0 : index
    %c0_0 = arith.constant 0 : index
    %0 = vector.load %arg0[%c0, %c0_0] : memref<2x1024xf32, #tpu.memory_space<vmem>>, vector<2x1024xf32>
    %c0_1 = arith.constant 0 : index
    %c0_2 = arith.constant 0 : index
    %1 = vector.load %arg1[%c0_1, %c0_2] : memref<1024x512xf32, #tpu.memory_space<vmem>>, vector<1024x512xf32>
    %cst = arith.constant dense<0.000000e+00> : vector<2x512xf32>
    %2 = tpu.matmul %0, %1, %cst {dimension_numbers = #tpu.dot_dimension_numbers<[1], [0], [0], [1], [0, 0, 1, 1], [], []>} : vector<2x1024xf32>, vector<1024x512xf32>, vector<2x512xf32> -> vector<2x512xf32>
    %c0_3 = arith.constant 0 : index
    %c0_4 = arith.constant 0 : index
    %3 = vector.load %arg2[%c0_3, %c0_4] : memref<1x512xf32, #tpu.memory_space<vmem>>, vector<1x512xf32>
    %4 = vector.broadcast %3 : vector<1x512xf32> to vector<2x512xf32>
    %5 = arith.addf %2, %4 : vector<2x512xf32>
    %cst_5 = arith.constant 0.000000e+00 : f32
    %6 = vector.broadcast %cst_5 : f32 to vector<2x512xf32>
    %7 = arith.maximumf %5, %6 : vector<2x512xf32>
    %c0_6 = arith.constant 0 : index
    %c0_7 = arith.constant 0 : index
    %8 = vector.load %arg3[%c0_6, %c0_7] : memref<512x256xf32, #tpu.memory_space<vmem>>, vector<512x256xf32>
    %cst_8 = arith.constant dense<0.000000e+00> : vector<2x256xf32>
    %9 = tpu.matmul %7, %8, %cst_8 {dimension_numbers = #tpu.dot_dimension_numbers<[1], [0], [0], [1], [0, 0, 1, 1], [], []>} : vector<2x512xf32>, vector<512x256xf32>, vector<2x256xf32> -> vector<2x256xf32>
    %c0_9 = arith.constant 0 : index
    %c0_10 = arith.constant 0 : index
    %10 = vector.load %arg4[%c0_9, %c0_10] : memref<1x256xf32, #tpu.memory_space<vmem>>, vector<1x256xf32>
    %11 = vector.broadcast %10 : vector<1x256xf32> to vector<2x256xf32>
    %12 = arith.addf %9, %11 : vector<2x256xf32>
    %cst_11 = arith.constant 0.000000e+00 : f32
    %13 = vector.broadcast %cst_11 : f32 to vector<2x256xf32>
    %14 = arith.maximumf %12, %13 : vector<2x256xf32>
    %c0_12 = arith.constant 0 : index
    %c0_13 = arith.constant 0 : index
    %15 = vector.load %arg5[%c0_12, %c0_13] : memref<256x9xf32, #tpu.memory_space<vmem>>, vector<256x9xf32>
    %cst_14 = arith.constant dense<0.000000e+00> : vector<2x9xf32>
    %16 = tpu.matmul %14, %15, %cst_14 {dimension_numbers = #tpu.dot_dimension_numbers<[1], [0], [0], [1], [0, 0, 1, 1], [], []>} : vector<2x256xf32>, vector<256x9xf32>, vector<2x9xf32> -> vector<2x9xf32>
    %c0_15 = arith.constant 0 : index
    %c0_16 = arith.constant 0 : index
    %17 = vector.load %arg6[%c0_15, %c0_16] : memref<1x9xf32, #tpu.memory_space<vmem>>, vector<1x9xf32>
    %18 = vector.broadcast %17 : vector<1x9xf32> to vector<2x9xf32>
    %19 = arith.addf %16, %18 : vector<2x9xf32>
    %c0_17 = arith.constant 0 : index
    %c0_18 = arith.constant 0 : index
    %20 = vector.load %arg7[%c0_17, %c0_18] : memref<2x9xf32, #tpu.memory_space<vmem>>, vector<2x9xf32>
    tpu.vector_store %arg7[%c0_17, %c0_18], %19 {strides = array<i32>} : memref<2x9xf32, #tpu.memory_space<vmem>>, vector<2x9xf32>,
    return
  }
}

module attributes {stable_mosaic.version = 11 : i64} {
  func.func @_fused_conv_max_kernel(%arg0: i32, %arg1: i32, %arg2: memref<1x3x128xf32, #tpu.memory_space<vmem>>, %arg3: memref<64x3xf32, #tpu.memory_space<vmem>>, %arg4: memref<64x1xf32, #tpu.memory_space<vmem>>, %arg5: memref<128x64xf32, #tpu.memory_space<vmem>>, %arg6: memref<128x1xf32, #tpu.memory_space<vmem>>, %arg7: memref<1024x128xf32, #tpu.memory_space<vmem>>, %arg8: memref<1024x1xf32, #tpu.memory_space<vmem>>, %arg9: memref<1x1024x1xf32, #tpu.memory_space<vmem>>, %arg10: memref<1024x128xf32, #tpu.memory_space<vmem>>) attributes {dimension_semantics = [#tpu.dimension_semantics<parallel>, #tpu.dimension_semantics<arbitrary>], iteration_bounds = array<i64: 2, 1>, scalar_prefetch = 0 : i64, scratch_operands = 1 : i64, tpu.core_type = #tpu.core_type<tc>, window_params = [{transform_indices = @transform_0, window_bounds = array<i64: 1, 3, 128>}, {pipeline_mode = #tpu.pipeline_mode<synchronous>, transform_indices = @transform_1, window_bounds = array<i64: 64, 3>}, {pipeline_mode = #tpu.pipeline_mode<synchronous>, transform_indices = @transform_2, window_bounds = array<i64: 64, 1>}, {pipeline_mode = #tpu.pipeline_mode<synchronous>, transform_indices = @transform_3, window_bounds = array<i64: 128, 64>}, {pipeline_mode = #tpu.pipeline_mode<synchronous>, transform_indices = @transform_4, window_bounds = array<i64: 128, 1>}, {pipeline_mode = #tpu.pipeline_mode<synchronous>, transform_indices = @transform_5, window_bounds = array<i64: 1024, 128>}, {pipeline_mode = #tpu.pipeline_mode<synchronous>, transform_indices = @transform_6, window_bounds = array<i64: 1024, 1>}, {transform_indices = @transform_7, window_bounds = array<i64: 1, 1024, 1>}]} {
    %c0_i32 = arith.constant 0 : i32
    %0 = arith.cmpi eq, %arg1, %c0_i32 : i32
    %1 = arith.extui %0 : i1 to i32
    %c0_i32_0 = arith.constant 0 : i32
    %2 = arith.cmpi ne, %1, %c0_i32_0 : i32
    scf.if %2 {
      %cst_27 = arith.constant 0xFF800000 : f32
      %59 = vector.broadcast %cst_27 : f32 to vector<1024x128xf32>
      %c0_28 = arith.constant 0 : index
      %c0_29 = arith.constant 0 : index
      %60 = vector.load %arg10[%c0_28, %c0_29] : memref<1024x128xf32, #tpu.memory_space<vmem>>, vector<1024x128xf32>
      tpu.vector_store %arg10[%c0_28, %c0_29], %59 {strides = array<i32>} : memref<1024x128xf32, #tpu.memory_space<vmem>>, vector<1024x128xf32>,
    } else {
    }
    %c0 = arith.constant 0 : index
    %c0_1 = arith.constant 0 : index
    %c0_2 = arith.constant 0 : index
    %3 = vector.load %arg2[%c0, %c0_1, %c0_2] : memref<1x3x128xf32, #tpu.memory_space<vmem>>, vector<1x3x128xf32>
    %4 = vector.shape_cast %3 : vector<1x3x128xf32> to vector<3x128xf32>
    %c0_3 = arith.constant 0 : index
    %c0_4 = arith.constant 0 : index
    %5 = vector.load %arg3[%c0_3, %c0_4] : memref<64x3xf32, #tpu.memory_space<vmem>>, vector<64x3xf32>
    %6 = vector.extract_strided_slice %5 {offsets = [0, 0], sizes = [64, 1], strides = [1, 1]} : vector<64x3xf32> to vector<64x1xf32>
    %7 = vector.extract_strided_slice %5 {offsets = [0, 1], sizes = [64, 1], strides = [1, 1]} : vector<64x3xf32> to vector<64x1xf32>
    %8 = vector.extract_strided_slice %5 {offsets = [0, 2], sizes = [64, 1], strides = [1, 1]} : vector<64x3xf32> to vector<64x1xf32>
    %9 = vector.extract_strided_slice %4 {offsets = [0, 0], sizes = [1, 128], strides = [1, 1]} : vector<3x128xf32> to vector<1x128xf32>
    %10 = vector.broadcast %6 : vector<64x1xf32> to vector<64x128xf32>
    %11 = vector.broadcast %9 : vector<1x128xf32> to vector<64x128xf32>
    %12 = arith.mulf %10, %11 : vector<64x128xf32>
    %13 = vector.extract_strided_slice %4 {offsets = [1, 0], sizes = [1, 128], strides = [1, 1]} : vector<3x128xf32> to vector<1x128xf32>
    %14 = vector.broadcast %7 : vector<64x1xf32> to vector<64x128xf32>
    %15 = vector.broadcast %13 : vector<1x128xf32> to vector<64x128xf32>
    %16 = arith.mulf %14, %15 : vector<64x128xf32>
    %17 = arith.addf %12, %16 : vector<64x128xf32>
    %18 = vector.extract_strided_slice %4 {offsets = [2, 0], sizes = [1, 128], strides = [1, 1]} : vector<3x128xf32> to vector<1x128xf32>
    %19 = vector.broadcast %8 : vector<64x1xf32> to vector<64x128xf32>
    %20 = vector.broadcast %18 : vector<1x128xf32> to vector<64x128xf32>
    %21 = arith.mulf %19, %20 : vector<64x128xf32>
    %22 = arith.addf %17, %21 : vector<64x128xf32>
    %c0_5 = arith.constant 0 : index
    %c0_6 = arith.constant 0 : index
    %23 = vector.load %arg4[%c0_5, %c0_6] : memref<64x1xf32, #tpu.memory_space<vmem>>, vector<64x1xf32>
    %24 = vector.broadcast %23 : vector<64x1xf32> to vector<64x128xf32>
    %25 = arith.addf %22, %24 : vector<64x128xf32>
    %cst = arith.constant 0.000000e+00 : f32
    %26 = vector.broadcast %cst : f32 to vector<64x128xf32>
    %27 = arith.maximumf %25, %26 : vector<64x128xf32>
    %c0_7 = arith.constant 0 : index
    %c0_8 = arith.constant 0 : index
    %28 = vector.load %arg5[%c0_7, %c0_8] : memref<128x64xf32, #tpu.memory_space<vmem>>, vector<128x64xf32>
    %cst_9 = arith.constant dense<0.000000e+00> : vector<128x128xf32>
    %29 = tpu.matmul %28, %27, %cst_9 {dimension_numbers = #tpu.dot_dimension_numbers<[1], [0], [0], [1], [0, 0, 1, 1], [], []>} : vector<128x64xf32>, vector<64x128xf32>, vector<128x128xf32> -> vector<128x128xf32>
    %c0_10 = arith.constant 0 : index
    %c0_11 = arith.constant 0 : index
    %30 = vector.load %arg6[%c0_10, %c0_11] : memref<128x1xf32, #tpu.memory_space<vmem>>, vector<128x1xf32>
    %31 = vector.broadcast %30 : vector<128x1xf32> to vector<128x128xf32>
    %32 = arith.addf %29, %31 : vector<128x128xf32>
    %cst_12 = arith.constant 0.000000e+00 : f32
    %33 = vector.broadcast %cst_12 : f32 to vector<128x128xf32>
    %34 = arith.maximumf %32, %33 : vector<128x128xf32>
    %c0_13 = arith.constant 0 : index
    %c0_14 = arith.constant 0 : index
    %35 = vector.load %arg7[%c0_13, %c0_14] : memref<1024x128xf32, #tpu.memory_space<vmem>>, vector<1024x128xf32>
    %cst_15 = arith.constant dense<0.000000e+00> : vector<1024x128xf32>
    %36 = tpu.matmul %35, %34, %cst_15 {dimension_numbers = #tpu.dot_dimension_numbers<[1], [0], [0], [1], [0, 0, 1, 1], [], []>} : vector<1024x128xf32>, vector<128x128xf32>, vector<1024x128xf32> -> vector<1024x128xf32>
    %c0_16 = arith.constant 0 : index
    %c0_17 = arith.constant 0 : index
    %37 = vector.load %arg8[%c0_16, %c0_17] : memref<1024x1xf32, #tpu.memory_space<vmem>>, vector<1024x1xf32>
    %38 = vector.broadcast %37 : vector<1024x1xf32> to vector<1024x128xf32>
    %39 = arith.addf %36, %38 : vector<1024x128xf32>
    %cst_18 = arith.constant 0.000000e+00 : f32
    %40 = vector.broadcast %cst_18 : f32 to vector<1024x128xf32>
    %41 = arith.maximumf %39, %40 : vector<1024x128xf32>
    %c128_i32 = arith.constant 128 : i32
    %42 = arith.muli %arg1, %c128_i32 : i32
    %43 = tpu.iota {dimensions = array<i32: 1>} : vector<1x128xi32>
    %44 = vector.broadcast %42 : i32 to vector<1x128xi32>
    %45 = arith.addi %44, %43 : vector<1x128xi32>
    %c32_i32 = arith.constant 32 : i32
    %46 = vector.broadcast %c32_i32 : i32 to vector<1x128xi32>
    %47 = arith.cmpi slt, %45, %46 : vector<1x128xi32>
    %cst_19 = arith.constant 0.000000e+00 : f32
    %cst_20 = arith.constant 0xFF800000 : f32
    %48 = vector.broadcast %cst_19 : f32 to vector<1x128xf32>
    %49 = vector.broadcast %cst_20 : f32 to vector<1x128xf32>
    %50 = arith.select %47, %48, %49 : vector<1x128xi1>, vector<1x128xf32>
    %51 = vector.broadcast %50 : vector<1x128xf32> to vector<1024x128xf32>
    %52 = arith.addf %41, %51 : vector<1024x128xf32>
    %c0_21 = arith.constant 0 : index
    %c0_22 = arith.constant 0 : index
    %53 = vector.load %arg10[%c0_21, %c0_22] : memref<1024x128xf32, #tpu.memory_space<vmem>>, vector<1024x128xf32>
    %54 = arith.maximumf %53, %52 : vector<1024x128xf32>
    %c0_23 = arith.constant 0 : index
    %c0_24 = arith.constant 0 : index
    %55 = vector.load %arg10[%c0_23, %c0_24] : memref<1024x128xf32, #tpu.memory_space<vmem>>, vector<1024x128xf32>
    tpu.vector_store %arg10[%c0_23, %c0_24], %54 {strides = array<i32>} : memref<1024x128xf32, #tpu.memory_space<vmem>>, vector<1024x128xf32>,
    %c0_i32_25 = arith.constant 0 : i32
    %56 = arith.cmpi eq, %arg1, %c0_i32_25 : i32
    %57 = arith.extui %56 : i1 to i32
    %c0_i32_26 = arith.constant 0 : i32
    %58 = arith.cmpi ne, %57, %c0_i32_26 : i32
    scf.if %58 {
      %c0_27 = arith.constant 0 : index
      %c0_28 = arith.constant 0 : index
      %59 = vector.load %arg10[%c0_27, %c0_28] : memref<1024x128xf32, #tpu.memory_space<vmem>>, vector<1024x128xf32>
      %cst_29 = arith.constant dense<0xFF800000> : vector<1024xf32>
      %60 = vector.multi_reduction <maximumf>, %59, %cst_29 [1] : vector<1024x128xf32> to vector<1024xf32>
      %61 = vector.shape_cast %60 : vector<1024xf32> to vector<1024x1xf32>
      %c0_30 = arith.constant 0 : index
      %c0_31 = arith.constant 0 : index
      %c0_32 = arith.constant 0 : index
      %62 = vector.load %arg9[%c0_30, %c0_31, %c0_32] : memref<1x1024x1xf32, #tpu.memory_space<vmem>>, vector<1x1024x1xf32>
      %63 = vector.shape_cast %62 : vector<1x1024x1xf32> to vector<1024x1xf32>
      %64 = vector.shape_cast %61 : vector<1024x1xf32> to vector<1x1024x1xf32>
      tpu.vector_store %arg9[%c0_30, %c0_31, %c0_32], %64 {strides = array<i32>} : memref<1x1024x1xf32, #tpu.memory_space<vmem>>, vector<1x1024x1xf32>,
    } else {
    }
    return
  }
  func.func @transform_0(%arg0: i32, %arg1: i32) -> (i32, i32, i32) {
    %c0_i32 = arith.constant 0 : i32
    %c0_i32_0 = arith.constant 0 : i32
    return %arg0, %c0_i32, %arg1 : i32, i32, i32
  }
  func.func @transform_1(%arg0: i32, %arg1: i32) -> (i32, i32) {
    %c0_i32 = arith.constant 0 : i32
    %c0_i32_0 = arith.constant 0 : i32
    %c0_i32_1 = arith.constant 0 : i32
    return %c0_i32, %c0_i32_0 : i32, i32
  }
  func.func @transform_2(%arg0: i32, %arg1: i32) -> (i32, i32) {
    %c0_i32 = arith.constant 0 : i32
    %c0_i32_0 = arith.constant 0 : i32
    %c0_i32_1 = arith.constant 0 : i32
    return %c0_i32, %c0_i32_0 : i32, i32
  }
  func.func @transform_3(%arg0: i32, %arg1: i32) -> (i32, i32) {
    %c0_i32 = arith.constant 0 : i32
    %c0_i32_0 = arith.constant 0 : i32
    %c0_i32_1 = arith.constant 0 : i32
    return %c0_i32, %c0_i32_0 : i32, i32
  }
  func.func @transform_4(%arg0: i32, %arg1: i32) -> (i32, i32) {
    %c0_i32 = arith.constant 0 : i32
    %c0_i32_0 = arith.constant 0 : i32
    %c0_i32_1 = arith.constant 0 : i32
    return %c0_i32, %c0_i32_0 : i32, i32
  }
  func.func @transform_5(%arg0: i32, %arg1: i32) -> (i32, i32) {
    %c0_i32 = arith.constant 0 : i32
    %c0_i32_0 = arith.constant 0 : i32
    %c0_i32_1 = arith.constant 0 : i32
    return %c0_i32, %c0_i32_0 : i32, i32
  }
  func.func @transform_6(%arg0: i32, %arg1: i32) -> (i32, i32) {
    %c0_i32 = arith.constant 0 : i32
    %c0_i32_0 = arith.constant 0 : i32
    %c0_i32_1 = arith.constant 0 : i32
    return %c0_i32, %c0_i32_0 : i32, i32
  }
  func.func @transform_7(%arg0: i32, %arg1: i32) -> (i32, i32, i32) {
    %c0_i32 = arith.constant 0 : i32
    %c0_i32_0 = arith.constant 0 : i32
    %c0_i32_1 = arith.constant 0 : i32
    return %arg0, %c0_i32, %c0_i32_0 : i32, i32, i32
  }
}

module attributes {stable_mosaic.version = 11 : i64} {
  func.func @_fused_conv_max_kernel(%arg0: i32, %arg1: i32, %arg2: memref<1x3x128xf32, #tpu.memory_space<vmem>>, %arg3: memref<2x9xf32, #tpu.memory_space<smem>>, %arg4: memref<64x3xf32, #tpu.memory_space<vmem>>, %arg5: memref<64x1xf32, #tpu.memory_space<vmem>>, %arg6: memref<128x64xf32, #tpu.memory_space<vmem>>, %arg7: memref<128x1xf32, #tpu.memory_space<vmem>>, %arg8: memref<1024x128xf32, #tpu.memory_space<vmem>>, %arg9: memref<1024x1xf32, #tpu.memory_space<vmem>>, %arg10: memref<1x1024x1xf32, #tpu.memory_space<vmem>>, %arg11: memref<1024x128xf32, #tpu.memory_space<vmem>>) attributes {dimension_semantics = [#tpu.dimension_semantics<parallel>, #tpu.dimension_semantics<arbitrary>], iteration_bounds = array<i64: 2, 1>, scalar_prefetch = 0 : i64, scratch_operands = 1 : i64, tpu.core_type = #tpu.core_type<tc>, window_params = [{transform_indices = @transform_0, window_bounds = array<i64: 1, 3, 128>}, {transform_indices = @transform_1, window_bounds = array<i64: 2, 9>}, {pipeline_mode = #tpu.pipeline_mode<synchronous>, transform_indices = @transform_2, window_bounds = array<i64: 64, 3>}, {pipeline_mode = #tpu.pipeline_mode<synchronous>, transform_indices = @transform_3, window_bounds = array<i64: 64, 1>}, {pipeline_mode = #tpu.pipeline_mode<synchronous>, transform_indices = @transform_4, window_bounds = array<i64: 128, 64>}, {pipeline_mode = #tpu.pipeline_mode<synchronous>, transform_indices = @transform_5, window_bounds = array<i64: 128, 1>}, {pipeline_mode = #tpu.pipeline_mode<synchronous>, transform_indices = @transform_6, window_bounds = array<i64: 1024, 128>}, {pipeline_mode = #tpu.pipeline_mode<synchronous>, transform_indices = @transform_7, window_bounds = array<i64: 1024, 1>}, {transform_indices = @transform_8, window_bounds = array<i64: 1, 1024, 1>}]} {
    %c0_i32 = arith.constant 0 : i32
    %0 = arith.cmpi eq, %arg1, %c0_i32 : i32
    %1 = arith.extui %0 : i1 to i32
    %c0_i32_0 = arith.constant 0 : i32
    %2 = arith.cmpi ne, %1, %c0_i32_0 : i32
    scf.if %2 {
      %cst_27 = arith.constant 0xFF800000 : f32
      %105 = vector.broadcast %cst_27 : f32 to vector<1024x128xf32>
      %c0_28 = arith.constant 0 : index
      %c0_29 = arith.constant 0 : index
      %106 = vector.load %arg11[%c0_28, %c0_29] : memref<1024x128xf32, #tpu.memory_space<vmem>>, vector<1024x128xf32>
      tpu.vector_store %arg11[%c0_28, %c0_29], %105 {strides = array<i32>} : memref<1024x128xf32, #tpu.memory_space<vmem>>, vector<1024x128xf32>,
    } else {
    }
    %c0 = arith.constant 0 : index
    %c0_1 = arith.constant 0 : index
    %c0_2 = arith.constant 0 : index
    %3 = vector.load %arg2[%c0, %c0_1, %c0_2] : memref<1x3x128xf32, #tpu.memory_space<vmem>>, vector<1x3x128xf32>
    %4 = vector.shape_cast %3 : vector<1x3x128xf32> to vector<3x128xf32>
    %c0_3 = arith.constant 0 : index
    %c0_4 = arith.constant 0 : index
    %5 = vector.load %arg4[%c0_3, %c0_4] : memref<64x3xf32, #tpu.memory_space<vmem>>, vector<64x3xf32>
    %6 = arith.index_cast %arg0 : i32 to index
    %c0_5 = arith.constant 0 : index
    %7 = memref.load %arg3[%6, %c0_5] : memref<2x9xf32, #tpu.memory_space<smem>>
    %8 = vector.extract_strided_slice %5 {offsets = [0, 0], sizes = [64, 1], strides = [1, 1]} : vector<64x3xf32> to vector<64x1xf32>
    %9 = vector.broadcast %7 : f32 to vector<64x1xf32>
    %10 = arith.mulf %9, %8 : vector<64x1xf32>
    %11 = arith.index_cast %arg0 : i32 to index
    %c1 = arith.constant 1 : index
    %12 = memref.load %arg3[%11, %c1] : memref<2x9xf32, #tpu.memory_space<smem>>
    %13 = vector.extract_strided_slice %5 {offsets = [0, 1], sizes = [64, 1], strides = [1, 1]} : vector<64x3xf32> to vector<64x1xf32>
    %14 = vector.broadcast %12 : f32 to vector<64x1xf32>
    %15 = arith.mulf %14, %13 : vector<64x1xf32>
    %16 = arith.addf %10, %15 : vector<64x1xf32>
    %17 = arith.index_cast %arg0 : i32 to index
    %c2 = arith.constant 2 : index
    %18 = memref.load %arg3[%17, %c2] : memref<2x9xf32, #tpu.memory_space<smem>>
    %19 = vector.extract_strided_slice %5 {offsets = [0, 2], sizes = [64, 1], strides = [1, 1]} : vector<64x3xf32> to vector<64x1xf32>
    %20 = vector.broadcast %18 : f32 to vector<64x1xf32>
    %21 = arith.mulf %20, %19 : vector<64x1xf32>
    %22 = arith.addf %16, %21 : vector<64x1xf32>
    %23 = arith.index_cast %arg0 : i32 to index
    %c3 = arith.constant 3 : index
    %24 = memref.load %arg3[%23, %c3] : memref<2x9xf32, #tpu.memory_space<smem>>
    %25 = vector.extract_strided_slice %5 {offsets = [0, 0], sizes = [64, 1], strides = [1, 1]} : vector<64x3xf32> to vector<64x1xf32>
    %26 = vector.broadcast %24 : f32 to vector<64x1xf32>
    %27 = arith.mulf %26, %25 : vector<64x1xf32>
    %28 = arith.index_cast %arg0 : i32 to index
    %c4 = arith.constant 4 : index
    %29 = memref.load %arg3[%28, %c4] : memref<2x9xf32, #tpu.memory_space<smem>>
    %30 = vector.extract_strided_slice %5 {offsets = [0, 1], sizes = [64, 1], strides = [1, 1]} : vector<64x3xf32> to vector<64x1xf32>
    %31 = vector.broadcast %29 : f32 to vector<64x1xf32>
    %32 = arith.mulf %31, %30 : vector<64x1xf32>
    %33 = arith.addf %27, %32 : vector<64x1xf32>
    %34 = arith.index_cast %arg0 : i32 to index
    %c5 = arith.constant 5 : index
    %35 = memref.load %arg3[%34, %c5] : memref<2x9xf32, #tpu.memory_space<smem>>
    %36 = vector.extract_strided_slice %5 {offsets = [0, 2], sizes = [64, 1], strides = [1, 1]} : vector<64x3xf32> to vector<64x1xf32>
    %37 = vector.broadcast %35 : f32 to vector<64x1xf32>
    %38 = arith.mulf %37, %36 : vector<64x1xf32>
    %39 = arith.addf %33, %38 : vector<64x1xf32>
    %40 = arith.index_cast %arg0 : i32 to index
    %c6 = arith.constant 6 : index
    %41 = memref.load %arg3[%40, %c6] : memref<2x9xf32, #tpu.memory_space<smem>>
    %42 = vector.extract_strided_slice %5 {offsets = [0, 0], sizes = [64, 1], strides = [1, 1]} : vector<64x3xf32> to vector<64x1xf32>
    %43 = vector.broadcast %41 : f32 to vector<64x1xf32>
    %44 = arith.mulf %43, %42 : vector<64x1xf32>
    %45 = arith.index_cast %arg0 : i32 to index
    %c7 = arith.constant 7 : index
    %46 = memref.load %arg3[%45, %c7] : memref<2x9xf32, #tpu.memory_space<smem>>
    %47 = vector.extract_strided_slice %5 {offsets = [0, 1], sizes = [64, 1], strides = [1, 1]} : vector<64x3xf32> to vector<64x1xf32>
    %48 = vector.broadcast %46 : f32 to vector<64x1xf32>
    %49 = arith.mulf %48, %47 : vector<64x1xf32>
    %50 = arith.addf %44, %49 : vector<64x1xf32>
    %51 = arith.index_cast %arg0 : i32 to index
    %c8 = arith.constant 8 : index
    %52 = memref.load %arg3[%51, %c8] : memref<2x9xf32, #tpu.memory_space<smem>>
    %53 = vector.extract_strided_slice %5 {offsets = [0, 2], sizes = [64, 1], strides = [1, 1]} : vector<64x3xf32> to vector<64x1xf32>
    %54 = vector.broadcast %52 : f32 to vector<64x1xf32>
    %55 = arith.mulf %54, %53 : vector<64x1xf32>
    %56 = arith.addf %50, %55 : vector<64x1xf32>
    %57 = vector.extract_strided_slice %4 {offsets = [0, 0], sizes = [1, 128], strides = [1, 1]} : vector<3x128xf32> to vector<1x128xf32>
    %58 = vector.broadcast %22 : vector<64x1xf32> to vector<64x128xf32>
    %59 = vector.broadcast %57 : vector<1x128xf32> to vector<64x128xf32>
    %60 = arith.mulf %58, %59 : vector<64x128xf32>
    %61 = vector.extract_strided_slice %4 {offsets = [1, 0], sizes = [1, 128], strides = [1, 1]} : vector<3x128xf32> to vector<1x128xf32>
    %62 = vector.broadcast %39 : vector<64x1xf32> to vector<64x128xf32>
    %63 = vector.broadcast %61 : vector<1x128xf32> to vector<64x128xf32>
    %64 = arith.mulf %62, %63 : vector<64x128xf32>
    %65 = arith.addf %60, %64 : vector<64x128xf32>
    %66 = vector.extract_strided_slice %4 {offsets = [2, 0], sizes = [1, 128], strides = [1, 1]} : vector<3x128xf32> to vector<1x128xf32>
    %67 = vector.broadcast %56 : vector<64x1xf32> to vector<64x128xf32>
    %68 = vector.broadcast %66 : vector<1x128xf32> to vector<64x128xf32>
    %69 = arith.mulf %67, %68 : vector<64x128xf32>
    %70 = arith.addf %65, %69 : vector<64x128xf32>
    %c0_6 = arith.constant 0 : index
    %c0_7 = arith.constant 0 : index
    %71 = vector.load %arg5[%c0_6, %c0_7] : memref<64x1xf32, #tpu.memory_space<vmem>>, vector<64x1xf32>
    %72 = vector.broadcast %71 : vector<64x1xf32> to vector<64x128xf32>
    %73 = arith.addf %70, %72 : vector<64x128xf32>
    %cst = arith.constant 0.000000e+00 : f32
    %74 = vector.broadcast %cst : f32 to vector<64x128xf32>
    %75 = arith.maximumf %73, %74 : vector<64x128xf32>
    %c0_8 = arith.constant 0 : index
    %c0_9 = arith.constant 0 : index
    %76 = vector.load %arg6[%c0_8, %c0_9] : memref<128x64xf32, #tpu.memory_space<vmem>>, vector<128x64xf32>
    %cst_10 = arith.constant dense<0.000000e+00> : vector<128x128xf32>
    %77 = tpu.matmul %76, %75, %cst_10 {dimension_numbers = #tpu.dot_dimension_numbers<[1], [0], [0], [1], [0, 0, 1, 1], [], []>} : vector<128x64xf32>, vector<64x128xf32>, vector<128x128xf32> -> vector<128x128xf32>
    %c0_11 = arith.constant 0 : index
    %c0_12 = arith.constant 0 : index
    %78 = vector.load %arg7[%c0_11, %c0_12] : memref<128x1xf32, #tpu.memory_space<vmem>>, vector<128x1xf32>
    %79 = vector.broadcast %78 : vector<128x1xf32> to vector<128x128xf32>
    %80 = arith.addf %77, %79 : vector<128x128xf32>
    %cst_13 = arith.constant 0.000000e+00 : f32
    %81 = vector.broadcast %cst_13 : f32 to vector<128x128xf32>
    %82 = arith.maximumf %80, %81 : vector<128x128xf32>
    %c0_14 = arith.constant 0 : index
    %c0_15 = arith.constant 0 : index
    %83 = vector.load %arg8[%c0_14, %c0_15] : memref<1024x128xf32, #tpu.memory_space<vmem>>, vector<1024x128xf32>
    %cst_16 = arith.constant dense<0.000000e+00> : vector<1024x128xf32>
    %84 = tpu.matmul %83, %82, %cst_16 {dimension_numbers = #tpu.dot_dimension_numbers<[1], [0], [0], [1], [0, 0, 1, 1], [], []>} : vector<1024x128xf32>, vector<128x128xf32>, vector<1024x128xf32> -> vector<1024x128xf32>
    %c0_17 = arith.constant 0 : index
    %c0_18 = arith.constant 0 : index
    %85 = vector.load %arg9[%c0_17, %c0_18] : memref<1024x1xf32, #tpu.memory_space<vmem>>, vector<1024x1xf32>
    %86 = vector.broadcast %85 : vector<1024x1xf32> to vector<1024x128xf32>
    %87 = arith.addf %84, %86 : vector<1024x128xf32>
    %c128_i32 = arith.constant 128 : i32
    %88 = arith.muli %arg1, %c128_i32 : i32
    %89 = tpu.iota {dimensions = array<i32: 1>} : vector<1x128xi32>
    %90 = vector.broadcast %88 : i32 to vector<1x128xi32>
    %91 = arith.addi %90, %89 : vector<1x128xi32>
    %c32_i32 = arith.constant 32 : i32
    %92 = vector.broadcast %c32_i32 : i32 to vector<1x128xi32>
    %93 = arith.cmpi slt, %91, %92 : vector<1x128xi32>
    %cst_19 = arith.constant 0.000000e+00 : f32
    %cst_20 = arith.constant 0xFF800000 : f32
    %94 = vector.broadcast %cst_19 : f32 to vector<1x128xf32>
    %95 = vector.broadcast %cst_20 : f32 to vector<1x128xf32>
    %96 = arith.select %93, %94, %95 : vector<1x128xi1>, vector<1x128xf32>
    %97 = vector.broadcast %96 : vector<1x128xf32> to vector<1024x128xf32>
    %98 = arith.addf %87, %97 : vector<1024x128xf32>
    %c0_21 = arith.constant 0 : index
    %c0_22 = arith.constant 0 : index
    %99 = vector.load %arg11[%c0_21, %c0_22] : memref<1024x128xf32, #tpu.memory_space<vmem>>, vector<1024x128xf32>
    %100 = arith.maximumf %99, %98 : vector<1024x128xf32>
    %c0_23 = arith.constant 0 : index
    %c0_24 = arith.constant 0 : index
    %101 = vector.load %arg11[%c0_23, %c0_24] : memref<1024x128xf32, #tpu.memory_space<vmem>>, vector<1024x128xf32>
    tpu.vector_store %arg11[%c0_23, %c0_24], %100 {strides = array<i32>} : memref<1024x128xf32, #tpu.memory_space<vmem>>, vector<1024x128xf32>,
    %c0_i32_25 = arith.constant 0 : i32
    %102 = arith.cmpi eq, %arg1, %c0_i32_25 : i32
    %103 = arith.extui %102 : i1 to i32
    %c0_i32_26 = arith.constant 0 : i32
    %104 = arith.cmpi ne, %103, %c0_i32_26 : i32
    scf.if %104 {
      %c0_27 = arith.constant 0 : index
      %c0_28 = arith.constant 0 : index
      %105 = vector.load %arg11[%c0_27, %c0_28] : memref<1024x128xf32, #tpu.memory_space<vmem>>, vector<1024x128xf32>
      %cst_29 = arith.constant dense<0xFF800000> : vector<1024xf32>
      %106 = vector.multi_reduction <maximumf>, %105, %cst_29 [1] : vector<1024x128xf32> to vector<1024xf32>
      %107 = vector.shape_cast %106 : vector<1024xf32> to vector<1024x1xf32>
      %c0_30 = arith.constant 0 : index
      %c0_31 = arith.constant 0 : index
      %c0_32 = arith.constant 0 : index
      %108 = vector.load %arg10[%c0_30, %c0_31, %c0_32] : memref<1x1024x1xf32, #tpu.memory_space<vmem>>, vector<1x1024x1xf32>
      %109 = vector.shape_cast %108 : vector<1x1024x1xf32> to vector<1024x1xf32>
      %110 = vector.shape_cast %107 : vector<1024x1xf32> to vector<1x1024x1xf32>
      tpu.vector_store %arg10[%c0_30, %c0_31, %c0_32], %110 {strides = array<i32>} : memref<1x1024x1xf32, #tpu.memory_space<vmem>>, vector<1x1024x1xf32>,
    } else {
    }
    return
  }
  func.func @transform_0(%arg0: i32, %arg1: i32) -> (i32, i32, i32) {
    %c0_i32 = arith.constant 0 : i32
    %c0_i32_0 = arith.constant 0 : i32
    return %arg0, %c0_i32, %arg1 : i32, i32, i32
  }
  func.func @transform_1(%arg0: i32, %arg1: i32) -> (i32, i32) {
    %c0_i32 = arith.constant 0 : i32
    %c0_i32_0 = arith.constant 0 : i32
    %c0_i32_1 = arith.constant 0 : i32
    return %c0_i32, %c0_i32_0 : i32, i32
  }
  func.func @transform_2(%arg0: i32, %arg1: i32) -> (i32, i32) {
    %c0_i32 = arith.constant 0 : i32
    %c0_i32_0 = arith.constant 0 : i32
    %c0_i32_1 = arith.constant 0 : i32
    return %c0_i32, %c0_i32_0 : i32, i32
  }
  func.func @transform_3(%arg0: i32, %arg1: i32) -> (i32, i32) {
    %c0_i32 = arith.constant 0 : i32
    %c0_i32_0 = arith.constant 0 : i32
    %c0_i32_1 = arith.constant 0 : i32
    return %c0_i32, %c0_i32_0 : i32, i32
  }
  func.func @transform_4(%arg0: i32, %arg1: i32) -> (i32, i32) {
    %c0_i32 = arith.constant 0 : i32
    %c0_i32_0 = arith.constant 0 : i32
    %c0_i32_1 = arith.constant 0 : i32
    return %c0_i32, %c0_i32_0 : i32, i32
  }
  func.func @transform_5(%arg0: i32, %arg1: i32) -> (i32, i32) {
    %c0_i32 = arith.constant 0 : i32
    %c0_i32_0 = arith.constant 0 : i32
    %c0_i32_1 = arith.constant 0 : i32
    return %c0_i32, %c0_i32_0 : i32, i32
  }
  func.func @transform_6(%arg0: i32, %arg1: i32) -> (i32, i32) {
    %c0_i32 = arith.constant 0 : i32
    %c0_i32_0 = arith.constant 0 : i32
    %c0_i32_1 = arith.constant 0 : i32
    return %c0_i32, %c0_i32_0 : i32, i32
  }
  func.func @transform_7(%arg0: i32, %arg1: i32) -> (i32, i32) {
    %c0_i32 = arith.constant 0 : i32
    %c0_i32_0 = arith.constant 0 : i32
    %c0_i32_1 = arith.constant 0 : i32
    return %c0_i32, %c0_i32_0 : i32, i32
  }
  func.func @transform_8(%arg0: i32, %arg1: i32) -> (i32, i32, i32) {
    %c0_i32 = arith.constant 0 : i32
    %c0_i32_0 = arith.constant 0 : i32
    %c0_i32_1 = arith.constant 0 : i32
    return %arg0, %c0_i32, %c0_i32_0 : i32, i32, i32
  }
}

</mosaic_0001>

<bundles_post_ra>
// kernel: pointnet_encoder_forward.4
= control target key start
LH: loop header
LB: loop body
LE: loop exit
PB: predicated region body
PF: predicated region fallthrough
CT: control target
= control target key end

     0   :  { %vm1571_vm0 = vcmask 66560   ;;  %s3758_s1 = inlined_call_operand.vmem [shape: f32[1024,512], index: 1, kind: input, shape index: {}]   ;;  %s3759_s0 = inlined_call_operand.vmem [shape: f32[2,1024], index: 0, kind: input, shape index: {}]   ;;  %s3760_s3 = inlined_call_operand.vmem [shape: f32[512,256], index: 3, kind: input, shape index: {}]   ;;  %s3761_s2 = inlined_call_operand.vmem [shape: f32[1,512], index: 2, kind: input, shape index: {}]   ;;  %s3762_s5 = inlined_call_operand.vmem [shape: f32[256,9], index: 5, kind: input, shape index: {}]   ;;  %s3763_s4 = inlined_call_operand.vmem [shape: f32[1,256], index: 4, kind: input, shape index: {}]   ;;  %s3764_s6 = inlined_call_operand.vmem [shape: f32[1,9], index: 6, kind: input, shape index: {}]   ;;  %s3765_s7 = inlined_call_operand.vmem [shape: f32[2,9], index: 7, kind: output, shape index: {}]  }
   0x1   :  { %v89_v0 = vld [vmem:[%s3758_s1 + $0x1e8] sm:$0xff]  ;;  %v88_v2 = vld [vmem:[%s3758_s1 + $0x1e0] sm:$0xff] }
   0x2   :  { %v217_v1 = vld [vmem:[%s3758_s1 + $0x5e8] sm:$0xff]  ;;  %606 = vmatprep.subr.mxu0 %v89_v0  ;;  %v216_v3 = vld [vmem:[%s3758_s1 + $0x5e0] sm:$0xff] }
   0x3   :  { %677 = vmatprep.subr.mxu1 %v217_v1  ;;  %v85_v4 = vld [vmem:[%s3758_s1 + $0x1c8] sm:$0xff]  ;;  %607 = vmatpush1.msra.mxu0 %v88_v2  ;;  %v84_v6 = vld [vmem:[%s3758_s1 + $0x1c0] sm:$0xff] }
   0x4   :  { %v213_v5 = vld [vmem:[%s3758_s1 + $0x5c8] sm:$0xff]  ;;  %678 = vmatpush1.msra.mxu1 %v216_v3  ;;  %v212_v7 = vld [vmem:[%s3758_s1 + $0x5c0] sm:$0xff]  ;;  %608 = vmatprep.subr.mxu0 %v85_v4 }
   0x5   :  { %v81_v8 = vld [vmem:[%s3758_s1 + $0x1a8] sm:$0xff]  ;;  %679 = vmatprep.subr.mxu1 %v213_v5  ;;  %v80_v10 = vld [vmem:[%s3758_s1 + $0x1a0] sm:$0xff]  ;;  %609 = vmatpush1.msra.mxu0 %v84_v6 }
   0x6   :  { %v209_v9 = vld [vmem:[%s3758_s1 + $0x5a8] sm:$0xff]  ;;  %v208_v11 = vld [vmem:[%s3758_s1 + $0x5a0] sm:$0xff]  ;;  %680 = vmatpush1.msra.mxu1 %v212_v7  ;;  %610 = vmatprep.subr.mxu0 %v81_v8 }
   0x7   :  { %v77_v12 = vld [vmem:[%s3758_s1 + $0x188] sm:$0xff]  ;;  %681 = vmatprep.subr.mxu1 %v209_v9  ;;  %v76_v14 = vld [vmem:[%s3758_s1 + $0x180] sm:$0xff]  ;;  %611 = vmatpush1.msra.mxu0 %v80_v10  ;;  %v542_v10 = vlaneseq }
   0x8   :  { %v205_v13 = vld [vmem:[%s3758_s1 + $0x588] sm:$0xff]  ;;  %v204_v15 = vld [vmem:[%s3758_s1 + $0x580] sm:$0xff]  ;;  %682 = vmatpush1.msra.mxu1 %v208_v11  ;;  %612 = vmatprep.subr.mxu0 %v77_v12  ;;  %v1616_v11 = vmov 1983009808  }
   0x9   :  { %v73_v16 = vld [vmem:[%s3758_s1 + $0x168] sm:$0xff]  ;;  %683 = vmatprep.subr.mxu1 %v205_v13  ;;  %v72_v18 = vld [vmem:[%s3758_s1 + $0x160] sm:$0xff]  ;;  %613 = vmatpush1.msra.mxu0 %v76_v14  ;;  %v566_v12 = vunpack.c.l.s4 %v1616_v11 }
   0xa   :  { %v201_v17 = vld [vmem:[%s3758_s1 + $0x568] sm:$0xff]  ;;  %v200_v19 = vld [vmem:[%s3758_s1 + $0x560] sm:$0xff]  ;;  %684 = vmatpush1.msra.mxu1 %v204_v15  ;;  %614 = vmatprep.subr.mxu0 %v73_v16 }
   0xb   :  { %v69_v20 = vld [vmem:[%s3758_s1 + $0x148] sm:$0xff]  ;;  %685 = vmatprep.subr.mxu1 %v201_v17  ;;  %v68_v22 = vld [vmem:[%s3758_s1 + $0x140] sm:$0xff]  ;;  %615 = vmatpush1.msra.mxu0 %v72_v18 }
   0xc   :  { %v197_v21 = vld [vmem:[%s3758_s1 + $0x548] sm:$0xff]  ;;  %v196_v23 = vld [vmem:[%s3758_s1 + $0x540] sm:$0xff]  ;;  %686 = vmatpush1.msra.mxu1 %v200_v19  ;;  %616 = vmatprep.subr.mxu0 %v69_v20 }
   0xd   :  { %v65_v24 = vld [vmem:[%s3758_s1 + $0x128] sm:$0xff]  ;;  %687 = vmatprep.subr.mxu1 %v197_v21  ;;  %v64_v26 = vld [vmem:[%s3758_s1 + $0x120] sm:$0xff]  ;;  %617 = vmatpush1.msra.mxu0 %v68_v22  ;;  %v1903_v21 = vshrl.u32 %v542_v10, 7  ;;  %v567_v22 = vunpack.c.0.s8 %v566_v12 }
   0xe   :  { %v193_v25 = vld [vmem:[%s3758_s1 + $0x528] sm:$0xff]  ;;  %v192_v27 = vld [vmem:[%s3758_s1 + $0x520] sm:$0xff]  ;;  %688 = vmatpush1.msra.mxu1 %v196_v23  ;;  %618 = vmatprep.subr.mxu0 %v65_v24 }
   0xf   :  { %v61_v28 = vld [vmem:[%s3758_s1 + $0x108] sm:$0xff]  ;;  %689 = vmatprep.subr.mxu1 %v193_v25  ;;  %v60_v30 = vld [vmem:[%s3758_s1 + $0x100] sm:$0xff]  ;;  %619 = vmatpush1.msra.mxu0 %v64_v26 }
  0x10   :  { %v189_v29 = vld [vmem:[%s3758_s1 + $0x508] sm:$0xff]  ;;  %v188_v31 = vld [vmem:[%s3758_s1 + $0x500] sm:$0xff]  ;;  %690 = vmatpush1.msra.mxu1 %v192_v27  ;;  %620 = vmatprep.subr.mxu0 %v61_v28 }
  0x11   :  { %v57_v32 = vld [vmem:[%s3758_s1 + $0xe8] sm:$0xff]  ;;  %691 = vmatprep.subr.mxu1 %v189_v29  ;;  %v56_v34 = vld [vmem:[%s3758_s1 + $0xe0] sm:$0xff]  ;;  %621 = vmatpush1.msra.mxu0 %v60_v30 }
  0x12   :  { %v185_v33 = vld [vmem:[%s3758_s1 + $0x4e8] sm:$0xff]  ;;  %v184_v35 = vld [vmem:[%s3758_s1 + $0x4e0] sm:$0xff]  ;;  %692 = vmatpush1.msra.mxu1 %v188_v31  ;;  %622 = vmatprep.subr.mxu0 %v57_v32  ;;  %v1933_v32 = vsub.s32 %v567_v22, %v1903_v21 }
  0x13   :  { %v53_v36 = vld [vmem:[%s3758_s1 + $0xc8] sm:$0xff]  ;;  %693 = vmatprep.subr.mxu1 %v185_v33  ;;  %v52_v38 = vld [vmem:[%s3758_s1 + $0xc0] sm:$0xff]  ;;  %623 = vmatpush1.msra.mxu0 %v56_v34 }
  0x14   :  { %v181_v37 = vld [vmem:[%s3758_s1 + $0x4c8] sm:$0xff]  ;;  %v180_v39 = vld [vmem:[%s3758_s1 + $0x4c0] sm:$0xff]  ;;  %694 = vmatpush1.msra.mxu1 %v184_v35  ;;  %624 = vmatprep.subr.mxu0 %v53_v36 }
  0x15   :  { %v49_v40 = vld [vmem:[%s3758_s1 + $0xa8] sm:$0xff]  ;;  %695 = vmatprep.subr.mxu1 %v181_v37  ;;  %v48_v42 = vld [vmem:[%s3758_s1 + $0xa0] sm:$0xff]  ;;  %625 = vmatpush1.msra.mxu0 %v52_v38 }
  0x16   :  { %v177_v41 = vld [vmem:[%s3758_s1 + $0x4a8] sm:$0xff]  ;;  %v176_v43 = vld [vmem:[%s3758_s1 + $0x4a0] sm:$0xff]  ;;  %696 = vmatpush1.msra.mxu1 %v180_v39  ;;  %626 = vmatprep.subr.mxu0 %v49_v40 }
  0x17   :  { %v45_v44 = vld [vmem:[%s3758_s1 + $0x88] sm:$0xff]  ;;  %697 = vmatprep.subr.mxu1 %v177_v41  ;;  %v44_v46 = vld [vmem:[%s3758_s1 + $0x80] sm:$0xff]  ;;  %627 = vmatpush1.msra.mxu0 %v48_v42 }
  0x18   :  { %v173_v45 = vld [vmem:[%s3758_s1 + $0x488] sm:$0xff]  ;;  %v172_v47 = vld [vmem:[%s3758_s1 + $0x480] sm:$0xff]  ;;  %698 = vmatpush1.msra.mxu1 %v176_v43  ;;  %628 = vmatprep.subr.mxu0 %v45_v44 }
  0x19   :  { %v41_v48 = vld [vmem:[%s3758_s1 + $0x68] sm:$0xff]  ;;  %699 = vmatprep.subr.mxu1 %v173_v45  ;;  %v40_v50 = vld [vmem:[%s3758_s1 + $0x60] sm:$0xff]  ;;  %629 = vmatpush1.msra.mxu0 %v44_v46 }
  0x1a   :  { %v169_v49 = vld [vmem:[%s3758_s1 + $0x468] sm:$0xff]  ;;  %v168_v51 = vld [vmem:[%s3758_s1 + $0x460] sm:$0xff]  ;;  %700 = vmatpush1.msra.mxu1 %v172_v47  ;;  %630 = vmatprep.subr.mxu0 %v41_v48 }
  0x1b   :  { %v37_v52 = vld [vmem:[%s3758_s1 + $0x48] sm:$0xff]  ;;  %701 = vmatprep.subr.mxu1 %v169_v49  ;;  %v36_v54 = vld [vmem:[%s3758_s1 + $0x40] sm:$0xff]  ;;  %631 = vmatpush1.msra.mxu0 %v40_v50 }
  0x1c   :  { %v165_v53 = vld [vmem:[%s3758_s1 + $0x448] sm:$0xff]  ;;  %v164_v55 = vld [vmem:[%s3758_s1 + $0x440] sm:$0xff]  ;;  %702 = vmatpush1.msra.mxu1 %v168_v51  ;;  %632 = vmatprep.subr.mxu0 %v37_v52 }
  0x1d   :  { %v33_v56 = vld [vmem:[%s3758_s1 + $0x28] sm:$0xff]  ;;  %703 = vmatprep.subr.mxu1 %v165_v53  ;;  %v32_v58 = vld [vmem:[%s3758_s1 + $0x20] sm:$0xff]  ;;  %633 = vmatpush1.msra.mxu0 %v36_v54 }
  0x1e   :  { %v161_v57 = vld [vmem:[%s3758_s1 + $0x428] sm:$0xff]  ;;  %v160_v59 = vld [vmem:[%s3758_s1 + $0x420] sm:$0xff]  ;;  %704 = vmatpush1.msra.mxu1 %v164_v55  ;;  %634 = vmatprep.subr.mxu0 %v33_v56 }
  0x1f   :  { %v29_v60 = vld [vmem:[%s3758_s1 + $0x8] sm:$0xff]  ;;  %705 = vmatprep.subr.mxu1 %v161_v57  ;;  %v28_v62 = vld [vmem:[%s3758_s1] sm:$0xff]  ;;  %635 = vmatpush1.msra.mxu0 %v32_v58 }
  0x20   :  { %v157_v61 = vld [vmem:[%s3758_s1 + $0x408] sm:$0xff]  ;;  %v156_v63 = vld [vmem:[%s3758_s1 + $0x400] sm:$0xff]  ;;  %706 = vmatpush1.msra.mxu1 %v160_v59  ;;  %636 = vmatprep.subr.mxu0 %v29_v60 }
  0x21   :  { %v153_v0 = vld [vmem:[%s3758_s1 + $0x3e8] sm:$0xff]  ;;  %707 = vmatprep.subr.mxu1 %v157_v61  ;;  %v152_v2 = vld [vmem:[%s3758_s1 + $0x3e0] sm:$0xff]  ;;  %637 = vmatpush1.msra.mxu0 %v28_v62 }
  0x22   :  { %v281_v1 = vld [vmem:[%s3758_s1 + $0x7e8] sm:$0xff]  ;;  %v280_v3 = vld [vmem:[%s3758_s1 + $0x7e0] sm:$0xff]  ;;  %708 = vmatpush1.msra.mxu1 %v156_v63  ;;  %638 = vmatprep.subr.mxu0 %v153_v0 }
  0x23   :  { %v149_v4 = vld [vmem:[%s3758_s1 + $0x3c8] sm:$0xff]  ;;  %709 = vmatprep.subr.mxu1 %v281_v1  ;;  %v148_v6 = vld [vmem:[%s3758_s1 + $0x3c0] sm:$0xff]  ;;  %639 = vmatpush2.msra.mxu0 %v152_v2 }
  0x24   :  { %v277_v5 = vld [vmem:[%s3758_s1 + $0x7c8] sm:$0xff]  ;;  %v276_v7 = vld [vmem:[%s3758_s1 + $0x7c0] sm:$0xff]  ;;  %710 = vmatpush2.msra.mxu1 %v280_v3  ;;  %640 = vmatprep.subr.mxu0 %v149_v4 }
  0x25   :  { %v145_v8 = vld [vmem:[%s3758_s1 + $0x3a8] sm:$0xff]  ;;  %711 = vmatprep.subr.mxu1 %v277_v5  ;;  %v144_v13 = vld [vmem:[%s3758_s1 + $0x3a0] sm:$0xff]  ;;  %641 = vmatpush2.msra.mxu0 %v148_v6 }
  0x26   :  { %v273_v9 = vld [vmem:[%s3758_s1 + $0x7a8] sm:$0xff]  ;;  %v272_v14 = vld [vmem:[%s3758_s1 + $0x7a0] sm:$0xff]  ;;  %712 = vmatpush2.msra.mxu1 %v276_v7  ;;  %642 = vmatprep.subr.mxu0 %v145_v8 }
  0x27   :  { %v141_v15 = vld [vmem:[%s3758_s1 + $0x388] sm:$0xff]  ;;  %713 = vmatprep.subr.mxu1 %v273_v9  ;;  %v140_v17 = vld [vmem:[%s3758_s1 + $0x380] sm:$0xff]  ;;  %643 = vmatpush2.msra.mxu0 %v144_v13 }
  0x28   :  { %v269_v16 = vld [vmem:[%s3758_s1 + $0x788] sm:$0xff]  ;;  %v268_v18 = vld [vmem:[%s3758_s1 + $0x780] sm:$0xff]  ;;  %714 = vmatpush2.msra.mxu1 %v272_v14  ;;  %644 = vmatprep.subr.mxu0 %v141_v15 }
  0x29   :  { %v137_v19 = vld [vmem:[%s3758_s1 + $0x368] sm:$0xff]  ;;  %715 = vmatprep.subr.mxu1 %v269_v16  ;;  %v136_v23 = vld [vmem:[%s3758_s1 + $0x360] sm:$0xff]  ;;  %645 = vmatpush2.msra.mxu0 %v140_v17 }
  0x2a   :  { %v265_v20 = vld [vmem:[%s3758_s1 + $0x768] sm:$0xff]  ;;  %v264_v24 = vld [vmem:[%s3758_s1 + $0x760] sm:$0xff]  ;;  %716 = vmatpush2.msra.mxu1 %v268_v18  ;;  %646 = vmatprep.subr.mxu0 %v137_v19 }
  0x2b   :  { %v133_v25 = vld [vmem:[%s3758_s1 + $0x348] sm:$0xff]  ;;  %717 = vmatprep.subr.mxu1 %v265_v20  ;;  %v132_v27 = vld [vmem:[%s3758_s1 + $0x340] sm:$0xff]  ;;  %647 = vmatpush2.msra.mxu0 %v136_v23 }
  0x2c   :  { %v261_v26 = vld [vmem:[%s3758_s1 + $0x748] sm:$0xff]  ;;  %v260_v28 = vld [vmem:[%s3758_s1 + $0x740] sm:$0xff]  ;;  %718 = vmatpush2.msra.mxu1 %v264_v24  ;;  %648 = vmatprep.subr.mxu0 %v133_v25 }
  0x2d   :  { %v129_v29 = vld [vmem:[%s3758_s1 + $0x328] sm:$0xff]  ;;  %719 = vmatprep.subr.mxu1 %v261_v26  ;;  %v128_v33 = vld [vmem:[%s3758_s1 + $0x320] sm:$0xff]  ;;  %649 = vmatpush2.msra.mxu0 %v132_v27 }
  0x2e   :  { %v257_v30 = vld [vmem:[%s3758_s1 + $0x728] sm:$0xff]  ;;  %v256_v34 = vld [vmem:[%s3758_s1 + $0x720] sm:$0xff]  ;;  %720 = vmatpush2.msra.mxu1 %v260_v28  ;;  %650 = vmatprep.subr.mxu0 %v129_v29 }
  0x2f   :  { %v27_v31 = vld [vmem:[%s3759_s0 + $0x8] sm:$0xff]  ;;  %721 = vmatprep.subr.mxu1 %v257_v30  ;;  %v124_v39 = vld [vmem:[%s3758_s1 + $0x300] sm:$0xff]  ;;  %651 = vmatpush2.msra.mxu0 %v128_v33 }
  0x30   :  { %v581_v35 = vcombine.high %v27_v31, %v27_v31  ;;  %v125_v36 = vld [vmem:[%s3758_s1 + $0x308] sm:$0xff]  ;;  %v1948_v38 = vrot.slane %v27_v31, %v1933_v32  ;;  %v252_v40 = vld [vmem:[%s3758_s1 + $0x700] sm:$0xff]  ;;  %722 = vmatpush2.msra.mxu1 %v256_v34 }
  0x31   :  { %v253_v37 = vld [vmem:[%s3758_s1 + $0x708] sm:$0xff]  ;;  %652 = vmatprep.subr.mxu0 %v125_v36  ;;  %v120_v44 = vld [vmem:[%s3758_s1 + $0x2e0] sm:$0xff] }
  0x32   :  { %v1957_v41 = vrot.slane %v581_v35, %v1933_v32  ;;  %v121_v42 = vld [vmem:[%s3758_s1 + $0x2e8] sm:$0xff]  ;;  %723 = vmatprep.subr.mxu1 %v253_v37  ;;  %v248_v45 = vld [vmem:[%s3758_s1 + $0x6e0] sm:$0xff]  ;;  %653 = vmatpush2.msra.mxu0 %v124_v39 }
  0x33   :  { %v249_v43 = vld [vmem:[%s3758_s1 + $0x6e8] sm:$0xff]  ;;  %724 = vmatpush2.msra.mxu1 %v252_v40  ;;  %654 = vmatprep.subr.mxu0 %v121_v42  ;;  %v116_v48 = vld [vmem:[%s3758_s1 + $0x2c0] sm:$0xff] }
  0x34   :  { %v117_v46 = vld [vmem:[%s3758_s1 + $0x2c8] sm:$0xff]  ;;  %725 = vmatprep.subr.mxu1 %v249_v43  ;;  %v244_v49 = vld [vmem:[%s3758_s1 + $0x6c0] sm:$0xff]  ;;  %655 = vmatpush2.msra.mxu0 %v120_v44 }
  0x35   :  { %v245_v47 = vld [vmem:[%s3758_s1 + $0x6c8] sm:$0xff]  ;;  %726 = vmatpush2.msra.mxu1 %v248_v45  ;;  %656 = vmatprep.subr.mxu0 %v117_v46  ;;  %v112_v52 = vld [vmem:[%s3758_s1 + $0x2a0] sm:$0xff] }
  0x36   :  { %v113_v50 = vld [vmem:[%s3758_s1 + $0x2a8] sm:$0xff]  ;;  %727 = vmatprep.subr.mxu1 %v245_v47  ;;  %v240_v53 = vld [vmem:[%s3758_s1 + $0x6a0] sm:$0xff]  ;;  %657 = vmatpush2.msra.mxu0 %v116_v48 }
  0x37   :  { %v241_v51 = vld [vmem:[%s3758_s1 + $0x6a8] sm:$0xff]  ;;  %v26_v54 = vld [vmem:[%s3759_s0] sm:$0xff]  ;;  %728 = vmatpush2.msra.mxu1 %v244_v49  ;;  %658 = vmatprep.subr.mxu0 %v113_v50 }
  0x38   :  { %v109_v55 = vld [vmem:[%s3758_s1 + $0x288] sm:$0xff]  ;;  %729 = vmatprep.subr.mxu1 %v241_v51  ;;  %v108_v57 = vld [vmem:[%s3758_s1 + $0x280] sm:$0xff]  ;;  %659 = vmatpush2.msra.mxu0 %v112_v52  ;;  %v564_v61 = vcombine.high %v26_v54, %v26_v54  ;;  %v2029_v2 = vrot.slane %v26_v54, %v1933_v32 }
  0x39   :  { %v237_v56 = vld [vmem:[%s3758_s1 + $0x688] sm:$0xff]  ;;  %v236_v58 = vld [vmem:[%s3758_s1 + $0x680] sm:$0xff]  ;;  %730 = vmatpush2.msra.mxu1 %v240_v53  ;;  %660 = vmatprep.subr.mxu0 %v109_v55 }
  0x3a   :  { %v105_v59 = vld [vmem:[%s3758_s1 + $0x268] sm:$0xff]  ;;  %731 = vmatprep.subr.mxu1 %v237_v56  ;;  %v104_v62 = vld [vmem:[%s3758_s1 + $0x260] sm:$0xff]  ;;  %661 = vmatpush2.msra.mxu0 %v108_v57  ;;  %v2044_v7 = vrot.slane %v564_v61, %v1933_v32  ;;  %v2060_v12 = vcombine.high %v2029_v2, %v2029_v2 }
  0x3b   :  { %v233_v60 = vld [vmem:[%s3758_s1 + $0x668] sm:$0xff]  ;;  %v232_v63 = vld [vmem:[%s3758_s1 + $0x660] sm:$0xff]  ;;  %732 = vmatpush2.msra.mxu1 %v236_v58  ;;  %662 = vmatprep.subr.mxu0 %v105_v59 }
  0x3c   :  { %v101_v0 = vld [vmem:[%s3758_s1 + $0x248] sm:$0xff]  ;;  %733 = vmatprep.subr.mxu1 %v233_v60  ;;  %v100_v3 = vld [vmem:[%s3758_s1 + $0x240] sm:$0xff]  ;;  %663 = vmatpush2.msra.mxu0 %v104_v62  ;;  %v2070_v15 = vcombine.high %v2044_v7, %v2044_v7 }
  0x3d   :  { %v229_v1 = vld [vmem:[%s3758_s1 + $0x648] sm:$0xff]  ;;  %v228_v4 = vld [vmem:[%s3758_s1 + $0x640] sm:$0xff]  ;;  %734 = vmatpush2.msra.mxu1 %v232_v63  ;;  %664 = vmatprep.subr.mxu0 %v101_v0 }
  0x3e   :  { %v97_v5 = vld [vmem:[%s3758_s1 + $0x228] sm:$0xff]  ;;  %735 = vmatprep.subr.mxu1 %v229_v1  ;;  %v96_v8 = vld [vmem:[%s3758_s1 + $0x220] sm:$0xff]  ;;  %665 = vmatpush2.msra.mxu0 %v100_v3 }
  0x3f   :  { %v225_v6 = vld [vmem:[%s3758_s1 + $0x628] sm:$0xff]  ;;  %v224_v9 = vld [vmem:[%s3758_s1 + $0x620] sm:$0xff]  ;;  %736 = vmatpush2.msra.mxu1 %v228_v4  ;;  %666 = vmatprep.subr.mxu0 %v97_v5 }
  0x40   :  { %v93_v10 = vld [vmem:[%s3758_s1 + $0x208] sm:$0xff]  ;;  %737 = vmatprep.subr.mxu1 %v225_v6  ;;  %v92_v13 = vld [vmem:[%s3758_s1 + $0x200] sm:$0xff]  ;;  %667 = vmatpush2.msra.mxu0 %v96_v8 }
  0x41   :  { %v221_v11 = vld [vmem:[%s3758_s1 + $0x608] sm:$0xff]  ;;  %738 = vmatpush2.msra.mxu1 %v224_v9  ;;  %v220_v14 = vld [vmem:[%s3758_s1 + $0x600] sm:$0xff]  ;;  %668 = vmatprep.subr.mxu0 %v93_v10 }
  0x42   :  { %739 = vmatprep.subr.mxu1 %v221_v11  ;;  %v345_v16 = vld [vmem:[%s3758_s1 + $0x9e8] sm:$0xff]  ;;  %669 = vmatpush2.msra.mxu0 %v92_v13  ;;  %v344_v18 = vld [vmem:[%s3758_s1 + $0x9e0] sm:$0xff] }
  0x43   :  { %670 = vmatprep.mubr.f32.mxu0 %v2060_v12  ;;  %v473_v17 = vld [vmem:[%s3758_s1 + $0xde8] sm:$0xff]  ;;  %740 = vmatpush2.msra.mxu1 %v220_v14  ;;  %v472_v19 = vld [vmem:[%s3758_s1 + $0xde0] sm:$0xff] }
  0x44   :  { %671 = vmatmul.mubr.f32.vlgmr.msra.gmra.mxu0 %v2029_v2  ;;  %741 = vmatprep.mubr.f32.mxu1 %v2070_v15  ;;  %v341_v20 = vld [vmem:[%s3758_s1 + $0x9c8] sm:$0xff]  ;;  %v340_v23 = vld [vmem:[%s3758_s1 + $0x9c0] sm:$0xff] }
  0x45   :  { %748 = vmatprep.subr.mxu0 %v345_v16  ;;  %v469_v22 = vld [vmem:[%s3758_s1 + $0xdc8] sm:$0xff]  ;;  %819 = vmatprep.subr.mxu1 %v473_v17  ;;  %v468_v24 = vld [vmem:[%s3758_s1 + $0xdc0] sm:$0xff] }
  0x46   :  { %742 = vmatmul.mubr.f32.vlgmr.msra.gmra.mxu1 %v2044_v7  ;;  %749 = vmatpush1.msra.mxu0 %v344_v18  ;;  %v337_v25 = vld [vmem:[%s3758_s1 + $0x9a8] sm:$0xff]  ;;  %v336_v27 = vld [vmem:[%s3758_s1 + $0x9a0] sm:$0xff] }
  0x47   :  { %820 = vmatpush1.msra.mxu1 %v472_v19  ;;  %v465_v26 = vld [vmem:[%s3758_s1 + $0xda8] sm:$0xff]  ;;  %750 = vmatprep.subr.mxu0 %v341_v20  ;;  %v464_v28 = vld [vmem:[%s3758_s1 + $0xda0] sm:$0xff] }
  0x48   :  { %821 = vmatprep.subr.mxu1 %v469_v22  ;;  %751 = vmatpush1.msra.mxu0 %v340_v23  ;;  %v333_v29 = vld [vmem:[%s3758_s1 + $0x988] sm:$0xff]  ;;  %v332_v31 = vld [vmem:[%s3758_s1 + $0x980] sm:$0xff] }
  0x49   :  { %822 = vmatpush1.msra.mxu1 %v468_v24  ;;  %v461_v30 = vld [vmem:[%s3758_s1 + $0xd88] sm:$0xff]  ;;  %752 = vmatprep.subr.mxu0 %v337_v25  ;;  %v460_v32 = vld [vmem:[%s3758_s1 + $0xd80] sm:$0xff] }
  0x4a   :  { %823 = vmatprep.subr.mxu1 %v465_v26  ;;  %753 = vmatpush1.msra.mxu0 %v336_v27  ;;  %v329_v33 = vld [vmem:[%s3758_s1 + $0x968] sm:$0xff]  ;;  %v328_v35 = vld [vmem:[%s3758_s1 + $0x960] sm:$0xff] }
  0x4b   :  { %824 = vmatpush1.msra.mxu1 %v464_v28  ;;  %v457_v34 = vld [vmem:[%s3758_s1 + $0xd68] sm:$0xff]  ;;  %754 = vmatprep.subr.mxu0 %v333_v29  ;;  %v456_v36 = vld [vmem:[%s3758_s1 + $0xd60] sm:$0xff] }
  0x4c   :  { %825 = vmatprep.subr.mxu1 %v461_v30  ;;  %755 = vmatpush1.msra.mxu0 %v332_v31  ;;  %v325_v37 = vld [vmem:[%s3758_s1 + $0x948] sm:$0xff]  ;;  %v324_v40 = vld [vmem:[%s3758_s1 + $0x940] sm:$0xff] }
  0x4d   :  { %826 = vmatpush1.msra.mxu1 %v460_v32  ;;  %v453_v39 = vld [vmem:[%s3758_s1 + $0xd48] sm:$0xff]  ;;  %756 = vmatprep.subr.mxu0 %v329_v33  ;;  %v452_v42 = vld [vmem:[%s3758_s1 + $0xd40] sm:$0xff] }
  0x4e   :  { %827 = vmatprep.subr.mxu1 %v457_v34  ;;  %757 = vmatpush1.msra.mxu0 %v328_v35  ;;  %v321_v43 = vld [vmem:[%s3758_s1 + $0x928] sm:$0xff]  ;;  %v320_v45 = vld [vmem:[%s3758_s1 + $0x920] sm:$0xff] }
  0x4f   :  { %828 = vmatpush1.msra.mxu1 %v456_v36  ;;  %v449_v44 = vld [vmem:[%s3758_s1 + $0xd28] sm:$0xff]  ;;  %758 = vmatprep.subr.mxu0 %v325_v37  ;;  %v448_v46 = vld [vmem:[%s3758_s1 + $0xd20] sm:$0xff] }
  0x50   :  { %829 = vmatprep.subr.mxu1 %v453_v39  ;;  %759 = vmatpush1.msra.mxu0 %v324_v40  ;;  %v317_v47 = vld [vmem:[%s3758_s1 + $0x908] sm:$0xff]  ;;  %v316_v49 = vld [vmem:[%s3758_s1 + $0x900] sm:$0xff] }
  0x51   :  { %830 = vmatpush1.msra.mxu1 %v452_v42  ;;  %v445_v48 = vld [vmem:[%s3758_s1 + $0xd08] sm:$0xff]  ;;  %760 = vmatprep.subr.mxu0 %v321_v43  ;;  %v444_v50 = vld [vmem:[%s3758_s1 + $0xd00] sm:$0xff] }
  0x52   :  { %831 = vmatprep.subr.mxu1 %v449_v44  ;;  %761 = vmatpush1.msra.mxu0 %v320_v45  ;;  %v313_v51 = vld [vmem:[%s3758_s1 + $0x8e8] sm:$0xff]  ;;  %v312_v53 = vld [vmem:[%s3758_s1 + $0x8e0] sm:$0xff] }
  0x53   :  { %832 = vmatpush1.msra.mxu1 %v448_v46  ;;  %v441_v52 = vld [vmem:[%s3758_s1 + $0xce8] sm:$0xff]  ;;  %762 = vmatprep.subr.mxu0 %v317_v47  ;;  %v440_v54 = vld [vmem:[%s3758_s1 + $0xce0] sm:$0xff] }
  0x54   :  { %833 = vmatprep.subr.mxu1 %v445_v48  ;;  %763 = vmatpush1.msra.mxu0 %v316_v49  ;;  %v309_v55 = vld [vmem:[%s3758_s1 + $0x8c8] sm:$0xff]  ;;  %v308_v57 = vld [vmem:[%s3758_s1 + $0x8c0] sm:$0xff] }
  0x55   :  { %834 = vmatpush1.msra.mxu1 %v444_v50  ;;  %v437_v56 = vld [vmem:[%s3758_s1 + $0xcc8] sm:$0xff]  ;;  %764 = vmatprep.subr.mxu0 %v313_v51  ;;  %v436_v58 = vld [vmem:[%s3758_s1 + $0xcc0] sm:$0xff] }
  0x56   :  { %835 = vmatprep.subr.mxu1 %v441_v52  ;;  %765 = vmatpush1.msra.mxu0 %v312_v53  ;;  %v305_v59 = vld [vmem:[%s3758_s1 + $0x8a8] sm:$0xff]  ;;  %v304_v61 = vld [vmem:[%s3758_s1 + $0x8a0] sm:$0xff] }
  0x57   :  { %836 = vmatpush1.msra.mxu1 %v440_v54  ;;  %v433_v60 = vld [vmem:[%s3758_s1 + $0xca8] sm:$0xff]  ;;  %766 = vmatprep.subr.mxu0 %v309_v55  ;;  %v432_v62 = vld [vmem:[%s3758_s1 + $0xca0] sm:$0xff] }
  0x58   :  { %837 = vmatprep.subr.mxu1 %v437_v56  ;;  %767 = vmatpush1.msra.mxu0 %v308_v57  ;;  %v301_v63 = vld [vmem:[%s3758_s1 + $0x888] sm:$0xff]  ;;  %v300_v1 = vld [vmem:[%s3758_s1 + $0x880] sm:$0xff] }
  0x59   :  { %838 = vmatpush1.msra.mxu1 %v436_v58  ;;  %v429_v0 = vld [vmem:[%s3758_s1 + $0xc88] sm:$0xff]  ;;  %768 = vmatprep.subr.mxu0 %v305_v59  ;;  %v428_v3 = vld [vmem:[%s3758_s1 + $0xc80] sm:$0xff] }
  0x5a   :  { %839 = vmatprep.subr.mxu1 %v433_v60  ;;  %769 = vmatpush1.msra.mxu0 %v304_v61  ;;  %v297_v4 = vld [vmem:[%s3758_s1 + $0x868] sm:$0xff]  ;;  %v296_v6 = vld [vmem:[%s3758_s1 + $0x860] sm:$0xff] }
  0x5b   :  { %840 = vmatpush1.msra.mxu1 %v432_v62  ;;  %v425_v5 = vld [vmem:[%s3758_s1 + $0xc68] sm:$0xff]  ;;  %770 = vmatprep.subr.mxu0 %v301_v63  ;;  %v424_v8 = vld [vmem:[%s3758_s1 + $0xc60] sm:$0xff] }
  0x5c   :  { %841 = vmatprep.subr.mxu1 %v429_v0  ;;  %771 = vmatpush1.msra.mxu0 %v300_v1  ;;  %v293_v9 = vld [vmem:[%s3758_s1 + $0x848] sm:$0xff]  ;;  %v292_v11 = vld [vmem:[%s3758_s1 + $0x840] sm:$0xff] }
  0x5d   :  { %842 = vmatpush1.msra.mxu1 %v428_v3  ;;  %v421_v10 = vld [vmem:[%s3758_s1 + $0xc48] sm:$0xff]  ;;  %772 = vmatprep.subr.mxu0 %v297_v4  ;;  %v420_v13 = vld [vmem:[%s3758_s1 + $0xc40] sm:$0xff] }
  0x5e   :  { %843 = vmatprep.subr.mxu1 %v425_v5  ;;  %773 = vmatpush1.msra.mxu0 %v296_v6  ;;  %v289_v14 = vld [vmem:[%s3758_s1 + $0x828] sm:$0xff]  ;;  %v288_v17 = vld [vmem:[%s3758_s1 + $0x820] sm:$0xff] }
  0x5f   :  { %844 = vmatpush1.msra.mxu1 %v424_v8  ;;  %v417_v16 = vld [vmem:[%s3758_s1 + $0xc28] sm:$0xff]  ;;  %774 = vmatprep.subr.mxu0 %v293_v9  ;;  %v416_v18 = vld [vmem:[%s3758_s1 + $0xc20] sm:$0xff] }
  0x60   :  { %845 = vmatprep.subr.mxu1 %v421_v10  ;;  %775 = vmatpush1.msra.mxu0 %v292_v11  ;;  %v285_v19 = vld [vmem:[%s3758_s1 + $0x808] sm:$0xff]  ;;  %v284_v22 = vld [vmem:[%s3758_s1 + $0x800] sm:$0xff] }
  0x61   :  { %846 = vmatpush1.msra.mxu1 %v420_v13  ;;  %v413_v20 = vld [vmem:[%s3758_s1 + $0xc08] sm:$0xff]  ;;  %776 = vmatprep.subr.mxu0 %v289_v14  ;;  %v412_v23 = vld [vmem:[%s3758_s1 + $0xc00] sm:$0xff] }
  0x62   :  { %847 = vmatprep.subr.mxu1 %v417_v16  ;;  %777 = vmatpush1.msra.mxu0 %v288_v17  ;;  %v409_v24 = vld [vmem:[%s3758_s1 + $0xbe8] sm:$0xff]  ;;  %v408_v26 = vld [vmem:[%s3758_s1 + $0xbe0] sm:$0xff] }
  0x63   :  { %848 = vmatpush1.msra.mxu1 %v416_v18  ;;  %v537_v25 = vld [vmem:[%s3758_s1 + $0xfe8] sm:$0xff]  ;;  %778 = vmatprep.subr.mxu0 %v285_v19  ;;  %v536_v27 = vld [vmem:[%s3758_s1 + $0xfe0] sm:$0xff] }
  0x64   :  { %849 = vmatprep.subr.mxu1 %v413_v20  ;;  %779 = vmatpush1.msra.mxu0 %v284_v22  ;;  %v405_v28 = vld [vmem:[%s3758_s1 + $0xbc8] sm:$0xff]  ;;  %v404_v30 = vld [vmem:[%s3758_s1 + $0xbc0] sm:$0xff] }
  0x65   :  { %850 = vmatpush1.msra.mxu1 %v412_v23  ;;  %v533_v29 = vld [vmem:[%s3758_s1 + $0xfc8] sm:$0xff]  ;;  %780 = vmatprep.subr.mxu0 %v409_v24  ;;  %v532_v31 = vld [vmem:[%s3758_s1 + $0xfc0] sm:$0xff] }
  0x66   :  { %851 = vmatprep.subr.mxu1 %v537_v25  ;;  %781 = vmatpush2.msra.mxu0 %v408_v26  ;;  %v401_v32 = vld [vmem:[%s3758_s1 + $0xba8] sm:$0xff]  ;;  %v400_v34 = vld [vmem:[%s3758_s1 + $0xba0] sm:$0xff] }
  0x67   :  { %852 = vmatpush2.msra.mxu1 %v536_v27  ;;  %v529_v33 = vld [vmem:[%s3758_s1 + $0xfa8] sm:$0xff]  ;;  %782 = vmatprep.subr.mxu0 %v405_v28  ;;  %v528_v35 = vld [vmem:[%s3758_s1 + $0xfa0] sm:$0xff] }
  0x68   :  { %853 = vmatprep.subr.mxu1 %v533_v29  ;;  %783 = vmatpush2.msra.mxu0 %v404_v30  ;;  %v397_v36 = vld [vmem:[%s3758_s1 + $0xb88] sm:$0xff]  ;;  %v396_v39 = vld [vmem:[%s3758_s1 + $0xb80] sm:$0xff]  ;;  %v2456_v29 = vcombine.high %v1948_v38, %v1948_v38 }
  0x69   :  { %854 = vmatpush2.msra.mxu1 %v532_v31  ;;  %v525_v37 = vld [vmem:[%s3758_s1 + $0xf88] sm:$0xff]  ;;  %784 = vmatprep.subr.mxu0 %v401_v32  ;;  %v524_v40 = vld [vmem:[%s3758_s1 + $0xf80] sm:$0xff]  ;;  %v2466_v32 = vcombine.high %v1957_v41, %v1957_v41 }
  0x6a   :  { %855 = vmatprep.subr.mxu1 %v529_v33  ;;  %785 = vmatpush2.msra.mxu0 %v400_v34  ;;  %v393_v42 = vld [vmem:[%s3758_s1 + $0xb68] sm:$0xff]  ;;  %v392_v44 = vld [vmem:[%s3758_s1 + $0xb60] sm:$0xff]  ;;  %v91_v33 = vld [vmem:[%s3758_s1 + $0x1f8] sm:$0xff] }
  0x6b   :  { %856 = vmatpush2.msra.mxu1 %v528_v35  ;;  %v521_v43 = vld [vmem:[%s3758_s1 + $0xf68] sm:$0xff]  ;;  %786 = vmatprep.subr.mxu0 %v397_v36  ;;  %v520_v45 = vld [vmem:[%s3758_s1 + $0xf60] sm:$0xff]  ;;  %v219_v34 = vld [vmem:[%s3758_s1 + $0x5f8] sm:$0xff] }
  0x6c   :  { %857 = vmatprep.subr.mxu1 %v525_v37  ;;  %787 = vmatpush2.msra.mxu0 %v396_v39  ;;  %v389_v46 = vld [vmem:[%s3758_s1 + $0xb48] sm:$0xff]  ;;  %v388_v48 = vld [vmem:[%s3758_s1 + $0xb40] sm:$0xff]  ;;  %v90_v35 = vld [vmem:[%s3758_s1 + $0x1f0] sm:$0xff] }
  0x6d   :  { %858 = vmatpush2.msra.mxu1 %v524_v40  ;;  %v517_v47 = vld [vmem:[%s3758_s1 + $0xf48] sm:$0xff]  ;;  %788 = vmatprep.subr.mxu0 %v393_v42  ;;  %v516_v49 = vld [vmem:[%s3758_s1 + $0xf40] sm:$0xff]  ;;  %v218_v36 = vld [vmem:[%s3758_s1 + $0x5f0] sm:$0xff] }
  0x6e   :  { %859 = vmatprep.subr.mxu1 %v521_v43  ;;  %789 = vmatpush2.msra.mxu0 %v392_v44  ;;  %v385_v50 = vld [vmem:[%s3758_s1 + $0xb28] sm:$0xff]  ;;  %v384_v52 = vld [vmem:[%s3758_s1 + $0xb20] sm:$0xff]  ;;  %v87_v37 = vld [vmem:[%s3758_s1 + $0x1d8] sm:$0xff] }
  0x6f   :  { %860 = vmatpush2.msra.mxu1 %v520_v45  ;;  %v513_v51 = vld [vmem:[%s3758_s1 + $0xf28] sm:$0xff]  ;;  %790 = vmatprep.subr.mxu0 %v389_v46  ;;  %v512_v53 = vld [vmem:[%s3758_s1 + $0xf20] sm:$0xff]  ;;  %v215_v39 = vld [vmem:[%s3758_s1 + $0x5d8] sm:$0xff] }
  0x70   :  { %861 = vmatprep.subr.mxu1 %v517_v47  ;;  %791 = vmatpush2.msra.mxu0 %v388_v48  ;;  %v381_v54 = vld [vmem:[%s3758_s1 + $0xb08] sm:$0xff]  ;;  %v380_v56 = vld [vmem:[%s3758_s1 + $0xb00] sm:$0xff]  ;;  %v86_v40 = vld [vmem:[%s3758_s1 + $0x1d0] sm:$0xff] }
  0x71   :  { %862 = vmatpush2.msra.mxu1 %v516_v49  ;;  %v509_v55 = vld [vmem:[%s3758_s1 + $0xf08] sm:$0xff]  ;;  %792 = vmatprep.subr.mxu0 %v385_v50  ;;  %v508_v57 = vld [vmem:[%s3758_s1 + $0xf00] sm:$0xff]  ;;  %v214_v42 = vld [vmem:[%s3758_s1 + $0x5d0] sm:$0xff] }
  0x72   :  { %863 = vmatprep.subr.mxu1 %v513_v51  ;;  %793 = vmatpush2.msra.mxu0 %v384_v52  ;;  %v377_v58 = vld [vmem:[%s3758_s1 + $0xae8] sm:$0xff]  ;;  %v376_v60 = vld [vmem:[%s3758_s1 + $0xae0] sm:$0xff]  ;;  %v83_v43 = vld [vmem:[%s3758_s1 + $0x1b8] sm:$0xff] }
  0x73   :  { %864 = vmatpush2.msra.mxu1 %v512_v53  ;;  %v505_v59 = vld [vmem:[%s3758_s1 + $0xee8] sm:$0xff]  ;;  %794 = vmatprep.subr.mxu0 %v381_v54  ;;  %v504_v61 = vld [vmem:[%s3758_s1 + $0xee0] sm:$0xff]  ;;  %v211_v44 = vld [vmem:[%s3758_s1 + $0x5b8] sm:$0xff] }
  0x74   :  { %865 = vmatprep.subr.mxu1 %v509_v55  ;;  %795 = vmatpush2.msra.mxu0 %v380_v56  ;;  %v373_v62 = vld [vmem:[%s3758_s1 + $0xac8] sm:$0xff]  ;;  %v372_v0 = vld [vmem:[%s3758_s1 + $0xac0] sm:$0xff]  ;;  %v82_v45 = vld [vmem:[%s3758_s1 + $0x1b0] sm:$0xff] }
  0x75   :  { %866 = vmatpush2.msra.mxu1 %v508_v57  ;;  %v501_v63 = vld [vmem:[%s3758_s1 + $0xec8] sm:$0xff]  ;;  %796 = vmatprep.subr.mxu0 %v377_v58  ;;  %v500_v1 = vld [vmem:[%s3758_s1 + $0xec0] sm:$0xff]  ;;  %v210_v46 = vld [vmem:[%s3758_s1 + $0x5b0] sm:$0xff] }
  0x76   :  { %867 = vmatprep.subr.mxu1 %v505_v59  ;;  %797 = vmatpush2.msra.mxu0 %v376_v60  ;;  %v369_v3 = vld [vmem:[%s3758_s1 + $0xaa8] sm:$0xff]  ;;  %v368_v5 = vld [vmem:[%s3758_s1 + $0xaa0] sm:$0xff]  ;;  %v79_v47 = vld [vmem:[%s3758_s1 + $0x198] sm:$0xff] }
  0x77   :  { %868 = vmatpush2.msra.mxu1 %v504_v61  ;;  %v497_v4 = vld [vmem:[%s3758_s1 + $0xea8] sm:$0xff]  ;;  %798 = vmatprep.subr.mxu0 %v373_v62  ;;  %v496_v6 = vld [vmem:[%s3758_s1 + $0xea0] sm:$0xff]  ;;  %v207_v48 = vld [vmem:[%s3758_s1 + $0x598] sm:$0xff] }
  0x78   :  { %869 = vmatprep.subr.mxu1 %v501_v63  ;;  %799 = vmatpush2.msra.mxu0 %v372_v0  ;;  %v365_v8 = vld [vmem:[%s3758_s1 + $0xa88] sm:$0xff]  ;;  %v364_v10 = vld [vmem:[%s3758_s1 + $0xa80] sm:$0xff]  ;;  %v78_v49 = vld [vmem:[%s3758_s1 + $0x190] sm:$0xff] }
  0x79   :  { %870 = vmatpush2.msra.mxu1 %v500_v1  ;;  %v493_v9 = vld [vmem:[%s3758_s1 + $0xe88] sm:$0xff]  ;;  %800 = vmatprep.subr.mxu0 %v369_v3  ;;  %v492_v11 = vld [vmem:[%s3758_s1 + $0xe80] sm:$0xff]  ;;  %v206_v50 = vld [vmem:[%s3758_s1 + $0x590] sm:$0xff] }
  0x7a   :  { %871 = vmatprep.subr.mxu1 %v497_v4  ;;  %801 = vmatpush2.msra.mxu0 %v368_v5  ;;  %v361_v13 = vld [vmem:[%s3758_s1 + $0xa68] sm:$0xff]  ;;  %v360_v16 = vld [vmem:[%s3758_s1 + $0xa60] sm:$0xff]  ;;  %v75_v51 = vld [vmem:[%s3758_s1 + $0x178] sm:$0xff] }
  0x7b   :  { %872 = vmatpush2.msra.mxu1 %v496_v6  ;;  %v489_v14 = vld [vmem:[%s3758_s1 + $0xe68] sm:$0xff]  ;;  %802 = vmatprep.subr.mxu0 %v365_v8  ;;  %v488_v17 = vld [vmem:[%s3758_s1 + $0xe60] sm:$0xff]  ;;  %v203_v52 = vld [vmem:[%s3758_s1 + $0x578] sm:$0xff] }
  0x7c   :  { %873 = vmatprep.subr.mxu1 %v493_v9  ;;  %803 = vmatpush2.msra.mxu0 %v364_v10  ;;  %v357_v18 = vld [vmem:[%s3758_s1 + $0xa48] sm:$0xff]  ;;  %v356_v20 = vld [vmem:[%s3758_s1 + $0xa40] sm:$0xff]  ;;  %v74_v53 = vld [vmem:[%s3758_s1 + $0x170] sm:$0xff] }
  0x7d   :  { %874 = vmatpush2.msra.mxu1 %v492_v11  ;;  %v485_v19 = vld [vmem:[%s3758_s1 + $0xe48] sm:$0xff]  ;;  %804 = vmatprep.subr.mxu0 %v361_v13  ;;  %v484_v22 = vld [vmem:[%s3758_s1 + $0xe40] sm:$0xff]  ;;  %v202_v54 = vld [vmem:[%s3758_s1 + $0x570] sm:$0xff] }
  0x7e   :  { %875 = vmatprep.subr.mxu1 %v489_v14  ;;  %805 = vmatpush2.msra.mxu0 %v360_v16  ;;  %v353_v23 = vld [vmem:[%s3758_s1 + $0xa28] sm:$0xff]  ;;  %v352_v25 = vld [vmem:[%s3758_s1 + $0xa20] sm:$0xff]  ;;  %v71_v55 = vld [vmem:[%s3758_s1 + $0x158] sm:$0xff] }
  0x7f   :  { %876 = vmatpush2.msra.mxu1 %v488_v17  ;;  %v481_v24 = vld [vmem:[%s3758_s1 + $0xe28] sm:$0xff]  ;;  %806 = vmatprep.subr.mxu0 %v357_v18  ;;  %v480_v26 = vld [vmem:[%s3758_s1 + $0xe20] sm:$0xff]  ;;  %v199_v56 = vld [vmem:[%s3758_s1 + $0x558] sm:$0xff] }
  0x80   :  { %877 = vmatprep.subr.mxu1 %v485_v19  ;;  %807 = vmatpush2.msra.mxu0 %v356_v20  ;;  %v349_v27 = vld [vmem:[%s3758_s1 + $0xa08] sm:$0xff]  ;;  %v348_v30 = vld [vmem:[%s3758_s1 + $0xa00] sm:$0xff]  ;;  %v70_v57 = vld [vmem:[%s3758_s1 + $0x150] sm:$0xff] }
  0x81   :  { %878 = vmatpush2.msra.mxu1 %v484_v22  ;;  %v477_v28 = vld [vmem:[%s3758_s1 + $0xe08] sm:$0xff]  ;;  %808 = vmatprep.subr.mxu0 %v353_v23  ;;  %v476_v31 = vld [vmem:[%s3758_s1 + $0xe00] sm:$0xff]  ;;  %v198_v58 = vld [vmem:[%s3758_s1 + $0x550] sm:$0xff] }
  0x82   :  { %879 = vmatprep.subr.mxu1 %v481_v24  ;;  %809 = vmatpush2.msra.mxu0 %v352_v25  ;;  %v67_v59 = vld [vmem:[%s3758_s1 + $0x138] sm:$0xff]  ;;  %v66_v61 = vld [vmem:[%s3758_s1 + $0x130] sm:$0xff] }
  0x83   :  { %880 = vmatpush2.msra.mxu1 %v480_v26  ;;  %810 = vmatprep.subr.mxu0 %v349_v27  ;;  %v195_v60 = vld [vmem:[%s3758_s1 + $0x538] sm:$0xff]  ;;  %v194_v62 = vld [vmem:[%s3758_s1 + $0x530] sm:$0xff] }
  0x84   :  { %881 = vmatprep.subr.mxu1 %v477_v28  ;;  %811 = vmatpush2.msra.mxu0 %v348_v30  ;;  %v63_v63 = vld [vmem:[%s3758_s1 + $0x118] sm:$0xff]  ;;  %v62_v1 = vld [vmem:[%s3758_s1 + $0x110] sm:$0xff] }
  0x85   :  { %812 = vmatprep.mubr.f32.mxu0 %v2456_v29  ;;  %882 = vmatpush2.msra.mxu1 %v476_v31  ;;  %v191_v0 = vld [vmem:[%s3758_s1 + $0x518] sm:$0xff]  ;;  %v190_v3 = vld [vmem:[%s3758_s1 + $0x510] sm:$0xff] }
  0x86   :  { %813 = vmatmul.mubr.f32.vlgmr.msra.gmra.mxu0 %v1948_v38  ;;  %883 = vmatprep.mubr.f32.mxu1 %v2466_v32  ;;  %v59_v4 = vld [vmem:[%s3758_s1 + $0xf8] sm:$0xff]  ;;  %v58_v6 = vld [vmem:[%s3758_s1 + $0xf0] sm:$0xff] }
  0x87   :  { %890 = vmatprep.subr.mxu0 %v91_v33  ;;  %961 = vmatprep.subr.mxu1 %v219_v34  ;;  %v187_v5 = vld [vmem:[%s3758_s1 + $0x4f8] sm:$0xff]  ;;  %v186_v8 = vld [vmem:[%s3758_s1 + $0x4f0] sm:$0xff] }
  0x88   :  { %884 = vmatmul.mubr.f32.vlgmr.msra.gmra.mxu1 %v1957_v41  ;;  %891 = vmatpush1.msra.mxu0 %v90_v35  ;;  %v55_v9 = vld [vmem:[%s3758_s1 + $0xd8] sm:$0xff]  ;;  %v54_v11 = vld [vmem:[%s3758_s1 + $0xd0] sm:$0xff] }
  0x89   :  { %962 = vmatpush1.msra.mxu1 %v218_v36  ;;  %892 = vmatprep.subr.mxu0 %v87_v37  ;;  %v183_v10 = vld [vmem:[%s3758_s1 + $0x4d8] sm:$0xff]  ;;  %v182_v13 = vld [vmem:[%s3758_s1 + $0x4d0] sm:$0xff] }
  0x8a   :  { %963 = vmatprep.subr.mxu1 %v215_v39  ;;  %893 = vmatpush1.msra.mxu0 %v86_v40  ;;  %v51_v14 = vld [vmem:[%s3758_s1 + $0xb8] sm:$0xff]  ;;  %v50_v17 = vld [vmem:[%s3758_s1 + $0xb0] sm:$0xff] }
  0x8b   :  { %964 = vmatpush1.msra.mxu1 %v214_v42  ;;  %894 = vmatprep.subr.mxu0 %v83_v43  ;;  %v179_v16 = vld [vmem:[%s3758_s1 + $0x4b8] sm:$0xff]  ;;  %v178_v18 = vld [vmem:[%s3758_s1 + $0x4b0] sm:$0xff] }
  0x8c   :  { %965 = vmatprep.subr.mxu1 %v211_v44  ;;  %895 = vmatpush1.msra.mxu0 %v82_v45  ;;  %v47_v19 = vld [vmem:[%s3758_s1 + $0x98] sm:$0xff]  ;;  %v46_v22 = vld [vmem:[%s3758_s1 + $0x90] sm:$0xff] }
  0x8d   :  { %966 = vmatpush1.msra.mxu1 %v210_v46  ;;  %896 = vmatprep.subr.mxu0 %v79_v47  ;;  %v175_v20 = vld [vmem:[%s3758_s1 + $0x498] sm:$0xff]  ;;  %v174_v23 = vld [vmem:[%s3758_s1 + $0x490] sm:$0xff] }
  0x8e   :  { %967 = vmatprep.subr.mxu1 %v207_v48  ;;  %897 = vmatpush1.msra.mxu0 %v78_v49  ;;  %v43_v24 = vld [vmem:[%s3758_s1 + $0x78] sm:$0xff]  ;;  %v42_v26 = vld [vmem:[%s3758_s1 + $0x70] sm:$0xff] }
  0x8f   :  { %968 = vmatpush1.msra.mxu1 %v206_v50  ;;  %898 = vmatprep.subr.mxu0 %v75_v51  ;;  %v171_v25 = vld [vmem:[%s3758_s1 + $0x478] sm:$0xff]  ;;  %v170_v27 = vld [vmem:[%s3758_s1 + $0x470] sm:$0xff] }
  0x90   :  { %969 = vmatprep.subr.mxu1 %v203_v52  ;;  %899 = vmatpush1.msra.mxu0 %v74_v53  ;;  %v39_v28 = vld [vmem:[%s3758_s1 + $0x58] sm:$0xff]  ;;  %v38_v31 = vld [vmem:[%s3758_s1 + $0x50] sm:$0xff] }
  0x91   :  { %970 = vmatpush1.msra.mxu1 %v202_v54  ;;  %900 = vmatprep.subr.mxu0 %v71_v55  ;;  %v167_v30 = vld [vmem:[%s3758_s1 + $0x458] sm:$0xff]  ;;  %v166_v33 = vld [vmem:[%s3758_s1 + $0x450] sm:$0xff] }
  0x92   :  { %971 = vmatprep.subr.mxu1 %v199_v56  ;;  %901 = vmatpush1.msra.mxu0 %v70_v57  ;;  %v35_v34 = vld [vmem:[%s3758_s1 + $0x38] sm:$0xff]  ;;  %v34_v36 = vld [vmem:[%s3758_s1 + $0x30] sm:$0xff] }
  0x93   :  { %972 = vmatpush1.msra.mxu1 %v198_v58  ;;  %902 = vmatprep.subr.mxu0 %v67_v59  ;;  %v163_v35 = vld [vmem:[%s3758_s1 + $0x438] sm:$0xff]  ;;  %v162_v37 = vld [vmem:[%s3758_s1 + $0x430] sm:$0xff] }
  0x94   :  { %973 = vmatprep.subr.mxu1 %v195_v60  ;;  %903 = vmatpush1.msra.mxu0 %v66_v61  ;;  %v31_v39 = vld [vmem:[%s3758_s1 + $0x18] sm:$0xff]  ;;  %v30_v42 = vld [vmem:[%s3758_s1 + $0x10] sm:$0xff] }
  0x95   :  { %974 = vmatpush1.msra.mxu1 %v194_v62  ;;  %904 = vmatprep.subr.mxu0 %v63_v63  ;;  %v159_v40 = vld [vmem:[%s3758_s1 + $0x418] sm:$0xff]  ;;  %v158_v43 = vld [vmem:[%s3758_s1 + $0x410] sm:$0xff] }
  0x96   :  { %975 = vmatprep.subr.mxu1 %v191_v0  ;;  %905 = vmatpush1.msra.mxu0 %v62_v1  ;;  %v155_v44 = vld [vmem:[%s3758_s1 + $0x3f8] sm:$0xff]  ;;  %v154_v46 = vld [vmem:[%s3758_s1 + $0x3f0] sm:$0xff] }
  0x97   :  { %976 = vmatpush1.msra.mxu1 %v190_v3  ;;  %906 = vmatprep.subr.mxu0 %v59_v4  ;;  %v283_v45 = vld [vmem:[%s3758_s1 + $0x7f8] sm:$0xff]  ;;  %v282_v47 = vld [vmem:[%s3758_s1 + $0x7f0] sm:$0xff] }
  0x98   :  { %977 = vmatprep.subr.mxu1 %v187_v5  ;;  %907 = vmatpush1.msra.mxu0 %v58_v6  ;;  %v151_v48 = vld [vmem:[%s3758_s1 + $0x3d8] sm:$0xff]  ;;  %v150_v50 = vld [vmem:[%s3758_s1 + $0x3d0] sm:$0xff] }
  0x99   :  { %978 = vmatpush1.msra.mxu1 %v186_v8  ;;  %908 = vmatprep.subr.mxu0 %v55_v9  ;;  %v279_v49 = vld [vmem:[%s3758_s1 + $0x7d8] sm:$0xff]  ;;  %v278_v51 = vld [vmem:[%s3758_s1 + $0x7d0] sm:$0xff] }
  0x9a   :  { %979 = vmatprep.subr.mxu1 %v183_v10  ;;  %909 = vmatpush1.msra.mxu0 %v54_v11  ;;  %v147_v52 = vld [vmem:[%s3758_s1 + $0x3b8] sm:$0xff]  ;;  %v146_v54 = vld [vmem:[%s3758_s1 + $0x3b0] sm:$0xff] }
  0x9b   :  { %980 = vmatpush1.msra.mxu1 %v182_v13  ;;  %910 = vmatprep.subr.mxu0 %v51_v14  ;;  %v275_v53 = vld [vmem:[%s3758_s1 + $0x7b8] sm:$0xff]  ;;  %v274_v55 = vld [vmem:[%s3758_s1 + $0x7b0] sm:$0xff] }
  0x9c   :  { %981 = vmatprep.subr.mxu1 %v179_v16  ;;  %911 = vmatpush1.msra.mxu0 %v50_v17  ;;  %v143_v56 = vld [vmem:[%s3758_s1 + $0x398] sm:$0xff]  ;;  %v142_v58 = vld [vmem:[%s3758_s1 + $0x390] sm:$0xff] }
  0x9d   :  { %982 = vmatpush1.msra.mxu1 %v178_v18  ;;  %912 = vmatprep.subr.mxu0 %v47_v19  ;;  %v271_v57 = vld [vmem:[%s3758_s1 + $0x798] sm:$0xff]  ;;  %v270_v59 = vld [vmem:[%s3758_s1 + $0x790] sm:$0xff] }
  0x9e   :  { %983 = vmatprep.subr.mxu1 %v175_v20  ;;  %913 = vmatpush1.msra.mxu0 %v46_v22  ;;  %v139_v60 = vld [vmem:[%s3758_s1 + $0x378] sm:$0xff]  ;;  %v138_v62 = vld [vmem:[%s3758_s1 + $0x370] sm:$0xff] }
  0x9f   :  { %984 = vmatpush1.msra.mxu1 %v174_v23  ;;  %914 = vmatprep.subr.mxu0 %v43_v24  ;;  %v267_v61 = vld [vmem:[%s3758_s1 + $0x778] sm:$0xff]  ;;  %v266_v63 = vld [vmem:[%s3758_s1 + $0x770] sm:$0xff] }
  0xa0   :  { %985 = vmatprep.subr.mxu1 %v171_v25  ;;  %915 = vmatpush1.msra.mxu0 %v42_v26  ;;  %v135_v0 = vld [vmem:[%s3758_s1 + $0x358] sm:$0xff]  ;;  %v134_v3 = vld [vmem:[%s3758_s1 + $0x350] sm:$0xff] }
  0xa1   :  { %986 = vmatpush1.msra.mxu1 %v170_v27  ;;  %916 = vmatprep.subr.mxu0 %v39_v28  ;;  %v263_v1 = vld [vmem:[%s3758_s1 + $0x758] sm:$0xff]  ;;  %v262_v4 = vld [vmem:[%s3758_s1 + $0x750] sm:$0xff] }
  0xa2   :  { %987 = vmatprep.subr.mxu1 %v167_v30  ;;  %917 = vmatpush1.msra.mxu0 %v38_v31  ;;  %v131_v5 = vld [vmem:[%s3758_s1 + $0x338] sm:$0xff]  ;;  %v130_v8 = vld [vmem:[%s3758_s1 + $0x330] sm:$0xff] }
  0xa3   :  { %988 = vmatpush1.msra.mxu1 %v166_v33  ;;  %918 = vmatprep.subr.mxu0 %v35_v34  ;;  %v259_v6 = vld [vmem:[%s3758_s1 + $0x738] sm:$0xff]  ;;  %v258_v9 = vld [vmem:[%s3758_s1 + $0x730] sm:$0xff] }
  0xa4   :  { %989 = vmatprep.subr.mxu1 %v163_v35  ;;  %919 = vmatpush1.msra.mxu0 %v34_v36  ;;  %v127_v10 = vld [vmem:[%s3758_s1 + $0x318] sm:$0xff]  ;;  %v126_v13 = vld [vmem:[%s3758_s1 + $0x310] sm:$0xff] }
  0xa5   :  { %990 = vmatpush1.msra.mxu1 %v162_v37  ;;  %920 = vmatprep.subr.mxu0 %v31_v39  ;;  %v255_v11 = vld [vmem:[%s3758_s1 + $0x718] sm:$0xff]  ;;  %v254_v14 = vld [vmem:[%s3758_s1 + $0x710] sm:$0xff] }
  0xa6   :  { %991 = vmatprep.subr.mxu1 %v159_v40  ;;  %921 = vmatpush1.msra.mxu0 %v30_v42  ;;  %v123_v16 = vld [vmem:[%s3758_s1 + $0x2f8] sm:$0xff]  ;;  %v122_v18 = vld [vmem:[%s3758_s1 + $0x2f0] sm:$0xff] }
  0xa7   :  { %992 = vmatpush1.msra.mxu1 %v158_v43  ;;  %922 = vmatprep.subr.mxu0 %v155_v44  ;;  %v251_v17 = vld [vmem:[%s3758_s1 + $0x6f8] sm:$0xff]  ;;  %v250_v19 = vld [vmem:[%s3758_s1 + $0x6f0] sm:$0xff] }
  0xa8   :  { %993 = vmatprep.subr.mxu1 %v283_v45  ;;  %923 = vmatpush2.msra.mxu0 %v154_v46  ;;  %v119_v20 = vld [vmem:[%s3758_s1 + $0x2d8] sm:$0xff]  ;;  %v118_v23 = vld [vmem:[%s3758_s1 + $0x2d0] sm:$0xff] }
  0xa9   :  { %994 = vmatpush2.msra.mxu1 %v282_v47  ;;  %924 = vmatprep.subr.mxu0 %v151_v48  ;;  %v247_v22 = vld [vmem:[%s3758_s1 + $0x6d8] sm:$0xff]  ;;  %v246_v24 = vld [vmem:[%s3758_s1 + $0x6d0] sm:$0xff] }
  0xaa   :  { %995 = vmatprep.subr.mxu1 %v279_v49  ;;  %925 = vmatpush2.msra.mxu0 %v150_v50  ;;  %v115_v25 = vld [vmem:[%s3758_s1 + $0x2b8] sm:$0xff]  ;;  %v114_v27 = vld [vmem:[%s3758_s1 + $0x2b0] sm:$0xff] }
  0xab   :  { %996 = vmatpush2.msra.mxu1 %v278_v51  ;;  %926 = vmatprep.subr.mxu0 %v147_v52  ;;  %v243_v26 = vld [vmem:[%s3758_s1 + $0x6b8] sm:$0xff]  ;;  %v242_v28 = vld [vmem:[%s3758_s1 + $0x6b0] sm:$0xff] }
  0xac   :  { %997 = vmatprep.subr.mxu1 %v275_v53  ;;  %927 = vmatpush2.msra.mxu0 %v146_v54  ;;  %v111_v30 = vld [vmem:[%s3758_s1 + $0x298] sm:$0xff]  ;;  %v110_v33 = vld [vmem:[%s3758_s1 + $0x290] sm:$0xff] }
  0xad   :  { %998 = vmatpush2.msra.mxu1 %v274_v55  ;;  %928 = vmatprep.subr.mxu0 %v143_v56  ;;  %v239_v31 = vld [vmem:[%s3758_s1 + $0x698] sm:$0xff]  ;;  %v238_v34 = vld [vmem:[%s3758_s1 + $0x690] sm:$0xff] }
  0xae   :  { %999 = vmatprep.subr.mxu1 %v271_v57  ;;  %929 = vmatpush2.msra.mxu0 %v142_v58  ;;  %v107_v35 = vld [vmem:[%s3758_s1 + $0x278] sm:$0xff]  ;;  %v106_v37 = vld [vmem:[%s3758_s1 + $0x270] sm:$0xff] }
  0xaf   :  { %1000 = vmatpush2.msra.mxu1 %v270_v59  ;;  %930 = vmatprep.subr.mxu0 %v139_v60  ;;  %v235_v36 = vld [vmem:[%s3758_s1 + $0x678] sm:$0xff]  ;;  %v234_v39 = vld [vmem:[%s3758_s1 + $0x670] sm:$0xff] }
  0xb0   :  { %1001 = vmatprep.subr.mxu1 %v267_v61  ;;  %931 = vmatpush2.msra.mxu0 %v138_v62  ;;  %v103_v40 = vld [vmem:[%s3758_s1 + $0x258] sm:$0xff]  ;;  %v102_v43 = vld [vmem:[%s3758_s1 + $0x250] sm:$0xff] }
  0xb1   :  { %1002 = vmatpush2.msra.mxu1 %v266_v63  ;;  %932 = vmatprep.subr.mxu0 %v135_v0  ;;  %v231_v42 = vld [vmem:[%s3758_s1 + $0x658] sm:$0xff]  ;;  %v230_v44 = vld [vmem:[%s3758_s1 + $0x650] sm:$0xff] }
  0xb2   :  { %1003 = vmatprep.subr.mxu1 %v263_v1  ;;  %933 = vmatpush2.msra.mxu0 %v134_v3  ;;  %v99_v45 = vld [vmem:[%s3758_s1 + $0x238] sm:$0xff]  ;;  %v98_v47 = vld [vmem:[%s3758_s1 + $0x230] sm:$0xff] }
  0xb3   :  { %1004 = vmatpush2.msra.mxu1 %v262_v4  ;;  %934 = vmatprep.subr.mxu0 %v131_v5  ;;  %v227_v46 = vld [vmem:[%s3758_s1 + $0x638] sm:$0xff]  ;;  %v226_v48 = vld [vmem:[%s3758_s1 + $0x630] sm:$0xff] }
  0xb4   :  { %1005 = vmatprep.subr.mxu1 %v259_v6  ;;  %935 = vmatpush2.msra.mxu0 %v130_v8  ;;  %v95_v49 = vld [vmem:[%s3758_s1 + $0x218] sm:$0xff]  ;;  %v94_v51 = vld [vmem:[%s3758_s1 + $0x210] sm:$0xff] }
  0xb5   :  { %1006 = vmatpush2.msra.mxu1 %v258_v9  ;;  %936 = vmatprep.subr.mxu0 %v127_v10  ;;  %v223_v50 = vld [vmem:[%s3758_s1 + $0x618] sm:$0xff]  ;;  %v222_v52 = vld [vmem:[%s3758_s1 + $0x610] sm:$0xff] }
  0xb6   :  { %1007 = vmatprep.subr.mxu1 %v255_v11  ;;  %937 = vmatpush2.msra.mxu0 %v126_v13  ;;  %v347_v53 = vld [vmem:[%s3758_s1 + $0x9f8] sm:$0xff]  ;;  %v346_v55 = vld [vmem:[%s3758_s1 + $0x9f0] sm:$0xff] }
  0xb7   :  { %1008 = vmatpush2.msra.mxu1 %v254_v14  ;;  %938 = vmatprep.subr.mxu0 %v123_v16  ;;  %v475_v54 = vld [vmem:[%s3758_s1 + $0xdf8] sm:$0xff]  ;;  %v474_v56 = vld [vmem:[%s3758_s1 + $0xdf0] sm:$0xff] }
  0xb8   :  { %1009 = vmatprep.subr.mxu1 %v251_v17  ;;  %939 = vmatpush2.msra.mxu0 %v122_v18  ;;  %v471_v57 = vld [vmem:[%s3758_s1 + $0xdd8] sm:$0xff]  ;;  %v466_v60 = vld [vmem:[%s3758_s1 + $0xdb0] sm:$0xff] }
  0xb9   :  { %1010 = vmatpush2.msra.mxu1 %v250_v19  ;;  %940 = vmatprep.subr.mxu0 %v119_v20  ;;  %v339_v58 = vld [vmem:[%s3758_s1 + $0x9b8] sm:$0xff]  ;;  %v334_v63 = vld [vmem:[%s3758_s1 + $0x990] sm:$0xff] }
  0xba   :  { %1011 = vmatprep.subr.mxu1 %v247_v22  ;;  %941 = vmatpush2.msra.mxu0 %v118_v23  ;;  %v467_v59 = vld [vmem:[%s3758_s1 + $0xdb8] sm:$0xff]  ;;  %v462_v0 = vld [vmem:[%s3758_s1 + $0xd90] sm:$0xff] }
  0xbb   :  { %1012 = vmatpush2.msra.mxu1 %v246_v24  ;;  %942 = vmatprep.subr.mxu0 %v115_v25  ;;  %v335_v61 = vld [vmem:[%s3758_s1 + $0x998] sm:$0xff]  ;;  %v330_v4 = vld [vmem:[%s3758_s1 + $0x970] sm:$0xff] }
  0xbc   :  { %1013 = vmatprep.subr.mxu1 %v243_v26  ;;  %943 = vmatpush2.msra.mxu0 %v114_v27  ;;  %v463_v62 = vld [vmem:[%s3758_s1 + $0xd98] sm:$0xff]  ;;  %v458_v5 = vld [vmem:[%s3758_s1 + $0xd70] sm:$0xff] }
  0xbd   :  { %1014 = vmatpush2.msra.mxu1 %v242_v28  ;;  %944 = vmatprep.subr.mxu0 %v111_v30  ;;  %v331_v1 = vld [vmem:[%s3758_s1 + $0x978] sm:$0xff]  ;;  %v326_v9 = vld [vmem:[%s3758_s1 + $0x950] sm:$0xff] }
  0xbe   :  { %1015 = vmatprep.subr.mxu1 %v239_v31  ;;  %945 = vmatpush2.msra.mxu0 %v110_v33  ;;  %v459_v3 = vld [vmem:[%s3758_s1 + $0xd78] sm:$0xff]  ;;  %v454_v10 = vld [vmem:[%s3758_s1 + $0xd50] sm:$0xff] }
  0xbf   :  { %1016 = vmatpush2.msra.mxu1 %v238_v34  ;;  %946 = vmatprep.subr.mxu0 %v107_v35  ;;  %v327_v6 = vld [vmem:[%s3758_s1 + $0x958] sm:$0xff]  ;;  %v322_v14 = vld [vmem:[%s3758_s1 + $0x930] sm:$0xff] }
  0xc0   :  { %1017 = vmatprep.subr.mxu1 %v235_v36  ;;  %947 = vmatpush2.msra.mxu0 %v106_v37  ;;  %v455_v8 = vld [vmem:[%s3758_s1 + $0xd58] sm:$0xff]  ;;  %v450_v16 = vld [vmem:[%s3758_s1 + $0xd30] sm:$0xff] }
  0xc1   :  { %1018 = vmatpush2.msra.mxu1 %v234_v39  ;;  %948 = vmatprep.subr.mxu0 %v103_v40  ;;  %v323_v11 = vld [vmem:[%s3758_s1 + $0x938] sm:$0xff]  ;;  %v318_v19 = vld [vmem:[%s3758_s1 + $0x910] sm:$0xff] }
  0xc2   :  { %1019 = vmatprep.subr.mxu1 %v231_v42  ;;  %949 = vmatpush2.msra.mxu0 %v102_v43  ;;  %v451_v13 = vld [vmem:[%s3758_s1 + $0xd38] sm:$0xff]  ;;  %v446_v20 = vld [vmem:[%s3758_s1 + $0xd10] sm:$0xff] }
  0xc3   :  { %1020 = vmatpush2.msra.mxu1 %v230_v44  ;;  %950 = vmatprep.subr.mxu0 %v99_v45  ;;  %v319_v17 = vld [vmem:[%s3758_s1 + $0x918] sm:$0xff]  ;;  %v314_v24 = vld [vmem:[%s3758_s1 + $0x8f0] sm:$0xff] }
  0xc4   :  { %1021 = vmatprep.subr.mxu1 %v227_v46  ;;  %951 = vmatpush2.msra.mxu0 %v98_v47  ;;  %v447_v18 = vld [vmem:[%s3758_s1 + $0xd18] sm:$0xff]  ;;  %v442_v25 = vld [vmem:[%s3758_s1 + $0xcf0] sm:$0xff] }
  0xc5   :  { %1022 = vmatpush2.msra.mxu1 %v226_v48  ;;  %952 = vmatprep.subr.mxu0 %v95_v49  ;;  %v315_v22 = vld [vmem:[%s3758_s1 + $0x8f8] sm:$0xff]  ;;  %v310_v28 = vld [vmem:[%s3758_s1 + $0x8d0] sm:$0xff] }
  0xc6   :  { %1023 = vmatprep.subr.mxu1 %v223_v50  ;;  %953 = vmatpush2.msra.mxu0 %v94_v51  ;;  %v443_v23 = vld [vmem:[%s3758_s1 + $0xcf8] sm:$0xff]  ;;  %v438_v30 = vld [vmem:[%s3758_s1 + $0xcd0] sm:$0xff] }
  0xc7   :  { %954 = vmatprep.mubr.f32.mxu0 %v2060_v12  ;;  %1024 = vmatpush2.msra.mxu1 %v222_v52  ;;  %v343_v12 = vld [vmem:[%s3758_s1 + $0x9d8] sm:$0xff]  ;;  %v306_v34 = vld [vmem:[%s3758_s1 + $0x8b0] sm:$0xff] }
  0xc8   :  { %955 = vmatmul.mubr.f32.vlgmr.msra.gmra.mxu0 %v2029_v2  ;;  %1025 = vmatprep.mubr.f32.mxu1 %v2070_v15  ;;  %v342_v2 = vld [vmem:[%s3758_s1 + $0x9d0] sm:$0xff]  ;;  %v311_v26 = vld [vmem:[%s3758_s1 + $0x8d8] sm:$0xff] }
  0xc9   :  { %1032 = vmatprep.subr.mxu0 %v347_v53  ;;  %1103 = vmatprep.subr.mxu1 %v475_v54  ;;  %v470_v15 = vld [vmem:[%s3758_s1 + $0xdd0] sm:$0xff]  ;;  %v439_v27 = vld [vmem:[%s3758_s1 + $0xcd8] sm:$0xff] }
  0xca   :  { %1026 = vmatmul.mubr.f32.vlgmr.msra.gmra.mxu1 %v2044_v7  ;;  %1033 = vmatpush1.msra.mxu0 %v346_v55  ;;  %v338_v7 = vld [vmem:[%s3758_s1 + $0x9b0] sm:$0xff]  ;;  %v307_v31 = vld [vmem:[%s3758_s1 + $0x8b8] sm:$0xff] }
  0xcb   :  { %1104 = vmatpush1.msra.mxu1 %v474_v56  ;;  %1034 = vmatprep.subr.mxu0 %v343_v12  ;;  %v435_v33 = vld [vmem:[%s3758_s1 + $0xcb8] sm:$0xff]  ;;  %v434_v35 = vld [vmem:[%s3758_s1 + $0xcb0] sm:$0xff] }
  0xcc   :  { %1105 = vmatprep.subr.mxu1 %v471_v57  ;;  %1035 = vmatpush1.msra.mxu0 %v342_v2  ;;  %v303_v36 = vld [vmem:[%s3758_s1 + $0x898] sm:$0xff]  ;;  %v302_v39 = vld [vmem:[%s3758_s1 + $0x890] sm:$0xff] }
  0xcd   :  { %1106 = vmatpush1.msra.mxu1 %v470_v15  ;;  %1036 = vmatprep.subr.mxu0 %v339_v58  ;;  %v431_v37 = vld [vmem:[%s3758_s1 + $0xc98] sm:$0xff]  ;;  %v430_v40 = vld [vmem:[%s3758_s1 + $0xc90] sm:$0xff] }
  0xce   :  { %1107 = vmatprep.subr.mxu1 %v467_v59  ;;  %1037 = vmatpush1.msra.mxu0 %v338_v7  ;;  %v299_v42 = vld [vmem:[%s3758_s1 + $0x878] sm:$0xff]  ;;  %v298_v44 = vld [vmem:[%s3758_s1 + $0x870] sm:$0xff] }
  0xcf   :  { %1108 = vmatpush1.msra.mxu1 %v466_v60  ;;  %1038 = vmatprep.subr.mxu0 %v335_v61  ;;  %v427_v43 = vld [vmem:[%s3758_s1 + $0xc78] sm:$0xff]  ;;  %v426_v45 = vld [vmem:[%s3758_s1 + $0xc70] sm:$0xff] }
  0xd0   :  { %1109 = vmatprep.subr.mxu1 %v463_v62  ;;  %1039 = vmatpush1.msra.mxu0 %v334_v63  ;;  %v295_v46 = vld [vmem:[%s3758_s1 + $0x858] sm:$0xff]  ;;  %v294_v48 = vld [vmem:[%s3758_s1 + $0x850] sm:$0xff] }
  0xd1   :  { %1110 = vmatpush1.msra.mxu1 %v462_v0  ;;  %1040 = vmatprep.subr.mxu0 %v331_v1  ;;  %v423_v47 = vld [vmem:[%s3758_s1 + $0xc58] sm:$0xff]  ;;  %v422_v49 = vld [vmem:[%s3758_s1 + $0xc50] sm:$0xff] }
  0xd2   :  { %1111 = vmatprep.subr.mxu1 %v459_v3  ;;  %1041 = vmatpush1.msra.mxu0 %v330_v4  ;;  %v291_v50 = vld [vmem:[%s3758_s1 + $0x838] sm:$0xff]  ;;  %v290_v52 = vld [vmem:[%s3758_s1 + $0x830] sm:$0xff] }
  0xd3   :  { %1112 = vmatpush1.msra.mxu1 %v458_v5  ;;  %1042 = vmatprep.subr.mxu0 %v327_v6  ;;  %v419_v51 = vld [vmem:[%s3758_s1 + $0xc38] sm:$0xff]  ;;  %v418_v53 = vld [vmem:[%s3758_s1 + $0xc30] sm:$0xff] }
  0xd4   :  { %1113 = vmatprep.subr.mxu1 %v455_v8  ;;  %1043 = vmatpush1.msra.mxu0 %v326_v9  ;;  %v287_v54 = vld [vmem:[%s3758_s1 + $0x818] sm:$0xff]  ;;  %v286_v56 = vld [vmem:[%s3758_s1 + $0x810] sm:$0xff] }
  0xd5   :  { %1114 = vmatpush1.msra.mxu1 %v454_v10  ;;  %1044 = vmatprep.subr.mxu0 %v323_v11  ;;  %v415_v55 = vld [vmem:[%s3758_s1 + $0xc18] sm:$0xff]  ;;  %v414_v12 = vld [vmem:[%s3758_s1 + $0xc10] sm:$0xff] }
  0xd6   :  { %1115 = vmatprep.subr.mxu1 %v451_v13  ;;  %1045 = vmatpush1.msra.mxu0 %v322_v14  ;;  %v411_v57 = vld [vmem:[%s3758_s1 + $0xbf8] sm:$0xff]  ;;  %v410_v15 = vld [vmem:[%s3758_s1 + $0xbf0] sm:$0xff] }
  0xd7   :  { %1116 = vmatpush1.msra.mxu1 %v450_v16  ;;  %1046 = vmatprep.subr.mxu0 %v319_v17  ;;  %v539_v2 = vld [vmem:[%s3758_s1 + $0xff8] sm:$0xff]  ;;  %v538_v58 = vld [vmem:[%s3758_s1 + $0xff0] sm:$0xff] }
  0xd8   :  { %1117 = vmatprep.subr.mxu1 %v447_v18  ;;  %1047 = vmatpush1.msra.mxu0 %v318_v19  ;;  %v407_v59 = vld [vmem:[%s3758_s1 + $0xbd8] sm:$0xff]  ;;  %v406_v60 = vld [vmem:[%s3758_s1 + $0xbd0] sm:$0xff] }
  0xd9   :  { %1118 = vmatpush1.msra.mxu1 %v446_v20  ;;  %1048 = vmatprep.subr.mxu0 %v315_v22  ;;  %v535_v7 = vld [vmem:[%s3758_s1 + $0xfd8] sm:$0xff]  ;;  %v534_v61 = vld [vmem:[%s3758_s1 + $0xfd0] sm:$0xff] }
  0xda   :  { %1119 = vmatprep.subr.mxu1 %v443_v23  ;;  %1049 = vmatpush1.msra.mxu0 %v314_v24  ;;  %v403_v62 = vld [vmem:[%s3758_s1 + $0xbb8] sm:$0xff]  ;;  %v402_v0 = vld [vmem:[%s3758_s1 + $0xbb0] sm:$0xff] }
  0xdb   :  { %1120 = vmatpush1.msra.mxu1 %v442_v25  ;;  %1050 = vmatprep.subr.mxu0 %v311_v26  ;;  %v531_v63 = vld [vmem:[%s3758_s1 + $0xfb8] sm:$0xff]  ;;  %v530_v1 = vld [vmem:[%s3758_s1 + $0xfb0] sm:$0xff] }
  0xdc   :  { %1121 = vmatprep.subr.mxu1 %v439_v27  ;;  %1051 = vmatpush1.msra.mxu0 %v310_v28  ;;  %v399_v3 = vld [vmem:[%s3758_s1 + $0xb98] sm:$0xff]  ;;  %v398_v5 = vld [vmem:[%s3758_s1 + $0xb90] sm:$0xff] }
  0xdd   :  { %1122 = vmatpush1.msra.mxu1 %v438_v30  ;;  %1052 = vmatprep.subr.mxu0 %v307_v31  ;;  %v527_v4 = vld [vmem:[%s3758_s1 + $0xf98] sm:$0xff]  ;;  %v526_v6 = vld [vmem:[%s3758_s1 + $0xf90] sm:$0xff] }
  0xde   :  { %1123 = vmatprep.subr.mxu1 %v435_v33  ;;  %1053 = vmatpush1.msra.mxu0 %v306_v34  ;;  %v395_v8 = vld [vmem:[%s3758_s1 + $0xb78] sm:$0xff]  ;;  %v394_v10 = vld [vmem:[%s3758_s1 + $0xb70] sm:$0xff] }
  0xdf   :  { %1124 = vmatpush1.msra.mxu1 %v434_v35  ;;  %1054 = vmatprep.subr.mxu0 %v303_v36  ;;  %v523_v9 = vld [vmem:[%s3758_s1 + $0xf78] sm:$0xff]  ;;  %v522_v11 = vld [vmem:[%s3758_s1 + $0xf70] sm:$0xff] }
  0xe0   :  { %1125 = vmatprep.subr.mxu1 %v431_v37  ;;  %1055 = vmatpush1.msra.mxu0 %v302_v39  ;;  %v391_v13 = vld [vmem:[%s3758_s1 + $0xb58] sm:$0xff]  ;;  %v390_v16 = vld [vmem:[%s3758_s1 + $0xb50] sm:$0xff] }
  0xe1   :  { %1126 = vmatpush1.msra.mxu1 %v430_v40  ;;  %1056 = vmatprep.subr.mxu0 %v299_v42  ;;  %v519_v14 = vld [vmem:[%s3758_s1 + $0xf58] sm:$0xff]  ;;  %v518_v17 = vld [vmem:[%s3758_s1 + $0xf50] sm:$0xff] }
  0xe2   :  { %1127 = vmatprep.subr.mxu1 %v427_v43  ;;  %1057 = vmatpush1.msra.mxu0 %v298_v44  ;;  %v387_v18 = vld [vmem:[%s3758_s1 + $0xb38] sm:$0xff]  ;;  %v386_v20 = vld [vmem:[%s3758_s1 + $0xb30] sm:$0xff] }
  0xe3   :  { %1128 = vmatpush1.msra.mxu1 %v426_v45  ;;  %1058 = vmatprep.subr.mxu0 %v295_v46  ;;  %v515_v19 = vld [vmem:[%s3758_s1 + $0xf38] sm:$0xff]  ;;  %v514_v22 = vld [vmem:[%s3758_s1 + $0xf30] sm:$0xff] }
  0xe4   :  { %1129 = vmatprep.subr.mxu1 %v423_v47  ;;  %1059 = vmatpush1.msra.mxu0 %v294_v48  ;;  %v383_v23 = vld [vmem:[%s3758_s1 + $0xb18] sm:$0xff]  ;;  %v382_v25 = vld [vmem:[%s3758_s1 + $0xb10] sm:$0xff] }
  0xe5   :  { %1130 = vmatpush1.msra.mxu1 %v422_v49  ;;  %1060 = vmatprep.subr.mxu0 %v291_v50  ;;  %v511_v24 = vld [vmem:[%s3758_s1 + $0xf18] sm:$0xff]  ;;  %v510_v26 = vld [vmem:[%s3758_s1 + $0xf10] sm:$0xff] }
  0xe6   :  { %1131 = vmatprep.subr.mxu1 %v419_v51  ;;  %1061 = vmatpush1.msra.mxu0 %v290_v52  ;;  %v379_v27 = vld [vmem:[%s3758_s1 + $0xaf8] sm:$0xff]  ;;  %v378_v30 = vld [vmem:[%s3758_s1 + $0xaf0] sm:$0xff] }
  0xe7   :  { %1132 = vmatpush1.msra.mxu1 %v418_v53  ;;  %1062 = vmatprep.subr.mxu0 %v287_v54  ;;  %v507_v28 = vld [vmem:[%s3758_s1 + $0xef8] sm:$0xff]  ;;  %v506_v31 = vld [vmem:[%s3758_s1 + $0xef0] sm:$0xff] }
  0xe8   :  { %1133 = vmatprep.subr.mxu1 %v415_v55  ;;  %1063 = vmatpush1.msra.mxu0 %v286_v56  ;;  %v375_v33 = vld [vmem:[%s3758_s1 + $0xad8] sm:$0xff]  ;;  %v374_v35 = vld [vmem:[%s3758_s1 + $0xad0] sm:$0xff] }
  0xe9   :  { %1134 = vmatpush1.msra.mxu1 %v414_v12  ;;  %1064 = vmatprep.subr.mxu0 %v411_v57  ;;  %v503_v34 = vld [vmem:[%s3758_s1 + $0xed8] sm:$0xff]  ;;  %v502_v36 = vld [vmem:[%s3758_s1 + $0xed0] sm:$0xff] }
  0xea   :  { %1135 = vmatprep.subr.mxu1 %v539_v2  ;;  %1065 = vmatpush2.msra.mxu0 %v410_v15  ;;  %v371_v37 = vld [vmem:[%s3758_s1 + $0xab8] sm:$0xff]  ;;  %v370_v40 = vld [vmem:[%s3758_s1 + $0xab0] sm:$0xff] }
  0xeb   :  { %1136 = vmatpush2.msra.mxu1 %v538_v58  ;;  %1066 = vmatprep.subr.mxu0 %v407_v59  ;;  %v499_v39 = vld [vmem:[%s3758_s1 + $0xeb8] sm:$0xff]  ;;  %v498_v42 = vld [vmem:[%s3758_s1 + $0xeb0] sm:$0xff] }
  0xec   :  { %1137 = vmatprep.subr.mxu1 %v535_v7  ;;  %1067 = vmatpush2.msra.mxu0 %v406_v60  ;;  %v367_v43 = vld [vmem:[%s3758_s1 + $0xa98] sm:$0xff]  ;;  %v366_v45 = vld [vmem:[%s3758_s1 + $0xa90] sm:$0xff] }
  0xed   :  { %1138 = vmatpush2.msra.mxu1 %v534_v61  ;;  %1068 = vmatprep.subr.mxu0 %v403_v62  ;;  %v495_v44 = vld [vmem:[%s3758_s1 + $0xe98] sm:$0xff]  ;;  %v494_v46 = vld [vmem:[%s3758_s1 + $0xe90] sm:$0xff]  ;;  %v1207_v61 = vld [vmem:[%s3760_s3 + $0xe8] sm:$0xff] }
  0xee   :  { %1139 = vmatprep.subr.mxu1 %v531_v63  ;;  %1069 = vmatpush2.msra.mxu0 %v402_v0  ;;  %v363_v47 = vld [vmem:[%s3758_s1 + $0xa78] sm:$0xff]  ;;  %v362_v49 = vld [vmem:[%s3758_s1 + $0xa70] sm:$0xff]  ;;  %v1271_v62 = vld [vmem:[%s3760_s3 + $0x2e8] sm:$0xff] }
  0xef   :  { %1140 = vmatpush2.msra.mxu1 %v530_v1  ;;  %1070 = vmatprep.subr.mxu0 %v399_v3  ;;  %v491_v48 = vld [vmem:[%s3758_s1 + $0xe78] sm:$0xff]  ;;  %v490_v50 = vld [vmem:[%s3758_s1 + $0xe70] sm:$0xff]  ;;  %v1270_v0 = vld [vmem:[%s3760_s3 + $0x2e0] sm:$0xff] }
  0xf0   :  { %1141 = vmatprep.subr.mxu1 %v527_v4  ;;  %1071 = vmatpush2.msra.mxu0 %v398_v5  ;;  %v359_v51 = vld [vmem:[%s3758_s1 + $0xa58] sm:$0xff]  ;;  %v358_v53 = vld [vmem:[%s3758_s1 + $0xa50] sm:$0xff]  ;;  %v1203_v1 = vld [vmem:[%s3760_s3 + $0xc8] sm:$0xff] }
  0xf1   :  { %1142 = vmatpush2.msra.mxu1 %v526_v6  ;;  %1072 = vmatprep.subr.mxu0 %v395_v8  ;;  %v487_v52 = vld [vmem:[%s3758_s1 + $0xe58] sm:$0xff]  ;;  %v486_v54 = vld [vmem:[%s3758_s1 + $0xe50] sm:$0xff]  ;;  %v1202_v4 = vld [vmem:[%s3760_s3 + $0xc0] sm:$0xff] }
  0xf2   :  { %1143 = vmatprep.subr.mxu1 %v523_v9  ;;  %1073 = vmatpush2.msra.mxu0 %v394_v10  ;;  %v355_v55 = vld [vmem:[%s3758_s1 + $0xa38] sm:$0xff]  ;;  %v354_v12 = vld [vmem:[%s3758_s1 + $0xa30] sm:$0xff]  ;;  %v1267_v8 = vld [vmem:[%s3760_s3 + $0x2c8] sm:$0xff] }
  0xf3   :  { %1144 = vmatpush2.msra.mxu1 %v522_v11  ;;  %1074 = vmatprep.subr.mxu0 %v391_v13  ;;  %v483_v56 = vld [vmem:[%s3758_s1 + $0xe38] sm:$0xff]  ;;  %v482_v57 = vld [vmem:[%s3758_s1 + $0xe30] sm:$0xff]  ;;  %v1266_v10 = vld [vmem:[%s3760_s3 + $0x2c0] sm:$0xff] }
  0xf4   :  { %1145 = vmatprep.subr.mxu1 %v519_v14  ;;  %1075 = vmatpush2.msra.mxu0 %v390_v16  ;;  %v351_v2 = vld [vmem:[%s3758_s1 + $0xa18] sm:$0xff]  ;;  %v350_v58 = vld [vmem:[%s3758_s1 + $0xa10] sm:$0xff]  ;;  %v1199_v11 = vld [vmem:[%s3760_s3 + $0xa8] sm:$0xff] }
  0xf5   :  { %1146 = vmatpush2.msra.mxu1 %v518_v17  ;;  %1076 = vmatprep.subr.mxu0 %v387_v18  ;;  %v479_v15 = vld [vmem:[%s3758_s1 + $0xe18] sm:$0xff]  ;;  %v478_v59 = vld [vmem:[%s3758_s1 + $0xe10] sm:$0xff]  ;;  %v1198_v14 = vld [vmem:[%s3760_s3 + $0xa0] sm:$0xff] }
  0xf6   :  { %1147 = vmatprep.subr.mxu1 %v515_v19  ;;  %1077 = vmatpush2.msra.mxu0 %v386_v20  ;;  %v1209_v7 = vld [vmem:[%s3760_s3 + $0xf8] sm:$0xff]  ;;  %v1208_v60 = vld [vmem:[%s3760_s3 + $0xf0] sm:$0xff]  ;;  %v1263_v18 = vld [vmem:[%s3760_s3 + $0x2a8] sm:$0xff] }
  0xf7   :  { %1148 = vmatpush2.msra.mxu1 %v514_v22  ;;  %1078 = vmatprep.subr.mxu0 %v383_v23  ;;  %v1204_v63 = vld [vmem:[%s3760_s3 + $0xd0] sm:$0xff]  ;;  %v1269_v3 = vld [vmem:[%s3760_s3 + $0x2d8] sm:$0xff]  ;;  %v1262_v20 = vld [vmem:[%s3760_s3 + $0x2a0] sm:$0xff] }
  0xf8   :  { %1149 = vmatprep.subr.mxu1 %v511_v24  ;;  %1079 = vmatpush2.msra.mxu0 %v382_v25  ;;  %v1268_v5 = vld [vmem:[%s3760_s3 + $0x2d0] sm:$0xff]  ;;  %v1201_v6 = vld [vmem:[%s3760_s3 + $0xb8] sm:$0xff]  ;;  %v1195_v22 = vld [vmem:[%s3760_s3 + $0x88] sm:$0xff] }
  0xf9   :  { %1150 = vmatpush2.msra.mxu1 %v510_v26  ;;  %1080 = vmatprep.subr.mxu0 %v379_v27  ;;  %v1200_v9 = vld [vmem:[%s3760_s3 + $0xb0] sm:$0xff]  ;;  %v1265_v13 = vld [vmem:[%s3760_s3 + $0x2b8] sm:$0xff]  ;;  %v1194_v24 = vld [vmem:[%s3760_s3 + $0x80] sm:$0xff] }
  0xfa   :  { %1151 = vmatprep.subr.mxu1 %v507_v28  ;;  %1081 = vmatpush2.msra.mxu0 %v378_v30  ;;  %v1264_v16 = vld [vmem:[%s3760_s3 + $0x2b0] sm:$0xff]  ;;  %v1197_v17 = vld [vmem:[%s3760_s3 + $0x98] sm:$0xff]  ;;  %v1259_v27 = vld [vmem:[%s3760_s3 + $0x288] sm:$0xff] }
  0xfb   :  { %1152 = vmatpush2.msra.mxu1 %v506_v31  ;;  %1082 = vmatprep.subr.mxu0 %v375_v33  ;;  %v1196_v19 = vld [vmem:[%s3760_s3 + $0x90] sm:$0xff]  ;;  %v1261_v23 = vld [vmem:[%s3760_s3 + $0x298] sm:$0xff]  ;;  %v1258_v30 = vld [vmem:[%s3760_s3 + $0x280] sm:$0xff] }
  0xfc   :  { %1153 = vmatprep.subr.mxu1 %v503_v34  ;;  %1083 = vmatpush2.msra.mxu0 %v374_v35  ;;  %v1260_v25 = vld [vmem:[%s3760_s3 + $0x290] sm:$0xff]  ;;  %v1193_v26 = vld [vmem:[%s3760_s3 + $0x78] sm:$0xff]  ;;  %v1191_v31 = vld [vmem:[%s3760_s3 + $0x68] sm:$0xff] }
  0xfd   :  { %1154 = vmatpush2.msra.mxu1 %v502_v36  ;;  %1084 = vmatprep.subr.mxu0 %v371_v37  ;;  %v1192_v28 = vld [vmem:[%s3760_s3 + $0x70] sm:$0xff]  ;;  %v1257_v33 = vld [vmem:[%s3760_s3 + $0x278] sm:$0xff]  ;;  %v1190_v34 = vld [vmem:[%s3760_s3 + $0x60] sm:$0xff] }
  0xfe   :  { %1155 = vmatprep.subr.mxu1 %v499_v39  ;;  %1085 = vmatpush2.msra.mxu0 %v370_v40  ;;  %v1256_v35 = vld [vmem:[%s3760_s3 + $0x270] sm:$0xff]  ;;  %v1189_v36 = vld [vmem:[%s3760_s3 + $0x58] sm:$0xff]  ;;  %v1255_v37 = vld [vmem:[%s3760_s3 + $0x268] sm:$0xff] }
  0xff   :  { %1156 = vmatpush2.msra.mxu1 %v498_v42  ;;  %1086 = vmatprep.subr.mxu0 %v367_v43  ;;  %v1188_v39 = vld [vmem:[%s3760_s3 + $0x50] sm:$0xff]  ;;  %v1254_v40 = vld [vmem:[%s3760_s3 + $0x260] sm:$0xff]  ;;  %v1187_v42 = vld [vmem:[%s3760_s3 + $0x48] sm:$0xff] }
 0x100   :  { %1157 = vmatprep.subr.mxu1 %v495_v44  ;;  %1087 = vmatpush2.msra.mxu0 %v366_v45  ;;  %v1253_v43 = vld [vmem:[%s3760_s3 + $0x258] sm:$0xff]  ;;  %v1186_v44 = vld [vmem:[%s3760_s3 + $0x40] sm:$0xff]  ;;  %v1252_v45 = vld [vmem:[%s3760_s3 + $0x250] sm:$0xff] }
 0x101   :  { %1158 = vmatpush2.msra.mxu1 %v494_v46  ;;  %1088 = vmatprep.subr.mxu0 %v363_v47  ;;  %v1185_v46 = vld [vmem:[%s3760_s3 + $0x38] sm:$0xff]  ;;  %v1251_v47 = vld [vmem:[%s3760_s3 + $0x248] sm:$0xff] }
 0x102   :  { %1159 = vmatprep.subr.mxu1 %v491_v48  ;;  %1089 = vmatpush2.msra.mxu0 %v362_v49  ;;  %v1184_v48 = vld [vmem:[%s3760_s3 + $0x30] sm:$0xff]  ;;  %v1250_v49 = vld [vmem:[%s3760_s3 + $0x240] sm:$0xff] }
 0x103   :  { %1160 = vmatpush2.msra.mxu1 %v490_v50  ;;  %1090 = vmatprep.subr.mxu0 %v359_v51  ;;  %v1183_v50 = vld [vmem:[%s3760_s3 + $0x28] sm:$0xff]  ;;  %v1249_v51 = vld [vmem:[%s3760_s3 + $0x238] sm:$0xff] }
 0x104   :  { %1161 = vmatprep.subr.mxu1 %v487_v52  ;;  %1091 = vmatpush2.msra.mxu0 %v358_v53  ;;  %v1182_v52 = vld [vmem:[%s3760_s3 + $0x20] sm:$0xff]  ;;  %v1248_v53 = vld [vmem:[%s3760_s3 + $0x230] sm:$0xff] }
 0x105   :  { %1162 = vmatpush2.msra.mxu1 %v486_v54  ;;  %1092 = vmatprep.subr.mxu0 %v355_v55  ;;  %v1181_v54 = vld [vmem:[%s3760_s3 + $0x18] sm:$0xff]  ;;  %v1247_v55 = vld [vmem:[%s3760_s3 + $0x228] sm:$0xff] }
 0x106   :  { %1163 = vmatprep.subr.mxu1 %v483_v56  ;;  %1093 = vmatpush2.msra.mxu0 %v354_v12  ;;  %v1180_v56 = vld [vmem:[%s3760_s3 + $0x10] sm:$0xff]  ;;  %v1246_v12 = vld [vmem:[%s3760_s3 + $0x220] sm:$0xff] }
 0x107   :  { %1164 = vmatpush2.msra.mxu1 %v482_v57  ;;  %1094 = vmatprep.subr.mxu0 %v351_v2  ;;  %v1179_v57 = vld [vmem:[%s3760_s3 + $0x8] sm:$0xff]  ;;  %v1245_v2 = vld [vmem:[%s3760_s3 + $0x218] sm:$0xff] }
 0x108   :  { %1165 = vmatprep.subr.mxu1 %v479_v15  ;;  %1095 = vmatpush2.msra.mxu0 %v350_v58  ;;  %v1178_v15 = vld [vmem:[%s3760_s3] sm:$0xff]  ;;  %v1244_v58 = vld [vmem:[%s3760_s3 + $0x210] sm:$0xff] }
 0x109   :  { %1096 = vmatprep.mubr.f32.mxu0 %v2456_v29  ;;  %1166 = vmatpush2.msra.mxu1 %v478_v59  ;;  %v1206_v29 = vld [vmem:[%s3760_s3 + $0xe0] sm:$0xff]  ;;  %v1241_v59 = vld [vmem:[%s3760_s3 + $0x1f8] sm:$0xff] }
 0x10a   :  { %1167 = vmatprep.mubr.f32.mxu1 %v2466_v32  ;;  %1097 = vmatmul.mubr.f32.vlgmr.msra.gmra.mxu0 %v1948_v38  ;;  %v1205_v32 = vld [vmem:[%s3760_s3 + $0xd8] sm:$0xff] }
 0x10b   :  { %1168 = vmatmul.mubr.f32.vlgmr.msra.gmra.mxu1 %v1957_v41  ;;  %1318 = vmatprep.subr.mxu0 %v1209_v7  ;;  %v1273_v38 = vld [vmem:[%s3760_s3 + $0x2f8] sm:$0xff]  ;;  %v1272_v41 = vld [vmem:[%s3760_s3 + $0x2f0] sm:$0xff]  ;;  %v1243_v7 = vld [vmem:[%s3760_s3 + $0x208] sm:$0xff] }
 0x10c   :  { %1319 = vmatpush1.msra.mxu0 %v1208_v60  ;;  %1389 = vmatprep.subr.mxu1 %v1273_v38  ;;  %v1240_v60 = vld [vmem:[%s3760_s3 + $0x1f0] sm:$0xff]  ;;  %v1238_v38 = vld [vmem:[%s3760_s3 + $0x1e0] sm:$0xff] }
 0x10d   :  { %1320 = vmatprep.subr.mxu0 %v1207_v61  ;;  %1390 = vmatpush1.msra.mxu1 %v1272_v41  ;;  %v1242_v61 = vld [vmem:[%s3760_s3 + $0x200] sm:$0xff]  ;;  %v1304_v41 = vld [vmem:[%s3760_s3 + $0x3f0] sm:$0xff] }
 0x10e   :  { %1321 = vmatpush1.msra.mxu0 %v1206_v29  ;;  %1391 = vmatprep.subr.mxu1 %v1271_v62  ;;  %v1239_v29 = vld [vmem:[%s3760_s3 + $0x1e8] sm:$0xff]  ;;  %v1237_v62 = vld [vmem:[%s3760_s3 + $0x1d8] sm:$0xff] }
 0x10f   :  { %1322 = vmatprep.subr.mxu0 %v1205_v32  ;;  %1392 = vmatpush1.msra.mxu1 %v1270_v0  ;;  %v1305_v32 = vld [vmem:[%s3760_s3 + $0x3f8] sm:$0xff]  ;;  %v1236_v0 = vld [vmem:[%s3760_s3 + $0x1d0] sm:$0xff] }
 0x110   :  { %1323 = vmatpush1.msra.mxu0 %v1204_v63  ;;  %1393 = vmatprep.subr.mxu1 %v1269_v3  ;;  %v1303_v63 = vld [vmem:[%s3760_s3 + $0x3e8] sm:$0xff] }
 0x111   :  { %1324 = vmatprep.subr.mxu0 %v1203_v1  ;;  %1394 = vmatpush1.msra.mxu1 %v1268_v5  ;;  %v1302_v1 = vld [vmem:[%s3760_s3 + $0x3e0] sm:$0xff]  ;;  %v1235_v3 = vld [vmem:[%s3760_s3 + $0x1c8] sm:$0xff] }
 0x112   :  { %1325 = vmatpush1.msra.mxu0 %v1202_v4  ;;  %1395 = vmatprep.subr.mxu1 %v1267_v8  ;;  %v1301_v4 = vld [vmem:[%s3760_s3 + $0x3d8] sm:$0xff]  ;;  %v1234_v5 = vld [vmem:[%s3760_s3 + $0x1c0] sm:$0xff] }
 0x113   :  { %1326 = vmatprep.subr.mxu0 %v1201_v6  ;;  %1396 = vmatpush1.msra.mxu1 %v1266_v10  ;;  %v1300_v6 = vld [vmem:[%s3760_s3 + $0x3d0] sm:$0xff]  ;;  %v1233_v8 = vld [vmem:[%s3760_s3 + $0x1b8] sm:$0xff] }
 0x114   :  { %1327 = vmatpush1.msra.mxu0 %v1200_v9  ;;  %1397 = vmatprep.subr.mxu1 %v1265_v13  ;;  %v1299_v9 = vld [vmem:[%s3760_s3 + $0x3c8] sm:$0xff]  ;;  %v1232_v10 = vld [vmem:[%s3760_s3 + $0x1b0] sm:$0xff] }
 0x115   :  { %1328 = vmatprep.subr.mxu0 %v1199_v11  ;;  %1398 = vmatpush1.msra.mxu1 %v1264_v16  ;;  %v1298_v11 = vld [vmem:[%s3760_s3 + $0x3c0] sm:$0xff]  ;;  %v1231_v13 = vld [vmem:[%s3760_s3 + $0x1a8] sm:$0xff] }
 0x116   :  { %1329 = vmatpush1.msra.mxu0 %v1198_v14  ;;  %1399 = vmatprep.subr.mxu1 %v1263_v18  ;;  %v1297_v14 = vld [vmem:[%s3760_s3 + $0x3b8] sm:$0xff]  ;;  %v1230_v16 = vld [vmem:[%s3760_s3 + $0x1a0] sm:$0xff] }
 0x117   :  { %1330 = vmatprep.subr.mxu0 %v1197_v17  ;;  %1400 = vmatpush1.msra.mxu1 %v1262_v20  ;;  %v1296_v17 = vld [vmem:[%s3760_s3 + $0x3b0] sm:$0xff]  ;;  %v1229_v18 = vld [vmem:[%s3760_s3 + $0x198] sm:$0xff] }
 0x118   :  { %1331 = vmatpush1.msra.mxu0 %v1196_v19  ;;  %1401 = vmatprep.subr.mxu1 %v1261_v23  ;;  %v1295_v19 = vld [vmem:[%s3760_s3 + $0x3a8] sm:$0xff]  ;;  %v1228_v20 = vld [vmem:[%s3760_s3 + $0x190] sm:$0xff] }
 0x119   :  { %1332 = vmatprep.subr.mxu0 %v1195_v22  ;;  %1402 = vmatpush1.msra.mxu1 %v1260_v25  ;;  %v1294_v22 = vld [vmem:[%s3760_s3 + $0x3a0] sm:$0xff]  ;;  %v1227_v23 = vld [vmem:[%s3760_s3 + $0x188] sm:$0xff] }
 0x11a   :  { %1333 = vmatpush1.msra.mxu0 %v1194_v24  ;;  %1403 = vmatprep.subr.mxu1 %v1259_v27  ;;  %v1293_v24 = vld [vmem:[%s3760_s3 + $0x398] sm:$0xff]  ;;  %v1226_v25 = vld [vmem:[%s3760_s3 + $0x180] sm:$0xff]  ;;  %v544_v27 = vsub.s32 0, %v1903_v21 }
 0x11b   :  { %1334 = vmatprep.subr.mxu0 %v1193_v26  ;;  %1404 = vmatpush1.msra.mxu1 %v1258_v30  ;;  %v1292_v26 = vld [vmem:[%s3760_s3 + $0x390] sm:$0xff]  ;;  %v1291_v30 = vld [vmem:[%s3760_s3 + $0x388] sm:$0xff] }
 0x11c   :  { %1335 = vmatpush1.msra.mxu0 %v1192_v28  ;;  %1405 = vmatprep.subr.mxu1 %v1257_v33  ;;  %v1225_v28 = vld [vmem:[%s3760_s3 + $0x178] sm:$0xff]  ;;  %v1224_v33 = vld [vmem:[%s3760_s3 + $0x170] sm:$0xff] }
 0x11d   :  { %1336 = vmatprep.subr.mxu0 %v1191_v31  ;;  %1406 = vmatpush1.msra.mxu1 %v1256_v35  ;;  %v3540_v31 = vld [vmem:[%s3761_s2] sm:$0xf]  ;;  %v548_v35 = vsub.s32 1, %v1903_v21 }
 0x11e   :  { %1337 = vmatpush1.msra.mxu0 %v1190_v34  ;;  %1407 = vmatprep.subr.mxu1 %v1255_v37  ;;  %v1290_v34 = vld [vmem:[%s3760_s3 + $0x380] sm:$0xff]  ;;  %v1289_v37 = vld [vmem:[%s3760_s3 + $0x378] sm:$0xff] }
 0x11f   :  { %1338 = vmatprep.subr.mxu0 %v1189_v36  ;;  %1408 = vmatpush1.msra.mxu1 %v1254_v40  ;;  %v1223_v36 = vld [vmem:[%s3760_s3 + $0x168] sm:$0xff]  ;;  %v1222_v40 = vld [vmem:[%s3760_s3 + $0x160] sm:$0xff] }
 0x120   :  { %1339 = vmatpush1.msra.mxu0 %v1188_v39  ;;  %1409 = vmatprep.subr.mxu1 %v1253_v43  ;;  %v672_v39 = vpop.f32.mrf.mxu0  ;;  %v545_v43 = vrot.slane %v3540_v31, %v544_v27 }
 0x121   :  { %1340 = vmatprep.subr.mxu0 %v1187_v42  ;;  %1410 = vmatpush1.msra.mxu1 %v1252_v45  ;;  %v1288_v42 = vld [vmem:[%s3760_s3 + $0x370] sm:$0xff]  ;;  %v1287_v45 = vld [vmem:[%s3760_s3 + $0x368] sm:$0xff] }
 0x122   :  { %1341 = vmatpush1.msra.mxu0 %v1186_v44  ;;  %1411 = vmatprep.subr.mxu1 %v1251_v47  ;;  %v1221_v44 = vld [vmem:[%s3760_s3 + $0x158] sm:$0xff]  ;;  %v1286_v47 = vld [vmem:[%s3760_s3 + $0x360] sm:$0xff] }
 0x123   :  { %1342 = vmatprep.subr.mxu0 %v1185_v46  ;;  %1412 = vmatpush1.msra.mxu1 %v1250_v49  ;;  %v1220_v46 = vld [vmem:[%s3760_s3 + $0x150] sm:$0xff]  ;;  %v1219_v49 = vld [vmem:[%s3760_s3 + $0x148] sm:$0xff] }
 0x124   :  { %1343 = vmatpush1.msra.mxu0 %v1184_v48  ;;  %1413 = vmatprep.subr.mxu1 %v1249_v51  ;;  %v549_v48 = vrot.slane %v3540_v31, %v548_v35  ;;  %v743_v51 = vpop.f32.mrf.mxu1 }
 0x125   :  { %1344 = vmatprep.subr.mxu0 %v1183_v50  ;;  %1414 = vmatpush1.msra.mxu1 %v1248_v53  ;;  %v1285_v50 = vld [vmem:[%s3760_s3 + $0x358] sm:$0xff]  ;;  %v1218_v53 = vld [vmem:[%s3760_s3 + $0x140] sm:$0xff] }
 0x126   :  { %1345 = vmatpush1.msra.mxu0 %v1182_v52  ;;  %1415 = vmatprep.subr.mxu1 %v1247_v55  ;;  %v674_v52 = vpop.f32.mrf.mxu0  ;;  %v673_v55 = vadd.f32 %v672_v39, %v545_v43  ;;  %v1487_v39 = vld [vmem:[%s3762_s5 + $0xc8] sm:$0xff]  ;;  %v1470_v43 = vld [vmem:[%s3762_s5 + $0x40] sm:$0xff] }
 0x127   :  { %1346 = vmatprep.subr.mxu0 %v1181_v54  ;;  %1416 = vmatpush1.msra.mxu1 %v1246_v12  ;;  %v1284_v54 = vld [vmem:[%s3760_s3 + $0x350] sm:$0xff] }
 0x128   :  { %1347 = vmatpush1.msra.mxu0 %v1180_v56  ;;  %1417 = vmatprep.subr.mxu1 %v1245_v2  ;;  %v1217_v56 = vld [vmem:[%s3760_s3 + $0x138] sm:$0xff]  ;;  %v1216_v12 = vld [vmem:[%s3760_s3 + $0x130] sm:$0xff]  ;;  %v1215_v2 = vld [vmem:[%s3760_s3 + $0x128] sm:$0xff] }
 0x129   :  { %1348 = vmatprep.subr.mxu0 %v1179_v57  ;;  %1418 = vmatpush1.msra.mxu1 %v1244_v58  ;;  %v675_v57 = vadd.f32 %v674_v52, %v549_v48  ;;  %v1214_v58 = vld [vmem:[%s3760_s3 + $0x120] sm:$0xff]  ;;  %v1483_v48 = vld [vmem:[%s3762_s5 + $0xa8] sm:$0xff]  ;;  %v552_v52 = vsub.s32 2, %v1903_v21 }
 0x12a   :  { %1349 = vmatpush1.msra.mxu0 %v1178_v15  ;;  %1419 = vmatprep.subr.mxu1 %v1243_v7  ;;  %v745_v15 = vpop.f32.mrf.mxu1  ;;  %v1213_v7 = vld [vmem:[%s3760_s3 + $0x118] sm:$0xff] }
 0x12b   :  { %1350 = vmatprep.subr.mxu0 %v1241_v59  ;;  %1420 = vmatpush1.msra.mxu1 %v1242_v61  ;;  %v744_v59 = vadd.f32 %v743_v51, %v673_v55  ;;  %v1212_v61 = vld [vmem:[%s3760_s3 + $0x110] sm:$0xff]  ;;  %v1466_v51 = vld [vmem:[%s3762_s5 + $0x20] sm:$0xff]  ;;  %v553_v55 = vrot.slane %v3540_v31, %v552_v52 }
 0x12c   :  { %1351 = vmatpush2.msra.mxu0 %v1240_v60  ;;  %1421 = vmatprep.subr.mxu1 %v1305_v32 }
 0x12d   :  { %1352 = vmatprep.subr.mxu0 %v1239_v29  ;;  %1422 = vmatpush2.msra.mxu1 %v1304_v41  ;;  %v746_v29 = vadd.f32 %v745_v15, %v675_v57 }
 0x12e   :  { %1353 = vmatpush2.msra.mxu0 %v1238_v38  ;;  %1423 = vmatprep.subr.mxu1 %v1303_v63  ;;  %v1211_v38 = vld [vmem:[%s3760_s3 + $0x108] sm:$0xff]  ;;  %v1210_v63 = vld [vmem:[%s3760_s3 + $0x100] sm:$0xff] }
 0x12f   :  { %1354 = vmatprep.subr.mxu0 %v1237_v62  ;;  %1424 = vmatpush2.msra.mxu1 %v1302_v1 }
 0x130   :  { %1355 = vmatpush2.msra.mxu0 %v1236_v0  ;;  %1425 = vmatprep.subr.mxu1 %v1301_v4  ;;  %v1283_v4 = vld [vmem:[%s3760_s3 + $0x348] sm:$0xff] }
 0x131   :  { %1356 = vmatprep.subr.mxu0 %v1235_v3  ;;  %1426 = vmatpush2.msra.mxu1 %v1300_v6  ;;  %v1282_v6 = vld [vmem:[%s3760_s3 + $0x340] sm:$0xff] }
 0x132   :  { %1357 = vmatpush2.msra.mxu0 %v1234_v5  ;;  %1427 = vmatprep.subr.mxu1 %v1299_v9 }
 0x133   :  { %1358 = vmatprep.subr.mxu0 %v1233_v8  ;;  %1428 = vmatpush2.msra.mxu1 %v1298_v11  ;;  %v1281_v8 = vld [vmem:[%s3760_s3 + $0x338] sm:$0xff] }
 0x134   :  { %1359 = vmatpush2.msra.mxu0 %v1232_v10  ;;  %1429 = vmatprep.subr.mxu1 %v1297_v14  ;;  %v1280_v10 = vld [vmem:[%s3760_s3 + $0x330] sm:$0xff]  ;;  %v1278_v14 = vld [vmem:[%s3760_s3 + $0x320] sm:$0xff] }
 0x135   :  { %1360 = vmatprep.subr.mxu0 %v1231_v13  ;;  %1430 = vmatpush2.msra.mxu1 %v1296_v17  ;;  %v1279_v13 = vld [vmem:[%s3760_s3 + $0x328] sm:$0xff]  ;;  %v1276_v17 = vld [vmem:[%s3760_s3 + $0x310] sm:$0xff] }
 0x136   :  { %1361 = vmatpush2.msra.mxu0 %v1230_v16  ;;  %1431 = vmatprep.subr.mxu1 %v1295_v19  ;;  %v1277_v16 = vld [vmem:[%s3760_s3 + $0x318] sm:$0xff]  ;;  %v1274_v19 = vld [vmem:[%s3760_s3 + $0x300] sm:$0xff] }
 0x137   :  { %1362 = vmatprep.subr.mxu0 %v1229_v18  ;;  %1432 = vmatpush2.msra.mxu1 %v1294_v22  ;;  %v1275_v18 = vld [vmem:[%s3760_s3 + $0x308] sm:$0xff]  ;;  %v1477_v22 = vld [vmem:[%s3762_s5 + $0x78] sm:$0xff] }
 0x138   :  { %1363 = vmatpush2.msra.mxu0 %v1228_v20  ;;  %1433 = vmatprep.subr.mxu1 %v1293_v24  ;;  %v1493_v20 = vld [vmem:[%s3762_s5 + $0xf8] sm:$0xff]  ;;  %v1476_v24 = vld [vmem:[%s3762_s5 + $0x70] sm:$0xff] }
 0x139   :  { %1364 = vmatprep.subr.mxu0 %v1227_v23  ;;  %1434 = vmatpush2.msra.mxu1 %v1292_v26  ;;  %v1492_v23 = vld [vmem:[%s3762_s5 + $0xf0] sm:$0xff]  ;;  %v1475_v26 = vld [vmem:[%s3762_s5 + $0x68] sm:$0xff] }
 0x13a   :  { %1365 = vmatpush2.msra.mxu0 %v1226_v25  ;;  %1435 = vmatprep.subr.mxu1 %v1291_v30  ;;  %v1491_v25 = vld [vmem:[%s3762_s5 + $0xe8] sm:$0xff]  ;;  %v1474_v30 = vld [vmem:[%s3762_s5 + $0x60] sm:$0xff] }
 0x13b   :  { %1366 = vmatprep.subr.mxu0 %v1225_v28  ;;  %1436 = vmatpush2.msra.mxu1 %v1290_v34  ;;  %v1490_v28 = vld [vmem:[%s3762_s5 + $0xe0] sm:$0xff]  ;;  %v1473_v34 = vld [vmem:[%s3762_s5 + $0x58] sm:$0xff] }
 0x13c   :  { %1367 = vmatpush2.msra.mxu0 %v1224_v33  ;;  %1437 = vmatprep.subr.mxu1 %v1289_v37  ;;  %v1489_v33 = vld [vmem:[%s3762_s5 + $0xd8] sm:$0xff]  ;;  %v1472_v37 = vld [vmem:[%s3762_s5 + $0x50] sm:$0xff] }
 0x13d   :  { %1368 = vmatprep.subr.mxu0 %v1223_v36  ;;  %1438 = vmatpush2.msra.mxu1 %v1288_v42  ;;  %v1488_v36 = vld [vmem:[%s3762_s5 + $0xd0] sm:$0xff]  ;;  %v1486_v42 = vld [vmem:[%s3762_s5 + $0xc0] sm:$0xff] }
 0x13e   :  { %1369 = vmatpush2.msra.mxu0 %v1222_v40  ;;  %1439 = vmatprep.subr.mxu1 %v1287_v45  ;;  %v1471_v40 = vld [vmem:[%s3762_s5 + $0x48] sm:$0xff]  ;;  %v1469_v45 = vld [vmem:[%s3762_s5 + $0x38] sm:$0xff] }
 0x13f   :  { %1370 = vmatprep.subr.mxu0 %v1221_v44  ;;  %1440 = vmatpush2.msra.mxu1 %v1286_v47  ;;  %v1485_v44 = vld [vmem:[%s3762_s5 + $0xb8] sm:$0xff]  ;;  %v1468_v47 = vld [vmem:[%s3762_s5 + $0x30] sm:$0xff] }
 0x140   :  { %1371 = vmatpush2.msra.mxu0 %v1220_v46  ;;  %1441 = vmatprep.subr.mxu1 %v1285_v50  ;;  %v1484_v46 = vld [vmem:[%s3762_s5 + $0xb0] sm:$0xff]  ;;  %v1482_v50 = vld [vmem:[%s3762_s5 + $0xa0] sm:$0xff] }
 0x141   :  { %1372 = vmatprep.subr.mxu0 %v1219_v49  ;;  %1442 = vmatpush2.msra.mxu1 %v1284_v54  ;;  %v1467_v49 = vld [vmem:[%s3762_s5 + $0x28] sm:$0xff] }
 0x142   :  { %1373 = vmatpush2.msra.mxu0 %v1218_v53  ;;  %1443 = vmatprep.subr.mxu1 %v1283_v4  ;;  %v556_v53 = vsub.s32 3, %v1903_v21  ;;  %v1480_v4 = vld [vmem:[%s3762_s5 + $0x90] sm:$0xff] }
 0x143   :  { %1374 = vmatprep.subr.mxu0 %v1217_v56  ;;  %1444 = vmatpush2.msra.mxu1 %v1282_v6  ;;  %v1479_v6 = vld [vmem:[%s3762_s5 + $0x88] sm:$0xff] }
 0x144   :  { %1375 = vmatpush2.msra.mxu0 %v1216_v12  ;;  %1445 = vmatprep.subr.mxu1 %v1281_v8  ;;  %v557_v56 = vrot.slane %v3540_v31, %v556_v53  ;;  %v1481_v31 = vld [vmem:[%s3762_s5 + $0x98] sm:$0xff]  ;;  %v1463_v8 = vld [vmem:[%s3762_s5 + $0x8] sm:$0xff] }
 0x145   :  { %1376 = vmatprep.subr.mxu0 %v1215_v2  ;;  %1446 = vmatpush2.msra.mxu1 %v1280_v10  ;;  %v1462_v10 = vld [vmem:[%s3762_s5] sm:$0xff] }
 0x146   :  { %v814_v60 = vpop.f32.mrf.mxu0  ;;  %1377 = vmatpush2.msra.mxu0 %v1214_v58  ;;  %1447 = vmatprep.subr.mxu1 %v1279_v13 }
 0x147   :  { %v815_v32 = vadd.f32 %v814_v60, %v744_v59  ;;  %1378 = vmatprep.subr.mxu0 %v1213_v7  ;;  %1448 = vmatpush2.msra.mxu1 %v1278_v14 }
 0x148   :  { %v885_v41 = vpop.f32.mrf.mxu1  ;;  %v816_v62 = vpop.f32.mrf.mxu0  ;;  %1379 = vmatpush2.msra.mxu0 %v1212_v61  ;;  %1449 = vmatprep.subr.mxu1 %v1277_v16 }
 0x149   :  { %v817_v0 = vadd.f32 %v816_v62, %v746_v29  ;;  %v886_v1 = vadd.f32 %v885_v41, %v815_v32  ;;  %1380 = vmatprep.subr.mxu0 %v1211_v38  ;;  %1450 = vmatpush2.msra.mxu1 %v1276_v17 }
 0x14a   :  { %v887_v3 = vpop.f32.mrf.mxu1  ;;  %1381 = vmatpush2.msra.mxu0 %v1210_v63  ;;  %1451 = vmatprep.subr.mxu1 %v1275_v18 }
 0x14b   :  { %v888_v5 = vadd.f32 %v887_v3, %v817_v0  ;;  %v1174_v11 = vmax.f32 %v886_v1, 0.0  ;;  %1452 = vmatpush2.msra.mxu1 %v1274_v19  ;;  %1578 = vmatprep.subr.mxu0 %v1493_v20  ;;  %v1465_v3 = vld [vmem:[%s3762_s5 + $0x18] sm:$0xff] }
 0x14d   :  { %v1175_v9 = vmax.f32 %v888_v5, 0.0  ;;  %v1464_v5 = vld [vmem:[%s3762_s5 + $0x10] sm:$0xff] }
 0x14f   :  { %1382 = vmatprep.mubr.f32.mxu0 %v1175_v9  ;;  %v1478_v9 = vld [vmem:[%s3762_s5 + $0x80] sm:$0xff] }
 0x150   :  { %1383 = vmatmul.mubr.f32.vlgmr.msra.gmra.mxu0 %v1174_v11  ;;  %v1306_v11 = vld [vmem:[%s3763_s4] sm:$0x3] }
 0x151   :  { %1579 = vmatpush3.msra.mxu0 %v1477_v22  ;;  %v1311_v14 = vrot.slane %v1306_v11, %v544_v27  ;;  %v1315_v16 = vrot.slane %v1306_v11, %v548_v35 }
 0x152   :  { %1580 = vmatprep.subr.mxu0 %v1492_v23 }
 0x153   :  { %1581 = vmatpush3.msra.mxu0 %v1476_v24 }
 0x154   :  { %1582 = vmatprep.subr.mxu0 %v1491_v25 }
 0x155   :  { %1583 = vmatpush3.msra.mxu0 %v1475_v26 }
 0x156   :  { %1584 = vmatprep.subr.mxu0 %v1490_v28 }
 0x157   :  { %1585 = vmatpush3.msra.mxu0 %v1474_v30  ;;  %v1577_v30 = vld [vmem:[%s3764_s6] ss:$0 sm:$0xff] }
 0x158   :  { %1586 = vmatprep.subr.mxu0 %v1489_v33 }
 0x159   :  { %1587 = vmatpush3.msra.mxu0 %v1473_v34 }
 0x15a   :  { %1588 = vmatprep.subr.mxu0 %v1488_v36 }
 0x15b   :  { %1589 = vmatpush3.msra.mxu0 %v1472_v37 }
 0x15c   :  { %1590 = vmatprep.subr.mxu0 %v1487_v39 }
 0x15d   :  { %1591 = vmatpush3.msra.mxu0 %v1471_v40 }
 0x15e   :  { %1592 = vmatprep.subr.mxu0 %v1486_v42 }
 0x15f   :  { %1593 = vmatpush3.msra.mxu0 %v1470_v43 }
 0x160   :  { %1594 = vmatprep.subr.mxu0 %v1485_v44 }
 0x161   :  { %1595 = vmatpush3.msra.mxu0 %v1469_v45 }
 0x162   :  { %1596 = vmatprep.subr.mxu0 %v1484_v46 }
 0x163   :  { %1597 = vmatpush3.msra.mxu0 %v1468_v47 }
 0x164   :  { %1598 = vmatprep.subr.mxu0 %v1483_v48 }
 0x165   :  { %1599 = vmatpush3.msra.mxu0 %v1467_v49 }
 0x166   :  { %1600 = vmatprep.subr.mxu0 %v1482_v50 }
 0x167   :  { %1601 = vmatpush3.msra.mxu0 %v1466_v51 }
 0x168   :  { %1602 = vmatprep.subr.mxu0 %v1481_v31 }
 0x169   :  { %1603 = vmatpush3.msra.mxu0 %v1465_v3 }
 0x16a   :  { %1604 = vmatprep.subr.mxu0 %v1480_v4 }
 0x16b   :  { %1605 = vmatpush3.msra.mxu0 %v1464_v5 }
 0x16c   :  { %1606 = vmatprep.subr.mxu0 %v1479_v6 }
 0x16d   :  { %1607 = vmatpush3.msra.mxu0 %v1463_v8 }
 0x16e   :  { %1608 = vmatprep.subr.mxu0 %v1478_v9 }
 0x16f   :  { %1609 = vmatpush3.msra.mxu0 %v1462_v10 }
 0x188   :  { %v956_v54 = vpop.f32.mrf.mxu0 }
 0x189   :  { %v957_v2 = vadd.f32 %v956_v54, %v553_v55 }
 0x18a   :  { %v1027_v12 = vpop.f32.mrf.mxu1  ;;  %v958_v57 = vpop.f32.mrf.mxu0 }
 0x18b   :  { %v959_v15 = vadd.f32 %v958_v57, %v557_v56  ;;  %v1028_v59 = vadd.f32 %v1027_v12, %v957_v2 }
 0x18c   :  { %v1029_v58 = vpop.f32.mrf.mxu1 }
 0x18d   :  { %v1030_v61 = vadd.f32 %v1029_v58, %v959_v15 }
 0x1ca   :  { %v1098_v7 = vpop.f32.mrf.mxu0 }
 0x1cb   :  { %v1169_v60 = vpop.f32.mrf.mxu1  ;;  %v1099_v29 = vadd.f32 %v1098_v7, %v1028_v59 }
 0x1cc   :  { %v1100_v32 = vpop.f32.mrf.mxu0 }
 0x1cd   :  { %v1101_v38 = vadd.f32 %v1100_v32, %v1030_v61  ;;  %v1170_v41 = vadd.f32 %v1169_v60, %v1099_v29  ;;  %v1171_v62 = vpop.f32.mrf.mxu1 }
 0x1cf   :  { %v1172_v63 = vadd.f32 %v1171_v62, %v1101_v38  ;;  %v1176_v1 = vmax.f32 %v1170_v41, 0.0 }
 0x1d1   :  { %v1177_v0 = vmax.f32 %v1172_v63, 0.0 }
 0x1d3   :  { %1453 = vmatprep.mubr.f32.mxu1 %v1177_v0 }
 0x1d4   :  { %1454 = vmatmul.mubr.f32.vlgmr.msra.gmra.mxu1 %v1176_v1 }
 0x210   :  { %v1384_v13 = vpop.f32.mrf.mxu0 }
 0x211   :  { %v1385_v18 = vadd.f32 %v1384_v13, %v1311_v14 }
 0x212   :  { %v1386_v17 = vpop.f32.mrf.mxu0 }
 0x213   :  { %v1387_v20 = vadd.f32 %v1386_v17, %v1315_v16 }
 0x294   :  { %v1455_v19 = vpop.f32.mrf.mxu1 }
 0x295   :  { %v1456_v22 = vadd.f32 %v1455_v19, %v1385_v18 }
 0x296   :  { %v1457_v23 = vpop.f32.mrf.mxu1 }
 0x297   :  { %v1458_v24 = vadd.f32 %v1457_v23, %v1387_v20  ;;  %v1460_v26 = vmax.f32 %v1456_v22, 0.0 }
 0x299   :  { %v1461_v25 = vmax.f32 %v1458_v24, 0.0 }
 0x29b   :  { %1565 = vmatprep.mubr.f32.mxu0 %v1461_v25 }
 0x29c   :  { %1566 = vmatmul.mubr.f32.vlgmr.msra.gmra.mxu0 %v1460_v26 }
 0x35c   :  { %v1610_v28 = vpop.f32.mrf.mxu0 }
 0x35e   :  { %v1611_v27 = vpop.f32.mrf.mxu0 }
 0x35f   :  { %v1612_v33 = vadd.f32 %v1611_v27, %v1610_v28 }
 0x361   :  { %v1568_v21 = vadd.f32 %v1612_v33, %v1577_v30 }
 0x363   :  { %1572 = vst.msk [vmem:[%s3765_s7] sm:$0x3] %vm1571_vm0, %v1568_v21 }

// kernel: pointnet_encoder_forward.3
= control target key start
LH: loop header
LB: loop body
LE: loop exit
PB: predicated region body
PF: predicated region fallthrough
CT: control target
= control target key end

     0   :  { %12 = vsyncpa [#allocation4], 0  ;;  %s4482_s24 = smov 0   ;;  %s4484_s25 = smov 0   ;;  %s6109_s0 = inlined_call_operand.vmem [shape: f32[2,3,128], index: 0, kind: input, shape index: {}]   ;;  %s6110_s1 = inlined_call_operand.vmem [shape: f32[64,3], index: 1, kind: input, shape index: {}]   ;;  %s6111_s2 = inlined_call_operand.vmem [shape: f32[64,1], index: 2, kind: input, shape index: {}]   ;;  %s6112_s3 = inlined_call_operand.vmem [shape: f32[128,64], index: 3, kind: input, shape index: {}]   ;;  %s6113_s4 = inlined_call_operand.vmem [shape: f32[128,1], index: 4, kind: input, shape index: {}]   ;;  %s6114_s5 = inlined_call_operand.hbm [shape: f32[1024,128], index: 5, kind: input, shape index: {}]   ;;  %s6115_s6 = inlined_call_operand.vmem [shape: f32[1024,1], index: 6, kind: input, shape index: {}]   ;;  %s6116_s7 = inlined_call_operand.vmem [shape: f32[2,1024,1], index: 7, kind: output, shape index: {}]  }
   0x1   :  { %s4486_s26 = smov 0  }
   0x2 LB: > { %s3840_s27 = sadd.s32 4294967295, %s4433_s26   ;;  %s30_s28 = sadd.s32 1, %s4429_s25  ;;  %s4433_s26 = sphi %s4486_s26, %s18_s26   ;;  %s4429_s25 = sphi %s4484_s25, %s6196_s25   ;;  %s4425_s24 = sphi %s4482_s24, %s6195_s24  }
   0x3   : > { %p32_p0 = scmp.ge.s32.totalorder %s30_s28, 2  ;;  %p3842_p1 = scmp.ge.s32.totalorder %s4433_s26, 1 }
   0x4   : > { %p215_p2 = scmp.lt.s32.totalorder %s4433_s26, 3  ;;  %p4507_p4 = scmp.eq.s32.totalorder %s3840_s27, 0 }
   0x5   : > { %s6198_s28 = smov (%p32_p0, %s30_s28), 0  ;;  %s4435_s8 = smov [#allocation3]  }
   0x6   : > { %p4503_p3 = pnand %p3842_p1, %p215_p2  ;;  %s239_s9 = sshll.u32 %s4435_s8, 4  ;;  %s240_s9 = int_to_ptr.vmem [resolvable:$true] %s239_s9 }
   0x7   : > { %s4392_s10 = scalar_lea.vmem %s240_s9, 16384  ;;  %p4400_p11 = scmp.lt.s32.totalorder %s240_s9, %s240_s9 }
   0x8   : > { %p4337_p5 = pneg %p4503_p3  ;;  %p4393_p8 = scmp.ne.s32.totalorder %s240_s9, %s4392_s10 }
   0x9   : > { %p4401_p12 = scmp.lt.s32.totalorder %s4392_s10, %s4392_s10 }
   0xa   : > { %p4338_p6 = pnand %p4507_p4, %p4337_p5 }
   0xb   : > { %p4402_p13 = por %p4401_p12, %p4400_p11 }
   0xc   : > { %p4383_p7 = pneg %p4338_p6 }
   0xe   : > { %p4395_p9 = pnand %p4393_p8, %p4383_p7 }
  0x10   : > { %p4396_p10 = pneg %p4395_p9 }
  0x12   : > { %p4403_p0 = pnand %p4402_p13, %p4396_p10 }
  0x14   : > { %4406 = shalt.err (!%p4403_p0)
}
  0x15   : > { %s4436_s11 = smov 128   ;;  %s4437_s12 = smov 8  }
  0x16   : > { %4340 = dma.hbm_to_vmem [thread:$0]  (!%p4338_p6), %s6114_s5, 16384, %s240_s9, [#allocation4], %s4436_s11, %s4436_s11, %s4437_s12  }
  0x17   : > { %268 = sbr.rel (%p4503_p3) target bundleno = 1087 (0x43f), region = 48 }
  0x1c   : > { %4420 = dma.done.wait (%p4507_p4), [#allocation4], 16384  }
  0x1d   : > { %4422 = vsyncadd (%p4507_p4), [#allocation4], 4294950912  ;;  %v4438_v0 = vmov 1   ;;  %v4439_v1 = vmov 0   ;;  %v449_v2 = vld [vmem:[%s6110_s1 + $0x10] sm:$0xff]  ;;  %v447_v3 = vld [vmem:[%s6110_s1] sm:$0xff] }
  0x1e   : > { %4375 = vset.pattern.permute.xlu0 %v4438_v0  ;;  %4374 = vset.pattern.permute.xlu1 %v4439_v1  ;;  %v450_v4 = vld [vmem:[%s6110_s1 + $0x18] sm:$0xff]  ;;  %v452_v5 = vld [vmem:[%s6110_s1 + $0x28] sm:$0xff]  ;;  %v4440_v8 = vmov 2   ;;  %v451_v9 = vld [vmem:[%s6110_s1 + $0x20] sm:$0xff]  ;;  %vm787_vm0 = vcmask 523264   ;;  %p302_p1 = scmp.lt.s32.totalorder %s4425_s24, 1 }
  0x1f   : > { %467 = vperm.xlu1 %4374, %v449_v2   ;;  %508 = vperm.xlu0 %4375, %v447_v3   ;;  %v454_v6 = vld [vmem:[%s6110_s1 + $0x38] sm:$0xff]  ;;  %v448_v7 = vld [vmem:[%s6110_s1 + $0x8] sm:$0xff]  ;;  %v453_v10 = vld [vmem:[%s6110_s1 + $0x30] sm:$0xff]  ;;  %vm3632_vm2 = vcmask 7168  }
  0x20   : > { %v611_v11 = vld [vmem:[%s6111_s2] sm:$0xff]  ;;  %v614_v12 = vld [vmem:[%s6111_s2 + $0x18] sm:$0xff]  ;;  %v616_v13 = vld [vmem:[%s6111_s2 + $0x28] sm:$0xff]  ;;  %s6200_s24 = smov (!%p302_p1, %s4425_s24), 1 }
  0x21   : > { %v612_v14 = vld [vmem:[%s6111_s2 + $0x8] sm:$0xff]  ;;  %v618_v15 = vld [vmem:[%s6111_s2 + $0x38] sm:$0xff]  ;;  %v613_v16 = vld [vmem:[%s6111_s2 + $0x10] sm:$0xff]  ;;  %s3847_s16 = sshll.u32 %s6200_s24, 2  ;;  %s3868_s10 = sshll.u32 %s6200_s24, 10 }
  0x22   : > { %v692_v17 = vld [vmem:[%s6113_s4 + $0x8] sm:$0xff]  ;;  %v615_v18 = vld [vmem:[%s6111_s2 + $0x20] sm:$0xff]  ;;  %v694_v19 = vld [vmem:[%s6113_s4 + $0x18] sm:$0xff]  ;;  %s308_s23 = scalar_lea.vmem %s6109_s0, %s3847_s16  ;;  %s5669_s13 = scalar_lea.vmem %s6116_s7, %s3868_s10 }
  0x23   : > { %472 = vperm.xlu1 %4374, %v450_v4   ;;  %520 = vperm.xlu0 %4375, %v450_v4   ;;  %v617_v20 = vld [vmem:[%s6111_s2 + $0x30] sm:$0xff]  ;;  %v696_v21 = vld [vmem:[%s6113_s4 + $0x28] sm:$0xff]  ;;  %v691_v22 = vld [vmem:[%s6113_s4] sm:$0xff] }
  0x24   : > { %v698_v23 = vld [vmem:[%s6113_s4 + $0x38] sm:$0xff]  ;;  %v693_v24 = vld [vmem:[%s6113_s4 + $0x10] sm:$0xff]  ;;  %v700_v25 = vld [vmem:[%s6113_s4 + $0x48] sm:$0xff] }
  0x25   : > { %v695_v26 = vld [vmem:[%s6113_s4 + $0x20] sm:$0xff]  ;;  %v702_v27 = vld [vmem:[%s6113_s4 + $0x58] sm:$0xff]  ;;  %v697_v29 = vld [vmem:[%s6113_s4 + $0x30] sm:$0xff] }
  0x26   : > { %v675_v28 = vld [vmem:[%s6112_s3] sm:$0xff]  ;;  %v704_v30 = vld [vmem:[%s6113_s4 + $0x68] sm:$0xff]  ;;  %v706_v32 = vld [vmem:[%s6113_s4 + $0x78] sm:$0xff] }
  0x27   : > { %482 = vperm.xlu1 %4374, %v452_v5   ;;  %528 = vperm.xlu0 %4375, %v452_v5   ;;  %v699_v31 = vld [vmem:[%s6113_s4 + $0x40] sm:$0xff]  ;;  %v701_v33 = vld [vmem:[%s6113_s4 + $0x50] sm:$0xff]  ;;  %v1126_v34 = vld [vmem:[%s6115_s6 + $0x8] sm:$0xff] }
  0x28   : > { %4053 = vmatprep.mubr.msk.f32.mxu0 %vm787_vm0, %v675_v28  ;;  %v703_v35 = vld [vmem:[%s6113_s4 + $0x60] sm:$0xff]  ;;  %v1128_v36 = vld [vmem:[%s6115_s6 + $0x18] sm:$0xff]  ;;  %v705_v37 = vld [vmem:[%s6113_s4 + $0x70] sm:$0xff] }
  0x29   : > { %v1130_v38 = vld [vmem:[%s6115_s6 + $0x28] sm:$0xff]  ;;  %v1125_v39 = vld [vmem:[%s6115_s6] sm:$0xff]  ;;  %v1132_v40 = vld [vmem:[%s6115_s6 + $0x38] sm:$0xff] }
  0x2a   : > { %v1127_v41 = vld [vmem:[%s6115_s6 + $0x10] sm:$0xff]  ;;  %v1134_v42 = vld [vmem:[%s6115_s6 + $0x48] sm:$0xff]  ;;  %v1129_v43 = vld [vmem:[%s6115_s6 + $0x20] sm:$0xff] }
  0x2b   : > { %492 = vperm.xlu1 %4374, %v454_v6   ;;  %536 = vperm.xlu0 %4375, %v454_v6   ;;  %v1136_v44 = vld [vmem:[%s6115_s6 + $0x58] sm:$0xff]  ;;  %v1131_v45 = vld [vmem:[%s6115_s6 + $0x30] sm:$0xff]  ;;  %v1138_v46 = vld [vmem:[%s6115_s6 + $0x68] sm:$0xff] }
  0x2c   : > { %v1133_v47 = vld [vmem:[%s6115_s6 + $0x40] sm:$0xff]  ;;  %v1140_v48 = vld [vmem:[%s6115_s6 + $0x78] sm:$0xff]  ;;  %v1135_v49 = vld [vmem:[%s6115_s6 + $0x50] sm:$0xff] }
  0x2d   : > { %v1142_v52 = vld [vmem:[%s6115_s6 + $0x88] sm:$0xff]  ;;  %v1137_v53 = vld [vmem:[%s6115_s6 + $0x60] sm:$0xff]  ;;  %v1144_v56 = vld [vmem:[%s6115_s6 + $0x98] sm:$0xff] }
  0x2e   : > { %v1139_v57 = vld [vmem:[%s6115_s6 + $0x70] sm:$0xff]  ;;  %v1146_v60 = vld [vmem:[%s6115_s6 + $0xa8] sm:$0xff]  ;;  %v1141_v61 = vld [vmem:[%s6115_s6 + $0x80] sm:$0xff] }
  0x2f   : > { %4376 = vset.pattern.permute.xlu1 %v4438_v0  ;;  %4378 = vset.pattern.permute.xlu0 %v4440_v8  ;;  %v1148_v0 = vld [vmem:[%s6115_s6 + $0xb8] sm:$0xff] }
  0x30   : > { %512 = vperm.xlu1 %4376, %v448_v7   ;;  %564 = vperm.xlu0 %4378, %v448_v7  }
  0x34   : > { %516 = vperm.xlu1 %4376, %v449_v2   ;;  %576 = vperm.xlu0 %4378, %v451_v9  }
  0x38   : > { %524 = vperm.xlu1 %4376, %v451_v9   ;;  %584 = vperm.xlu0 %4378, %v453_v10  }
  0x3c   : > { %532 = vperm.xlu1 %4376, %v453_v10   ;;  %4379 = vset.pattern.permute.xlu0 %v4439_v1 }
  0x3d   : > { %457 = vperm.xlu0 %4379, %v447_v3  }
  0x40   : > { %4377 = vset.pattern.permute.xlu1 %v4440_v8 }
  0x41   : > { %560 = vperm.xlu1 %4377, %v447_v3   ;;  %462 = vperm.xlu0 %4379, %v448_v7  }
  0x45   : > { %568 = vperm.xlu1 %4377, %v449_v2   ;;  %477 = vperm.xlu0 %4379, %v451_v9   ;;  %v1150_v2 = vld [vmem:[%s6115_s6 + $0xc8] sm:$0xff]  ;;  %v1147_v9 = vld [vmem:[%s6115_s6 + $0xb0] sm:$0xff] }
  0x49   : > { %572 = vperm.xlu1 %4377, %v450_v4   ;;  %487 = vperm.xlu0 %4379, %v453_v10   ;;  %v1154_v10 = vld [vmem:[%s6115_s6 + $0xe8] sm:$0xff] }
  0x4d   : > { %580 = vperm.xlu1 %4377, %v452_v5   ;;  %621 = vperm.xlu0 %4379, %v611_v11   ;;  %v1145_v5 = vld [vmem:[%s6115_s6 + $0xa0] sm:$0xff] }
  0x51   : > { %588 = vperm.xlu1 %4377, %v454_v6   ;;  %636 = vperm.xlu0 %4379, %v614_v12   ;;  %v1152_v6 = vld [vmem:[%s6115_s6 + $0xd8] sm:$0xff] }
  0x55   : > { %4380 = vset.pattern.permute.xlu1 %v4439_v1  ;;  %646 = vperm.xlu0 %4379, %v616_v13   ;;  %v1143_v1 = vld [vmem:[%s6115_s6 + $0x90] sm:$0xff]  ;;  %v1149_v13 = vld [vmem:[%s6115_s6 + $0xc0] sm:$0xff] }
  0x56   : > { %626 = vperm.xlu1 %4380, %v612_v14   ;;  %v1156_v14 = vld [vmem:[%s6115_s6 + $0xf8] sm:$0xff] }
  0x59   : > { %656 = vperm.xlu0 %4379, %v618_v15  }
  0x5a   : > { %631 = vperm.xlu1 %4380, %v613_v16   ;;  %v1151_v16 = vld [vmem:[%s6115_s6 + $0xd0] sm:$0xff] }
  0x5d   : > { %714 = vperm.xlu0 %4379, %v692_v17  }
  0x5e   : > { %641 = vperm.xlu1 %4380, %v615_v18   ;;  %v1158_v18 = vld [vmem:[%s6115_s6 + $0x108] sm:$0xff] }
  0x61   : > { %724 = vperm.xlu0 %4379, %v694_v19   ;;  %v1153_v19 = vld [vmem:[%s6115_s6 + $0xe0] sm:$0xff] }
  0x62   : > { %651 = vperm.xlu1 %4380, %v617_v20  }
  0x65   : > { %734 = vperm.xlu0 %4379, %v696_v21  }
  0x66   : > { %709 = vperm.xlu1 %4380, %v691_v22   ;;  %v1160_v22 = vld [vmem:[%s6115_s6 + $0x118] sm:$0xff] }
  0x69   : > { %744 = vperm.xlu0 %4379, %v698_v23   ;;  %v6117_v23 = vlaneseq }
  0x6a   : > { %719 = vperm.xlu1 %4380, %v693_v24   ;;  %v1155_v24 = vld [vmem:[%s6115_s6 + $0xf0] sm:$0xff] }
  0x6b   : > { %v496_v28 = vshrl.u32 %v6117_v23, 7 }
  0x6d   : > { %754 = vperm.xlu0 %4379, %v700_v25  }
  0x6e   : > { %729 = vperm.xlu1 %4380, %v695_v26  }
  0x71   : > { %764 = vperm.xlu0 %4379, %v702_v27   ;;  %v1162_v27 = vld [vmem:[%s6115_s6 + $0x128] sm:$0xff] }
  0x72   : > { %739 = vperm.xlu1 %4380, %v697_v29   ;;  %v1157_v29 = vld [vmem:[%s6115_s6 + $0x100] sm:$0xff] }
  0x75   : > { %774 = vperm.xlu0 %4379, %v704_v30  }
  0x76   : > { %749 = vperm.xlu1 %4380, %v699_v31  }
  0x79   : > { %784 = vperm.xlu0 %4379, %v706_v32   ;;  %v1164_v32 = vld [vmem:[%s6115_s6 + $0x138] sm:$0xff] }
  0x7a   : > { %759 = vperm.xlu1 %4380, %v701_v33   ;;  %v497_v33 = vsub.s32 0, %v496_v28 }
  0x7d   : > { %1260 = vperm.xlu0 %4379, %v1126_v34   ;;  %v541_v34 = vsub.s32 1, %v496_v28 }
  0x7e   : > { %769 = vperm.xlu1 %4380, %v703_v35   ;;  %v1159_v35 = vld [vmem:[%s6115_s6 + $0x110] sm:$0xff] }
  0x81   : > { %1270 = vperm.xlu0 %4379, %v1128_v36   ;;  %v446_v36 = vld [vmem:[%s308_s23] sm:$0x7] }
  0x82   : > { %779 = vperm.xlu1 %4380, %v705_v37  }
  0x85   : > { %1280 = vperm.xlu0 %4379, %v1130_v38  }
  0x86   : > { %1255 = vperm.xlu1 %4380, %v1125_v39   ;;  %v593_v39 = vsub.s32 2, %v496_v28 }
  0x89   : > { %1290 = vperm.xlu0 %4379, %v1132_v40   ;;  %v1166_v40 = vld [vmem:[%s6115_s6 + $0x148] sm:$0xff] }
  0x8a   : > { %1265 = vperm.xlu1 %4380, %v1127_v41   ;;  %v4792_v41 = vrot.slane %v446_v36, %v497_v33 }
  0x8d   : > { %1300 = vperm.xlu0 %4379, %v1134_v42   ;;  %v4794_v42 = vrot.slane %v446_v36, %v541_v34 }
  0x8e   : > { %1275 = vperm.xlu1 %4380, %v1129_v43   ;;  %v1161_v43 = vld [vmem:[%s6115_s6 + $0x120] sm:$0xff] }
  0x91   : > { %1310 = vperm.xlu0 %4379, %v1136_v44  }
  0x92   : > { %1285 = vperm.xlu1 %4380, %v1131_v45  }
  0x95   : > { %1320 = vperm.xlu0 %4379, %v1138_v46  }
  0x96   : > { %1295 = vperm.xlu1 %4380, %v1133_v47  }
  0x99   : > { %1330 = vperm.xlu0 %4379, %v1140_v48   ;;  %v4805_v48 = vrot.slane %v446_v36, %v593_v39 }
  0x9a   : > { %v4666_v50 = vpop.permute.xlu1 %467  ;;  %1305 = vperm.xlu1 %4380, %v1135_v49   ;;  %v4668_v51 = vpop.permute.xlu0 %508  ;;  %v1168_v49 = vld [vmem:[%s6115_s6 + $0x158] sm:$0xff] }
  0x9b   : > { %v501_v34 = vmul.f32 %v4792_v41, %v4666_v50 }
  0x9d   : > { %1340 = vperm.xlu0 %4379, %v1142_v52  }
  0x9e   : > { %v4676_v54 = vpop.permute.xlu1 %472  ;;  %1315 = vperm.xlu1 %4380, %v1137_v53   ;;  %v4678_v55 = vpop.permute.xlu0 %520  ;;  %v1163_v53 = vld [vmem:[%s6115_s6 + $0x130] sm:$0xff] }
  0xa1   : > { %1350 = vperm.xlu0 %4379, %v1144_v56  }
  0xa2   : > { %v4686_v58 = vpop.permute.xlu1 %482  ;;  %1325 = vperm.xlu1 %4380, %v1139_v57   ;;  %v4688_v59 = vpop.permute.xlu0 %528 }
  0xa5   : > { %1360 = vperm.xlu0 %4379, %v1146_v60  }
  0xa6   : > { %v4696_v62 = vpop.permute.xlu1 %492  ;;  %1335 = vperm.xlu1 %4380, %v1141_v61   ;;  %v4698_v63 = vpop.permute.xlu0 %536  ;;  %v1170_v61 = vld [vmem:[%s6115_s6 + $0x168] sm:$0xff] }
  0xa7   : > { %v506_v46 = vmul.f32 %v4792_v41, %v4696_v62  ;;  %v550_v47 = vmul.f32 %v4794_v42, %v4698_v63  ;;  %v1165_v63 = vld [vmem:[%s6115_s6 + $0x140] sm:$0xff] }
  0xa9   : > { %1370 = vperm.xlu0 %4379, %v1148_v0   ;;  %v558_v57 = vadd.f32 %v550_v47, %v506_v46  ;;  %v543_v47 = vmul.f32 %v4794_v42, %v4668_v51  ;;  %v1173_v51 = vld [vmem:[%s6115_s6 + $0x180] sm:$0xff] }
  0xaa   : > { %1345 = vperm.xlu1 %4380, %v1143_v1  }
  0xab   : > { %v4709_v3 = vpop.permute.xlu1 %512  ;;  %v4711_v4 = vpop.permute.xlu0 %564 }
  0xad   : > { %1380 = vperm.xlu0 %4379, %v1150_v2  }
  0xae   : > { %1355 = vperm.xlu1 %4380, %v1145_v5  }
  0xaf   : > { %v4719_v7 = vpop.permute.xlu1 %516  ;;  %v4721_v8 = vpop.permute.xlu0 %576 }
  0xb1   : > { %1390 = vperm.xlu0 %4379, %v1152_v6   ;;  %v504_v6 = vmul.f32 %v4792_v41, %v4686_v58 }
  0xb2   : > { %1365 = vperm.xlu1 %4380, %v1147_v9   ;;  %v548_v9 = vmul.f32 %v4794_v42, %v4688_v59 }
  0xb3   : > { %v4729_v11 = vpop.permute.xlu1 %524  ;;  %v4731_v12 = vpop.permute.xlu0 %584 }
  0xb4   : > { %v547_v58 = vmul.f32 %v4794_v42, %v4729_v11  ;;  %v1174_v11 = vld [vmem:[%s6115_s6 + $0x188] sm:$0xff] }
  0xb5   : > { %1400 = vperm.xlu0 %4379, %v1154_v10  }
  0xb6   : > { %1375 = vperm.xlu1 %4380, %v1149_v13  }
  0xb7   : > { %v4739_v15 = vpop.permute.xlu1 %532 }
  0xb8   : > { %v4744_v17 = vpop.permute.xlu0 %457  ;;  %v549_v10 = vmul.f32 %v4794_v42, %v4739_v15  ;;  %v502_v15 = vmul.f32 %v4792_v41, %v4676_v54  ;;  %v545_v54 = vmul.f32 %v4794_v42, %v4719_v7  ;;  %v544_v7 = vmul.f32 %v4794_v42, %v4709_v3  ;;  %v1171_v3 = vld [vmem:[%s6115_s6 + $0x170] sm:$0xff] }
  0xb9   : > { %1410 = vperm.xlu0 %4379, %v1156_v14   ;;  %v1172_v14 = vld [vmem:[%s6115_s6 + $0x178] sm:$0xff]  ;;  %v499_v50 = vmul.f32 %v4792_v41, %v4744_v17 }
  0xba   : > { %1385 = vperm.xlu1 %4380, %v1151_v16  }
  0xbc   : > { %v4753_v20 = vpop.permute.xlu1 %560  ;;  %v4755_v21 = vpop.permute.xlu0 %462 }
  0xbd   : > { %1420 = vperm.xlu0 %4379, %v1158_v18   ;;  %v1167_v18 = vld [vmem:[%s6115_s6 + $0x150] sm:$0xff] }
  0xbe   : > { %1395 = vperm.xlu1 %4380, %v1153_v19  }
  0xc0   : > { %v4766_v25 = vpop.permute.xlu1 %568  ;;  %v478_v26 = vpop.permute.xlu0 %477 }
  0xc1   : > { %1430 = vperm.xlu0 %4379, %v1160_v22   ;;  %v503_v13 = vmul.f32 %v4792_v41, %v478_v26  ;;  %v546_v22 = vmul.f32 %v4794_v42, %v4678_v55  ;;  %v556_v26 = vadd.f32 %v548_v9, %v504_v6  ;;  %v599_v55 = vmul.f32 %v4805_v48, %v4721_v8  ;;  %v1184_v9 = vld [vmem:[%s6115_s6 + $0x1d8] sm:$0xff] }
  0xc2   : > { %1405 = vperm.xlu1 %4380, %v1155_v24   ;;  %v597_v36 = vmul.f32 %v4805_v48, %v4766_v25 }
  0xc3   : > { %v555_v28 = vadd.f32 %v547_v58, %v503_v13  ;;  %v1179_v13 = vld [vmem:[%s6115_s6 + $0x1b0] sm:$0xff]  ;;  %v1181_v58 = vld [vmem:[%s6115_s6 + $0x1c0] sm:$0xff] }
  0xc4   : > { %v4776_v30 = vpop.permute.xlu1 %572  ;;  %v488_v31 = vpop.permute.xlu0 %487 }
  0xc5   : > { %1440 = vperm.xlu0 %4379, %v1162_v27   ;;  %v505_v0 = vmul.f32 %v4792_v41, %v488_v31  ;;  %v601_v27 = vmul.f32 %v4805_v48, %v4731_v12  ;;  %v500_v12 = vmul.f32 %v4792_v41, %v4755_v21  ;;  %v598_v31 = vmul.f32 %v4805_v48, %v4776_v30  ;;  %v1176_v30 = vld [vmem:[%s6115_s6 + $0x198] sm:$0xff] }
  0xc6   : > { %1415 = vperm.xlu1 %4380, %v1157_v29   ;;  %v1169_v29 = vld [vmem:[%s6115_s6 + $0x160] sm:$0xff]  ;;  %v607_v39 = vadd.f32 %v599_v55, %v555_v28  ;;  %v684_v55 = vld [vmem:[%s6112_s3 + $0x48] sm:$0xff] }
  0xc7   : > { %v557_v19 = vadd.f32 %v549_v10, %v505_v0  ;;  %v677_v10 = vld [vmem:[%s6112_s3 + $0x10] sm:$0xff]  ;;  %v683_v28 = vld [vmem:[%s6112_s3 + $0x40] sm:$0xff] }
  0xc8   : > { %v581_v37 = vpop.permute.xlu1 %580  ;;  %v4787_v38 = vpop.permute.xlu0 %621 }
  0xc9   : > { %1450 = vperm.xlu0 %4379, %v1164_v32   ;;  %v600_v59 = vmul.f32 %v4805_v48, %v581_v37  ;;  %v609_v33 = vadd.f32 %v601_v27, %v557_v19  ;;  %v1190_v27 = vld [vmem:[%s6115_s6 + $0x208] sm:$0xff] }
  0xca   : > { %1425 = vperm.xlu1 %4380, %v1159_v35   ;;  %v554_v35 = vadd.f32 %v546_v22, %v502_v15  ;;  %v1188_v15 = vld [vmem:[%s6115_s6 + $0x1f8] sm:$0xff]  ;;  %v681_v22 = vld [vmem:[%s6112_s3 + $0x30] sm:$0xff] }
  0xcb   : > { %v608_v32 = vadd.f32 %v600_v59, %v556_v26  ;;  %v680_v59 = vld [vmem:[%s6112_s3 + $0x28] sm:$0xff]  ;;  %v682_v26 = vld [vmem:[%s6112_s3 + $0x38] sm:$0xff] }
  0xcc   : > { %v589_v44 = vpop.permute.xlu1 %588  ;;  %v4799_v45 = vpop.permute.xlu0 %636 }
  0xcd   : > { %1460 = vperm.xlu0 %4379, %v1166_v40   ;;  %v602_v52 = vmul.f32 %v4805_v48, %v589_v44  ;;  %v553_v40 = vadd.f32 %v545_v54, %v501_v34  ;;  %v606_v44 = vadd.f32 %v598_v31, %v554_v35  ;;  %v1185_v54 = vld [vmem:[%s6115_s6 + $0x1e0] sm:$0xff]  ;;  %v685_v31 = vld [vmem:[%s6112_s3 + $0x50] sm:$0xff]  ;;  %v686_v34 = vld [vmem:[%s6112_s3 + $0x58] sm:$0xff] }
  0xce   : > { %1435 = vperm.xlu1 %4380, %v1161_v43   ;;  %v552_v43 = vadd.f32 %v544_v7, %v500_v12  ;;  %v1192_v12 = vld [vmem:[%s6115_s6 + $0x218] sm:$0xff]  ;;  %v1194_v35 = vld [vmem:[%s6115_s6 + $0x228] sm:$0xff]  ;;  %v687_v7 = vld [vmem:[%s6112_s3 + $0x60] sm:$0xff] }
  0xcf   : > { %v610_v62 = vadd.f32 %v602_v52, %v558_v57  ;;  %v595_v52 = vmul.f32 %v4805_v48, %v4753_v20  ;;  %v662_v17 = vadd.f32 %v4799_v45, %v606_v44  ;;  %v1193_v44 = vld [vmem:[%s6115_s6 + $0x220] sm:$0xff] }
  0xd0   : > { %v647_v56 = vpop.permute.xlu0 %646 }
  0xd1   : > { %v4814_v60 = vpop.permute.xlu1 %626  ;;  %1470 = vperm.xlu0 %4379, %v1168_v49   ;;  %v664_v37 = vadd.f32 %v647_v56, %v608_v32  ;;  %v596_v49 = vmul.f32 %v4805_v48, %v4711_v4  ;;  %v1178_v56 = vld [vmem:[%s6115_s6 + $0x1a8] sm:$0xff]  ;;  %v551_v4 = vadd.f32 %v543_v47, %v499_v50  ;;  %v670_v48 = vmax.f32 %v662_v17, 0.0  ;;  %v1187_v32 = vld [vmem:[%s6115_s6 + $0x1f0] sm:$0xff]  ;;  %v690_v50 = vld [vmem:[%s6112_s3 + $0x78] sm:$0xff] }
  0xd2   : > { %1445 = vperm.xlu1 %4380, %v1163_v53   ;;  %v605_v53 = vadd.f32 %v597_v36, %v553_v40  ;;  %v1191_v40 = vld [vmem:[%s6115_s6 + $0x210] sm:$0xff] }
  0xd3   : > { %v672_v41 = vmax.f32 %v664_v37, 0.0  ;;  %v604_v42 = vadd.f32 %v596_v49, %v552_v43  ;;  %v603_v45 = vadd.f32 %v595_v52, %v551_v4  ;;  %v688_v37 = vld [vmem:[%s6112_s3 + $0x68] sm:$0xff]  ;;  %v1195_v47 = vld [vmem:[%s6115_s6 + $0x230] sm:$0xff] }
  0xd4   : > { %v657_v1 = vpop.permute.xlu0 %656  ;;  %v1198_v43 = vld [vmem:[%s6115_s6 + $0x248] sm:$0xff] }
  0xd5   : > { %v666_v2 = vadd.f32 %v657_v1, %v610_v62  ;;  %v4823_v5 = vpop.permute.xlu1 %631  ;;  %1480 = vperm.xlu0 %4379, %v1170_v61   ;;  %v660_v61 = vadd.f32 %v4814_v60, %v604_v42  ;;  %v1180_v62 = vld [vmem:[%s6115_s6 + $0x1b8] sm:$0xff]  ;;  %v659_v0 = vadd.f32 %v4787_v38, %v603_v45  ;;  %v1182_v60 = vld [vmem:[%s6115_s6 + $0x1c8] sm:$0xff] }
  0xd6   : > { %1455 = vperm.xlu1 %4380, %v1165_v63   ;;  %v661_v57 = vadd.f32 %v4823_v5, %v605_v53  ;;  %v1175_v63 = vld [vmem:[%s6115_s6 + $0x190] sm:$0xff]  ;;  %v1177_v5 = vld [vmem:[%s6115_s6 + $0x1a0] sm:$0xff]  ;;  %v676_v38 = vld [vmem:[%s6112_s3 + $0x8] sm:$0xff] }
  0xd7   : > { %v674_v16 = vmax.f32 %v666_v2, 0.0  ;;  %v668_v2 = vmax.f32 %v660_v61, 0.0  ;;  %v667_v6 = vmax.f32 %v659_v0, 0.0  ;;  %v1202_v52 = vld [vmem:[%s6115_s6 + $0x268] sm:$0xff]  ;;  %v1208_v45 = vld [vmem:[%s6115_s6 + $0x298] sm:$0xff]  ;;  %v1203_v61 = vld [vmem:[%s6115_s6 + $0x270] sm:$0xff] }
  0xd8   : > { %v669_v1 = vmax.f32 %v661_v57, 0.0  ;;  %v4930_v19 = vpop.permute.xlu0 %714  ;;  %v1206_v42 = vld [vmem:[%s6115_s6 + $0x288] sm:$0xff]  ;;  %v1201_v57 = vld [vmem:[%s6115_s6 + $0x260] sm:$0xff] }
  0xd9   : > { %v642_v24 = vpop.permute.xlu1 %641  ;;  %1490 = vperm.xlu0 %4379, %v1172_v14   ;;  %4037 = vmatprep.subr.mxu0 %v674_v16  ;;  %v678_v14 = vld [vmem:[%s6112_s3 + $0x18] sm:$0xff]  ;;  %v1205_v0 = vld [vmem:[%s6115_s6 + $0x280] sm:$0xff] }
  0xda   : > { %1465 = vperm.xlu1 %4380, %v1167_v18   ;;  %4038 = vmatpush3.msra.mxu0 %v674_v16  ;;  %v663_v46 = vadd.f32 %v642_v24, %v607_v39  ;;  %v1186_v16 = vld [vmem:[%s6115_s6 + $0x1e8] sm:$0xff]  ;;  %v679_v18 = vld [vmem:[%s6112_s3 + $0x20] sm:$0xff]  ;;  %v1183_v24 = vld [vmem:[%s6115_s6 + $0x1d0] sm:$0xff] }
  0xdb   : > { %v1196_v39 = vld [vmem:[%s6115_s6 + $0x238] sm:$0xff] }
  0xdc   : > { %v671_v20 = vmax.f32 %v663_v46, 0.0 }
  0xdd   : > { %v652_v8 = vpop.permute.xlu1 %651  ;;  %1500 = vperm.xlu0 %4379, %v1174_v11   ;;  %v4956_v11 = vpop.permute.xlu0 %724 }
  0xde   : > { %v665_v21 = vadd.f32 %v652_v8, %v609_v33  ;;  %1475 = vperm.xlu1 %4380, %v1169_v29   ;;  %v1189_v8 = vld [vmem:[%s6115_s6 + $0x200] sm:$0xff] }
  0xe0   : > { %v673_v25 = vmax.f32 %v665_v21, 0.0  ;;  %v689_v21 = vld [vmem:[%s6112_s3 + $0x70] sm:$0xff] }
  0xe1   : > { %1510 = vperm.xlu0 %4379, %v1176_v30   ;;  %v4966_v29 = vpop.permute.xlu1 %709  ;;  %v4978_v33 = vpop.permute.xlu0 %734 }
  0xe2   : > { %1485 = vperm.xlu1 %4380, %v1171_v3   ;;  %4039 = vmatprep.subr.mxu0 %v673_v25 }
  0xe3   : > { %4040 = vmatpush3.msra.mxu0 %v673_v25  ;;  %v1200_v25 = vld [vmem:[%s6115_s6 + $0x258] sm:$0xff] }
  0xe4   : > { %4041 = vmatprep.subr.mxu0 %v672_v41 }
  0xe5   : > { %1520 = vperm.xlu0 %4379, %v1178_v56   ;;  %4042 = vmatpush3.msra.mxu0 %v672_v41  ;;  %v4993_v36 = vpop.permute.xlu1 %719  ;;  %v5006_v30 = vpop.permute.xlu0 %744  ;;  %v1197_v41 = vld [vmem:[%s6115_s6 + $0x240] sm:$0xff]  ;;  %v1204_v56 = vld [vmem:[%s6115_s6 + $0x278] sm:$0xff] }
  0xe6   : > { %1495 = vperm.xlu1 %4380, %v1173_v51   ;;  %4043 = vmatprep.subr.mxu0 %v671_v20  ;;  %v1199_v51 = vld [vmem:[%s6115_s6 + $0x250] sm:$0xff] }
  0xe7   : > { %4044 = vmatpush3.msra.mxu0 %v671_v20 }
  0xe8   : > { %4045 = vmatprep.subr.mxu0 %v670_v48 }
  0xe9   : > { %1530 = vperm.xlu0 %4379, %v1180_v62   ;;  %4046 = vmatpush3.msra.mxu0 %v670_v48  ;;  %v5016_v3 = vpop.permute.xlu1 %729  ;;  %v5025_v46 = vpop.permute.xlu0 %754 }
  0xea   : > { %1505 = vperm.xlu1 %4380, %v1175_v63   ;;  %4047 = vmatprep.subr.mxu0 %v669_v1  ;;  %v1210_v63 = vld [vmem:[%s6115_s6 + $0x2a8] sm:$0xff] }
  0xeb   : > { %4048 = vmatpush3.msra.mxu0 %v669_v1 }
  0xec   : > { %4049 = vmatprep.subr.mxu0 %v668_v2 }
  0xed   : > { %1540 = vperm.xlu0 %4379, %v1182_v60   ;;  %4050 = vmatpush3.msra.mxu0 %v668_v2  ;;  %v5033_v49 = vpop.permute.xlu1 %739  ;;  %v5038_v17 = vpop.permute.xlu0 %764  ;;  %v1212_v2 = vld [vmem:[%s6115_s6 + $0x2b8] sm:$0xff]  ;;  %v1207_v60 = vld [vmem:[%s6115_s6 + $0x290] sm:$0xff] }
  0xee   : > { %1515 = vperm.xlu1 %4380, %v1177_v5   ;;  %4051 = vmatprep.subr.mxu0 %v667_v6 }
  0xef   : > { %4052 = vmatpush3.msra.mxu0 %v667_v6  ;;  %v1214_v6 = vld [vmem:[%s6115_s6 + $0x2c8] sm:$0xff] }
  0xf0   : > { %4054 = vmatmul.mubr.msk.f32.vlgmr.msra.gmra.mxu0 %vm787_vm0, %v676_v38 }
  0xf1   : > { %1550 = vperm.xlu0 %4379, %v1184_v9   ;;  %4056 = vmatprep.mubr.msk.f32.mxu0 %vm787_vm0, %v677_v10  ;;  %v5043_v53 = vpop.permute.xlu1 %749  ;;  %v5051_v4 = vpop.permute.xlu0 %774  ;;  %v1209_v9 = vld [vmem:[%s6115_s6 + $0x2a0] sm:$0xff] }
  0xf2   : > { %1525 = vperm.xlu1 %4380, %v1179_v13   ;;  %v1216_v13 = vld [vmem:[%s6115_s6 + $0x2d8] sm:$0xff] }
  0xf4   : > { %4057 = vmatmul.mubr.msk.f32.gmra.mxu0 %vm787_vm0, %v678_v14  ;;  %v1211_v14 = vld [vmem:[%s6115_s6 + $0x2b0] sm:$0xff] }
  0xf5   : > { %1560 = vperm.xlu0 %4379, %v1186_v16   ;;  %4059 = vmatprep.mubr.msk.f32.mxu0 %vm787_vm0, %v679_v18  ;;  %v5059_v20 = vpop.permute.xlu1 %759  ;;  %v5064_v48 = vpop.permute.xlu0 %784  ;;  %v1218_v18 = vld [vmem:[%s6115_s6 + $0x2e8] sm:$0xff] }
  0xf6   : > { %1535 = vperm.xlu1 %4380, %v1181_v58   ;;  %v1213_v58 = vld [vmem:[%s6115_s6 + $0x2c0] sm:$0xff] }
  0xf8   : > { %4060 = vmatmul.mubr.msk.f32.gmra.mxu0 %vm787_vm0, %v680_v59 }
  0xf9   : > { %1570 = vperm.xlu0 %4379, %v1188_v15   ;;  %4062 = vmatprep.mubr.msk.f32.mxu0 %vm787_vm0, %v681_v22  ;;  %v5069_v62 = vpop.permute.xlu1 %769  ;;  %v5077_v1 = vpop.permute.xlu0 %1260  ;;  %v1220_v15 = vld [vmem:[%s6115_s6 + $0x2f8] sm:$0xff] }
  0xfa   : > { %1545 = vperm.xlu1 %4380, %v1183_v24   ;;  %v1215_v24 = vld [vmem:[%s6115_s6 + $0x2d0] sm:$0xff] }
  0xfc   : > { %4063 = vmatmul.mubr.msk.f32.gmra.mxu0 %vm787_vm0, %v682_v26 }
  0xfd   : > { %1580 = vperm.xlu0 %4379, %v1190_v27   ;;  %4065 = vmatprep.mubr.msk.f32.mxu0 %vm787_vm0, %v683_v28  ;;  %v5085_v5 = vpop.permute.xlu1 %779  ;;  %v5090_v38 = vpop.permute.xlu0 %1270  ;;  %v1222_v27 = vld [vmem:[%s6115_s6 + $0x308] sm:$0xff]  ;;  %v1217_v28 = vld [vmem:[%s6115_s6 + $0x2e0] sm:$0xff] }
  0xfe   : > { %1555 = vperm.xlu1 %4380, %v1185_v54  }
 0x100   : > { %4066 = vmatmul.mubr.msk.f32.gmra.mxu0 %vm787_vm0, %v684_v55  ;;  %v1224_v55 = vld [vmem:[%s6115_s6 + $0x318] sm:$0xff] }
 0x101   : > { %1590 = vperm.xlu0 %4379, %v1192_v12   ;;  %4068 = vmatprep.mubr.msk.f32.mxu0 %vm787_vm0, %v685_v31  ;;  %v5095_v10 = vpop.permute.xlu1 %1255  ;;  %v5103_v16 = vpop.permute.xlu0 %1280  ;;  %v1219_v12 = vld [vmem:[%s6115_s6 + $0x2f0] sm:$0xff] }
 0x102   : > { %1565 = vperm.xlu1 %4380, %v1187_v32   ;;  %v1226_v32 = vld [vmem:[%s6115_s6 + $0x328] sm:$0xff] }
 0x104   : > { %4069 = vmatmul.mubr.msk.f32.gmra.mxu0 %vm787_vm0, %v686_v34 }
 0x105   : > { %1600 = vperm.xlu0 %4379, %v1194_v35   ;;  %4071 = vmatprep.mubr.msk.f32.mxu0 %vm787_vm0, %v687_v7  ;;  %v5111_v59 = vpop.permute.xlu1 %1265  ;;  %v5116_v22 = vpop.permute.xlu0 %1290  ;;  %v1221_v35 = vld [vmem:[%s6115_s6 + $0x300] sm:$0xff] }
 0x106   : > { %1575 = vperm.xlu1 %4380, %v1189_v8   ;;  %v1228_v8 = vld [vmem:[%s6115_s6 + $0x338] sm:$0xff] }
 0x108   : > { %4072 = vmatmul.mubr.msk.f32.gmra.mxu0 %vm787_vm0, %v688_v37  ;;  %v1223_v37 = vld [vmem:[%s6115_s6 + $0x310] sm:$0xff] }
 0x109   : > { %1610 = vperm.xlu0 %4379, %v1196_v39   ;;  %4074 = vmatprep.mubr.msk.f32.mxu0 %vm787_vm0, %v689_v21  ;;  %v5121_v26 = vpop.permute.xlu1 %1275  ;;  %v5129_v54 = vpop.permute.xlu0 %1300  ;;  %v1230_v21 = vld [vmem:[%s6115_s6 + $0x348] sm:$0xff] }
 0x10a   : > { %1585 = vperm.xlu1 %4380, %v1191_v40   ;;  %v1225_v40 = vld [vmem:[%s6115_s6 + $0x320] sm:$0xff] }
 0x10c   : > { %4075 = vmatmul.mubr.msk.f32.gmra.mxu0 %vm787_vm0, %v690_v50 }
 0x10d   : > { %1620 = vperm.xlu0 %4379, %v1198_v43   ;;  %v5137_v31 = vpop.permute.xlu1 %1285  ;;  %v5142_v34 = vpop.permute.xlu0 %1310  ;;  %v1232_v43 = vld [vmem:[%s6115_s6 + $0x358] sm:$0xff] }
 0x10e   : > { %1595 = vperm.xlu1 %4380, %v1193_v44  }
 0x111   : > { %1630 = vperm.xlu0 %4379, %v1200_v25   ;;  %v5147_v7 = vpop.permute.xlu1 %1295  ;;  %v5155_v39 = vpop.permute.xlu0 %1320  ;;  %v1227_v25 = vld [vmem:[%s6115_s6 + $0x330] sm:$0xff] }
 0x112   : > { %1605 = vperm.xlu1 %4380, %v1195_v47  }
 0x115   : > { %1640 = vperm.xlu0 %4379, %v1202_v52   ;;  %v5163_v50 = vpop.permute.xlu1 %1305  ;;  %v5168_v44 = vpop.permute.xlu0 %1330  ;;  %v1234_v52 = vld [vmem:[%s6115_s6 + $0x368] sm:$0xff] }
 0x116   : > { %1615 = vperm.xlu1 %4380, %v1197_v41   ;;  %v1229_v41 = vld [vmem:[%s6115_s6 + $0x340] sm:$0xff] }
 0x119   : > { %1650 = vperm.xlu0 %4379, %v1204_v56   ;;  %v5173_v47 = vpop.permute.xlu1 %1315  ;;  %v5181_v56 = vpop.permute.xlu0 %1340 }
 0x11a   : > { %1625 = vperm.xlu1 %4380, %v1199_v51   ;;  %v1236_v51 = vld [vmem:[%s6115_s6 + $0x378] sm:$0xff] }
 0x11d   : > { %1660 = vperm.xlu0 %4379, %v1206_v42   ;;  %v1231_v42 = vld [vmem:[%s6115_s6 + $0x350] sm:$0xff] }
 0x11e   : > { %1635 = vperm.xlu1 %4380, %v1201_v57   ;;  %v5189_v57 = vpop.permute.xlu1 %1325 }
 0x121   : > { %1670 = vperm.xlu0 %4379, %v1208_v45   ;;  %v1238_v45 = vld [vmem:[%s6115_s6 + $0x388] sm:$0xff] }
 0x122   : > { %1645 = vperm.xlu1 %4380, %v1203_v61   ;;  %v5194_v61 = vpop.permute.xlu0 %1350 }
 0x125   : > { %1680 = vperm.xlu0 %4379, %v1210_v63   ;;  %v1233_v63 = vld [vmem:[%s6115_s6 + $0x360] sm:$0xff] }
 0x126   : > { %1655 = vperm.xlu1 %4380, %v1205_v0   ;;  %v5199_v0 = vpop.permute.xlu1 %1335 }
 0x129   : > { %1690 = vperm.xlu0 %4379, %v1212_v2   ;;  %v1240_v2 = vld [vmem:[%s6115_s6 + $0x398] sm:$0xff] }
 0x12a   : > { %1665 = vperm.xlu1 %4380, %v1207_v60   ;;  %v1235_v60 = vld [vmem:[%s6115_s6 + $0x370] sm:$0xff] }
 0x12d   : > { %1700 = vperm.xlu0 %4379, %v1214_v6   ;;  %v5207_v6 = vpop.permute.xlu0 %1360 }
 0x12e   : > { %1675 = vperm.xlu1 %4380, %v1209_v9   ;;  %v1242_v9 = vld [vmem:[%s6115_s6 + $0x3a8] sm:$0xff] }
 0x131   : > { %1710 = vperm.xlu0 %4379, %v1216_v13   ;;  %v1237_v13 = vld [vmem:[%s6115_s6 + $0x380] sm:$0xff] }
 0x132   : > { %1685 = vperm.xlu1 %4380, %v1211_v14   ;;  %v5215_v14 = vpop.permute.xlu1 %1345 }
 0x135   : > { %1720 = vperm.xlu0 %4379, %v1218_v18   ;;  %v1244_v18 = vld [vmem:[%s6115_s6 + $0x3b8] sm:$0xff] }
 0x136   : > { %1695 = vperm.xlu1 %4380, %v1213_v58   ;;  %v5220_v58 = vpop.permute.xlu0 %1370 }
 0x139   : > { %1730 = vperm.xlu0 %4379, %v1220_v15   ;;  %v1239_v15 = vld [vmem:[%s6115_s6 + $0x390] sm:$0xff] }
 0x13a   : > { %1705 = vperm.xlu1 %4380, %v1215_v24   ;;  %v5225_v24 = vpop.permute.xlu1 %1355 }
 0x13d   : > { %1740 = vperm.xlu0 %4379, %v1222_v27   ;;  %v1246_v27 = vld [vmem:[%s6115_s6 + $0x3c8] sm:$0xff] }
 0x13e   : > { %1715 = vperm.xlu1 %4380, %v1217_v28   ;;  %v1241_v28 = vld [vmem:[%s6115_s6 + $0x3a0] sm:$0xff] }
 0x141   : > { %1750 = vperm.xlu0 %4379, %v1224_v55   ;;  %v5233_v55 = vpop.permute.xlu0 %1380 }
 0x142   : > { %1725 = vperm.xlu1 %4380, %v1219_v12   ;;  %6120 = vst [vmem:[#allocation6_spill] sm:$0xff] %v5233_v55  ;;  %v1248_v12 = vld [vmem:[%s6115_s6 + $0x3d8] sm:$0xff] }
 0x145   : > { %1760 = vperm.xlu0 %4379, %v1226_v32   ;;  %v1243_v32 = vld [vmem:[%s6115_s6 + $0x3b0] sm:$0xff] }
 0x146   : > { %1735 = vperm.xlu1 %4380, %v1221_v35   ;;  %v1057_v35 = vld [vmem:[#allocation3 + $0x1e0] sm:$0xff] }
 0x147   : > { %4199 = vmatprep.mubr.f32.mxu1 %v1057_v35 }
 0x149   : > { %1770 = vperm.xlu0 %4379, %v1228_v8   ;;  %v997_v8 = vld [vmem:[#allocation3] sm:$0xff] }
 0x14a   : > { %1745 = vperm.xlu1 %4380, %v1223_v37   ;;  %v5241_v37 = vpop.permute.xlu1 %1365  ;;  %4109 = vmatprep.mubr.f32.mxu0 %v997_v8 }
 0x14d   : > { %1780 = vperm.xlu0 %4379, %v1230_v21   ;;  %v1250_v21 = vld [vmem:[%s6115_s6 + $0x3e8] sm:$0xff] }
 0x14e   : > { %1755 = vperm.xlu1 %4380, %v1225_v40   ;;  %v5246_v40 = vpop.permute.xlu0 %1390 }
 0x14f   : > { %6121 = vst [vmem:[#allocation7_spill] sm:$0xff] %v5246_v40 }
 0x151   : > { %1790 = vperm.xlu0 %4379, %v1232_v43   ;;  %v1245_v43 = vld [vmem:[%s6115_s6 + $0x3c0] sm:$0xff] }
 0x152   : > { %1765 = vperm.xlu1 %4380, %v1227_v25   ;;  %v5251_v25 = vpop.permute.xlu1 %1375 }
 0x153   : > { %6122 = vst [vmem:[#allocation8_spill] sm:$0xff] %v5251_v25 }
 0x155   : > { %1800 = vperm.xlu0 %4379, %v1234_v52   ;;  %v1252_v52 = vld [vmem:[%s6115_s6 + $0x3f8] sm:$0xff] }
 0x156   : > { %1775 = vperm.xlu1 %4380, %v1229_v41   ;;  %v1247_v41 = vld [vmem:[%s6115_s6 + $0x3d0] sm:$0xff] }
 0x159   : > { %1810 = vperm.xlu0 %4379, %v1236_v51   ;;  %v5259_v51 = vpop.permute.xlu0 %1400 }
 0x15a   : > { %1785 = vperm.xlu1 %4380, %v1231_v42   ;;  %6123 = vst [vmem:[#allocation9_spill] sm:$0xff] %v5259_v51  ;;  %v1249_v42 = vld [vmem:[%s6115_s6 + $0x3e0] sm:$0xff] }
 0x15d   : > { %1820 = vperm.xlu0 %4379, %v1238_v45   ;;  %v5264_v45 = vpop.permute.xlu1 %1385 }
 0x15e   : > { %1795 = vperm.xlu1 %4380, %v1233_v63   ;;  %6124 = vst [vmem:[#allocation10_spill] sm:$0xff] %v5264_v45  ;;  %v1251_v63 = vld [vmem:[%s6115_s6 + $0x3f0] sm:$0xff] }
 0x161   : > { %1830 = vperm.xlu0 %4379, %v1240_v2   ;;  %v5269_v2 = vpop.permute.xlu1 %1395 }
 0x162   : > { %1805 = vperm.xlu1 %4380, %v1235_v60   ;;  %6125 = vst [vmem:[#allocation11_spill] sm:$0xff] %v5269_v2 }
 0x165   : > { %1840 = vperm.xlu0 %4379, %v1242_v9  }
 0x166   : > { %1815 = vperm.xlu1 %4380, %v1237_v13  }
 0x169   : > { %1850 = vperm.xlu0 %4379, %v1244_v18  }
 0x16a   : > { %1825 = vperm.xlu1 %4380, %v1239_v15  }
 0x16d   : > { %1860 = vperm.xlu0 %4379, %v1246_v27  }
 0x16e   : > { %1835 = vperm.xlu1 %4380, %v1241_v28  }
 0x171   : > { %1870 = vperm.xlu0 %4379, %v1248_v12  }
 0x172   : > { %1845 = vperm.xlu1 %4380, %v1243_v32  }
 0x175   : > { %1880 = vperm.xlu0 %4379, %v1250_v21  }
 0x176   : > { %1855 = vperm.xlu1 %4380, %v1245_v43  }
 0x179   : > { %1890 = vperm.xlu0 %4379, %v1252_v52  }
 0x17a   : > { %1865 = vperm.xlu1 %4380, %v1247_v41  }
 0x17e   : > { %1875 = vperm.xlu1 %4380, %v1249_v42  }
 0x182   : > { %1885 = vperm.xlu1 %4380, %v1251_v63  }
 0x1b0   : > { %v5271_v60 = vpop.f32.mrf.mxu0 }
 0x1b2   : > { %v5273_v9 = vpop.f32.mrf.mxu0 }
 0x1b4   : > { %v5275_v13 = vpop.f32.mrf.mxu0 }
 0x1b6   : > { %v5277_v18 = vpop.f32.mrf.mxu0 }
 0x1b8   : > { %v4061_v15 = vpop.f32.mrf.mxu0 }
 0x1ba   : > { %v5279_v27 = vpop.f32.mrf.mxu0 }
 0x1bc   : > { %v4064_v28 = vpop.f32.mrf.mxu0 }
 0x1be   : > { %v932_v12 = vpop.f32.mrf.mxu0 }
 0x1c0   : > { %v4067_v32 = vpop.f32.mrf.mxu0 }
 0x1c2   : > { %v942_v35 = vpop.f32.mrf.mxu0 }
 0x1c4   : > { %v4070_v8 = vpop.f32.mrf.mxu0 }
 0x1c5   : > { %v958_v25 = vadd.f32 %v4070_v8, %v5038_v17  ;;  %v1062_v8 = vld [vmem:[#allocation3 + $0x208] sm:$0xff] }
 0x1c6   : > { %v952_v21 = vpop.f32.mrf.mxu0 }
 0x1c8   : > { %v4073_v43 = vpop.f32.mrf.mxu0 }
 0x1c9   : > { %v968_v23 = vadd.f32 %v4073_v43, %v5051_v4  ;;  %v1063_v43 = vld [vmem:[#allocation3 + $0x210] sm:$0xff] }
 0x1ca   : > { %v962_v52 = vpop.f32.mrf.mxu0 }
 0x1cb   : > { %v963_v45 = vadd.f32 %v962_v52, %v5069_v62  ;;  %v994_v55 = vmax.f32 %v968_v23, 0.0  ;;  %v948_v62 = vadd.f32 %v4067_v32, %v5025_v46  ;;  %v943_v23 = vadd.f32 %v942_v35, %v5043_v53  ;;  %v1061_v32 = vld [vmem:[#allocation3 + $0x200] sm:$0xff]  ;;  %v1002_v35 = vld [vmem:[#allocation3 + $0x28] sm:$0xff]  ;;  %v1004_v52 = vld [vmem:[#allocation3 + $0x38] sm:$0xff] }
 0x1cc   : > { %v4076_v41 = vpop.f32.mrf.mxu0  ;;  %v933_v46 = vadd.f32 %v932_v12, %v5033_v49  ;;  %v928_v53 = vadd.f32 %v4061_v15, %v4978_v33  ;;  %v918_v49 = vadd.f32 %v5275_v13, %v4956_v11  ;;  %v913_v33 = vadd.f32 %v5277_v18, %v4993_v36  ;;  %v1001_v12 = vld [vmem:[#allocation3 + $0x20] sm:$0xff] }
 0x1cd   : > { %v978_v42 = vadd.f32 %v4076_v41, %v5064_v48  ;;  %v953_v48 = vadd.f32 %v952_v21, %v5059_v20  ;;  %v993_v4 = vmax.f32 %v963_v45, 0.0  ;;  %v938_v20 = vadd.f32 %v4064_v28, %v5006_v30  ;;  %v1060_v28 = vld [vmem:[#allocation3 + $0x1f8] sm:$0xff]  ;;  %v1003_v21 = vld [vmem:[#allocation3 + $0x30] sm:$0xff] }
 0x1ce   : > { %v972_v63 = vpop.f32.mrf.mxu0  ;;  %v923_v30 = vadd.f32 %v5279_v27, %v5016_v3  ;;  %v986_v45 = vmax.f32 %v928_v53, 0.0  ;;  %v908_v3 = vadd.f32 %v5271_v60, %v4930_v19  ;;  %v984_v15 = vmax.f32 %v918_v49, 0.0  ;;  %v998_v19 = vld [vmem:[#allocation3 + $0x8] sm:$0xff]  ;;  %v1000_v27 = vld [vmem:[#allocation3 + $0x18] sm:$0xff]  ;;  %v1011_v53 = vld [vmem:[#allocation3 + $0x70] sm:$0xff] }
 0x1cf   : > { %v996_v2 = vmax.f32 %v978_v42, 0.0  ;;  %v973_v51 = vadd.f32 %v972_v63, %v5085_v5  ;;  %v992_v5 = vmax.f32 %v958_v25, 0.0  ;;  %v991_v17 = vmax.f32 %v953_v48, 0.0  ;;  %v1058_v60 = vld [vmem:[#allocation3 + $0x1e8] sm:$0xff]  ;;  %v1064_v41 = vld [vmem:[#allocation3 + $0x218] sm:$0xff]  ;;  %v1005_v42 = vld [vmem:[#allocation3 + $0x40] sm:$0xff] }
 0x1d0   : > { %v988_v25 = vmax.f32 %v938_v20, 0.0  ;;  %v903_v11 = vadd.f32 %v5273_v9, %v4966_v29  ;;  %v983_v13 = vmax.f32 %v913_v33, 0.0  ;;  %v982_v36 = vmax.f32 %v908_v3, 0.0  ;;  %v999_v29 = vld [vmem:[#allocation3 + $0x10] sm:$0xff]  ;;  %v1065_v63 = vld [vmem:[#allocation3 + $0x220] sm:$0xff]  ;;  %v1006_v48 = vld [vmem:[#allocation3 + $0x48] sm:$0xff] }
 0x1d1   : > { %v995_v40 = vmax.f32 %v973_v51, 0.0  ;;  %4077 = vmatprep.subr.mxu0 %v996_v2  ;;  %4301 = vmatprep.subr.mxu1 %v996_v2  ;;  %v987_v51 = vmax.f32 %v933_v46, 0.0  ;;  %v1059_v9 = vld [vmem:[#allocation3 + $0x1f0] sm:$0xff]  ;;  %v1009_v20 = vld [vmem:[#allocation3 + $0x60] sm:$0xff]  ;;  %v1010_v46 = vld [vmem:[#allocation3 + $0x68] sm:$0xff] }
 0x1d2   : > { %4078 = vmatpush3.msra.mxu0 %v996_v2  ;;  %4317 = vmatpush3.msra.mxu1 %v996_v2  ;;  %v985_v2 = vmax.f32 %v923_v30, 0.0  ;;  %v981_v18 = vmax.f32 %v903_v11, 0.0  ;;  %v1012_v30 = vld [vmem:[#allocation3 + $0x78] sm:$0xff]  ;;  %v1013_v49 = vld [vmem:[#allocation3 + $0x80] sm:$0xff]  ;;  %v1014_v33 = vld [vmem:[#allocation3 + $0x88] sm:$0xff] }
 0x1d3   : > { %4079 = vmatprep.subr.mxu0 %v995_v40  ;;  %4302 = vmatprep.subr.mxu1 %v995_v40  ;;  %v1015_v3 = vld [vmem:[#allocation3 + $0x90] sm:$0xff]  ;;  %v1016_v11 = vld [vmem:[#allocation3 + $0x98] sm:$0xff] }
 0x1d4   : > { %4080 = vmatpush3.msra.mxu0 %v995_v40  ;;  %4318 = vmatpush3.msra.mxu1 %v995_v40  ;;  %v990_v40 = vmax.f32 %v948_v62, 0.0  ;;  %v1007_v62 = vld [vmem:[#allocation3 + $0x50] sm:$0xff] }
 0x1d5   : > { %4081 = vmatprep.subr.mxu0 %v994_v55  ;;  %4303 = vmatprep.subr.mxu1 %v994_v55 }
 0x1d6   : > { %4082 = vmatpush3.msra.mxu0 %v994_v55  ;;  %4319 = vmatpush3.msra.mxu1 %v994_v55  ;;  %v989_v55 = vmax.f32 %v943_v23, 0.0  ;;  %v1008_v23 = vld [vmem:[#allocation3 + $0x58] sm:$0xff] }
 0x1d7   : > { %4083 = vmatprep.subr.mxu0 %v993_v4  ;;  %4304 = vmatprep.subr.mxu1 %v993_v4 }
 0x1d8   : > { %4084 = vmatpush3.msra.mxu0 %v993_v4  ;;  %4320 = vmatpush3.msra.mxu1 %v993_v4  ;;  %v1066_v4 = vld [vmem:[#allocation3 + $0x228] sm:$0xff] }
 0x1d9   : > { %4085 = vmatprep.subr.mxu0 %v992_v5  ;;  %4305 = vmatprep.subr.mxu1 %v992_v5 }
 0x1da   : > { %4086 = vmatpush3.msra.mxu0 %v992_v5  ;;  %4321 = vmatpush3.msra.mxu1 %v992_v5  ;;  %v1067_v5 = vld [vmem:[#allocation3 + $0x230] sm:$0xff] }
 0x1db   : > { %4087 = vmatprep.subr.mxu0 %v991_v17  ;;  %4306 = vmatprep.subr.mxu1 %v991_v17 }
 0x1dc   : > { %4088 = vmatpush3.msra.mxu0 %v991_v17  ;;  %4322 = vmatpush3.msra.mxu1 %v991_v17  ;;  %v1068_v17 = vld [vmem:[#allocation3 + $0x238] sm:$0xff] }
 0x1dd   : > { %4089 = vmatprep.subr.mxu0 %v990_v40  ;;  %4307 = vmatprep.subr.mxu1 %v990_v40 }
 0x1de   : > { %4090 = vmatpush3.msra.mxu0 %v990_v40  ;;  %4323 = vmatpush3.msra.mxu1 %v990_v40  ;;  %v1069_v40 = vld [vmem:[#allocation3 + $0x240] sm:$0xff] }
 0x1df   : > { %4091 = vmatprep.subr.mxu0 %v989_v55  ;;  %4308 = vmatprep.subr.mxu1 %v989_v55 }
 0x1e0   : > { %4092 = vmatpush3.msra.mxu0 %v989_v55  ;;  %4324 = vmatpush3.msra.mxu1 %v989_v55  ;;  %v1070_v55 = vld [vmem:[#allocation3 + $0x248] sm:$0xff] }
 0x1e1   : > { %4093 = vmatprep.subr.mxu0 %v988_v25  ;;  %4309 = vmatprep.subr.mxu1 %v988_v25 }
 0x1e2   : > { %4094 = vmatpush3.msra.mxu0 %v988_v25  ;;  %4325 = vmatpush3.msra.mxu1 %v988_v25  ;;  %v1071_v25 = vld [vmem:[#allocation3 + $0x250] sm:$0xff] }
 0x1e3   : > { %4095 = vmatprep.subr.mxu0 %v987_v51  ;;  %4310 = vmatprep.subr.mxu1 %v987_v51 }
 0x1e4   : > { %4096 = vmatpush3.msra.mxu0 %v987_v51  ;;  %4326 = vmatpush3.msra.mxu1 %v987_v51  ;;  %v1072_v51 = vld [vmem:[#allocation3 + $0x258] sm:$0xff] }
 0x1e5   : > { %4097 = vmatprep.subr.mxu0 %v986_v45  ;;  %4311 = vmatprep.subr.mxu1 %v986_v45 }
 0x1e6   : > { %4098 = vmatpush3.msra.mxu0 %v986_v45  ;;  %4327 = vmatpush3.msra.mxu1 %v986_v45  ;;  %v1073_v45 = vld [vmem:[#allocation3 + $0x260] sm:$0xff] }
 0x1e7   : > { %4099 = vmatprep.subr.mxu0 %v985_v2  ;;  %4312 = vmatprep.subr.mxu1 %v985_v2 }
 0x1e8   : > { %4100 = vmatpush3.msra.mxu0 %v985_v2  ;;  %4328 = vmatpush3.msra.mxu1 %v985_v2  ;;  %v1074_v2 = vld [vmem:[#allocation3 + $0x268] sm:$0xff] }
 0x1e9   : > { %4101 = vmatprep.subr.mxu0 %v984_v15  ;;  %4313 = vmatprep.subr.mxu1 %v984_v15 }
 0x1ea   : > { %4102 = vmatpush3.msra.mxu0 %v984_v15  ;;  %4329 = vmatpush3.msra.mxu1 %v984_v15  ;;  %v1075_v15 = vld [vmem:[#allocation3 + $0x270] sm:$0xff] }
 0x1eb   : > { %4103 = vmatprep.subr.mxu0 %v983_v13  ;;  %4314 = vmatprep.subr.mxu1 %v983_v13 }
 0x1ec   : > { %4104 = vmatpush3.msra.mxu0 %v983_v13  ;;  %4330 = vmatpush3.msra.mxu1 %v983_v13  ;;  %v1076_v13 = vld [vmem:[#allocation3 + $0x278] sm:$0xff] }
 0x1ed   : > { %4105 = vmatprep.subr.mxu0 %v982_v36  ;;  %4315 = vmatprep.subr.mxu1 %v982_v36 }
 0x1ee   : > { %4106 = vmatpush3.msra.mxu0 %v982_v36  ;;  %4331 = vmatpush3.msra.mxu1 %v982_v36  ;;  %v1017_v36 = vld [vmem:[#allocation3 + $0xa0] sm:$0xff] }
 0x1ef   : > { %4107 = vmatprep.subr.mxu0 %v981_v18  ;;  %4316 = vmatprep.subr.mxu1 %v981_v18 }
 0x1f0   : > { %4108 = vmatpush3.msra.mxu0 %v981_v18  ;;  %4332 = vmatpush3.msra.mxu1 %v981_v18  ;;  %v1077_v18 = vld [vmem:[#allocation3 + $0x280] sm:$0xff] }
 0x1f1   : > { %4110 = vmatmul.mubr.f32.vlgmr.msra.gmra.mxu0 %v998_v19  ;;  %4200 = vmatmul.mubr.f32.vlgmr.msra.gmra.mxu1 %v1058_v60  ;;  %v1018_v19 = vld [vmem:[#allocation3 + $0xa8] sm:$0xff] }
 0x1f2   : > { %4112 = vmatprep.mubr.f32.mxu0 %v999_v29  ;;  %4202 = vmatprep.mubr.f32.mxu1 %v1059_v9  ;;  %v1078_v60 = vld [vmem:[#allocation3 + $0x288] sm:$0xff]  ;;  %v1019_v29 = vld [vmem:[#allocation3 + $0xb0] sm:$0xff] }
 0x1f3   : > { %v1079_v9 = vld [vmem:[#allocation3 + $0x290] sm:$0xff] }
 0x1f5   : > { %4113 = vmatmul.mubr.f32.gmra.mxu0 %v1000_v27  ;;  %4203 = vmatmul.mubr.f32.gmra.mxu1 %v1060_v28  ;;  %v1020_v27 = vld [vmem:[#allocation3 + $0xb8] sm:$0xff] }
 0x1f6   : > { %4115 = vmatprep.mubr.f32.mxu0 %v1001_v12  ;;  %4205 = vmatprep.mubr.f32.mxu1 %v1061_v32  ;;  %v1080_v28 = vld [vmem:[#allocation3 + $0x298] sm:$0xff]  ;;  %v1021_v12 = vld [vmem:[#allocation3 + $0xc0] sm:$0xff] }
 0x1f7   : > { %v1081_v32 = vld [vmem:[#allocation3 + $0x2a0] sm:$0xff] }
 0x1f9   : > { %4116 = vmatmul.mubr.f32.gmra.mxu0 %v1002_v35  ;;  %4206 = vmatmul.mubr.f32.gmra.mxu1 %v1062_v8  ;;  %v5302_v35 = vpop.permute.xlu0 %1410  ;;  %v5304_v8 = vpop.permute.xlu1 %1405 }
 0x1fa   : > { %4118 = vmatprep.mubr.f32.mxu0 %v1003_v21  ;;  %4208 = vmatprep.mubr.f32.mxu1 %v1063_v43  ;;  %6126 = vst [vmem:[#allocation12_spill] sm:$0xff] %v5302_v35  ;;  %6127 = vst [vmem:[#allocation13_spill] sm:$0xff] %v5304_v8  ;;  %v1022_v21 = vld [vmem:[#allocation3 + $0xc8] sm:$0xff] }
 0x1fb   : > { %v1082_v43 = vld [vmem:[#allocation3 + $0x2a8] sm:$0xff] }
 0x1fd   : > { %4119 = vmatmul.mubr.f32.gmra.mxu0 %v1004_v52  ;;  %4209 = vmatmul.mubr.f32.gmra.mxu1 %v1064_v41  ;;  %v1023_v52 = vld [vmem:[#allocation3 + $0xd0] sm:$0xff] }
 0x1fe   : > { %4121 = vmatprep.mubr.f32.mxu0 %v1005_v42  ;;  %4211 = vmatprep.mubr.f32.mxu1 %v1065_v63  ;;  %v1083_v41 = vld [vmem:[#allocation3 + $0x2b0] sm:$0xff]  ;;  %v5306_v42 = vpop.permute.xlu0 %1420  ;;  %v5308_v63 = vpop.permute.xlu1 %1415 }
 0x1ff   : > { %6128 = vst [vmem:[#allocation14_spill] sm:$0xff] %v5306_v42  ;;  %6129 = vst [vmem:[#allocation15_spill] sm:$0xff] %v5308_v63 }
 0x201   : > { %4122 = vmatmul.mubr.f32.gmra.mxu0 %v1006_v48  ;;  %4212 = vmatmul.mubr.f32.gmra.mxu1 %v1066_v4  ;;  %v1024_v48 = vld [vmem:[#allocation3 + $0xd8] sm:$0xff] }
 0x202   : > { %4124 = vmatprep.mubr.f32.mxu0 %v1007_v62  ;;  %4214 = vmatprep.mubr.f32.mxu1 %v1067_v5  ;;  %v1084_v4 = vld [vmem:[#allocation3 + $0x2b8] sm:$0xff]  ;;  %v1025_v62 = vld [vmem:[#allocation3 + $0xe0] sm:$0xff] }
 0x203   : > { %v1085_v5 = vld [vmem:[#allocation3 + $0x2c0] sm:$0xff] }
 0x205   : > { %4125 = vmatmul.mubr.f32.gmra.mxu0 %v1008_v23  ;;  %4215 = vmatmul.mubr.f32.gmra.mxu1 %v1068_v17  ;;  %v1026_v23 = vld [vmem:[#allocation3 + $0xe8] sm:$0xff] }
 0x206   : > { %4127 = vmatprep.mubr.f32.mxu0 %v1009_v20  ;;  %4217 = vmatprep.mubr.f32.mxu1 %v1069_v40  ;;  %v1086_v17 = vld [vmem:[#allocation3 + $0x2c8] sm:$0xff]  ;;  %v1027_v20 = vld [vmem:[#allocation3 + $0xf0] sm:$0xff] }
 0x207   : > { %v1087_v40 = vld [vmem:[#allocation3 + $0x2d0] sm:$0xff] }
 0x209   : > { %4128 = vmatmul.mubr.f32.gmra.mxu0 %v1010_v46  ;;  %4218 = vmatmul.mubr.f32.gmra.mxu1 %v1070_v55  ;;  %v5310_v46 = vpop.permute.xlu0 %1430  ;;  %v5312_v55 = vpop.permute.xlu1 %1425 }
 0x20a   : > { %4130 = vmatprep.mubr.f32.mxu0 %v1011_v53  ;;  %4220 = vmatprep.mubr.f32.mxu1 %v1071_v25  ;;  %6130 = vst [vmem:[#allocation16_spill] sm:$0xff] %v5310_v46  ;;  %6131 = vst [vmem:[#allocation17_spill] sm:$0xff] %v5312_v55  ;;  %v1028_v53 = vld [vmem:[#allocation3 + $0xf8] sm:$0xff] }
 0x20b   : > { %v1088_v25 = vld [vmem:[#allocation3 + $0x2d8] sm:$0xff] }
 0x20d   : > { %4131 = vmatmul.mubr.f32.gmra.mxu0 %v1012_v30  ;;  %4221 = vmatmul.mubr.f32.gmra.mxu1 %v1072_v51  ;;  %v1029_v30 = vld [vmem:[#allocation3 + $0x100] sm:$0xff] }
 0x20e   : > { %4133 = vmatprep.mubr.f32.mxu0 %v1013_v49  ;;  %4223 = vmatprep.mubr.f32.mxu1 %v1073_v45  ;;  %v1089_v51 = vld [vmem:[#allocation3 + $0x2e0] sm:$0xff]  ;;  %v5314_v49 = vpop.permute.xlu0 %1440  ;;  %v5316_v45 = vpop.permute.xlu1 %1435 }
 0x20f   : > { %6132 = vst [vmem:[#allocation18_spill] sm:$0xff] %v5314_v49  ;;  %6133 = vst [vmem:[#allocation19_spill] sm:$0xff] %v5316_v45 }
 0x211   : > { %4134 = vmatmul.mubr.f32.gmra.mxu0 %v1014_v33  ;;  %4224 = vmatmul.mubr.f32.gmra.mxu1 %v1074_v2  ;;  %v1030_v33 = vld [vmem:[#allocation3 + $0x108] sm:$0xff] }
 0x212   : > { %4136 = vmatprep.mubr.f32.mxu0 %v1015_v3  ;;  %4226 = vmatprep.mubr.f32.mxu1 %v1075_v15  ;;  %v1090_v2 = vld [vmem:[#allocation3 + $0x2e8] sm:$0xff]  ;;  %v1031_v3 = vld [vmem:[#allocation3 + $0x110] sm:$0xff] }
 0x213   : > { %v1091_v15 = vld [vmem:[#allocation3 + $0x2f0] sm:$0xff] }
 0x215   : > { %4137 = vmatmul.mubr.f32.gmra.mxu0 %v1016_v11  ;;  %4227 = vmatmul.mubr.f32.gmra.mxu1 %v1076_v13  ;;  %v1032_v11 = vld [vmem:[#allocation3 + $0x118] sm:$0xff] }
 0x216   : > { %4139 = vmatprep.mubr.f32.mxu0 %v1017_v36  ;;  %4229 = vmatprep.mubr.f32.mxu1 %v1077_v18  ;;  %v1092_v13 = vld [vmem:[#allocation3 + $0x2f8] sm:$0xff]  ;;  %v1033_v36 = vld [vmem:[#allocation3 + $0x120] sm:$0xff] }
 0x217   : > { %v1093_v18 = vld [vmem:[#allocation3 + $0x300] sm:$0xff] }
 0x219   : > { %4140 = vmatmul.mubr.f32.gmra.mxu0 %v1018_v19  ;;  %4230 = vmatmul.mubr.f32.gmra.mxu1 %v1078_v60  ;;  %v5318_v19 = vpop.permute.xlu0 %1450  ;;  %v5320_v60 = vpop.permute.xlu1 %1445 }
 0x21a   : > { %4142 = vmatprep.mubr.f32.mxu0 %v1019_v29  ;;  %4232 = vmatprep.mubr.f32.mxu1 %v1079_v9  ;;  %6134 = vst [vmem:[#allocation20_spill] sm:$0xff] %v5318_v19  ;;  %6135 = vst [vmem:[#allocation21_spill] sm:$0xff] %v5320_v60  ;;  %v1034_v29 = vld [vmem:[#allocation3 + $0x128] sm:$0xff] }
 0x21b   : > { %v1094_v9 = vld [vmem:[#allocation3 + $0x308] sm:$0xff] }
 0x21d   : > { %4143 = vmatmul.mubr.f32.gmra.mxu0 %v1020_v27  ;;  %4233 = vmatmul.mubr.f32.gmra.mxu1 %v1080_v28  ;;  %v1035_v27 = vld [vmem:[#allocation3 + $0x130] sm:$0xff] }
 0x21e   : > { %4145 = vmatprep.mubr.f32.mxu0 %v1021_v12  ;;  %4235 = vmatprep.mubr.f32.mxu1 %v1081_v32  ;;  %v1095_v28 = vld [vmem:[#allocation3 + $0x310] sm:$0xff]  ;;  %v5322_v12 = vpop.permute.xlu0 %1460  ;;  %v5324_v32 = vpop.permute.xlu1 %1455 }
 0x21f   : > { %6136 = vst [vmem:[#allocation22_spill] sm:$0xff] %v5322_v12  ;;  %6137 = vst [vmem:[#allocation23_spill] sm:$0xff] %v5324_v32  ;;  %v4441_v32 = vmov -inf  }
 0x221   : > { %4146 = vmatmul.mubr.f32.gmra.mxu0 %v1022_v21  ;;  %4236 = vmatmul.mubr.f32.gmra.mxu1 %v1082_v43  ;;  %v1036_v21 = vld [vmem:[#allocation3 + $0x138] sm:$0xff] }
 0x222   : > { %4148 = vmatprep.mubr.f32.mxu0 %v1023_v52  ;;  %4238 = vmatprep.mubr.f32.mxu1 %v1083_v41  ;;  %v1096_v43 = vld [vmem:[#allocation3 + $0x318] sm:$0xff]  ;;  %v1037_v52 = vld [vmem:[#allocation3 + $0x140] sm:$0xff] }
 0x223   : > { %v1097_v41 = vld [vmem:[#allocation3 + $0x320] sm:$0xff] }
 0x225   : > { %4149 = vmatmul.mubr.f32.gmra.mxu0 %v1024_v48  ;;  %4239 = vmatmul.mubr.f32.gmra.mxu1 %v1084_v4  ;;  %v1038_v48 = vld [vmem:[#allocation3 + $0x148] sm:$0xff] }
 0x226   : > { %4151 = vmatprep.mubr.f32.mxu0 %v1025_v62  ;;  %4241 = vmatprep.mubr.f32.mxu1 %v1085_v5  ;;  %v1098_v4 = vld [vmem:[#allocation3 + $0x328] sm:$0xff]  ;;  %v1039_v62 = vld [vmem:[#allocation3 + $0x150] sm:$0xff] }
 0x227   : > { %v1099_v5 = vld [vmem:[#allocation3 + $0x330] sm:$0xff] }
 0x229   : > { %4152 = vmatmul.mubr.f32.gmra.mxu0 %v1026_v23  ;;  %4242 = vmatmul.mubr.f32.gmra.mxu1 %v1086_v17  ;;  %v5326_v23 = vpop.permute.xlu0 %1470  ;;  %v5328_v17 = vpop.permute.xlu1 %1465 }
 0x22a   : > { %4154 = vmatprep.mubr.f32.mxu0 %v1027_v20  ;;  %4244 = vmatprep.mubr.f32.mxu1 %v1087_v40  ;;  %6138 = vst [vmem:[#allocation24_spill] sm:$0xff] %v5326_v23  ;;  %6139 = vst [vmem:[#allocation25_spill] sm:$0xff] %v5328_v17  ;;  %v1040_v20 = vld [vmem:[#allocation3 + $0x158] sm:$0xff] }
 0x22b   : > { %v1100_v40 = vld [vmem:[#allocation3 + $0x338] sm:$0xff] }
 0x22d   : > { %4155 = vmatmul.mubr.f32.gmra.mxu0 %v1028_v53  ;;  %4245 = vmatmul.mubr.f32.gmra.mxu1 %v1088_v25  ;;  %v1041_v53 = vld [vmem:[#allocation3 + $0x160] sm:$0xff] }
 0x22e   : > { %4157 = vmatprep.mubr.f32.mxu0 %v1029_v30  ;;  %4247 = vmatprep.mubr.f32.mxu1 %v1089_v51  ;;  %v1101_v25 = vld [vmem:[#allocation3 + $0x340] sm:$0xff]  ;;  %v5330_v30 = vpop.permute.xlu0 %1480  ;;  %v5332_v51 = vpop.permute.xlu1 %1475 }
 0x22f   : > { %6140 = vst [vmem:[#allocation26_spill] sm:$0xff] %v5330_v30  ;;  %6141 = vst [vmem:[#allocation27_spill] sm:$0xff] %v5332_v51 }
 0x231   : > { %4158 = vmatmul.mubr.f32.gmra.mxu0 %v1030_v33  ;;  %4248 = vmatmul.mubr.f32.gmra.mxu1 %v1090_v2  ;;  %v1042_v33 = vld [vmem:[#allocation3 + $0x168] sm:$0xff] }
 0x232   : > { %4160 = vmatprep.mubr.f32.mxu0 %v1031_v3  ;;  %4250 = vmatprep.mubr.f32.mxu1 %v1091_v15  ;;  %v1102_v2 = vld [vmem:[#allocation3 + $0x348] sm:$0xff]  ;;  %v1043_v3 = vld [vmem:[#allocation3 + $0x170] sm:$0xff] }
 0x233   : > { %v1103_v15 = vld [vmem:[#allocation3 + $0x350] sm:$0xff] }
 0x235   : > { %4161 = vmatmul.mubr.f32.gmra.mxu0 %v1032_v11  ;;  %4251 = vmatmul.mubr.f32.gmra.mxu1 %v1092_v13  ;;  %v1044_v11 = vld [vmem:[#allocation3 + $0x178] sm:$0xff] }
 0x236   : > { %4163 = vmatprep.mubr.f32.mxu0 %v1033_v36  ;;  %4253 = vmatprep.mubr.f32.mxu1 %v1093_v18  ;;  %v1104_v13 = vld [vmem:[#allocation3 + $0x358] sm:$0xff]  ;;  %v1045_v36 = vld [vmem:[#allocation3 + $0x180] sm:$0xff] }
 0x237   : > { %v1105_v18 = vld [vmem:[#allocation3 + $0x360] sm:$0xff] }
 0x239   : > { %4164 = vmatmul.mubr.f32.gmra.mxu0 %v1034_v29  ;;  %4254 = vmatmul.mubr.f32.gmra.mxu1 %v1094_v9  ;;  %v5334_v29 = vpop.permute.xlu0 %1490  ;;  %v5336_v9 = vpop.permute.xlu1 %1485 }
 0x23a   : > { %4166 = vmatprep.mubr.f32.mxu0 %v1035_v27  ;;  %4256 = vmatprep.mubr.f32.mxu1 %v1095_v28  ;;  %6142 = vst [vmem:[#allocation28_spill] sm:$0xff] %v5334_v29  ;;  %6143 = vst [vmem:[#allocation29_spill] sm:$0xff] %v5336_v9  ;;  %v1046_v27 = vld [vmem:[#allocation3 + $0x188] sm:$0xff] }
 0x23b   : > { %v1106_v28 = vld [vmem:[#allocation3 + $0x368] sm:$0xff] }
 0x23d   : > { %4167 = vmatmul.mubr.f32.gmra.mxu0 %v1036_v21  ;;  %4257 = vmatmul.mubr.f32.gmra.mxu1 %v1096_v43  ;;  %v1047_v21 = vld [vmem:[#allocation3 + $0x190] sm:$0xff] }
 0x23e   : > { %4169 = vmatprep.mubr.f32.mxu0 %v1037_v52  ;;  %4259 = vmatprep.mubr.f32.mxu1 %v1097_v41  ;;  %v1107_v43 = vld [vmem:[#allocation3 + $0x370] sm:$0xff]  ;;  %v5338_v52 = vpop.permute.xlu0 %1500  ;;  %v5340_v41 = vpop.permute.xlu1 %1495 }
 0x23f   : > { %6144 = vst [vmem:[#allocation30_spill] sm:$0xff] %v5338_v52  ;;  %6145 = vst [vmem:[#allocation31_spill] sm:$0xff] %v5340_v41 }
 0x241   : > { %4170 = vmatmul.mubr.f32.gmra.mxu0 %v1038_v48  ;;  %4260 = vmatmul.mubr.f32.gmra.mxu1 %v1098_v4  ;;  %v1048_v48 = vld [vmem:[#allocation3 + $0x198] sm:$0xff] }
 0x242   : > { %4172 = vmatprep.mubr.f32.mxu0 %v1039_v62  ;;  %4262 = vmatprep.mubr.f32.mxu1 %v1099_v5  ;;  %v1108_v4 = vld [vmem:[#allocation3 + $0x378] sm:$0xff]  ;;  %v1049_v62 = vld [vmem:[#allocation3 + $0x1a0] sm:$0xff] }
 0x243   : > { %v1109_v5 = vld [vmem:[#allocation3 + $0x380] sm:$0xff] }
 0x245   : > { %4173 = vmatmul.mubr.f32.gmra.mxu0 %v1040_v20  ;;  %4263 = vmatmul.mubr.f32.gmra.mxu1 %v1100_v40  ;;  %v1050_v20 = vld [vmem:[#allocation3 + $0x1a8] sm:$0xff] }
 0x246   : > { %4175 = vmatprep.mubr.f32.mxu0 %v1041_v53  ;;  %4265 = vmatprep.mubr.f32.mxu1 %v1101_v25  ;;  %v1110_v40 = vld [vmem:[#allocation3 + $0x388] sm:$0xff]  ;;  %v1051_v53 = vld [vmem:[#allocation3 + $0x1b0] sm:$0xff] }
 0x247   : > { %v1111_v25 = vld [vmem:[#allocation3 + $0x390] sm:$0xff] }
 0x249   : > { %4176 = vmatmul.mubr.f32.gmra.mxu0 %v1042_v33  ;;  %4266 = vmatmul.mubr.f32.gmra.mxu1 %v1102_v2  ;;  %v5342_v33 = vpop.permute.xlu0 %1510  ;;  %v5344_v2 = vpop.permute.xlu1 %1505 }
 0x24a   : > { %4178 = vmatprep.mubr.f32.mxu0 %v1043_v3  ;;  %4268 = vmatprep.mubr.f32.mxu1 %v1103_v15  ;;  %6146 = vst [vmem:[#allocation32_spill] sm:$0xff] %v5342_v33  ;;  %6147 = vst [vmem:[#allocation33_spill] sm:$0xff] %v5344_v2  ;;  %v1052_v3 = vld [vmem:[#allocation3 + $0x1b8] sm:$0xff]  ;;  %v6156_v2 = vlaneseq }
 0x24b   : > { %v1112_v15 = vld [vmem:[#allocation3 + $0x398] sm:$0xff] }
 0x24c   : > { %v2728_v33 = vand.u32 127, %v6156_v2 }
 0x24d   : > { %4179 = vmatmul.mubr.f32.gmra.mxu0 %v1044_v11  ;;  %4269 = vmatmul.mubr.f32.gmra.mxu1 %v1104_v13  ;;  %v1053_v11 = vld [vmem:[#allocation3 + $0x1c0] sm:$0xff] }
 0x24e   : > { %4181 = vmatprep.mubr.f32.mxu0 %v1045_v36  ;;  %4271 = vmatprep.mubr.f32.mxu1 %v1105_v18  ;;  %v1113_v13 = vld [vmem:[#allocation3 + $0x3a0] sm:$0xff]  ;;  %v5346_v36 = vpop.permute.xlu0 %1520  ;;  %v5348_v18 = vpop.permute.xlu1 %1515  ;;  %vm2731_vm1 = vcmp.lt.s32.totalorder %v2728_v33, 32 }
 0x24f   : > { %6148 = vst [vmem:[#allocation34_spill] sm:$0xff] %v5346_v36  ;;  %6149 = vst [vmem:[#allocation35_spill] sm:$0xff] %v5348_v18  ;;  %v5400_v12 = vsel %vm2731_vm1, 0.0, %v4441_v32 }
 0x251   : > { %4182 = vmatmul.mubr.f32.gmra.mxu0 %v1046_v27  ;;  %4272 = vmatmul.mubr.f32.gmra.mxu1 %v1106_v28  ;;  %v1054_v27 = vld [vmem:[#allocation3 + $0x1c8] sm:$0xff] }
 0x252   : > { %4184 = vmatprep.mubr.f32.mxu0 %v1047_v21  ;;  %4274 = vmatprep.mubr.f32.mxu1 %v1107_v43  ;;  %v1114_v28 = vld [vmem:[#allocation3 + $0x3a8] sm:$0xff]  ;;  %v1055_v21 = vld [vmem:[#allocation3 + $0x1d0] sm:$0xff] }
 0x253   : > { %v1115_v43 = vld [vmem:[#allocation3 + $0x3b0] sm:$0xff] }
 0x255   : > { %4185 = vmatmul.mubr.f32.gmra.mxu0 %v1048_v48  ;;  %4275 = vmatmul.mubr.f32.gmra.mxu1 %v1108_v4  ;;  %v1056_v48 = vld [vmem:[#allocation3 + $0x1d8] sm:$0xff] }
 0x256   : > { %4187 = vmatprep.mubr.f32.mxu0 %v1049_v62  ;;  %4277 = vmatprep.mubr.f32.mxu1 %v1109_v5  ;;  %v1116_v4 = vld [vmem:[#allocation3 + $0x3b8] sm:$0xff]  ;;  %v1117_v62 = vld [vmem:[#allocation3 + $0x3c0] sm:$0xff]  ;;  %v5350_v5 = vpop.permute.xlu0 %1530 }
 0x257   : > { %6150 = vst [vmem:[#allocation36_spill] sm:$0xff] %v5350_v5 }
 0x259   : > { %4188 = vmatmul.mubr.f32.gmra.mxu0 %v1050_v20  ;;  %4278 = vmatmul.mubr.f32.gmra.mxu1 %v1110_v40  ;;  %v5352_v20 = vpop.permute.xlu1 %1525  ;;  %v1118_v40 = vld [vmem:[#allocation3 + $0x3c8] sm:$0xff] }
 0x25a   : > { %4190 = vmatprep.mubr.f32.mxu0 %v1051_v53  ;;  %4280 = vmatprep.mubr.f32.mxu1 %v1111_v25  ;;  %6151 = vst [vmem:[#allocation37_spill] sm:$0xff] %v5352_v20  ;;  %v1119_v53 = vld [vmem:[#allocation3 + $0x3d0] sm:$0xff]  ;;  %v5354_v25 = vpop.permute.xlu0 %1540 }
 0x25b   : > { %6152 = vst [vmem:[#allocation38_spill] sm:$0xff] %v5354_v25 }
 0x25d   : > { %4191 = vmatmul.mubr.f32.gmra.mxu0 %v1052_v3  ;;  %4281 = vmatmul.mubr.f32.gmra.mxu1 %v1112_v15  ;;  %v5356_v3 = vpop.permute.xlu1 %1535  ;;  %v1120_v15 = vld [vmem:[#allocation3 + $0x3d8] sm:$0xff] }
 0x25e   : > { %4193 = vmatprep.mubr.f32.mxu0 %v1053_v11  ;;  %4283 = vmatprep.mubr.f32.mxu1 %v1113_v13  ;;  %6153 = vst [vmem:[#allocation39_spill] sm:$0xff] %v5356_v3  ;;  %v1121_v11 = vld [vmem:[#allocation3 + $0x3e0] sm:$0xff]  ;;  %v1122_v13 = vld [vmem:[#allocation3 + $0x3e8] sm:$0xff] }
 0x261   : > { %4194 = vmatmul.mubr.f32.gmra.mxu0 %v1054_v27  ;;  %4284 = vmatmul.mubr.f32.gmra.mxu1 %v1114_v28  ;;  %v1123_v27 = vld [vmem:[#allocation3 + $0x3f0] sm:$0xff]  ;;  %v5358_v28 = vpop.permute.xlu0 %1550 }
 0x262   : > { %4196 = vmatprep.mubr.f32.mxu0 %v1055_v21  ;;  %4286 = vmatprep.mubr.f32.mxu1 %v1115_v43  ;;  %6154 = vst [vmem:[#allocation40_spill] sm:$0xff] %v5358_v28  ;;  %v5360_v21 = vpop.permute.xlu1 %1545  ;;  %v1124_v43 = vld [vmem:[#allocation3 + $0x3f8] sm:$0xff] }
 0x263   : > { %6155 = vst [vmem:[#allocation41_spill] sm:$0xff] %v5360_v21 }
 0x265   : > { %4197 = vmatmul.mubr.f32.gmra.mxu0 %v1056_v48  ;;  %4287 = vmatmul.mubr.f32.gmra.mxu1 %v1116_v4  ;;  %v1561_v48 = vpop.permute.xlu0 %1560 }
 0x266   : > { %4289 = vmatprep.mubr.f32.mxu1 %v1117_v62  ;;  %v1556_v4 = vpop.permute.xlu1 %1555 }
 0x269   : > { %4290 = vmatmul.mubr.f32.gmra.mxu1 %v1118_v40  ;;  %v1571_v62 = vpop.permute.xlu0 %1570 }
 0x26a   : > { %4292 = vmatprep.mubr.f32.mxu1 %v1119_v53  ;;  %v1566_v40 = vpop.permute.xlu1 %1565 }
 0x26d   : > { %4293 = vmatmul.mubr.f32.gmra.mxu1 %v1120_v15  ;;  %v5362_v3 = vpop.permute.xlu0 %1580 }
 0x26e   : > { %4295 = vmatprep.mubr.f32.mxu1 %v1121_v11  ;;  %v5364_v53 = vpop.permute.xlu1 %1575 }
 0x271   : > { %4296 = vmatmul.mubr.f32.gmra.mxu1 %v1122_v13  ;;  %v5366_v15 = vpop.permute.xlu0 %1590 }
 0x272   : > { %4298 = vmatprep.mubr.f32.mxu1 %v1123_v27  ;;  %v5368_v11 = vpop.permute.xlu1 %1585 }
 0x275   : > { %4299 = vmatmul.mubr.f32.gmra.mxu1 %v1124_v43  ;;  %v5370_v25 = vpop.permute.xlu0 %1600 }
 0x276   : > { %v5372_v28 = vpop.permute.xlu1 %1595 }
 0x279   : > { %v5374_v13 = vpop.permute.xlu0 %1610 }
 0x27a   : > { %v5376_v27 = vpop.permute.xlu1 %1605 }
 0x27d   : > { %v5378_v43 = vpop.permute.xlu0 %1620 }
 0x27e   : > { %v5380_v21 = vpop.permute.xlu1 %1615 }
 0x281   : > { %v5382_v20 = vpop.permute.xlu0 %1630 }
 0x282   : > { %v5384_v5 = vpop.permute.xlu1 %1625 }
 0x285   : > { %v5386_v18 = vpop.permute.xlu0 %1640 }
 0x286   : > { %v5388_v36 = vpop.permute.xlu1 %1635 }
 0x289   : > { %v5391_v41 = vpop.permute.xlu0 %1650 }
 0x28a   : > { %v5393_v52 = vpop.permute.xlu1 %1645 }
 0x28d   : > { %v5395_v51 = vpop.permute.xlu0 %1660 }
 0x28e   : > { %v5397_v30 = vpop.permute.xlu1 %1655 }
 0x2b1   : > { %v4111_v9 = vpop.f32.mrf.mxu0  ;;  %v4201_v29 = vpop.f32.mrf.mxu1 }
 0x2b2   : > { %v1965_v17 = vadd.f32 %v4111_v9, %v5077_v1  ;;  %v2265_v23 = vadd.f32 %v4201_v29, %v1561_v48  ;;  %v5406_v9 = vpop.permute.xlu0 %1670  ;;  %v5408_v48 = vpop.permute.xlu1 %1665 }
 0x2b3   : > { %v1959_v60 = vpop.f32.mrf.mxu0  ;;  %v2259_v19 = vpop.f32.mrf.mxu1  ;;  %6157 = vst [vmem:[#allocation42_spill] sm:$0xff] %v5408_v48 }
 0x2b4   : > { %v2599_v2 = vmax.f32 %v1965_v17, 0.0  ;;  %v2659_v45 = vmax.f32 %v2265_v23, 0.0  ;;  %v1960_v49 = vadd.f32 %v1959_v60, %v5095_v10  ;;  %v2260_v55 = vadd.f32 %v2259_v19, %v1556_v4 }
 0x2b5   : > { %v4114_v33 = vpop.f32.mrf.mxu0  ;;  %v4204_v46 = vpop.f32.mrf.mxu1 }
 0x2b6   : > { %v2734_v63 = vadd.f32 %v5400_v12, %v2599_v2  ;;  %v2794_v42 = vadd.f32 %v5400_v12, %v2659_v45  ;;  %v2598_v8 = vmax.f32 %v1960_v49, 0.0  ;;  %v2658_v35 = vmax.f32 %v2260_v55, 0.0  ;;  %v5413_v48 = vpop.permute.xlu0 %1680 }
 0x2b7   : > { %v1975_v1 = vadd.f32 %v4114_v33, %v5090_v38  ;;  %v1969_v29 = vpop.f32.mrf.mxu0  ;;  %v2269_v32 = vpop.f32.mrf.mxu1  ;;  %v2275_v45 = vadd.f32 %v4204_v46, %v1571_v62 }
 0x2b8   : > { %v1970_v23 = vadd.f32 %v1969_v29, %v5111_v59  ;;  %3498 = vmax.xlane.f32.xlu1 %v2794_v42  ;;  %3378 = vmax.xlane.f32.xlu0 %v2734_v63  ;;  %v2733_v60 = vadd.f32 %v5400_v12, %v2598_v8  ;;  %v2793_v55 = vadd.f32 %v5400_v12, %v2658_v35  ;;  %v5417_v29 = vpop.permute.xlu1 %1675 }
 0x2b9   : > { %v4117_v10 = vpop.f32.mrf.mxu0  ;;  %v4207_v19 = vpop.f32.mrf.mxu1  ;;  %v2601_v17 = vmax.f32 %v1975_v1, 0.0  ;;  %v2270_v38 = vadd.f32 %v2269_v32, %v1566_v40  ;;  %v2661_v42 = vmax.f32 %v2275_v45, 0.0 }
 0x2ba   : > { %v2600_v49 = vmax.f32 %v1970_v23, 0.0  ;;  %v1985_v63 = vadd.f32 %v4117_v10, %v5103_v16 }
 0x2bb   : > { %v2279_v4 = vpop.f32.mrf.mxu1  ;;  %v1979_v2 = vpop.f32.mrf.mxu0  ;;  %v2736_v59 = vadd.f32 %v5400_v12, %v2601_v17  ;;  %v2660_v46 = vmax.f32 %v2270_v38, 0.0  ;;  %v2796_v32 = vadd.f32 %v5400_v12, %v2661_v42 }
 0x2bc   : > { %3376 = vmax.xlane.f32.xlu1 %v2733_v60  ;;  %3496 = vmax.xlane.f32.xlu0 %v2793_v55  ;;  %v2735_v8 = vadd.f32 %v5400_v12, %v2600_v49  ;;  %v1980_v35 = vadd.f32 %v1979_v2, %v5121_v26  ;;  %v2603_v23 = vmax.f32 %v1985_v63, 0.0  ;;  %v2285_v60 = vadd.f32 %v4207_v19, %v5362_v3  ;;  %v5425_v55 = vpop.permute.xlu0 %1690  ;;  %v5427_v26 = vpop.permute.xlu1 %1685 }
 0x2bd   : > { %v4210_v33 = vpop.f32.mrf.mxu1  ;;  %v4120_v40 = vpop.f32.mrf.mxu0  ;;  %v2795_v17 = vadd.f32 %v5400_v12, %v2660_v46  ;;  %v2280_v10 = vadd.f32 %v2279_v4, %v5364_v53 }
 0x2be   : > { %v2602_v16 = vmax.f32 %v1980_v35, 0.0  ;;  %v2738_v2 = vadd.f32 %v5400_v12, %v2603_v23  ;;  %v1995_v42 = vadd.f32 %v4120_v40, %v5116_v22  ;;  %v2295_v35 = vadd.f32 %v4210_v33, %v5366_v15 }
 0x2bf   : > { %v2289_v62 = vpop.f32.mrf.mxu1  ;;  %v1989_v49 = vpop.f32.mrf.mxu0  ;;  %v2662_v19 = vmax.f32 %v2280_v10, 0.0 }
 0x2c0   : > { %3382 = vmax.xlane.f32.xlu1 %v2736_v59  ;;  %3380 = vmax.xlane.f32.xlu0 %v2735_v8  ;;  %v2663_v59 = vmax.f32 %v2285_v60, 0.0  ;;  %v2737_v3 = vadd.f32 %v5400_v12, %v2602_v16  ;;  %v1990_v63 = vadd.f32 %v1989_v49, %v5137_v31  ;;  %v2605_v46 = vmax.f32 %v1995_v42, 0.0  ;;  %v5437_v23 = vpop.permute.xlu1 %1695 }
 0x2c1   : > { %v4213_v1 = vpop.f32.mrf.mxu1  ;;  %v4123_v53 = vpop.f32.mrf.mxu0  ;;  %v2797_v22 = vadd.f32 %v5400_v12, %v2662_v19  ;;  %v2290_v60 = vadd.f32 %v2289_v62, %v5368_v11  ;;  %v2665_v10 = vmax.f32 %v2295_v35, 0.0 }
 0x2c2   : > { %v2798_v8 = vadd.f32 %v5400_v12, %v2663_v59  ;;  %v2604_v40 = vmax.f32 %v1990_v63, 0.0  ;;  %v2740_v16 = vadd.f32 %v5400_v12, %v2605_v46  ;;  %v2005_v49 = vadd.f32 %v4123_v53, %v5129_v54 }
 0x2c3   : > { %v2299_v45 = vpop.f32.mrf.mxu1  ;;  %v2664_v33 = vmax.f32 %v2290_v60, 0.0  ;;  %v2800_v62 = vadd.f32 %v5400_v12, %v2665_v10  ;;  %v2305_v63 = vadd.f32 %v4213_v1, %v5370_v25 }
 0x2c4   : > { %3502 = vmax.xlane.f32.xlu1 %v2796_v32  ;;  %3500 = vmax.xlane.f32.xlu0 %v2795_v17  ;;  %v5435_v32 = vpop.permute.xlu0 %1700  ;;  %v1999_v17 = vpop.f32.mrf.mxu0  ;;  %v2739_v15 = vadd.f32 %v5400_v12, %v2604_v40  ;;  %v2607_v19 = vmax.f32 %v2005_v49, 0.0 }
 0x2c5   : > { %v4216_v38 = vpop.f32.mrf.mxu1  ;;  %v5447_v11 = vpop.permute.xlu1 %1705  ;;  %v2799_v54 = vadd.f32 %v5400_v12, %v2664_v33 }
 0x2c6   : > { %v4126_v59 = vpop.f32.mrf.mxu0  ;;  %v2742_v35 = vadd.f32 %v5400_v12, %v2607_v19 }
 0x2c7   : > { %v2309_v4 = vpop.f32.mrf.mxu1  ;;  %v2015_v40 = vadd.f32 %v4126_v59, %v5142_v34 }
 0x2c8   : > { %3386 = vmax.xlane.f32.xlu1 %v2738_v2  ;;  %3384 = vmax.xlane.f32.xlu0 %v2737_v3  ;;  %v2000_v2 = vadd.f32 %v1999_v17, %v5147_v7  ;;  %v5445_v3 = vpop.permute.xlu0 %1710  ;;  %v2009_v46 = vpop.f32.mrf.mxu0 }
 0x2c9   : > { %v4219_v31 = vpop.f32.mrf.mxu1  ;;  %v5459_v17 = vpop.permute.xlu1 %1715  ;;  %v2609_v49 = vmax.f32 %v2015_v40, 0.0 }
 0x2ca   : > { %v2606_v53 = vmax.f32 %v2000_v2, 0.0  ;;  %v2310_v2 = vadd.f32 %v2309_v4, %v5376_v27 }
 0x2cb   : > { %v2319_v42 = vpop.f32.mrf.mxu1 }
 0x2cc   : > { %3506 = vmax.xlane.f32.xlu1 %v2798_v8  ;;  %3504 = vmax.xlane.f32.xlu0 %v2797_v22  ;;  %v2300_v8 = vadd.f32 %v2299_v45, %v5372_v28  ;;  %v2667_v22 = vmax.f32 %v2305_v63, 0.0  ;;  %v5457_v60 = vpop.permute.xlu0 %1720  ;;  %v2741_v25 = vadd.f32 %v5400_v12, %v2606_v53  ;;  %v4129_v28 = vpop.f32.mrf.mxu0  ;;  %v2744_v63 = vadd.f32 %v5400_v12, %v2609_v49 }
 0x2cd   : > { %v5453_v7 = vpop.f32.mrf.mxu1  ;;  %v2025_v53 = vadd.f32 %v4129_v28, %v5155_v39 }
 0x2ce   : > { %v2666_v1 = vmax.f32 %v2300_v8, 0.0  ;;  %v2802_v10 = vadd.f32 %v5400_v12, %v2667_v22  ;;  %v2019_v59 = vpop.f32.mrf.mxu0  ;;  %v2325_v22 = vadd.f32 %v4219_v31, %v5378_v43 }
 0x2cf   : > { %v2329_v45 = vpop.f32.mrf.mxu1  ;;  %v2020_v8 = vadd.f32 %v2019_v59, %v5173_v47 }
 0x2d0   : > { %3390 = vmax.xlane.f32.xlu1 %v2740_v16  ;;  %3388 = vmax.xlane.f32.xlu0 %v2739_v15  ;;  %v2010_v16 = vadd.f32 %v2009_v46, %v5163_v50  ;;  %v2315_v15 = vadd.f32 %v4216_v38, %v5374_v13  ;;  %v2801_v34 = vadd.f32 %v5400_v12, %v2666_v1  ;;  %v5469_v19 = vpop.permute.xlu0 %1730  ;;  %v5471_v50 = vpop.permute.xlu1 %1725  ;;  %v2668_v38 = vmax.f32 %v2310_v2, 0.0 }
 0x2d1   : > { %v4132_v27 = vpop.f32.mrf.mxu0  ;;  %v2610_v1 = vmax.f32 %v2020_v8, 0.0  ;;  %v2671_v49 = vmax.f32 %v2325_v22, 0.0 }
 0x2d2   : > { %v2608_v33 = vmax.f32 %v2010_v16, 0.0  ;;  %v2803_v39 = vadd.f32 %v5400_v12, %v2668_v38  ;;  %v2320_v16 = vadd.f32 %v2319_v42, %v5380_v21 }
 0x2d3   : > { %v2029_v28 = vpop.f32.mrf.mxu0  ;;  %v2745_v43 = vadd.f32 %v5400_v12, %v2610_v1  ;;  %v2806_v42 = vadd.f32 %v5400_v12, %v2671_v49 }
 0x2d4   : > { %3510 = vmax.xlane.f32.xlu1 %v2800_v62  ;;  %3508 = vmax.xlane.f32.xlu0 %v2799_v54  ;;  %v5467_v62 = vpop.f32.mrf.mxu1  ;;  %v2669_v54 = vmax.f32 %v2315_v15, 0.0  ;;  %v2743_v13 = vadd.f32 %v5400_v12, %v2608_v33  ;;  %v5479_v40 = vpop.permute.xlu0 %1740  ;;  %v2035_v15 = vadd.f32 %v4132_v27, %v5168_v44  ;;  %v2670_v31 = vmax.f32 %v2320_v16, 0.0 }
 0x2d5   : > { %v4135_v33 = vpop.f32.mrf.mxu0 }
 0x2d6   : > { %v2339_v4 = vpop.f32.mrf.mxu1  ;;  %v2804_v46 = vadd.f32 %v5400_v12, %v2669_v54  ;;  %v2335_v54 = vadd.f32 %v5453_v7, %v5382_v20  ;;  %v2805_v44 = vadd.f32 %v5400_v12, %v2670_v31 }
 0x2d7   : > { %v2340_v49 = vadd.f32 %v2339_v4, %v5388_v36 }
 0x2d8   : > { %3394 = vmax.xlane.f32.xlu1 %v2742_v35  ;;  %3392 = vmax.xlane.f32.xlu0 %v2741_v25  ;;  %v2611_v35 = vmax.f32 %v2025_v53, 0.0  ;;  %v5481_v25 = vpop.permute.xlu1 %1735  ;;  %v4228_v47 = vpop.f32.mrf.mxu1  ;;  %v2673_v27 = vmax.f32 %v2335_v54, 0.0 }
 0x2d9   : > { %v5489_v59 = vpop.permute.xlu0 %1750 }
 0x2da   : > { %v2349_v2 = vpop.f32.mrf.mxu1  ;;  %v2808_v1 = vadd.f32 %v5400_v12, %v2673_v27 }
 0x2db   : > { %v2350_v27 = vadd.f32 %v2349_v2, %v5393_v52 }
 0x2dc   : > { %3514 = vmax.xlane.f32.xlu1 %v2802_v10  ;;  %3512 = vmax.xlane.f32.xlu0 %v2801_v34  ;;  %v2746_v10 = vadd.f32 %v5400_v12, %v2611_v35  ;;  %v2030_v34 = vadd.f32 %v2029_v28, %v5189_v57  ;;  %v5491_v21 = vpop.permute.xlu1 %1745  ;;  %v2039_v57 = vpop.f32.mrf.mxu0  ;;  %v2345_v28 = vadd.f32 %v5467_v62, %v5386_v18  ;;  %v2674_v62 = vmax.f32 %v2340_v49, 0.0 }
 0x2dd   : > { %v5498_v38 = vpop.f32.mrf.mxu1  ;;  %v5502_v35 = vpop.permute.xlu0 %1760 }
 0x2de   : > { %v2612_v53 = vmax.f32 %v2030_v34, 0.0 }
 0x2e0   : > { %3398 = vmax.xlane.f32.xlu1 %v2744_v63  ;;  %3396 = vmax.xlane.f32.xlu0 %v2743_v13  ;;  %v2613_v63 = vmax.f32 %v2035_v15, 0.0  ;;  %v2330_v13 = vadd.f32 %v2329_v45, %v5384_v5  ;;  %v5504_v22 = vpop.permute.xlu1 %1755  ;;  %v2747_v20 = vadd.f32 %v5400_v12, %v2612_v53  ;;  %v4138_v5 = vpop.f32.mrf.mxu0  ;;  %v2355_v53 = vadd.f32 %v4228_v47, %v5391_v41 }
 0x2e1   : > { %v2359_v45 = vpop.f32.mrf.mxu1  ;;  %v2676_v47 = vmax.f32 %v2350_v27, 0.0 }
 0x2e2   : > { %v2748_v8 = vadd.f32 %v5400_v12, %v2613_v63  ;;  %v2672_v7 = vmax.f32 %v2330_v13, 0.0  ;;  %v2049_v15 = vpop.f32.mrf.mxu0 }
 0x2e3   : > { %v2050_v63 = vadd.f32 %v2049_v15, %v5215_v14  ;;  %v2360_v15 = vadd.f32 %v2359_v45, %v5397_v30 }
 0x2e4   : > { %3518 = vmax.xlane.f32.xlu1 %v2804_v46  ;;  %3516 = vmax.xlane.f32.xlu0 %v2803_v39  ;;  %v2045_v46 = vadd.f32 %v4135_v33, %v5181_v56  ;;  %v2040_v39 = vadd.f32 %v2039_v57, %v5199_v0  ;;  %v2807_v56 = vadd.f32 %v5400_v12, %v2672_v7  ;;  %v5515_v0 = vpop.permute.xlu0 %1770  ;;  %v5517_v31 = vpop.permute.xlu1 %1765  ;;  %v2675_v33 = vmax.f32 %v2345_v28, 0.0 }
 0x2e5   : > { %v4141_v36 = vpop.f32.mrf.mxu0  ;;  %v2677_v7 = vmax.f32 %v2355_v53, 0.0 }
 0x2e6   : > { %v2615_v16 = vmax.f32 %v2045_v46, 0.0  ;;  %v2810_v54 = vadd.f32 %v5400_v12, %v2675_v33 }
 0x2e7   : > { %v2059_v46 = vpop.f32.mrf.mxu0  ;;  %v2812_v2 = vadd.f32 %v5400_v12, %v2677_v7 }
 0x2e8   : > { %3402 = vmax.xlane.f32.xlu1 %v2746_v10  ;;  %3400 = vmax.xlane.f32.xlu0 %v2745_v43  ;;  %v2614_v10 = vmax.f32 %v2040_v39, 0.0  ;;  %v5513_v43 = vpop.f32.mrf.mxu1  ;;  %v2750_v34 = vadd.f32 %v5400_v12, %v2615_v16  ;;  %v5525_v13 = vpop.permute.xlu0 %1780  ;;  %v2065_v39 = vadd.f32 %v4141_v36, %v5207_v6  ;;  %v2811_v6 = vadd.f32 %v5400_v12, %v2676_v47  ;;  %v6159_v47 = vld [vmem:[#allocation6_spill] sm:$0xff] }
 0x2e9   : > { %v5527_v57 = vpop.permute.xlu1 %1775  ;;  %v2375_v53 = vadd.f32 %v5513_v43, %v5406_v9 }
 0x2ea   : > { %v2749_v18 = vadd.f32 %v5400_v12, %v2614_v10  ;;  %v2369_v4 = vpop.f32.mrf.mxu1  ;;  %v2365_v10 = vadd.f32 %v5498_v38, %v5395_v51  ;;  %v2678_v38 = vmax.f32 %v2360_v15, 0.0 }
 0x2ec   : > { %3522 = vmax.xlane.f32.xlu1 %v2806_v42  ;;  %3520 = vmax.xlane.f32.xlu0 %v2805_v44  ;;  %v2055_v42 = vadd.f32 %v4138_v5, %v5194_v61  ;;  %v2809_v61 = vadd.f32 %v5400_v12, %v2674_v62  ;;  %v4237_v14 = vpop.f32.mrf.mxu1  ;;  %v2060_v5 = vadd.f32 %v2059_v46, %v5225_v24  ;;  %v5535_v28 = vpop.permute.xlu0 %1790 }
 0x2ed   : > { %v5537_v52 = vpop.permute.xlu1 %1785 }
 0x2ee   : > { %v2617_v44 = vmax.f32 %v2055_v42, 0.0  ;;  %v2379_v16 = vpop.f32.mrf.mxu1  ;;  %v2618_v49 = vmax.f32 %v2060_v5, 0.0  ;;  %v2679_v42 = vmax.f32 %v2365_v10, 0.0 }
 0x2f0   : > { %3406 = vmax.xlane.f32.xlu1 %v2748_v8  ;;  %3404 = vmax.xlane.f32.xlu0 %v2747_v20  ;;  %v2616_v8 = vmax.f32 %v2050_v63, 0.0  ;;  %v2752_v20 = vadd.f32 %v5400_v12, %v2617_v44  ;;  %v5548_v62 = vpop.permute.xlu0 %1800  ;;  %v2753_v51 = vadd.f32 %v5400_v12, %v2618_v49  ;;  %v2385_v49 = vadd.f32 %v4237_v14, %v5413_v48 }
 0x2f1   : > { %v5550_v63 = vpop.permute.xlu1 %1795 }
 0x2f2   : > { %v2751_v41 = vadd.f32 %v5400_v12, %v2616_v8  ;;  %v6158_v8 = vld [vmem:[#allocation42_spill] sm:$0xff] }
 0x2f3   : > { %v2370_v27 = vadd.f32 %v2369_v4, %v6158_v8 }
 0x2f4   : > { %3526 = vmax.xlane.f32.xlu1 %v2808_v1  ;;  %3524 = vmax.xlane.f32.xlu0 %v2807_v56  ;;  %v4144_v1 = vpop.f32.mrf.mxu0  ;;  %v2619_v56 = vmax.f32 %v2065_v39, 0.0 }
 0x2f5   : > { %v5563_v7 = vpop.permute.xlu1 %1805  ;;  %v2680_v43 = vmax.f32 %v2370_v27, 0.0 }
 0x2f6   : > { %v2069_v24 = vpop.f32.mrf.mxu0  ;;  %v2754_v33 = vadd.f32 %v5400_v12, %v2619_v56 }
 0x2f7   : > { %v2070_v36 = vadd.f32 %v2069_v24, %v5241_v37  ;;  %v5561_v37 = vpop.permute.xlu0 %1810 }
 0x2f8   : > { %3410 = vmax.xlane.f32.xlu1 %v2750_v34  ;;  %3408 = vmax.xlane.f32.xlu0 %v2749_v18  ;;  %v5544_v34 = vpop.f32.mrf.mxu1  ;;  %v2075_v18 = vadd.f32 %v4144_v1, %v5220_v58  ;;  %v4147_v30 = vpop.f32.mrf.mxu0  ;;  %v2813_v58 = vadd.f32 %v5400_v12, %v2678_v38  ;;  %v6160_v1 = vld [vmem:[#allocation8_spill] sm:$0xff] }
 0x2f9   : > { %v2085_v5 = vadd.f32 %v4147_v30, %v6159_v47  ;;  %v5573_v24 = vpop.permute.xlu1 %1815  ;;  %v2683_v30 = vmax.f32 %v2385_v49, 0.0 }
 0x2fa   : > { %v2389_v45 = vpop.f32.mrf.mxu1  ;;  %v2621_v44 = vmax.f32 %v2075_v18, 0.0  ;;  %v2079_v46 = vpop.f32.mrf.mxu0  ;;  %v2380_v18 = vadd.f32 %v2379_v16, %v5417_v29 }
 0x2fb   : > { %v5571_v15 = vpop.permute.xlu0 %1820  ;;  %v2818_v16 = vadd.f32 %v5400_v12, %v2683_v30 }
 0x2fc   : > { %3530 = vmax.xlane.f32.xlu1 %v2810_v54  ;;  %3528 = vmax.xlane.f32.xlu0 %v2809_v61  ;;  %v2814_v54 = vadd.f32 %v5400_v12, %v2679_v42  ;;  %v2620_v61 = vmax.f32 %v2070_v36, 0.0  ;;  %v2756_v39 = vadd.f32 %v5400_v12, %v2621_v44  ;;  %v4150_v4 = vpop.f32.mrf.mxu0  ;;  %v2682_v14 = vmax.f32 %v2380_v18, 0.0 }
 0x2fd   : > { %v5583_v29 = vpop.permute.xlu1 %1825 }
 0x2fe   : > { %v2755_v9 = vadd.f32 %v5400_v12, %v2620_v61 }
 0x2ff   : > { %v5581_v27 = vpop.permute.xlu0 %1830 }
 0x300   : > { %3414 = vmax.xlane.f32.xlu1 %v2752_v20  ;;  %3412 = vmax.xlane.f32.xlu0 %v2751_v41  ;;  %v5559_v20 = vpop.f32.mrf.mxu1  ;;  %v2681_v41 = vmax.f32 %v2375_v53, 0.0  ;;  %v6162_v53 = vld [vmem:[#allocation10_spill] sm:$0xff] }
 0x301   : > { %v5596_v49 = vpop.permute.xlu1 %1835 }
 0x302   : > { %v2399_v56 = vpop.f32.mrf.mxu1  ;;  %v2816_v10 = vadd.f32 %v5400_v12, %v2681_v41  ;;  %v2817_v41 = vadd.f32 %v5400_v12, %v2682_v14 }
 0x304   : > { %3534 = vmax.xlane.f32.xlu1 %v2812_v2  ;;  %3532 = vmax.xlane.f32.xlu0 %v2811_v6  ;;  %v2080_v2 = vadd.f32 %v2079_v46, %v6160_v1  ;;  %v2623_v6 = vmax.f32 %v2085_v5, 0.0  ;;  %v4246_v38 = vpop.f32.mrf.mxu1  ;;  %v2390_v5 = vadd.f32 %v2389_v45, %v5427_v26 }
 0x306   : > { %v2622_v42 = vmax.f32 %v2080_v2, 0.0  ;;  %v2758_v36 = vadd.f32 %v5400_v12, %v2623_v6  ;;  %v2409_v8 = vpop.f32.mrf.mxu1  ;;  %v5594_v6 = vpop.permute.xlu0 %1840 }
 0x308   : > { %3418 = vmax.xlane.f32.xlu1 %v2754_v33  ;;  %3416 = vmax.xlane.f32.xlu0 %v2753_v51  ;;  %v2815_v33 = vadd.f32 %v5400_v12, %v2680_v43  ;;  %v2089_v51 = vpop.f32.mrf.mxu0  ;;  %v2757_v48 = vadd.f32 %v5400_v12, %v2622_v42  ;;  %v5590_v43 = vpop.f32.mrf.mxu1 }
 0x30a   : > { %v4153_v61 = vpop.f32.mrf.mxu0  ;;  %v2419_v45 = vpop.f32.mrf.mxu1 }
 0x30c   : > { %3538 = vmax.xlane.f32.xlu1 %v2814_v54  ;;  %3536 = vmax.xlane.f32.xlu0 %v2813_v58  ;;  %v6161_v54 = vld [vmem:[#allocation7_spill] sm:$0xff]  ;;  %v2090_v58 = vadd.f32 %v2089_v51, %v6162_v53  ;;  %v5605_v14 = vpop.f32.mrf.mxu1  ;;  %v5607_v53 = vpop.permute.xlu0 %1850 }
 0x30d   : > { %v2095_v44 = vadd.f32 %v4150_v4, %v6161_v54  ;;  %v6163_v4 = vld [vmem:[#allocation9_spill] sm:$0xff] }
 0x30e   : > { %v2624_v47 = vmax.f32 %v2090_v58, 0.0  ;;  %v5609_v58 = vpop.permute.xlu1 %1845 }
 0x30f   : > { %v2625_v46 = vmax.f32 %v2095_v44, 0.0  ;;  %v2400_v44 = vadd.f32 %v2399_v56, %v5437_v23  ;;  %v2429_v56 = vpop.f32.mrf.mxu1 }
 0x310   : > { %3422 = vmax.xlane.f32.xlu1 %v2756_v39  ;;  %3420 = vmax.xlane.f32.xlu0 %v2755_v9  ;;  %v2395_v39 = vadd.f32 %v5544_v34, %v5425_v55  ;;  %v2099_v9 = vpop.f32.mrf.mxu0  ;;  %v2759_v55 = vadd.f32 %v5400_v12, %v2624_v47  ;;  %v2684_v34 = vmax.f32 %v2390_v5, 0.0 }
 0x311   : > { %v2760_v1 = vadd.f32 %v5400_v12, %v2625_v46  ;;  %v6165_v46 = vld [vmem:[#allocation12_spill] sm:$0xff] }
 0x312   : > { %v2685_v2 = vmax.f32 %v2395_v39, 0.0  ;;  %v4156_v26 = vpop.f32.mrf.mxu0  ;;  %v2819_v30 = vadd.f32 %v5400_v12, %v2684_v34  ;;  %v2410_v34 = vadd.f32 %v2409_v8, %v5447_v11 }
 0x313   : > { %v2115_v39 = vadd.f32 %v4156_v26, %v6165_v46  ;;  %v2425_v46 = vadd.f32 %v5590_v43, %v5457_v60 }
 0x314   : > { %3542 = vmax.xlane.f32.xlu1 %v2816_v10  ;;  %3540 = vmax.xlane.f32.xlu0 %v2815_v33  ;;  %v2105_v10 = vadd.f32 %v4153_v61, %v6163_v4  ;;  %v6164_v33 = vld [vmem:[#allocation11_spill] sm:$0xff]  ;;  %v2820_v18 = vadd.f32 %v5400_v12, %v2685_v2  ;;  %v5617_v2 = vpop.permute.xlu0 %1860  ;;  %v5619_v4 = vpop.permute.xlu1 %1855 }
 0x315   : > { %v2100_v42 = vadd.f32 %v2099_v9, %v6164_v33  ;;  %v2629_v9 = vmax.f32 %v2115_v39, 0.0 }
 0x316   : > { %v2627_v51 = vmax.f32 %v2105_v10, 0.0 }
 0x317   : > { %v2626_v54 = vmax.f32 %v2100_v42, 0.0  ;;  %v5623_v42 = vpop.f32.mrf.mxu1  ;;  %v2764_v26 = vadd.f32 %v5400_v12, %v2629_v9  ;;  %v6169_v9 = vld [vmem:[#allocation16_spill] sm:$0xff] }
 0x318   : > { %3426 = vmax.xlane.f32.xlu1 %v2758_v36  ;;  %3424 = vmax.xlane.f32.xlu0 %v2757_v48  ;;  %v2405_v36 = vadd.f32 %v5559_v20, %v5435_v32  ;;  %v2109_v48 = vpop.f32.mrf.mxu0  ;;  %v2762_v61 = vadd.f32 %v5400_v12, %v2627_v51  ;;  %v2686_v20 = vmax.f32 %v2400_v44, 0.0  ;;  %v6167_v51 = vld [vmem:[#allocation14_spill] sm:$0xff]  ;;  %v5631_v11 = vpop.permute.xlu1 %1865 }
 0x319   : > { %v2761_v32 = vadd.f32 %v5400_v12, %v2626_v54 }
 0x31a   : > { %v4159_v23 = vpop.f32.mrf.mxu0  ;;  %v2821_v10 = vadd.f32 %v5400_v12, %v2686_v20  ;;  %v2420_v20 = vadd.f32 %v2419_v45, %v5459_v17 }
 0x31c   : > { %3546 = vmax.xlane.f32.xlu1 %v2818_v16  ;;  %3544 = vmax.xlane.f32.xlu0 %v2817_v41  ;;  %v2687_v16 = vmax.f32 %v2405_v36, 0.0  ;;  %v6166_v41 = vld [vmem:[#allocation13_spill] sm:$0xff]  ;;  %v2119_v33 = vpop.f32.mrf.mxu0  ;;  %v2125_v36 = vadd.f32 %v4159_v23, %v6167_v51  ;;  %v2690_v43 = vmax.f32 %v2420_v20, 0.0  ;;  %v2435_v51 = vadd.f32 %v5605_v14, %v5469_v19  ;;  %v6172_v20 = vld [vmem:[#allocation19_spill] sm:$0xff] }
 0x31d   : > { %v2110_v47 = vadd.f32 %v2109_v48, %v6166_v41  ;;  %v2439_v48 = vpop.f32.mrf.mxu1 }
 0x31e   : > { %v2822_v5 = vadd.f32 %v5400_v12, %v2687_v16  ;;  %v4162_v44 = vpop.f32.mrf.mxu0  ;;  %v2631_v16 = vmax.f32 %v2125_v36, 0.0  ;;  %v2825_v36 = vadd.f32 %v5400_v12, %v2690_v43 }
 0x320   : > { %3430 = vmax.xlane.f32.xlu1 %v2760_v1  ;;  %3428 = vmax.xlane.f32.xlu0 %v2759_v55  ;;  %v2415_v1 = vadd.f32 %v4246_v38, %v5445_v3  ;;  %v2628_v55 = vmax.f32 %v2110_v47, 0.0  ;;  %v2688_v38 = vmax.f32 %v2410_v34, 0.0  ;;  %v2129_v41 = vpop.f32.mrf.mxu0  ;;  %v5638_v47 = vpop.f32.mrf.mxu1  ;;  %v2766_v23 = vadd.f32 %v5400_v12, %v2631_v16  ;;  %v6170_v34 = vld [vmem:[#allocation17_spill] sm:$0xff] }
 0x321   : > { %v2130_v17 = vadd.f32 %v2129_v41, %v6170_v34 }
 0x322   : > { %v2763_v3 = vadd.f32 %v5400_v12, %v2628_v55  ;;  %v2823_v39 = vadd.f32 %v5400_v12, %v2688_v38  ;;  %v5644_v55 = vpop.permute.xlu1 %1875  ;;  %v4165_v45 = vpop.f32.mrf.mxu0  ;;  %v2430_v38 = vadd.f32 %v2429_v56, %v5471_v50 }
 0x324   : > { %3550 = vmax.xlane.f32.xlu1 %v2820_v18  ;;  %3548 = vmax.xlane.f32.xlu0 %v2819_v30  ;;  %v2689_v18 = vmax.f32 %v2415_v1, 0.0  ;;  %v6168_v30 = vld [vmem:[#allocation15_spill] sm:$0xff]  ;;  %v2135_v1 = vadd.f32 %v4162_v44, %v6169_v9 }
 0x325   : > { %v2120_v54 = vadd.f32 %v2119_v33, %v6168_v30  ;;  %v5648_v33 = vpop.f32.mrf.mxu1  ;;  %v2139_v30 = vpop.f32.mrf.mxu0 }
 0x326   : > { %v2824_v8 = vadd.f32 %v5400_v12, %v2689_v18  ;;  %v2633_v18 = vmax.f32 %v2135_v1, 0.0  ;;  %v5658_v44 = vpop.permute.xlu1 %1885  ;;  %v2140_v50 = vadd.f32 %v2139_v30, %v6172_v20  ;;  %v2445_v1 = vadd.f32 %v5623_v42, %v5479_v40 }
 0x327   : > { %v4168_v56 = vpop.f32.mrf.mxu0 }
 0x328   : > { %3434 = vmax.xlane.f32.xlu1 %v2762_v61  ;;  %3432 = vmax.xlane.f32.xlu0 %v2761_v32  ;;  %v5629_v61 = vpop.permute.xlu0 %1870  ;;  %v2630_v32 = vmax.f32 %v2120_v54, 0.0  ;;  %v5655_v54 = vpop.f32.mrf.mxu1  ;;  %v2768_v16 = vadd.f32 %v5400_v12, %v2633_v18  ;;  %v2634_v34 = vmax.f32 %v2140_v50, 0.0  ;;  %v2695_v42 = vmax.f32 %v2445_v1, 0.0 }
 0x32a   : > { %v2765_v60 = vadd.f32 %v5400_v12, %v2630_v32  ;;  %v2692_v32 = vmax.f32 %v2430_v38, 0.0  ;;  %v5671_v41 = vpop.f32.mrf.mxu1  ;;  %v2769_v38 = vadd.f32 %v5400_v12, %v2634_v34 }
 0x32c   : > { %3554 = vmax.xlane.f32.xlu1 %v2822_v5  ;;  %3552 = vmax.xlane.f32.xlu0 %v2821_v10  ;;  %v2691_v5 = vmax.f32 %v2425_v46, 0.0  ;;  %v5642_v10 = vpop.permute.xlu0 %1880  ;;  %v2693_v46 = vmax.f32 %v2435_v51, 0.0  ;;  %v2827_v43 = vadd.f32 %v5400_v12, %v2692_v32  ;;  %v6173_v51 = vld [vmem:[#allocation20_spill] sm:$0xff]  ;;  %v2455_v32 = vadd.f32 %v5638_v47, %v5489_v59 }
 0x32e   : > { %v2697_v47 = vmax.f32 %v2455_v32, 0.0 }
 0x330   : > { %3438 = vmax.xlane.f32.xlu1 %v2764_v26  ;;  %3436 = vmax.xlane.f32.xlu0 %v2763_v3  ;;  %v2826_v26 = vadd.f32 %v5400_v12, %v2691_v5  ;;  %v2632_v3 = vmax.f32 %v2130_v17, 0.0  ;;  %v2828_v5 = vadd.f32 %v5400_v12, %v2693_v46  ;;  %v2440_v17 = vadd.f32 %v2439_v48, %v5481_v25  ;;  %v6174_v48 = vld [vmem:[#allocation21_spill] sm:$0xff] }
 0x332   : > { %v2767_v14 = vadd.f32 %v5400_v12, %v2632_v3  ;;  %v2694_v25 = vmax.f32 %v2440_v17, 0.0 }
 0x334   : > { %3558 = vmax.xlane.f32.xlu1 %v2824_v8  ;;  %3556 = vmax.xlane.f32.xlu0 %v2823_v39  ;;  %v5660_v8 = vpop.permute.xlu0 %1890  ;;  %v6171_v39 = vld [vmem:[#allocation18_spill] sm:$0xff]  ;;  %v2829_v50 = vadd.f32 %v5400_v12, %v2694_v25 }
 0x335   : > { %v2145_v19 = vadd.f32 %v4165_v45, %v6171_v39  ;;  %v2149_v45 = vpop.f32.mrf.mxu0 }
 0x336   : > { %v2150_v30 = vadd.f32 %v2149_v45, %v6174_v48 }
 0x337   : > { %v2635_v9 = vmax.f32 %v2145_v19, 0.0  ;;  %v2830_v19 = vadd.f32 %v5400_v12, %v2695_v42 }
 0x338   : > { %3442 = vmax.xlane.f32.xlu1 %v2766_v23  ;;  %3440 = vmax.xlane.f32.xlu0 %v2765_v60 }
 0x339   : > { %v2770_v40 = vadd.f32 %v5400_v12, %v2635_v9 }
 0x33c   : > { %3562 = vmax.xlane.f32.xlu1 %v2826_v26  ;;  %3560 = vmax.xlane.f32.xlu0 %v2825_v36  ;;  %v5682_v26 = vpop.f32.mrf.mxu1  ;;  %v2155_v36 = vadd.f32 %v4168_v56, %v6173_v51  ;;  %v2636_v56 = vmax.f32 %v2150_v30, 0.0  ;;  %v2832_v51 = vadd.f32 %v5400_v12, %v2697_v47  ;;  %v2460_v30 = vadd.f32 %v5671_v41, %v5504_v22  ;;  %v6178_v41 = vld [vmem:[#allocation25_spill] sm:$0xff] }
 0x33e   : > { %v5692_v46 = vpop.f32.mrf.mxu1  ;;  %v2771_v17 = vadd.f32 %v5400_v12, %v2636_v56  ;;  %v2698_v22 = vmax.f32 %v2460_v30, 0.0 }
 0x340   : > { %3446 = vmax.xlane.f32.xlu1 %v2768_v16  ;;  %3444 = vmax.xlane.f32.xlu0 %v2767_v14  ;;  %v4171_v16 = vpop.f32.mrf.mxu0  ;;  %v2637_v14 = vmax.f32 %v2155_v36, 0.0  ;;  %v5704_v9 = vpop.f32.mrf.mxu1 }
 0x341   : > { %v3499_v23 = vpop.xlane.xlu1 %3498  ;;  %v3379_v60 = vpop.xlane.xlu0 %3378 }
 0x342   : > { %3694 = vst.msk [vmem:[%s5669_s13 + $0x1e8] sm:$0xff] %vm3632_vm2, %v3499_v23  ;;  %3634 = vst.msk [vmem:[%s5669_s13 + $0x8] sm:$0xff] %vm3632_vm2, %v3379_v60  ;;  %v2450_v23 = vadd.f32 %v5648_v33, %v5491_v21  ;;  %v2772_v59 = vadd.f32 %v5400_v12, %v2637_v14  ;;  %v6175_v60 = vld [vmem:[#allocation22_spill] sm:$0xff]  ;;  %v6176_v33 = vld [vmem:[#allocation23_spill] sm:$0xff] }
 0x343   : > { %v6177_v14 = vld [vmem:[#allocation24_spill] sm:$0xff] }
 0x344   : > { %3566 = vmax.xlane.f32.xlu1 %v2828_v5  ;;  %3564 = vmax.xlane.f32.xlu0 %v2827_v43  ;;  %v2159_v5 = vpop.f32.mrf.mxu0  ;;  %v2165_v43 = vadd.f32 %v4171_v16, %v6175_v60  ;;  %v2696_v21 = vmax.f32 %v2450_v23, 0.0  ;;  %v2475_v60 = vadd.f32 %v5682_v26, %v5515_v0 }
 0x345   : > { %v3377_v18 = vpop.xlane.xlu1 %3376  ;;  %v3497_v3 = vpop.xlane.xlu0 %3496  ;;  %v2160_v45 = vadd.f32 %v2159_v5, %v6176_v33 }
 0x346   : > { %3633 = vst.msk [vmem:[%s5669_s13] sm:$0xff] %vm3632_vm2, %v3377_v18  ;;  %3693 = vst.msk [vmem:[%s5669_s13 + $0x1e0] sm:$0xff] %vm3632_vm2, %v3497_v3  ;;  %v4174_v18 = vpop.f32.mrf.mxu0  ;;  %v2639_v36 = vmax.f32 %v2165_v43, 0.0  ;;  %v2465_v3 = vadd.f32 %v5655_v54, %v5502_v35  ;;  %v2831_v25 = vadd.f32 %v5400_v12, %v2696_v21  ;;  %v2470_v21 = vadd.f32 %v5692_v46, %v5517_v31  ;;  %v6180_v46 = vld [vmem:[#allocation27_spill] sm:$0xff] }
 0x347   : > { %v2638_v48 = vmax.f32 %v2160_v45, 0.0  ;;  %v2175_v32 = vadd.f32 %v4174_v18, %v6177_v14  ;;  %v2701_v26 = vmax.f32 %v2475_v60, 0.0 }
 0x348   : > { %3450 = vmax.xlane.f32.xlu1 %v2770_v40  ;;  %3448 = vmax.xlane.f32.xlu0 %v2769_v38  ;;  %v5714_v40 = vpop.f32.mrf.mxu1  ;;  %v2169_v16 = vpop.f32.mrf.mxu0  ;;  %v2774_v35 = vadd.f32 %v5400_v12, %v2639_v36  ;;  %v2699_v54 = vmax.f32 %v2465_v3, 0.0  ;;  %v2700_v31 = vmax.f32 %v2470_v21, 0.0 }
 0x349   : > { %v3383_v39 = vpop.xlane.xlu1 %3382  ;;  %v3381_v20 = vpop.xlane.xlu0 %3380  ;;  %v2170_v56 = vadd.f32 %v2169_v16, %v6178_v41  ;;  %v2641_v47 = vmax.f32 %v2175_v32, 0.0  ;;  %v2836_v16 = vadd.f32 %v5400_v12, %v2701_v26 }
 0x34a   : > { %3636 = vst.msk [vmem:[%s5669_s13 + $0x18] sm:$0xff] %vm3632_vm2, %v3383_v39  ;;  %3635 = vst.msk [vmem:[%s5669_s13 + $0x10] sm:$0xff] %vm3632_vm2, %v3381_v20  ;;  %v5726_v39 = vpop.f32.mrf.mxu1  ;;  %v4177_v23 = vpop.f32.mrf.mxu0  ;;  %v2835_v14 = vadd.f32 %v5400_v12, %v2700_v31  ;;  %v6183_v31 = vld [vmem:[#allocation30_spill] sm:$0xff] }
 0x34b   : > { %v2776_v0 = vadd.f32 %v5400_v12, %v2641_v47 }
 0x34c   : > { %3570 = vmax.xlane.f32.xlu1 %v2830_v19  ;;  %3568 = vmax.xlane.f32.xlu0 %v2829_v50  ;;  %v2773_v50 = vadd.f32 %v5400_v12, %v2638_v48  ;;  %v5736_v5 = vpop.f32.mrf.mxu1  ;;  %v2179_v33 = vpop.f32.mrf.mxu0 }
 0x34d   : > { %v3503_v1 = vpop.xlane.xlu1 %3502  ;;  %v3501_v34 = vpop.xlane.xlu0 %3500 }
 0x34e   : > { %3696 = vst.msk [vmem:[%s5669_s13 + $0x1f8] sm:$0xff] %vm3632_vm2, %v3503_v1  ;;  %3695 = vst.msk [vmem:[%s5669_s13 + $0x1f0] sm:$0xff] %vm3632_vm2, %v3501_v34  ;;  %v2833_v34 = vadd.f32 %v5400_v12, %v2698_v22  ;;  %v5748_v45 = vpop.f32.mrf.mxu1 }
 0x350   : > { %3454 = vmax.xlane.f32.xlu1 %v2772_v59  ;;  %3452 = vmax.xlane.f32.xlu0 %v2771_v17  ;;  %v2834_v59 = vadd.f32 %v5400_v12, %v2699_v54  ;;  %v2640_v17 = vmax.f32 %v2170_v56, 0.0  ;;  %v5758_v48 = vpop.f32.mrf.mxu1  ;;  %v6181_v56 = vld [vmem:[#allocation28_spill] sm:$0xff] }
 0x351   : > { %v3387_v42 = vpop.xlane.xlu1 %3386  ;;  %v3385_v38 = vpop.xlane.xlu0 %3384 }
 0x352   : > { %3638 = vst.msk [vmem:[%s5669_s13 + $0x28] sm:$0xff] %vm3632_vm2, %v3387_v42  ;;  %3637 = vst.msk [vmem:[%s5669_s13 + $0x20] sm:$0xff] %vm3632_vm2, %v3385_v38  ;;  %v6179_v42 = vld [vmem:[#allocation26_spill] sm:$0xff]  ;;  %v2775_v3 = vadd.f32 %v5400_v12, %v2640_v17  ;;  %v2180_v38 = vadd.f32 %v2179_v33, %v6180_v46  ;;  %v5770_v22 = vpop.f32.mrf.mxu1  ;;  %v2495_v33 = vadd.f32 %v5726_v39, %v5535_v28 }
 0x354   : > { %3574 = vmax.xlane.f32.xlu1 %v2832_v51  ;;  %3572 = vmax.xlane.f32.xlu0 %v2831_v25  ;;  %v2185_v51 = vadd.f32 %v4177_v23, %v6179_v42  ;;  %v4180_v25 = vpop.f32.mrf.mxu0  ;;  %v2642_v32 = vmax.f32 %v2180_v38, 0.0  ;;  %v2490_v42 = vadd.f32 %v5736_v5, %v5537_v52  ;;  %v2705_v39 = vmax.f32 %v2495_v33, 0.0  ;;  %v6184_v5 = vld [vmem:[#allocation31_spill] sm:$0xff] }
 0x355   : > { %v3507_v19 = vpop.xlane.xlu1 %3506  ;;  %v3505_v20 = vpop.xlane.xlu0 %3504  ;;  %v2195_v23 = vadd.f32 %v4180_v25, %v6181_v56 }
 0x356   : > { %3698 = vst.msk [vmem:[%s5669_s13 + $0x208] sm:$0xff] %vm3632_vm2, %v3507_v19  ;;  %3697 = vst.msk [vmem:[%s5669_s13 + $0x200] sm:$0xff] %vm3632_vm2, %v3505_v20  ;;  %v2643_v19 = vmax.f32 %v2185_v51, 0.0  ;;  %v2480_v20 = vadd.f32 %v5714_v40, %v5527_v57  ;;  %v6182_v40 = vld [vmem:[#allocation29_spill] sm:$0xff]  ;;  %v2704_v52 = vmax.f32 %v2490_v42, 0.0 }
 0x357   : > { %v2645_v21 = vmax.f32 %v2195_v23, 0.0 }
 0x358   : > { %3458 = vmax.xlane.f32.xlu1 %v2774_v35  ;;  %3456 = vmax.xlane.f32.xlu0 %v2773_v50  ;;  %v2485_v35 = vadd.f32 %v5704_v9, %v5525_v13  ;;  %v2189_v50 = vpop.f32.mrf.mxu0  ;;  %v2778_v13 = vadd.f32 %v5400_v12, %v2643_v19  ;;  %v2702_v57 = vmax.f32 %v2480_v20, 0.0 }
 0x359   : > { %v3391_v1 = vpop.xlane.xlu1 %3390  ;;  %v3389_v43 = vpop.xlane.xlu0 %3388  ;;  %v2190_v47 = vadd.f32 %v2189_v50, %v6182_v40  ;;  %v2780_v28 = vadd.f32 %v5400_v12, %v2645_v21  ;;  %v2839_v50 = vadd.f32 %v5400_v12, %v2704_v52 }
 0x35a   : > { %3640 = vst.msk [vmem:[%s5669_s13 + $0x38] sm:$0xff] %vm3632_vm2, %v3391_v1  ;;  %3639 = vst.msk [vmem:[%s5669_s13 + $0x30] sm:$0xff] %vm3632_vm2, %v3389_v43  ;;  %v2703_v9 = vmax.f32 %v2485_v35, 0.0  ;;  %v4183_v60 = vpop.f32.mrf.mxu0  ;;  %v5780_v43 = vpop.f32.mrf.mxu1 }
 0x35b   : > { %v2644_v26 = vmax.f32 %v2190_v47, 0.0  ;;  %v2205_v46 = vadd.f32 %v4183_v60, %v6183_v31  ;;  %v6187_v31 = vld [vmem:[#allocation34_spill] sm:$0xff] }
 0x35c   : > { %3578 = vmax.xlane.f32.xlu1 %v2834_v59  ;;  %3576 = vmax.xlane.f32.xlu0 %v2833_v34  ;;  %v2777_v59 = vadd.f32 %v5400_v12, %v2642_v32  ;;  %v2838_v17 = vadd.f32 %v5400_v12, %v2703_v9  ;;  %v2199_v51 = vpop.f32.mrf.mxu0  ;;  %v2505_v32 = vadd.f32 %v5748_v45, %v5548_v62 }
 0x35d   : > { %v3511_v18 = vpop.xlane.xlu1 %3510  ;;  %v3509_v36 = vpop.xlane.xlu0 %3508  ;;  %v2779_v25 = vadd.f32 %v5400_v12, %v2644_v26 }
 0x35e   : > { %3700 = vst.msk [vmem:[%s5669_s13 + $0x218] sm:$0xff] %vm3632_vm2, %v3511_v18  ;;  %3699 = vst.msk [vmem:[%s5669_s13 + $0x210] sm:$0xff] %vm3632_vm2, %v3509_v36  ;;  %v5792_v36 = vpop.f32.mrf.mxu1  ;;  %v2707_v45 = vmax.f32 %v2505_v32, 0.0 }
 0x360   : > { %3462 = vmax.xlane.f32.xlu1 %v2776_v0  ;;  %3460 = vmax.xlane.f32.xlu0 %v2775_v3  ;;  %v2837_v0 = vadd.f32 %v5400_v12, %v2702_v57  ;;  %v5802_v19 = vpop.f32.mrf.mxu1  ;;  %v2842_v21 = vadd.f32 %v5400_v12, %v2707_v45 }
 0x361   : > { %v3395_v30 = vpop.xlane.xlu1 %3394  ;;  %v3393_v54 = vpop.xlane.xlu0 %3392 }
 0x362   : > { %3642 = vst.msk [vmem:[%s5669_s13 + $0x48] sm:$0xff] %vm3632_vm2, %v3395_v30  ;;  %3641 = vst.msk [vmem:[%s5669_s13 + $0x40] sm:$0xff] %vm3632_vm2, %v3393_v54  ;;  %v2200_v30 = vadd.f32 %v2199_v51, %v6184_v5  ;;  %v2840_v54 = vadd.f32 %v5400_v12, %v2705_v39  ;;  %v5814_v56 = vpop.f32.mrf.mxu1  ;;  %v2510_v51 = vadd.f32 %v5780_v43, %v5563_v7  ;;  %v6188_v43 = vld [vmem:[#allocation35_spill] sm:$0xff] }
 0x364   : > { %3582 = vmax.xlane.f32.xlu1 %v2836_v16  ;;  %3580 = vmax.xlane.f32.xlu0 %v2835_v14  ;;  %v4186_v16 = vpop.f32.mrf.mxu0  ;;  %v2647_v14 = vmax.f32 %v2205_v46, 0.0  ;;  %v2708_v7 = vmax.f32 %v2510_v51, 0.0 }
 0x365   : > { %v3515_v41 = vpop.xlane.xlu1 %3514  ;;  %v3513_v1 = vpop.xlane.xlu0 %3512 }
 0x366   : > { %3702 = vst.msk [vmem:[%s5669_s13 + $0x228] sm:$0xff] %vm3632_vm2, %v3515_v41  ;;  %3701 = vst.msk [vmem:[%s5669_s13 + $0x220] sm:$0xff] %vm3632_vm2, %v3513_v1  ;;  %v2646_v41 = vmax.f32 %v2200_v30, 0.0  ;;  %v2209_v9 = vpop.f32.mrf.mxu0  ;;  %v2782_v62 = vadd.f32 %v5400_v12, %v2647_v14  ;;  %v6185_v1 = vld [vmem:[#allocation32_spill] sm:$0xff]  ;;  %v2525_v14 = vadd.f32 %v5792_v36, %v5571_v15 }
 0x368   : > { %3466 = vmax.xlane.f32.xlu1 %v2778_v13  ;;  %3464 = vmax.xlane.f32.xlu0 %v2777_v59  ;;  %v2500_v13 = vadd.f32 %v5758_v48, %v5550_v63  ;;  %v2215_v59 = vadd.f32 %v4186_v16, %v6185_v1  ;;  %v2781_v40 = vadd.f32 %v5400_v12, %v2646_v41  ;;  %v6186_v48 = vld [vmem:[#allocation33_spill] sm:$0xff]  ;;  %v4189_v60 = vpop.f32.mrf.mxu0  ;;  %v2711_v36 = vmax.f32 %v2525_v14, 0.0 }
 0x369   : > { %v3399_v34 = vpop.xlane.xlu1 %3398  ;;  %v3397_v18 = vpop.xlane.xlu0 %3396  ;;  %v2210_v47 = vadd.f32 %v2209_v9, %v6186_v48  ;;  %v2225_v46 = vadd.f32 %v4189_v60, %v6187_v31  ;;  %v2520_v41 = vadd.f32 %v5802_v19, %v5573_v24  ;;  %v6190_v19 = vld [vmem:[#allocation37_spill] sm:$0xff] }
 0x36a   : > { %3644 = vst.msk [vmem:[%s5669_s13 + $0x58] sm:$0xff] %vm3632_vm2, %v3399_v34  ;;  %3643 = vst.msk [vmem:[%s5669_s13 + $0x50] sm:$0xff] %vm3632_vm2, %v3397_v18  ;;  %v2706_v63 = vmax.f32 %v2500_v13, 0.0  ;;  %v5824_v34 = vpop.f32.mrf.mxu1  ;;  %v2649_v33 = vmax.f32 %v2215_v59, 0.0  ;;  %v2515_v18 = vadd.f32 %v5770_v22, %v5561_v37 }
 0x36b   : > { %v2648_v42 = vmax.f32 %v2210_v47, 0.0  ;;  %v2710_v24 = vmax.f32 %v2520_v41, 0.0  ;;  %v2846_v47 = vadd.f32 %v5400_v12, %v2711_v36 }
 0x36c   : > { %3586 = vmax.xlane.f32.xlu1 %v2838_v17  ;;  %3584 = vmax.xlane.f32.xlu0 %v2837_v0  ;;  %v2841_v26 = vadd.f32 %v5400_v12, %v2706_v63  ;;  %v2784_v37 = vadd.f32 %v5400_v12, %v2649_v33  ;;  %v2709_v22 = vmax.f32 %v2515_v18, 0.0 }
 0x36d   : > { %v3519_v3 = vpop.xlane.xlu1 %3518  ;;  %v3517_v38 = vpop.xlane.xlu0 %3516  ;;  %v2845_v33 = vadd.f32 %v5400_v12, %v2710_v24 }
 0x36e   : > { %3704 = vst.msk [vmem:[%s5669_s13 + $0x238] sm:$0xff] %vm3632_vm2, %v3519_v3  ;;  %3703 = vst.msk [vmem:[%s5669_s13 + $0x230] sm:$0xff] %vm3632_vm2, %v3517_v38  ;;  %v2219_v3 = vpop.f32.mrf.mxu0 }
 0x36f   : > { %v2220_v52 = vadd.f32 %v2219_v3, %v6188_v43  ;;  %v6191_v3 = vld [vmem:[#allocation38_spill] sm:$0xff] }
 0x370   : > { %3470 = vmax.xlane.f32.xlu1 %v2780_v28  ;;  %3468 = vmax.xlane.f32.xlu0 %v2779_v25  ;;  %v5836_v28 = vpop.f32.mrf.mxu1  ;;  %v2783_v25 = vadd.f32 %v5400_v12, %v2648_v42  ;;  %v4192_v5 = vpop.f32.mrf.mxu0 }
 0x371   : > { %v3403_v35 = vpop.xlane.xlu1 %3402  ;;  %v3401_v20 = vpop.xlane.xlu0 %3400 }
 0x372   : > { %3646 = vst.msk [vmem:[%s5669_s13 + $0x68] sm:$0xff] %vm3632_vm2, %v3403_v35  ;;  %3645 = vst.msk [vmem:[%s5669_s13 + $0x60] sm:$0xff] %vm3632_vm2, %v3401_v20  ;;  %v5846_v30 = vpop.f32.mrf.mxu1  ;;  %v2844_v35 = vadd.f32 %v5400_v12, %v2709_v22  ;;  %v2843_v20 = vadd.f32 %v5400_v12, %v2708_v7  ;;  %v2229_v13 = vpop.f32.mrf.mxu0 }
 0x374   : > { %3590 = vmax.xlane.f32.xlu1 %v2840_v54  ;;  %3588 = vmax.xlane.f32.xlu0 %v2839_v50  ;;  %v2651_v54 = vmax.f32 %v2225_v46, 0.0  ;;  %v2650_v50 = vmax.f32 %v2220_v52, 0.0  ;;  %v5858_v9 = vpop.f32.mrf.mxu1  ;;  %v2545_v52 = vadd.f32 %v5836_v28, %v5594_v6 }
 0x375   : > { %v3523_v23 = vpop.xlane.xlu1 %3522  ;;  %v3521_v57 = vpop.xlane.xlu0 %3520 }
 0x376   : > { %3706 = vst.msk [vmem:[%s5669_s13 + $0x248] sm:$0xff] %vm3632_vm2, %v3523_v23  ;;  %3705 = vst.msk [vmem:[%s5669_s13 + $0x240] sm:$0xff] %vm3632_vm2, %v3521_v57  ;;  %v2786_v15 = vadd.f32 %v5400_v12, %v2651_v54  ;;  %v2785_v59 = vadd.f32 %v5400_v12, %v2650_v50  ;;  %v2230_v57 = vadd.f32 %v2229_v13, %v6190_v19  ;;  %v5868_v63 = vpop.f32.mrf.mxu1  ;;  %v2715_v28 = vmax.f32 %v2545_v52, 0.0  ;;  %v6193_v50 = vld [vmem:[#allocation40_spill] sm:$0xff] }
 0x377   : > { %v2540_v54 = vadd.f32 %v5846_v30, %v5596_v49  ;;  %v6194_v30 = vld [vmem:[#allocation41_spill] sm:$0xff] }
 0x378   : > { %3474 = vmax.xlane.f32.xlu1 %v2782_v62  ;;  %3472 = vmax.xlane.f32.xlu0 %v2781_v40  ;;  %v6189_v62 = vld [vmem:[#allocation36_spill] sm:$0xff]  ;;  %v4195_v40 = vpop.f32.mrf.mxu0  ;;  %v2652_v18 = vmax.f32 %v2230_v57, 0.0  ;;  %v4291_v42 = vpop.f32.mrf.mxu1 }
 0x379   : > { %v3407_v17 = vpop.xlane.xlu1 %3406  ;;  %v3405_v0 = vpop.xlane.xlu0 %3404  ;;  %v2235_v45 = vadd.f32 %v4192_v5, %v6189_v62  ;;  %v2714_v49 = vmax.f32 %v2540_v54, 0.0 }
 0x37a   : > { %3648 = vst.msk [vmem:[%s5669_s13 + $0x78] sm:$0xff] %vm3632_vm2, %v3407_v17  ;;  %3647 = vst.msk [vmem:[%s5669_s13 + $0x70] sm:$0xff] %vm3632_vm2, %v3405_v0  ;;  %v2535_v17 = vadd.f32 %v5814_v56, %v5581_v27  ;;  %v2530_v0 = vadd.f32 %v5824_v34, %v5583_v29  ;;  %v2787_v22 = vadd.f32 %v5400_v12, %v2652_v18  ;;  %v6192_v29 = vld [vmem:[#allocation39_spill] sm:$0xff] }
 0x37b   : > { %v2653_v60 = vmax.f32 %v2235_v45, 0.0  ;;  %v2850_v45 = vadd.f32 %v5400_v12, %v2715_v28  ;;  %v2849_v19 = vadd.f32 %v5400_v12, %v2714_v49 }
 0x37c   : > { %3594 = vmax.xlane.f32.xlu1 %v2842_v21  ;;  %3592 = vmax.xlane.f32.xlu0 %v2841_v26  ;;  %v2239_v26 = vpop.f32.mrf.mxu0  ;;  %v2713_v56 = vmax.f32 %v2535_v17, 0.0  ;;  %v2712_v31 = vmax.f32 %v2530_v0, 0.0 }
 0x37d   : > { %v3527_v39 = vpop.xlane.xlu1 %3526  ;;  %v3525_v38 = vpop.xlane.xlu0 %3524  ;;  %v2788_v27 = vadd.f32 %v5400_v12, %v2653_v60  ;;  %v2240_v34 = vadd.f32 %v2239_v26, %v6192_v29 }
 0x37e   : > { %3708 = vst.msk [vmem:[%s5669_s13 + $0x258] sm:$0xff] %vm3632_vm2, %v3527_v39  ;;  %3707 = vst.msk [vmem:[%s5669_s13 + $0x250] sm:$0xff] %vm3632_vm2, %v3525_v38  ;;  %v2245_v39 = vadd.f32 %v4195_v40, %v6191_v3  ;;  %v4198_v46 = vpop.f32.mrf.mxu0  ;;  %v2559_v38 = vpop.f32.mrf.mxu1  ;;  %v2848_v7 = vadd.f32 %v5400_v12, %v2713_v56  ;;  %v2550_v40 = vadd.f32 %v5868_v63, %v5609_v58 }
 0x37f   : > { %v2255_v41 = vadd.f32 %v4198_v46, %v6193_v50  ;;  %v2560_v58 = vadd.f32 %v2559_v38, %v5619_v4 }
 0x380   : > { %3478 = vmax.xlane.f32.xlu1 %v2784_v37  ;;  %3476 = vmax.xlane.f32.xlu0 %v2783_v25  ;;  %v2655_v43 = vmax.f32 %v2245_v39, 0.0  ;;  %v2249_v14 = vpop.f32.mrf.mxu0 }
 0x381   : > { %v3411_v16 = vpop.xlane.xlu1 %3410  ;;  %v3409_v32 = vpop.xlane.xlu0 %3408 }
 0x382   : > { %3650 = vst.msk [vmem:[%s5669_s13 + $0x88] sm:$0xff] %vm3632_vm2, %v3411_v16  ;;  %3649 = vst.msk [vmem:[%s5669_s13 + $0x80] sm:$0xff] %vm3632_vm2, %v3409_v32  ;;  %v2847_v16 = vadd.f32 %v5400_v12, %v2712_v31  ;;  %v4294_v32 = vpop.f32.mrf.mxu1  ;;  %v2790_v6 = vadd.f32 %v5400_v12, %v2655_v43 }
 0x384   : > { %3598 = vmax.xlane.f32.xlu1 %v2844_v35  ;;  %3596 = vmax.xlane.f32.xlu0 %v2843_v20  ;;  %v2654_v35 = vmax.f32 %v2240_v34, 0.0  ;;  %v2569_v36 = vpop.f32.mrf.mxu1 }
 0x385   : > { %v3531_v23 = vpop.xlane.xlu1 %3530  ;;  %v3529_v1 = vpop.xlane.xlu0 %3528  ;;  %v2570_v4 = vadd.f32 %v2569_v36, %v5631_v11 }
 0x386   : > { %3710 = vst.msk [vmem:[%s5669_s13 + $0x268] sm:$0xff] %vm3632_vm2, %v3531_v23  ;;  %3709 = vst.msk [vmem:[%s5669_s13 + $0x260] sm:$0xff] %vm3632_vm2, %v3529_v1  ;;  %v2789_v23 = vadd.f32 %v5400_v12, %v2654_v35  ;;  %v2657_v1 = vmax.f32 %v2255_v41, 0.0 }
 0x387   : > { %v2720_v29 = vmax.f32 %v2570_v4, 0.0 }
 0x388   : > { %3482 = vmax.xlane.f32.xlu1 %v2786_v15  ;;  %3480 = vmax.xlane.f32.xlu0 %v2785_v59  ;;  %v2250_v15 = vadd.f32 %v2249_v14, %v6194_v30  ;;  %v2555_v59 = vadd.f32 %v5858_v9, %v5607_v53  ;;  %v2792_v60 = vadd.f32 %v5400_v12, %v2657_v1 }
 0x389   : > { %v3415_v48 = vpop.xlane.xlu1 %3414  ;;  %v3413_v21 = vpop.xlane.xlu0 %3412  ;;  %v2565_v53 = vadd.f32 %v4291_v42, %v5617_v2  ;;  %v2575_v2 = vadd.f32 %v4294_v32, %v5629_v61  ;;  %v2855_v43 = vadd.f32 %v5400_v12, %v2720_v29 }
 0x38a   : > { %3652 = vst.msk [vmem:[%s5669_s13 + $0x98] sm:$0xff] %vm3632_vm2, %v3415_v48  ;;  %3651 = vst.msk [vmem:[%s5669_s13 + $0x90] sm:$0xff] %vm3632_vm2, %v3413_v21  ;;  %v2656_v57 = vmax.f32 %v2250_v15, 0.0  ;;  %v4297_v48 = vpop.f32.mrf.mxu1  ;;  %v2717_v17 = vmax.f32 %v2555_v59, 0.0 }
 0x38b   : > { %v2719_v26 = vmax.f32 %v2565_v53, 0.0  ;;  %v2585_v61 = vadd.f32 %v4297_v48, %v5642_v10 }
 0x38c   : > { %3602 = vmax.xlane.f32.xlu1 %v2846_v47  ;;  %3600 = vmax.xlane.f32.xlu0 %v2845_v33  ;;  %v2791_v21 = vadd.f32 %v5400_v12, %v2656_v57  ;;  %v2716_v33 = vmax.f32 %v2550_v40, 0.0  ;;  %v2579_v63 = vpop.f32.mrf.mxu1  ;;  %v2852_v0 = vadd.f32 %v5400_v12, %v2717_v17 }
 0x38d   : > { %v3535_v51 = vpop.xlane.xlu1 %3534  ;;  %v3533_v37 = vpop.xlane.xlu0 %3532  ;;  %v2854_v39 = vadd.f32 %v5400_v12, %v2719_v26  ;;  %v2580_v11 = vadd.f32 %v2579_v63, %v5644_v55 }
 0x38e   : > { %3712 = vst.msk [vmem:[%s5669_s13 + $0x278] sm:$0xff] %vm3632_vm2, %v3535_v51  ;;  %3711 = vst.msk [vmem:[%s5669_s13 + $0x270] sm:$0xff] %vm3632_vm2, %v3533_v37  ;;  %v2851_v51 = vadd.f32 %v5400_v12, %v2716_v33  ;;  %v4300_v56 = vpop.f32.mrf.mxu1  ;;  %v2721_v37 = vmax.f32 %v2575_v2, 0.0 }
 0x38f   : > { %v2595_v10 = vadd.f32 %v4300_v56, %v5660_v8  ;;  %v2722_v52 = vmax.f32 %v2580_v11, 0.0 }
 0x390   : > { %3486 = vmax.xlane.f32.xlu1 %v2788_v27  ;;  %3484 = vmax.xlane.f32.xlu0 %v2787_v22  ;;  %v2718_v27 = vmax.f32 %v2560_v58, 0.0  ;;  %v2589_v34 = vpop.f32.mrf.mxu1  ;;  %v2856_v38 = vadd.f32 %v5400_v12, %v2721_v37 }
 0x391   : > { %v3419_v25 = vpop.xlane.xlu1 %3418  ;;  %v3417_v5 = vpop.xlane.xlu0 %3416  ;;  %v2590_v55 = vadd.f32 %v2589_v34, %v5658_v44  ;;  %v2725_v35 = vmax.f32 %v2595_v10, 0.0  ;;  %v2857_v54 = vadd.f32 %v5400_v12, %v2722_v52 }
 0x392   : > { %3654 = vst.msk [vmem:[%s5669_s13 + $0xa8] sm:$0xff] %vm3632_vm2, %v3419_v25  ;;  %3653 = vst.msk [vmem:[%s5669_s13 + $0xa0] sm:$0xff] %vm3632_vm2, %v3417_v5  ;;  %v2853_v31 = vadd.f32 %v5400_v12, %v2718_v27  ;;  %v2723_v25 = vmax.f32 %v2585_v61, 0.0 }
 0x393   : > { %v2724_v14 = vmax.f32 %v2590_v55, 0.0  ;;  %v2860_v32 = vadd.f32 %v5400_v12, %v2725_v35 }
 0x394   : > { %3606 = vmax.xlane.f32.xlu1 %v2848_v7  ;;  %3604 = vmax.xlane.f32.xlu0 %v2847_v16  ;;  %v2858_v16 = vadd.f32 %v5400_v12, %v2723_v25 }
 0x395   : > { %v3539_v20 = vpop.xlane.xlu1 %3538  ;;  %v3537_v13 = vpop.xlane.xlu0 %3536 }
 0x396   : > { %3714 = vst.msk [vmem:[%s5669_s13 + $0x288] sm:$0xff] %vm3632_vm2, %v3539_v20  ;;  %3713 = vst.msk [vmem:[%s5669_s13 + $0x280] sm:$0xff] %vm3632_vm2, %v3537_v13 }
 0x398   : > { %3490 = vmax.xlane.f32.xlu1 %v2790_v6  ;;  %3488 = vmax.xlane.f32.xlu0 %v2789_v23  ;;  %v2859_v6 = vadd.f32 %v5400_v12, %v2724_v14 }
 0x399   : > { %v3423_v62 = vpop.xlane.xlu1 %3422  ;;  %v3421_v24 = vpop.xlane.xlu0 %3420 }
 0x39a   : > { %3656 = vst.msk [vmem:[%s5669_s13 + $0xb8] sm:$0xff] %vm3632_vm2, %v3423_v62  ;;  %3655 = vst.msk [vmem:[%s5669_s13 + $0xb0] sm:$0xff] %vm3632_vm2, %v3421_v24 }
 0x39c   : > { %3610 = vmax.xlane.f32.xlu1 %v2850_v45  ;;  %3608 = vmax.xlane.f32.xlu0 %v2849_v19 }
 0x39d   : > { %v3543_v47 = vpop.xlane.xlu1 %3542  ;;  %v3541_v9 = vpop.xlane.xlu0 %3540 }
 0x39e   : > { %3716 = vst.msk [vmem:[%s5669_s13 + $0x298] sm:$0xff] %vm3632_vm2, %v3543_v47  ;;  %3715 = vst.msk [vmem:[%s5669_s13 + $0x290] sm:$0xff] %vm3632_vm2, %v3541_v9 }
 0x3a0   : > { %3494 = vmax.xlane.f32.xlu1 %v2792_v60  ;;  %3492 = vmax.xlane.f32.xlu0 %v2791_v21 }
 0x3a1   : > { %v3427_v18 = vpop.xlane.xlu1 %3426  ;;  %v3425_v42 = vpop.xlane.xlu0 %3424 }
 0x3a2   : > { %3658 = vst.msk [vmem:[%s5669_s13 + $0xc8] sm:$0xff] %vm3632_vm2, %v3427_v18  ;;  %3657 = vst.msk [vmem:[%s5669_s13 + $0xc0] sm:$0xff] %vm3632_vm2, %v3425_v42 }
 0x3a4   : > { %3614 = vmax.xlane.f32.xlu1 %v2852_v0  ;;  %3612 = vmax.xlane.f32.xlu0 %v2851_v51 }
 0x3a5   : > { %v3547_v3 = vpop.xlane.xlu1 %3546  ;;  %v3545_v22 = vpop.xlane.xlu0 %3544 }
 0x3a6   : > { %3718 = vst.msk [vmem:[%s5669_s13 + $0x2a8] sm:$0xff] %vm3632_vm2, %v3547_v3  ;;  %3717 = vst.msk [vmem:[%s5669_s13 + $0x2a0] sm:$0xff] %vm3632_vm2, %v3545_v22 }
 0x3a8   : > { %3618 = vmax.xlane.f32.xlu1 %v2854_v39  ;;  %3616 = vmax.xlane.f32.xlu0 %v2853_v31 }
 0x3a9   : > { %v3431_v46 = vpop.xlane.xlu1 %3430  ;;  %v3429_v7 = vpop.xlane.xlu0 %3428 }
 0x3aa   : > { %3660 = vst.msk [vmem:[%s5669_s13 + $0xd8] sm:$0xff] %vm3632_vm2, %v3431_v46  ;;  %3659 = vst.msk [vmem:[%s5669_s13 + $0xd0] sm:$0xff] %vm3632_vm2, %v3429_v7 }
 0x3ac   : > { %3622 = vmax.xlane.f32.xlu1 %v2856_v38  ;;  %3620 = vmax.xlane.f32.xlu0 %v2855_v43 }
 0x3ad   : > { %v3551_v5 = vpop.xlane.xlu1 %3550  ;;  %v3549_v8 = vpop.xlane.xlu0 %3548 }
 0x3ae   : > { %3720 = vst.msk [vmem:[%s5669_s13 + $0x2b8] sm:$0xff] %vm3632_vm2, %v3551_v5  ;;  %3719 = vst.msk [vmem:[%s5669_s13 + $0x2b0] sm:$0xff] %vm3632_vm2, %v3549_v8 }
 0x3b0   : > { %3626 = vmax.xlane.f32.xlu1 %v2858_v16  ;;  %3624 = vmax.xlane.f32.xlu0 %v2857_v54 }
 0x3b1   : > { %v3435_v44 = vpop.xlane.xlu1 %3434  ;;  %v3433_v20 = vpop.xlane.xlu0 %3432 }
 0x3b2   : > { %3662 = vst.msk [vmem:[%s5669_s13 + $0xe8] sm:$0xff] %vm3632_vm2, %v3435_v44  ;;  %3661 = vst.msk [vmem:[%s5669_s13 + $0xe0] sm:$0xff] %vm3632_vm2, %v3433_v20 }
 0x3b4   : > { %3630 = vmax.xlane.f32.xlu1 %v2860_v32  ;;  %3628 = vmax.xlane.f32.xlu0 %v2859_v6 }
 0x3b5   : > { %v3555_v28 = vpop.xlane.xlu1 %3554  ;;  %v3553_v50 = vpop.xlane.xlu0 %3552 }
 0x3b6   : > { %3722 = vst.msk [vmem:[%s5669_s13 + $0x2c8] sm:$0xff] %vm3632_vm2, %v3555_v28  ;;  %3721 = vst.msk [vmem:[%s5669_s13 + $0x2c0] sm:$0xff] %vm3632_vm2, %v3553_v50 }
 0x3b9   : > { %v3439_v41 = vpop.xlane.xlu1 %3438  ;;  %v3437_v13 = vpop.xlane.xlu0 %3436 }
 0x3ba   : > { %3664 = vst.msk [vmem:[%s5669_s13 + $0xf8] sm:$0xff] %vm3632_vm2, %v3439_v41  ;;  %3663 = vst.msk [vmem:[%s5669_s13 + $0xf0] sm:$0xff] %vm3632_vm2, %v3437_v13 }
 0x3bd   : > { %v3559_v12 = vpop.xlane.xlu1 %3558  ;;  %v3557_v23 = vpop.xlane.xlu0 %3556 }
 0x3be   : > { %3724 = vst.msk [vmem:[%s5669_s13 + $0x2d8] sm:$0xff] %vm3632_vm2, %v3559_v12  ;;  %3723 = vst.msk [vmem:[%s5669_s13 + $0x2d0] sm:$0xff] %vm3632_vm2, %v3557_v23 }
 0x3c1   : > { %v3443_v49 = vpop.xlane.xlu1 %3442  ;;  %v3441_v30 = vpop.xlane.xlu0 %3440 }
 0x3c2   : > { %3666 = vst.msk [vmem:[%s5669_s13 + $0x108] sm:$0xff] %vm3632_vm2, %v3443_v49  ;;  %3665 = vst.msk [vmem:[%s5669_s13 + $0x100] sm:$0xff] %vm3632_vm2, %v3441_v30 }
 0x3c5   : > { %v3563_v15 = vpop.xlane.xlu1 %3562  ;;  %v3561_v36 = vpop.xlane.xlu0 %3560 }
 0x3c6   : > { %3726 = vst.msk [vmem:[%s5669_s13 + $0x2e8] sm:$0xff] %vm3632_vm2, %v3563_v15  ;;  %3725 = vst.msk [vmem:[%s5669_s13 + $0x2e0] sm:$0xff] %vm3632_vm2, %v3561_v36 }
 0x3c9   : > { %v3447_v62 = vpop.xlane.xlu1 %3446  ;;  %v3445_v45 = vpop.xlane.xlu0 %3444 }
 0x3ca   : > { %3668 = vst.msk [vmem:[%s5669_s13 + $0x118] sm:$0xff] %vm3632_vm2, %v3447_v62  ;;  %3667 = vst.msk [vmem:[%s5669_s13 + $0x110] sm:$0xff] %vm3632_vm2, %v3445_v45 }
 0x3cd   : > { %v3567_v1 = vpop.xlane.xlu1 %3566  ;;  %v3565_v59 = vpop.xlane.xlu0 %3564 }
 0x3ce   : > { %3728 = vst.msk [vmem:[%s5669_s13 + $0x2f8] sm:$0xff] %vm3632_vm2, %v3567_v1  ;;  %3727 = vst.msk [vmem:[%s5669_s13 + $0x2f0] sm:$0xff] %vm3632_vm2, %v3565_v59 }
 0x3d1   : > { %v3451_v24 = vpop.xlane.xlu1 %3450  ;;  %v3449_v19 = vpop.xlane.xlu0 %3448 }
 0x3d2   : > { %3670 = vst.msk [vmem:[%s5669_s13 + $0x128] sm:$0xff] %vm3632_vm2, %v3451_v24  ;;  %3669 = vst.msk [vmem:[%s5669_s13 + $0x120] sm:$0xff] %vm3632_vm2, %v3449_v19 }
 0x3d5   : > { %v3571_v57 = vpop.xlane.xlu1 %3570  ;;  %v3569_v40 = vpop.xlane.xlu0 %3568 }
 0x3d6   : > { %3730 = vst.msk [vmem:[%s5669_s13 + $0x308] sm:$0xff] %vm3632_vm2, %v3571_v57  ;;  %3729 = vst.msk [vmem:[%s5669_s13 + $0x300] sm:$0xff] %vm3632_vm2, %v3569_v40 }
 0x3d9   : > { %v3455_v48 = vpop.xlane.xlu1 %3454  ;;  %v3453_v47 = vpop.xlane.xlu0 %3452 }
 0x3da   : > { %3672 = vst.msk [vmem:[%s5669_s13 + $0x138] sm:$0xff] %vm3632_vm2, %v3455_v48  ;;  %3671 = vst.msk [vmem:[%s5669_s13 + $0x130] sm:$0xff] %vm3632_vm2, %v3453_v47 }
 0x3dd   : > { %v3575_v60 = vpop.xlane.xlu1 %3574  ;;  %v3573_v17 = vpop.xlane.xlu0 %3572 }
 0x3de   : > { %3732 = vst.msk [vmem:[%s5669_s13 + $0x318] sm:$0xff] %vm3632_vm2, %v3575_v60  ;;  %3731 = vst.msk [vmem:[%s5669_s13 + $0x310] sm:$0xff] %vm3632_vm2, %v3573_v17 }
 0x3e1   : > { %v3459_v53 = vpop.xlane.xlu1 %3458  ;;  %v3457_v9 = vpop.xlane.xlu0 %3456 }
 0x3e2   : > { %3674 = vst.msk [vmem:[%s5669_s13 + $0x148] sm:$0xff] %vm3632_vm2, %v3459_v53  ;;  %3673 = vst.msk [vmem:[%s5669_s13 + $0x140] sm:$0xff] %vm3632_vm2, %v3457_v9 }
 0x3e5   : > { %v3579_v21 = vpop.xlane.xlu1 %3578  ;;  %v3577_v33 = vpop.xlane.xlu0 %3576 }
 0x3e6   : > { %3734 = vst.msk [vmem:[%s5669_s13 + $0x328] sm:$0xff] %vm3632_vm2, %v3579_v21  ;;  %3733 = vst.msk [vmem:[%s5669_s13 + $0x320] sm:$0xff] %vm3632_vm2, %v3577_v33 }
 0x3e9   : > { %v3463_v58 = vpop.xlane.xlu1 %3462  ;;  %v3461_v63 = vpop.xlane.xlu0 %3460 }
 0x3ea   : > { %3676 = vst.msk [vmem:[%s5669_s13 + $0x158] sm:$0xff] %vm3632_vm2, %v3463_v58  ;;  %3675 = vst.msk [vmem:[%s5669_s13 + $0x150] sm:$0xff] %vm3632_vm2, %v3461_v63 }
 0x3ed   : > { %v3583_v18 = vpop.xlane.xlu1 %3582  ;;  %v3581_v0 = vpop.xlane.xlu0 %3580 }
 0x3ee   : > { %3736 = vst.msk [vmem:[%s5669_s13 + $0x338] sm:$0xff] %vm3632_vm2, %v3583_v18  ;;  %3735 = vst.msk [vmem:[%s5669_s13 + $0x330] sm:$0xff] %vm3632_vm2, %v3581_v0 }
 0x3f1   : > { %v3467_v26 = vpop.xlane.xlu1 %3466  ;;  %v3465_v2 = vpop.xlane.xlu0 %3464 }
 0x3f2   : > { %3678 = vst.msk [vmem:[%s5669_s13 + $0x168] sm:$0xff] %vm3632_vm2, %v3467_v26  ;;  %3677 = vst.msk [vmem:[%s5669_s13 + $0x160] sm:$0xff] %vm3632_vm2, %v3465_v2 }
 0x3f5   : > { %v3587_v42 = vpop.xlane.xlu1 %3586  ;;  %v3585_v51 = vpop.xlane.xlu0 %3584 }
 0x3f6   : > { %3738 = vst.msk [vmem:[%s5669_s13 + $0x348] sm:$0xff] %vm3632_vm2, %v3587_v42  ;;  %3737 = vst.msk [vmem:[%s5669_s13 + $0x340] sm:$0xff] %vm3632_vm2, %v3585_v51 }
 0x3f9   : > { %v3471_v27 = vpop.xlane.xlu1 %3470  ;;  %v3469_v4 = vpop.xlane.xlu0 %3468 }
 0x3fa   : > { %3680 = vst.msk [vmem:[%s5669_s13 + $0x178] sm:$0xff] %vm3632_vm2, %v3471_v27  ;;  %3679 = vst.msk [vmem:[%s5669_s13 + $0x170] sm:$0xff] %vm3632_vm2, %v3469_v4 }
 0x3fd   : > { %v3591_v56 = vpop.xlane.xlu1 %3590  ;;  %v3589_v3 = vpop.xlane.xlu0 %3588 }
 0x3fe   : > { %3740 = vst.msk [vmem:[%s5669_s13 + $0x358] sm:$0xff] %vm3632_vm2, %v3591_v56  ;;  %3739 = vst.msk [vmem:[%s5669_s13 + $0x350] sm:$0xff] %vm3632_vm2, %v3589_v3 }
 0x401   : > { %v3475_v39 = vpop.xlane.xlu1 %3474  ;;  %v3473_v37 = vpop.xlane.xlu0 %3472 }
 0x402   : > { %3682 = vst.msk [vmem:[%s5669_s13 + $0x188] sm:$0xff] %vm3632_vm2, %v3475_v39  ;;  %3681 = vst.msk [vmem:[%s5669_s13 + $0x180] sm:$0xff] %vm3632_vm2, %v3473_v37 }
 0x405   : > { %v3595_v61 = vpop.xlane.xlu1 %3594  ;;  %v3593_v22 = vpop.xlane.xlu0 %3592 }
 0x406   : > { %3742 = vst.msk [vmem:[%s5669_s13 + $0x368] sm:$0xff] %vm3632_vm2, %v3595_v61  ;;  %3741 = vst.msk [vmem:[%s5669_s13 + $0x360] sm:$0xff] %vm3632_vm2, %v3593_v22 }
 0x409   : > { %v3479_v31 = vpop.xlane.xlu1 %3478  ;;  %v3477_v29 = vpop.xlane.xlu0 %3476 }
 0x40a   : > { %3684 = vst.msk [vmem:[%s5669_s13 + $0x198] sm:$0xff] %vm3632_vm2, %v3479_v31  ;;  %3683 = vst.msk [vmem:[%s5669_s13 + $0x190] sm:$0xff] %vm3632_vm2, %v3477_v29 }
 0x40d   : > { %v3599_v11 = vpop.xlane.xlu1 %3598  ;;  %v3597_v34 = vpop.xlane.xlu0 %3596 }
 0x40e   : > { %3744 = vst.msk [vmem:[%s5669_s13 + $0x378] sm:$0xff] %vm3632_vm2, %v3599_v11  ;;  %3743 = vst.msk [vmem:[%s5669_s13 + $0x370] sm:$0xff] %vm3632_vm2, %v3597_v34 }
 0x411   : > { %v3483_v46 = vpop.xlane.xlu1 %3482  ;;  %v3481_v38 = vpop.xlane.xlu0 %3480 }
 0x412   : > { %3686 = vst.msk [vmem:[%s5669_s13 + $0x1a8] sm:$0xff] %vm3632_vm2, %v3483_v46  ;;  %3685 = vst.msk [vmem:[%s5669_s13 + $0x1a0] sm:$0xff] %vm3632_vm2, %v3481_v38 }
 0x415   : > { %v3603_v25 = vpop.xlane.xlu1 %3602  ;;  %v3601_v10 = vpop.xlane.xlu0 %3600 }
 0x416   : > { %3746 = vst.msk [vmem:[%s5669_s13 + $0x388] sm:$0xff] %vm3632_vm2, %v3603_v25  ;;  %3745 = vst.msk [vmem:[%s5669_s13 + $0x380] sm:$0xff] %vm3632_vm2, %v3601_v10 }
 0x419   : > { %v3487_v7 = vpop.xlane.xlu1 %3486  ;;  %v3485_v43 = vpop.xlane.xlu0 %3484 }
 0x41a   : > { %3688 = vst.msk [vmem:[%s5669_s13 + $0x1b8] sm:$0xff] %vm3632_vm2, %v3487_v7  ;;  %3687 = vst.msk [vmem:[%s5669_s13 + $0x1b0] sm:$0xff] %vm3632_vm2, %v3485_v43 }
 0x41d   : > { %v3607_v52 = vpop.xlane.xlu1 %3606  ;;  %v3605_v55 = vpop.xlane.xlu0 %3604 }
 0x41e   : > { %3748 = vst.msk [vmem:[%s5669_s13 + $0x398] sm:$0xff] %vm3632_vm2, %v3607_v52  ;;  %3747 = vst.msk [vmem:[%s5669_s13 + $0x390] sm:$0xff] %vm3632_vm2, %v3605_v55 }
 0x421   : > { %v3491_v5 = vpop.xlane.xlu1 %3490  ;;  %v3489_v16 = vpop.xlane.xlu0 %3488 }
 0x422   : > { %3690 = vst.msk [vmem:[%s5669_s13 + $0x1c8] sm:$0xff] %vm3632_vm2, %v3491_v5  ;;  %3689 = vst.msk [vmem:[%s5669_s13 + $0x1c0] sm:$0xff] %vm3632_vm2, %v3489_v16 }
 0x425   : > { %v3611_v35 = vpop.xlane.xlu1 %3610  ;;  %v3609_v8 = vpop.xlane.xlu0 %3608 }
 0x426   : > { %3750 = vst.msk [vmem:[%s5669_s13 + $0x3a8] sm:$0xff] %vm3632_vm2, %v3611_v35  ;;  %3749 = vst.msk [vmem:[%s5669_s13 + $0x3a0] sm:$0xff] %vm3632_vm2, %v3609_v8 }
 0x429   : > { %v3495_v54 = vpop.xlane.xlu1 %3494  ;;  %v3493_v14 = vpop.xlane.xlu0 %3492 }
 0x42a   : > { %3692 = vst.msk [vmem:[%s5669_s13 + $0x1d8] sm:$0xff] %vm3632_vm2, %v3495_v54  ;;  %3691 = vst.msk [vmem:[%s5669_s13 + $0x1d0] sm:$0xff] %vm3632_vm2, %v3493_v14 }
 0x42d   : > { %v3615_v44 = vpop.xlane.xlu1 %3614  ;;  %v3613_v32 = vpop.xlane.xlu0 %3612 }
 0x42e   : > { %3752 = vst.msk [vmem:[%s5669_s13 + $0x3b8] sm:$0xff] %vm3632_vm2, %v3615_v44  ;;  %3751 = vst.msk [vmem:[%s5669_s13 + $0x3b0] sm:$0xff] %vm3632_vm2, %v3613_v32 }
 0x431   : > { %v3619_v20 = vpop.xlane.xlu1 %3618  ;;  %v3617_v6 = vpop.xlane.xlu0 %3616 }
 0x432   : > { %3754 = vst.msk [vmem:[%s5669_s13 + $0x3c8] sm:$0xff] %vm3632_vm2, %v3619_v20  ;;  %3753 = vst.msk [vmem:[%s5669_s13 + $0x3c0] sm:$0xff] %vm3632_vm2, %v3617_v6 }
 0x435   : > { %v3623_v28 = vpop.xlane.xlu1 %3622  ;;  %v3621_v50 = vpop.xlane.xlu0 %3620 }
 0x436   : > { %3756 = vst.msk [vmem:[%s5669_s13 + $0x3d8] sm:$0xff] %vm3632_vm2, %v3623_v28  ;;  %3755 = vst.msk [vmem:[%s5669_s13 + $0x3d0] sm:$0xff] %vm3632_vm2, %v3621_v50 }
 0x439   : > { %v3627_v41 = vpop.xlane.xlu1 %3626  ;;  %v3625_v13 = vpop.xlane.xlu0 %3624 }
 0x43a   : > { %3758 = vst.msk [vmem:[%s5669_s13 + $0x3e8] sm:$0xff] %vm3632_vm2, %v3627_v41  ;;  %3757 = vst.msk [vmem:[%s5669_s13 + $0x3e0] sm:$0xff] %vm3632_vm2, %v3625_v13 }
 0x43d   : > { %v3631_v12 = vpop.xlane.xlu1 %3630  ;;  %v3629_v23 = vpop.xlane.xlu0 %3628 }
 0x43e   : > { %3760 = vst.msk [vmem:[%s5669_s13 + $0x3f8] sm:$0xff] %vm3632_vm2, %v3631_v12  ;;  %3759 = vst.msk [vmem:[%s5669_s13 + $0x3f0] sm:$0xff] %vm3632_vm2, %v3629_v23 }
 0x43f PF: > { %s18_s26 = sadd.s32 1, %s4433_s26   ;;  %s6195_s24 = smov %s4429_s25 }
 0x440   : > { %p15_p2 = scmp.ge.s32.totalorder %s18_s26, 4   ;;  %s6196_s25 = smov %s6198_s28 }
 0x442   :  { %17 = sbr.rel (!%p15_p2) target bundleno = 2 (0x2), region = 91 }
 0x447   :  { %3782 = vsyncpa [#allocation4], 1 }
 0x448   :  { %3784 = vsyncpa [#allocation4 + $0x1], 1 }

// kernel: pointnet_encoder_forward.5
= control target key start
LH: loop header
LB: loop body
LE: loop exit
PB: predicated region body
PF: predicated region fallthrough
CT: control target
= control target key end

     0   :  { %13 = vsyncpa [#allocation4], 0  ;;  %s4721_s27 = smov 0   ;;  %s4723_s28 = smov 0   ;;  %s6918_s0 = inlined_call_operand.vmem [shape: f32[2,3,128], index: 0, kind: input, shape index: {}]   ;;  %s6919_s1 = inlined_call_operand.vmem [shape: f32[2,9], index: 1, kind: input, shape index: {}]   ;;  %s6920_s2 = inlined_call_operand.vmem [shape: f32[64,3], index: 2, kind: input, shape index: {}]   ;;  %s6921_s3 = inlined_call_operand.vmem [shape: f32[64,1], index: 3, kind: input, shape index: {}]   ;;  %s6922_s4 = inlined_call_operand.vmem [shape: f32[128,64], index: 4, kind: input, shape index: {}]   ;;  %s6923_s5 = inlined_call_operand.vmem [shape: f32[128,1], index: 5, kind: input, shape index: {}]   ;;  %s6924_s6 = inlined_call_operand.vmem [shape: f32[1024,128], index: 6, kind: input, shape index: {}]   ;;  %s6925_s7 = inlined_call_operand.vmem [shape: f32[1024,1], index: 7, kind: input, shape index: {}]   ;;  %s6926_s8 = inlined_call_operand.vmem [shape: f32[2,1024,1], index: 8, kind: output, shape index: {}]  }
   0x1   :  { %s4725_s29 = smov 0  }
   0x2 LB: > { %s4093_s30 = sadd.s32 4294967295, %s4669_s29   ;;  %s31_s9 = sadd.s32 1, %s4665_s28  ;;  %s4669_s29 = sphi %s4725_s29, %s19_s29   ;;  %s4665_s28 = sphi %s4723_s28, %s7002_s28   ;;  %s4661_s27 = sphi %s4721_s27, %s7001_s27  }
   0x3   : > { %p33_p0 = scmp.ge.s32.totalorder %s31_s9, 2  ;;  %p4095_p1 = scmp.ge.s32.totalorder %s4669_s29, 1 }
   0x4   : > { %p237_p2 = scmp.lt.s32.totalorder %s4669_s29, 3  ;;  %p4746_p4 = scmp.eq.s32.totalorder %s4093_s30, 0 }
   0x5   : > { %s7004_s9 = smov (%p33_p0, %s31_s9), 0  ;;  %s250_s14 = sshll.u32 %s6919_s1, 4  ;;  %s251_s14 = int_to_ptr.vmem [resolvable:$true] %s250_s14 }
   0x6   : > { %p4742_p3 = pnand %p4095_p1, %p237_p2  ;;  %s4628_s15 = scalar_lea.vmem %s251_s14, 32 }
   0x7   : > { %p4629_p7 = scmp.ne.s32.totalorder %s251_s14, %s4628_s15  ;;  %p4636_p11 = scmp.lt.s32.totalorder %s251_s14, %s251_s14 }
   0x8   : > { %p4591_p5 = pneg %p4742_p3  ;;  %p4637_p12 = scmp.lt.s32.totalorder %s4628_s15, %s4628_s15 }
   0xa   : > { %p4592_p6 = pnand %p4746_p4, %p4591_p5  ;;  %p4638_p13 = por %p4637_p12, %p4636_p11 }
   0xc   : > { %p4630_p8 = pneg %p4592_p6 }
   0xe   : > { %p4631_p9 = pnand %p4630_p8, %p4629_p7 }
  0x10   : > { %p4632_p10 = pneg %p4631_p9 }
  0x12   : > { %p4639_p0 = pnand %p4638_p13, %p4632_p10 }
  0x14   : > { %4642 = shalt.err (!%p4639_p0)
}
  0x15   : > { %s4671_s16 = smov [#allocation3]   ;;  %291 = sbr.rel (%p4742_p3) target bundleno = 1255 (0x4e7), region = 52 }
  0x16   : > { %4594 = dma.vmem_to_smem (!%p4592_p6), %s251_s14, 32, %s4671_s16, [#allocation4]  }
  0x1a   : > { %4656 = dma.done.wait (%p4746_p4), [#allocation4], 32  }
  0x1b   : > { %4658 = vsyncadd (%p4746_p4), [#allocation4], 4294967264 }
  0x1c   : > { %297 = sfence }
  0x1d   : > { %s4764_s17 = sshll.u32 %s4661_s27, 7  ;;  %v4771_v0 = vld [vmem:[%s6920_s2 + $0x10] sm:$0xff]  ;;  %v4776_v1 = vld [vmem:[%s6920_s2] sm:$0xff]  ;;  %v4783_v3 = vld [vmem:[%s6920_s2 + $0x18] sm:$0xff]  ;;  %s4672_s16 = smov 127   ;;  %v4673_v29 = vmov 0  }
  0x1e   : > { %s492_s18 = sadd.s32 1, %s4764_s17  ;;  %s543_s20 = sadd.s32 2, %s4764_s17  ;;  %v4788_v4 = vld [vmem:[%s6920_s2 + $0x8] sm:$0xff]  ;;  %v4805_v10 = vld [vmem:[%s6920_s2 + $0x20] sm:$0xff]  ;;  %v4810_v11 = vld [vmem:[%s6920_s2 + $0x38] sm:$0xff]  ;;  %4627 = vset.pattern.permute.xlu1 %v4673_v29  ;;  %4626 = vset.pattern.permute.xlu0 %v4673_v29  ;;  %vm1168_vm0 = vcmask 523264  }
  0x1f   : > { %s493_s19 = sld [smem:[#allocation3 + %s492_s18]]  ;;  %s718_s25 = sadd.s32 7, %s4764_s17  ;;  %v4800_v9 = vld [vmem:[%s6920_s2 + $0x28] sm:$0xff]  ;;  %v4815_v12 = vld [vmem:[%s6920_s2 + $0x30] sm:$0xff]  ;;  %vm3885_vm2 = vcmask 7168  }
  0x20   : > { %s544_s26 = sld [smem:[#allocation3 + %s543_s20]]  ;;  %s769_s30 = sadd.s32 8, %s4764_s17 }
  0x21   : > { %s719_s14 = sld [smem:[#allocation3 + %s718_s25]]  ;;  %s605_s11 = sadd.s32 4, %s4764_s17 }
  0x22   : > { %s770_s15 = sld [smem:[#allocation3 + %s769_s30]]  ;;  %s4674_s12 = smov 126  }
  0x23   : > { %s482_s18 = sld [smem:[#allocation3 + %s4764_s17]]  ;;  %p328_p1 = scmp.lt.s32.totalorder %s4661_s27, 1 }
  0x24   : > { %s606_s13 = sld [smem:[#allocation3 + %s605_s11]] }
  0x25   : > { %v494_v2 = vstv %s493_s19  ;;  %s7006_s27 = smov (!%p328_p1, %s4661_s27), 1 }
  0x26   : > { %v497_v5 = vmul.f32 %v494_v2, %v4771_v0  ;;  %v495_v6 = vmul.f32 %v494_v2, %v4776_v1  ;;  %v498_v7 = vmul.f32 %v494_v2, %v4783_v3  ;;  %v496_v8 = vmul.f32 %v494_v2, %v4788_v4  ;;  %s4122_s20 = sshll.u32 %s7006_s27, 10 }
  0x27   : > { %v500_v13 = vmul.f32 %v494_v2, %v4800_v9  ;;  %v499_v14 = vmul.f32 %v494_v2, %v4805_v10  ;;  %v545_v15 = vstv %s544_s26  ;;  %v502_v16 = vmul.f32 %v494_v2, %v4810_v11  ;;  %s594_s26 = sadd.s32 3, %s4764_s17  ;;  %s6507_s23 = scalar_lea.vmem %s6926_s8, %s4122_s20 }
  0x28   : > { %515 = vrot.lane.b32.xlu1 %v497_v5, %s4672_s16  ;;  %511 = vrot.lane.b32.xlu0 %v495_v6, %s4672_s16  ;;  %v501_v17 = vmul.f32 %v494_v2, %v4815_v12  ;;  %v547_v18 = vmul.f32 %v545_v15, %v4788_v4  ;;  %v546_v19 = vmul.f32 %v545_v15, %v4776_v1  ;;  %v4825_v20 = vstv %s719_s14  ;;  %s595_s10 = sld [smem:[#allocation3 + %s594_s26]]  ;;  %s656_s14 = sadd.s32 5, %s4764_s17 }
  0x29   : > { %v771_v21 = vstv %s770_s15  ;;  %v4831_v22 = vmul.f32 %v4825_v20, %v4776_v1  ;;  %v4835_v23 = vmul.f32 %v4825_v20, %v4783_v3  ;;  %v483_v24 = vstv %s482_s18  ;;  %s657_s15 = sld [smem:[#allocation3 + %s656_s14]]  ;;  %s707_s18 = sadd.s32 6, %s4764_s17 }
  0x2a   : > { %v4839_v25 = vmul.f32 %v4825_v20, %v4771_v0  ;;  %v4843_v26 = vmul.f32 %v4825_v20, %v4800_v9  ;;  %v4847_v27 = vmul.f32 %v4825_v20, %v4805_v10  ;;  %v4851_v28 = vmul.f32 %v4825_v20, %v4810_v11  ;;  %s708_s19 = sld [smem:[#allocation3 + %s707_s18]]  ;;  %s4100_s17 = sshll.u32 %s7006_s27, 2 }
  0x2b   : > { %v4856_v30 = vmul.f32 %v4825_v20, %v4815_v12  ;;  %v4859_v31 = vmul.f32 %v771_v21, %v4788_v4  ;;  %v4862_v32 = vmul.f32 %v771_v21, %v4776_v1  ;;  %v4865_v33 = vmul.f32 %v771_v21, %v4783_v3  ;;  %s334_s25 = scalar_lea.vmem %s6918_s0, %s4100_s17 }
  0x2c   : > { %517 = vrot.lane.b32.xlu1 %v498_v7, %s4672_s16  ;;  %513 = vrot.lane.b32.xlu0 %v496_v8, %s4672_s16  ;;  %v4868_v34 = vmul.f32 %v771_v21, %v4771_v0  ;;  %v4871_v35 = vmul.f32 %v771_v21, %v4800_v9  ;;  %v4874_v36 = vmul.f32 %v771_v21, %v4805_v10  ;;  %v607_v59 = vstv %s606_s13 }
  0x2d   : > { %v4877_v37 = vmul.f32 %v771_v21, %v4810_v11  ;;  %v4882_v38 = vmul.f32 %v771_v21, %v4815_v12  ;;  %v4885_v39 = vmul.f32 %v483_v24, %v4771_v0  ;;  %v4888_v40 = vmul.f32 %v483_v24, %v4776_v1 }
  0x2e   : > { %v4891_v41 = vmul.f32 %v483_v24, %v4783_v3  ;;  %v4894_v42 = vmul.f32 %v483_v24, %v4788_v4  ;;  %v4897_v43 = vmul.f32 %v483_v24, %v4800_v9  ;;  %v4900_v44 = vmul.f32 %v483_v24, %v4805_v10 }
  0x2f   : > { %v4904_v45 = vmul.f32 %v483_v24, %v4810_v11  ;;  %v4907_v46 = vmul.f32 %v483_v24, %v4815_v12  ;;  %v549_v47 = vmul.f32 %v545_v15, %v4783_v3  ;;  %v548_v48 = vmul.f32 %v545_v15, %v4771_v0 }
  0x30   : > { %521 = vrot.lane.b32.xlu1 %v500_v13, %s4672_s16  ;;  %519 = vrot.lane.b32.xlu0 %v499_v14, %s4672_s16  ;;  %v596_v49 = vstv %s595_s10  ;;  %v551_v53 = vmul.f32 %v545_v15, %v4800_v9  ;;  %v550_v54 = vmul.f32 %v545_v15, %v4805_v10  ;;  %v553_v57 = vmul.f32 %v545_v15, %v4810_v11 }
  0x31   : > { %v4914_v50 = vmul.f32 %v596_v49, %v4788_v4  ;;  %v4917_v51 = vmul.f32 %v596_v49, %v4776_v1  ;;  %v4920_v52 = vmul.f32 %v596_v49, %v4783_v3  ;;  %v4927_v55 = vmul.f32 %v596_v49, %v4771_v0 }
  0x32   : > { %v4930_v56 = vmul.f32 %v596_v49, %v4800_v9  ;;  %v552_v58 = vmul.f32 %v545_v15, %v4815_v12  ;;  %v4937_v60 = vmul.f32 %v596_v49, %v4805_v10  ;;  %v4940_v61 = vmul.f32 %v596_v49, %v4810_v11 }
  0x33   : > { %v609_v62 = vmul.f32 %v607_v59, %v4788_v4  ;;  %v608_v63 = vmul.f32 %v607_v59, %v4776_v1  ;;  %v4948_v2 = vmul.f32 %v596_v49, %v4815_v12  ;;  %v611_v5 = vmul.f32 %v607_v59, %v4783_v3 }
  0x34   : > { %525 = vrot.lane.b32.xlu1 %v502_v16, %s4672_s16  ;;  %523 = vrot.lane.b32.xlu0 %v501_v17, %s4672_s16  ;;  %v610_v6 = vmul.f32 %v607_v59, %v4771_v0  ;;  %v613_v7 = vmul.f32 %v607_v59, %v4800_v9  ;;  %v612_v8 = vmul.f32 %v607_v59, %v4805_v10  ;;  %v658_v15 = vstv %s657_s15 }
  0x35   : > { %v615_v13 = vmul.f32 %v607_v59, %v4810_v11  ;;  %v614_v14 = vmul.f32 %v607_v59, %v4815_v12  ;;  %v660_v16 = vmul.f32 %v658_v15, %v4788_v4  ;;  %v659_v17 = vmul.f32 %v658_v15, %v4776_v1 }
  0x36   : > { %v709_v21 = vstv %s708_s19  ;;  %v663_v49 = vmul.f32 %v658_v15, %v4805_v10 }
  0x37   : > { %v4972_v24 = vmul.f32 %v709_v21, %v4788_v4  ;;  %v4975_v29 = vmul.f32 %v709_v21, %v4776_v1  ;;  %v666_v1 = vmul.f32 %v658_v15, %v4810_v11 }
  0x38   : > { %564 = vrot.lane.b32.xlu1 %v547_v18, %s4674_s12  ;;  %562 = vrot.lane.b32.xlu0 %v546_v19, %s4674_s12  ;;  %v662_v18 = vmul.f32 %v658_v15, %v4783_v3  ;;  %v661_v19 = vmul.f32 %v658_v15, %v4771_v0 }
  0x3c   : > { %568 = vrot.lane.b32.xlu1 %v549_v47, %s4674_s12  ;;  %566 = vrot.lane.b32.xlu0 %v548_v48, %s4674_s12  ;;  %v4978_v47 = vmul.f32 %v709_v21, %v4783_v3  ;;  %v664_v48 = vmul.f32 %v658_v15, %v4800_v9  ;;  %v665_v3 = vmul.f32 %v658_v15, %v4815_v12 }
  0x40   : > { %572 = vrot.lane.b32.xlu1 %v551_v53, %s4674_s12  ;;  %570 = vrot.lane.b32.xlu0 %v550_v54, %s4674_s12  ;;  %v4985_v53 = vmul.f32 %v709_v21, %v4771_v0  ;;  %v4988_v54 = vmul.f32 %v709_v21, %v4800_v9  ;;  %v722_v0 = vmul.f32 %v4825_v20, %v4788_v4 }
  0x41   : > { %v5005_v9 = vmul.f32 %v709_v21, %v4815_v12 }
  0x44   : > { %576 = vrot.lane.b32.xlu1 %v553_v57, %s4674_s12  ;;  %574 = vrot.lane.b32.xlu0 %v552_v58, %s4674_s12  ;;  %v4995_v57 = vmul.f32 %v709_v21, %v4805_v10  ;;  %v4998_v58 = vmul.f32 %v709_v21, %v4810_v11 }
  0x48   : > { %626 = vrot.lane.b32.xlu1 %v609_v62, %s4672_s16  ;;  %624 = vrot.lane.b32.xlu0 %v608_v63, %s4672_s16 }
  0x4c   : > { %630 = vrot.lane.b32.xlu1 %v611_v5, %s4672_s16  ;;  %628 = vrot.lane.b32.xlu0 %v610_v6, %s4672_s16 }
  0x50   : > { %634 = vrot.lane.b32.xlu1 %v613_v7, %s4672_s16  ;;  %632 = vrot.lane.b32.xlu0 %v612_v8, %s4672_s16 }
  0x54   : > { %638 = vrot.lane.b32.xlu1 %v615_v13, %s4672_s16  ;;  %636 = vrot.lane.b32.xlu0 %v614_v14, %s4672_s16 }
  0x58   : > { %677 = vrot.lane.b32.xlu1 %v660_v16, %s4674_s12  ;;  %675 = vrot.lane.b32.xlu0 %v659_v17, %s4674_s12 }
  0x5c   : > { %681 = vrot.lane.b32.xlu1 %v662_v18, %s4674_s12  ;;  %679 = vrot.lane.b32.xlu0 %v661_v19, %s4674_s12 }
  0x60   : > { %685 = vrot.lane.b32.xlu1 %v664_v48, %s4674_s12  ;;  %683 = vrot.lane.b32.xlu0 %v663_v49, %s4674_s12 }
  0x64   : > { %689 = vrot.lane.b32.xlu1 %v666_v1, %s4674_s12  ;;  %687 = vrot.lane.b32.xlu0 %v665_v3, %s4674_s12 }
  0x68   : > { %739 = vrot.lane.b32.xlu1 %v722_v0, %s4672_s16  ;;  %737 = vrot.lane.b32.xlu0 %v4831_v22, %s4672_s16 }
  0x6c   : > { %743 = vrot.lane.b32.xlu1 %v4835_v23, %s4672_s16  ;;  %741 = vrot.lane.b32.xlu0 %v4839_v25, %s4672_s16 }
  0x70   : > { %747 = vrot.lane.b32.xlu1 %v4843_v26, %s4672_s16  ;;  %745 = vrot.lane.b32.xlu0 %v4847_v27, %s4672_s16 }
  0x74   : > { %751 = vrot.lane.b32.xlu1 %v4851_v28, %s4672_s16  ;;  %749 = vrot.lane.b32.xlu0 %v4856_v30, %s4672_s16 }
  0x78   : > { %790 = vrot.lane.b32.xlu1 %v4859_v31, %s4674_s12  ;;  %788 = vrot.lane.b32.xlu0 %v4862_v32, %s4674_s12 }
  0x7c   : > { %794 = vrot.lane.b32.xlu1 %v4865_v33, %s4674_s12  ;;  %792 = vrot.lane.b32.xlu0 %v4868_v34, %s4674_s12 }
  0x80   : > { %798 = vrot.lane.b32.xlu1 %v4871_v35, %s4674_s12  ;;  %796 = vrot.lane.b32.xlu0 %v4874_v36, %s4674_s12 }
  0x84   : > { %802 = vrot.lane.b32.xlu1 %v4877_v37, %s4674_s12  ;;  %800 = vrot.lane.b32.xlu0 %v4882_v38, %s4674_s12 }
  0x9a   : > { %v516_v4 = vpop.permute.xlu1 %515  ;;  %v512_v10 = vpop.permute.xlu0 %511 }
  0x9b   : > { %v535_v26 = vadd.f32 %v512_v10, %v4888_v40  ;;  %v537_v33 = vadd.f32 %v516_v4, %v4885_v39 }
  0x9e   : > { %v518_v11 = vpop.permute.xlu1 %517  ;;  %v514_v12 = vpop.permute.xlu0 %513 }
  0x9f   : > { %v536_v27 = vadd.f32 %v514_v12, %v4894_v42  ;;  %v538_v34 = vadd.f32 %v518_v11, %v4891_v41 }
  0xa2   : > { %v522_v20 = vpop.permute.xlu1 %521  ;;  %v520_v22 = vpop.permute.xlu0 %519 }
  0xa3   : > { %v540_v59 = vadd.f32 %v522_v20, %v4897_v43  ;;  %v539_v40 = vadd.f32 %v520_v22, %v4900_v44 }
  0xa6   : > { %v526_v23 = vpop.permute.xlu1 %525  ;;  %v524_v25 = vpop.permute.xlu0 %523 }
  0xa7   : > { %v542_v39 = vadd.f32 %v526_v23, %v4904_v45  ;;  %v541_v41 = vadd.f32 %v524_v25, %v4907_v46 }
  0xaa   : > { %v565_v28 = vpop.permute.xlu1 %564  ;;  %v563_v30 = vpop.permute.xlu0 %562 }
  0xab   : > { %v587_v31 = vadd.f32 %v565_v28, %v536_v27  ;;  %v586_v32 = vadd.f32 %v563_v30, %v535_v26 }
  0xad   : > { %827 = vperm.xlu1 %4627, %v587_v31   ;;  %822 = vperm.xlu0 %4626, %v586_v32  }
  0xae   : > { %v569_v35 = vpop.permute.xlu1 %568  ;;  %v567_v36 = vpop.permute.xlu0 %566 }
  0xaf   : > { %v589_v37 = vadd.f32 %v569_v35, %v538_v34  ;;  %v588_v38 = vadd.f32 %v567_v36, %v537_v33 }
  0xb1   : > { %832 = vperm.xlu1 %4627, %v588_v38   ;;  %837 = vperm.xlu0 %4626, %v589_v37  }
  0xb2   : > { %v573_v42 = vpop.permute.xlu1 %572  ;;  %v571_v62 = vpop.permute.xlu0 %570 }
  0xb3   : > { %v591_v63 = vadd.f32 %v573_v42, %v540_v59  ;;  %v590_v5 = vadd.f32 %v571_v62, %v539_v40 }
  0xb5   : > { %842 = vperm.xlu1 %4627, %v590_v5   ;;  %847 = vperm.xlu0 %4626, %v591_v63  }
  0xb6   : > { %v577_v6 = vpop.permute.xlu1 %576  ;;  %v575_v7 = vpop.permute.xlu0 %574 }
  0xb7   : > { %v593_v8 = vadd.f32 %v577_v6, %v542_v39  ;;  %v592_v13 = vadd.f32 %v575_v7, %v541_v41 }
  0xb9   : > { %852 = vperm.xlu1 %4627, %v592_v13   ;;  %857 = vperm.xlu0 %4626, %v593_v8  }
  0xba   : > { %v627_v43 = vpop.permute.xlu1 %626  ;;  %v625_v44 = vpop.permute.xlu0 %624 }
  0xbb   : > { %v649_v45 = vadd.f32 %v627_v43, %v4914_v50  ;;  %v648_v46 = vadd.f32 %v625_v44, %v4917_v51 }
  0xbe   : > { %v631_v14 = vpop.permute.xlu1 %630  ;;  %v629_v15 = vpop.permute.xlu0 %628 }
  0xbf   : > { %v651_v3 = vadd.f32 %v631_v14, %v4920_v52  ;;  %v650_v0 = vadd.f32 %v629_v15, %v4927_v55 }
  0xc2   : > { %v635_v16 = vpop.permute.xlu1 %634  ;;  %v633_v17 = vpop.permute.xlu0 %632 }
  0xc3   : > { %v653_v20 = vadd.f32 %v635_v16, %v4930_v56  ;;  %v652_v50 = vadd.f32 %v633_v17, %v4937_v60  ;;  %v996_v16 = vld [vmem:[%s6921_s3 + $0x20] sm:$0xff]  ;;  %v997_v17 = vld [vmem:[%s6921_s3 + $0x28] sm:$0xff] }
  0xc6   : > { %v639_v18 = vpop.permute.xlu1 %638  ;;  %v637_v19 = vpop.permute.xlu0 %636 }
  0xc7   : > { %v655_v52 = vadd.f32 %v639_v18, %v4940_v61  ;;  %v654_v55 = vadd.f32 %v637_v19, %v4948_v2  ;;  %v998_v18 = vld [vmem:[%s6921_s3 + $0x30] sm:$0xff]  ;;  %v999_v19 = vld [vmem:[%s6921_s3 + $0x38] sm:$0xff] }
  0xca   : > { %v678_v21 = vpop.permute.xlu1 %677  ;;  %v676_v48 = vpop.permute.xlu0 %675 }
  0xcb   : > { %v700_v49 = vadd.f32 %v678_v21, %v649_v45  ;;  %v699_v1 = vadd.f32 %v676_v48, %v648_v46  ;;  %v1072_v45 = vld [vmem:[%s6923_s5] sm:$0xff]  ;;  %v1073_v46 = vld [vmem:[%s6923_s5 + $0x8] sm:$0xff]  ;;  %v1074_v21 = vld [vmem:[%s6923_s5 + $0x10] sm:$0xff] }
  0xcc   : > { %v1075_v48 = vld [vmem:[%s6923_s5 + $0x18] sm:$0xff] }
  0xcd   : > { %874 = vperm.xlu1 %4627, %v699_v1   ;;  %879 = vperm.xlu0 %4626, %v700_v49   ;;  %v1076_v49 = vld [vmem:[%s6923_s5 + $0x20] sm:$0xff]  ;;  %v1077_v1 = vld [vmem:[%s6923_s5 + $0x28] sm:$0xff] }
  0xce   : > { %v682_v4 = vpop.permute.xlu1 %681  ;;  %v680_v10 = vpop.permute.xlu0 %679 }
  0xcf   : > { %v702_v11 = vadd.f32 %v682_v4, %v651_v3  ;;  %v701_v12 = vadd.f32 %v680_v10, %v650_v0  ;;  %v1078_v3 = vld [vmem:[%s6923_s5 + $0x30] sm:$0xff]  ;;  %v1079_v0 = vld [vmem:[%s6923_s5 + $0x38] sm:$0xff]  ;;  %v1056_v4 = vld [vmem:[%s6922_s4] sm:$0xff] }
  0xd0   : > { %v1080_v10 = vld [vmem:[%s6923_s5 + $0x40] sm:$0xff]  ;;  %4307 = vmatprep.mubr.msk.f32.mxu0 %vm1168_vm0, %v1056_v4  ;;  %v1541_v4 = vld [vmem:[%s6925_s7 + $0x118] sm:$0xff] }
  0xd1   : > { %884 = vperm.xlu1 %4627, %v701_v12   ;;  %889 = vperm.xlu0 %4626, %v702_v11   ;;  %v1081_v11 = vld [vmem:[%s6923_s5 + $0x48] sm:$0xff]  ;;  %v1082_v12 = vld [vmem:[%s6923_s5 + $0x50] sm:$0xff] }
  0xd2   : > { %v686_v51 = vpop.permute.xlu1 %685  ;;  %v684_v22 = vpop.permute.xlu0 %683 }
  0xd3   : > { %v704_v23 = vadd.f32 %v686_v51, %v653_v20  ;;  %v703_v25 = vadd.f32 %v684_v22, %v652_v50  ;;  %v1083_v20 = vld [vmem:[%s6923_s5 + $0x58] sm:$0xff]  ;;  %v1084_v50 = vld [vmem:[%s6923_s5 + $0x60] sm:$0xff]  ;;  %v1085_v51 = vld [vmem:[%s6923_s5 + $0x68] sm:$0xff] }
  0xd4   : > { %v1086_v22 = vld [vmem:[%s6923_s5 + $0x70] sm:$0xff] }
  0xd5   : > { %894 = vperm.xlu1 %4627, %v703_v25   ;;  %899 = vperm.xlu0 %4626, %v704_v23   ;;  %v1087_v23 = vld [vmem:[%s6923_s5 + $0x78] sm:$0xff]  ;;  %v1506_v25 = vld [vmem:[%s6925_s7] sm:$0xff] }
  0xd6   : > { %v690_v26 = vpop.permute.xlu1 %689  ;;  %v688_v27 = vpop.permute.xlu0 %687 }
  0xd7   : > { %v706_v28 = vadd.f32 %v690_v26, %v655_v52  ;;  %v705_v30 = vadd.f32 %v688_v27, %v654_v55  ;;  %v1507_v52 = vld [vmem:[%s6925_s7 + $0x8] sm:$0xff]  ;;  %v1508_v55 = vld [vmem:[%s6925_s7 + $0x10] sm:$0xff]  ;;  %v1509_v26 = vld [vmem:[%s6925_s7 + $0x18] sm:$0xff] }
  0xd8   : > { %v1510_v27 = vld [vmem:[%s6925_s7 + $0x20] sm:$0xff] }
  0xd9   : > { %904 = vperm.xlu1 %4627, %v705_v30   ;;  %909 = vperm.xlu0 %4626, %v706_v28   ;;  %v1511_v28 = vld [vmem:[%s6925_s7 + $0x28] sm:$0xff]  ;;  %v1512_v30 = vld [vmem:[%s6925_s7 + $0x30] sm:$0xff] }
  0xda   : > { %v740_v56 = vpop.permute.xlu1 %739  ;;  %v738_v60 = vpop.permute.xlu0 %737 }
  0xdb   : > { %v762_v61 = vadd.f32 %v740_v56, %v4972_v24  ;;  %v761_v2 = vadd.f32 %v738_v60, %v4975_v29  ;;  %v1513_v56 = vld [vmem:[%s6925_s7 + $0x38] sm:$0xff]  ;;  %v1514_v60 = vld [vmem:[%s6925_s7 + $0x40] sm:$0xff] }
  0xde   : > { %v744_v31 = vpop.permute.xlu1 %743  ;;  %v742_v32 = vpop.permute.xlu0 %741 }
  0xdf   : > { %v764_v42 = vadd.f32 %v744_v31, %v4978_v47  ;;  %v763_v62 = vadd.f32 %v742_v32, %v4985_v53  ;;  %v1515_v31 = vld [vmem:[%s6925_s7 + $0x48] sm:$0xff] }
  0xe2   : > { %v748_v33 = vpop.permute.xlu1 %747  ;;  %v746_v34 = vpop.permute.xlu0 %745 }
  0xe3   : > { %v766_v6 = vadd.f32 %v748_v33, %v4988_v54  ;;  %v765_v24 = vadd.f32 %v746_v34, %v4995_v57  ;;  %v992_v54 = vld [vmem:[%s6921_s3] sm:$0xff]  ;;  %v993_v57 = vld [vmem:[%s6921_s3 + $0x8] sm:$0xff]  ;;  %v1516_v34 = vld [vmem:[%s6925_s7 + $0x50] sm:$0xff] }
  0xe6   : > { %v752_v35 = vpop.permute.xlu1 %751  ;;  %v750_v36 = vpop.permute.xlu0 %749 }
  0xe7   : > { %v768_v47 = vadd.f32 %v752_v35, %v4998_v58  ;;  %v767_v53 = vadd.f32 %v750_v36, %v5005_v9  ;;  %v994_v58 = vld [vmem:[%s6921_s3 + $0x10] sm:$0xff]  ;;  %v995_v9 = vld [vmem:[%s6921_s3 + $0x18] sm:$0xff] }
  0xe8   : > { %v1517_v35 = vld [vmem:[%s6925_s7 + $0x58] sm:$0xff] }
  0xea   : > { %v791_v37 = vpop.permute.xlu1 %790  ;;  %v789_v38 = vpop.permute.xlu0 %788 }
  0xeb   : > { %v813_v59 = vadd.f32 %v791_v37, %v762_v61  ;;  %v812_v40 = vadd.f32 %v789_v38, %v761_v2  ;;  %v1518_v2 = vld [vmem:[%s6925_s7 + $0x60] sm:$0xff]  ;;  %v1519_v37 = vld [vmem:[%s6925_s7 + $0x68] sm:$0xff]  ;;  %v1520_v38 = vld [vmem:[%s6925_s7 + $0x70] sm:$0xff] }
  0xed   : > { %934 = vperm.xlu1 %4627, %v812_v40   ;;  %939 = vperm.xlu0 %4626, %v813_v59   ;;  %v1521_v59 = vld [vmem:[%s6925_s7 + $0x78] sm:$0xff] }
  0xee   : > { %v795_v63 = vpop.permute.xlu1 %794  ;;  %v793_v5 = vpop.permute.xlu0 %792 }
  0xef   : > { %v815_v39 = vadd.f32 %v795_v63, %v764_v42  ;;  %v814_v41 = vadd.f32 %v793_v5, %v763_v62  ;;  %v1522_v62 = vld [vmem:[%s6925_s7 + $0x80] sm:$0xff]  ;;  %v1523_v63 = vld [vmem:[%s6925_s7 + $0x88] sm:$0xff] }
  0xf1   : > { %944 = vperm.xlu1 %4627, %v814_v41   ;;  %949 = vperm.xlu0 %4626, %v815_v39   ;;  %v1524_v41 = vld [vmem:[%s6925_s7 + $0x90] sm:$0xff] }
  0xf2   : > { %v799_v29 = vpop.permute.xlu1 %798  ;;  %v797_v7 = vpop.permute.xlu0 %796 }
  0xf3   : > { %v817_v8 = vadd.f32 %v799_v29, %v766_v6  ;;  %v816_v13 = vadd.f32 %v797_v7, %v765_v24  ;;  %v1525_v6 = vld [vmem:[%s6925_s7 + $0x98] sm:$0xff]  ;;  %v1526_v7 = vld [vmem:[%s6925_s7 + $0xa0] sm:$0xff] }
  0xf5   : > { %954 = vperm.xlu1 %4627, %v816_v13   ;;  %959 = vperm.xlu0 %4626, %v817_v8   ;;  %v1527_v8 = vld [vmem:[%s6925_s7 + $0xa8] sm:$0xff]  ;;  %v1528_v13 = vld [vmem:[%s6925_s7 + $0xb0] sm:$0xff] }
  0xf6   : > { %v803_v43 = vpop.permute.xlu1 %802  ;;  %v801_v44 = vpop.permute.xlu0 %800 }
  0xf7   : > { %v819_v14 = vadd.f32 %v803_v43, %v768_v47  ;;  %v818_v15 = vadd.f32 %v801_v44, %v767_v53  ;;  %v1529_v47 = vld [vmem:[%s6925_s7 + $0xb8] sm:$0xff]  ;;  %v1530_v44 = vld [vmem:[%s6925_s7 + $0xc0] sm:$0xff] }
  0xf9   : > { %964 = vperm.xlu1 %4627, %v818_v15   ;;  %969 = vperm.xlu0 %4626, %v819_v14   ;;  %v1531_v14 = vld [vmem:[%s6925_s7 + $0xc8] sm:$0xff] }
  0xfd   : > { %1002 = vperm.xlu1 %4627, %v992_v54   ;;  %1007 = vperm.xlu0 %4626, %v993_v57   ;;  %v1532_v57 = vld [vmem:[%s6925_s7 + $0xd0] sm:$0xff] }
 0x101   : > { %1012 = vperm.xlu1 %4627, %v994_v58   ;;  %1017 = vperm.xlu0 %4626, %v995_v9   ;;  %v1533_v58 = vld [vmem:[%s6925_s7 + $0xd8] sm:$0xff]  ;;  %v1534_v9 = vld [vmem:[%s6925_s7 + $0xe0] sm:$0xff] }
 0x105   : > { %1022 = vperm.xlu1 %4627, %v996_v16   ;;  %1027 = vperm.xlu0 %4626, %v997_v17   ;;  %v1535_v16 = vld [vmem:[%s6925_s7 + $0xe8] sm:$0xff] }
 0x109   : > { %1032 = vperm.xlu1 %4627, %v998_v18   ;;  %1037 = vperm.xlu0 %4626, %v999_v19   ;;  %v1536_v19 = vld [vmem:[%s6925_s7 + $0xf0] sm:$0xff] }
 0x10d   : > { %1090 = vperm.xlu1 %4627, %v1072_v45   ;;  %1095 = vperm.xlu0 %4626, %v1073_v46   ;;  %v1537_v45 = vld [vmem:[%s6925_s7 + $0xf8] sm:$0xff] }
 0x111   : > { %1100 = vperm.xlu1 %4627, %v1074_v21   ;;  %1105 = vperm.xlu0 %4626, %v1075_v48   ;;  %v1538_v48 = vld [vmem:[%s6925_s7 + $0x100] sm:$0xff] }
 0x115   : > { %1110 = vperm.xlu1 %4627, %v1076_v49   ;;  %1115 = vperm.xlu0 %4626, %v1077_v1   ;;  %v1539_v49 = vld [vmem:[%s6925_s7 + $0x108] sm:$0xff] }
 0x119   : > { %1120 = vperm.xlu1 %4627, %v1078_v3   ;;  %1125 = vperm.xlu0 %4626, %v1079_v0   ;;  %v1540_v0 = vld [vmem:[%s6925_s7 + $0x110] sm:$0xff] }
 0x11d   : > { %1130 = vperm.xlu1 %4627, %v1080_v10   ;;  %1135 = vperm.xlu0 %4626, %v1081_v11  }
 0x121   : > { %1140 = vperm.xlu1 %4627, %v1082_v12   ;;  %1145 = vperm.xlu0 %4626, %v1083_v20   ;;  %v6927_v12 = vlaneseq  ;;  %v1542_v20 = vld [vmem:[%s6925_s7 + $0x120] sm:$0xff] }
 0x125   : > { %1150 = vperm.xlu1 %4627, %v1084_v50   ;;  %1155 = vperm.xlu0 %4626, %v1085_v51   ;;  %v1543_v50 = vld [vmem:[%s6925_s7 + $0x128] sm:$0xff] }
 0x128   : > { %v5168_v32 = vpop.permute.xlu1 %827  ;;  %v5170_v33 = vpop.permute.xlu0 %822 }
 0x129   : > { %1160 = vperm.xlu1 %4627, %v1086_v22   ;;  %1165 = vperm.xlu0 %4626, %v1087_v23   ;;  %v861_v23 = vshrl.u32 %v6927_v12, 7 }
 0x12c   : > { %v5178_v36 = vpop.permute.xlu1 %832  ;;  %v5180_v61 = vpop.permute.xlu0 %837 }
 0x12d   : > { %1636 = vperm.xlu1 %4627, %v1506_v25   ;;  %1641 = vperm.xlu0 %4626, %v1507_v52   ;;  %v1544_v25 = vld [vmem:[%s6925_s7 + $0x130] sm:$0xff]  ;;  %v1545_v52 = vld [vmem:[%s6925_s7 + $0x138] sm:$0xff] }
 0x130   : > { %v5194_v40 = vpop.permute.xlu1 %842  ;;  %v5196_v42 = vpop.permute.xlu0 %847 }
 0x131   : > { %1646 = vperm.xlu1 %4627, %v1508_v55   ;;  %1651 = vperm.xlu0 %4626, %v1509_v26   ;;  %v914_v55 = vsub.s32 1, %v861_v23 }
 0x134   : > { %v5204_v5 = vpop.permute.xlu1 %852  ;;  %v5206_v39 = vpop.permute.xlu0 %857 }
 0x135   : > { %1656 = vperm.xlu1 %4627, %v1510_v27   ;;  %1661 = vperm.xlu0 %4626, %v1511_v28   ;;  %v862_v28 = vsub.s32 0, %v861_v23 }
 0x139   : > { %1666 = vperm.xlu1 %4627, %v1512_v30   ;;  %1671 = vperm.xlu0 %4626, %v1513_v56   ;;  %v974_v30 = vsub.s32 2, %v861_v23  ;;  %v472_v56 = vld [vmem:[%s334_s25] sm:$0x7] }
 0x13d   : > { %1676 = vperm.xlu1 %4627, %v1514_v60   ;;  %1681 = vperm.xlu0 %4626, %v1515_v31   ;;  %v1546_v60 = vld [vmem:[%s6925_s7 + $0x140] sm:$0xff]  ;;  %v1547_v31 = vld [vmem:[%s6925_s7 + $0x148] sm:$0xff] }
 0x141   : > { %1686 = vperm.xlu1 %4627, %v1516_v34   ;;  %1691 = vperm.xlu0 %4626, %v1517_v35   ;;  %v915_v34 = vrot.slane %v472_v56, %v914_v55 }
 0x145   : > { %1696 = vperm.xlu1 %4627, %v1518_v2   ;;  %1701 = vperm.xlu0 %4626, %v1519_v37   ;;  %v863_v37 = vrot.slane %v472_v56, %v862_v28 }
 0x147   : > { %v865_v55 = vmul.f32 %v863_v37, %v5168_v32  ;;  %v1555_v32 = vld [vmem:[%s6925_s7 + $0x188] sm:$0xff] }
 0x148   : > { %v5214_v24 = vpop.permute.xlu1 %874  ;;  %v5216_v29 = vpop.permute.xlu0 %879 }
 0x149   : > { %1706 = vperm.xlu1 %4627, %v1520_v38   ;;  %1711 = vperm.xlu0 %4626, %v1521_v59   ;;  %v5317_v59 = vrot.slane %v472_v56, %v974_v30  ;;  %v916_v28 = vmul.f32 %v915_v34, %v5214_v24 }
 0x14c   : > { %v5230_v53 = vpop.permute.xlu1 %884  ;;  %v5232_v43 = vpop.permute.xlu0 %889 }
 0x14d   : > { %1716 = vperm.xlu1 %4627, %v1522_v62   ;;  %1721 = vperm.xlu0 %4626, %v1523_v63   ;;  %v1548_v63 = vld [vmem:[%s6925_s7 + $0x150] sm:$0xff] }
 0x150   : > { %v5240_v15 = vpop.permute.xlu1 %894  ;;  %v5242_v54 = vpop.permute.xlu0 %899 }
 0x151   : > { %1726 = vperm.xlu1 %4627, %v1524_v41   ;;  %1731 = vperm.xlu0 %4626, %v1525_v6   ;;  %v1549_v41 = vld [vmem:[%s6925_s7 + $0x158] sm:$0xff]  ;;  %v871_v6 = vmul.f32 %v863_v37, %v5206_v39 }
 0x154   : > { %v905_v17 = vpop.permute.xlu1 %904  ;;  %v910_v18 = vpop.permute.xlu0 %909 }
 0x155   : > { %1736 = vperm.xlu1 %4627, %v1526_v7   ;;  %1741 = vperm.xlu0 %4626, %v1527_v8   ;;  %v923_v38 = vmul.f32 %v915_v34, %v910_v18  ;;  %v922_v62 = vmul.f32 %v915_v34, %v905_v17  ;;  %v870_v8 = vmul.f32 %v863_v37, %v5204_v5  ;;  %v1550_v5 = vld [vmem:[%s6925_s7 + $0x160] sm:$0xff] }
 0x156   : > { %v868_v17 = vmul.f32 %v863_v37, %v5194_v40 }
 0x159   : > { %1746 = vperm.xlu1 %4627, %v1528_v13   ;;  %1751 = vperm.xlu0 %4626, %v1529_v47   ;;  %v921_v13 = vmul.f32 %v915_v34, %v5242_v54  ;;  %v1551_v54 = vld [vmem:[%s6925_s7 + $0x168] sm:$0xff] }
 0x15d   : > { %1756 = vperm.xlu1 %4627, %v1530_v44   ;;  %1761 = vperm.xlu0 %4626, %v1531_v14  }
 0x161   : > { %1766 = vperm.xlu1 %4627, %v1532_v57   ;;  %1771 = vperm.xlu0 %4626, %v1533_v58   ;;  %v931_v57 = vadd.f32 %v923_v38, %v871_v6  ;;  %v869_v58 = vmul.f32 %v863_v37, %v5196_v42  ;;  %v1556_v6 = vld [vmem:[%s6925_s7 + $0x190] sm:$0xff] }
 0x165   : > { %1776 = vperm.xlu1 %4627, %v1534_v9   ;;  %1781 = vperm.xlu0 %4626, %v1535_v16   ;;  %v920_v9 = vmul.f32 %v915_v34, %v5240_v15  ;;  %v930_v16 = vadd.f32 %v922_v62, %v870_v8 }
 0x168   : > { %v5262_v46 = vpop.permute.xlu1 %934  ;;  %v5264_v21 = vpop.permute.xlu0 %939 }
 0x169   : > { %1786 = vperm.xlu1 %4627, %v1536_v19   ;;  %1791 = vperm.xlu0 %4626, %v1537_v45   ;;  %v919_v19 = vmul.f32 %v915_v34, %v5232_v43  ;;  %v929_v45 = vadd.f32 %v921_v13, %v869_v58  ;;  %v1552_v43 = vld [vmem:[%s6925_s7 + $0x170] sm:$0xff]  ;;  %v977_v56 = vmul.f32 %v5317_v59, %v5264_v21  ;;  %v1558_v13 = vld [vmem:[%s6925_s7 + $0x1a0] sm:$0xff] }
 0x16a   : > { %v976_v24 = vmul.f32 %v5317_v59, %v5262_v46  ;;  %v1557_v46 = vld [vmem:[%s6925_s7 + $0x198] sm:$0xff]  ;;  %v1058_v58 = vld [vmem:[%s6922_s4 + $0x10] sm:$0xff] }
 0x16c   : > { %v5273_v1 = vpop.permute.xlu1 %944  ;;  %v5275_v3 = vpop.permute.xlu0 %949 }
 0x16d   : > { %1796 = vperm.xlu1 %4627, %v1538_v48   ;;  %1801 = vperm.xlu0 %4626, %v1539_v49   ;;  %v979_v40 = vmul.f32 %v5317_v59, %v5275_v3 }
 0x170   : > { %v955_v10 = vpop.permute.xlu1 %954  ;;  %v960_v11 = vpop.permute.xlu0 %959 }
 0x171   : > { %1806 = vperm.xlu1 %4627, %v1540_v0   ;;  %1811 = vperm.xlu0 %4626, %v1541_v4   ;;  %v981_v39 = vmul.f32 %v5317_v59, %v960_v11  ;;  %v980_v42 = vmul.f32 %v5317_v59, %v955_v10  ;;  %v867_v0 = vmul.f32 %v863_v37, %v5180_v61  ;;  %v1553_v10 = vld [vmem:[%s6925_s7 + $0x178] sm:$0xff] }
 0x172   : > { %v918_v4 = vmul.f32 %v915_v34, %v5230_v53  ;;  %v866_v61 = vmul.f32 %v863_v37, %v5178_v36  ;;  %v917_v53 = vmul.f32 %v915_v34, %v5216_v29 }
 0x173   : > { %v927_v23 = vadd.f32 %v919_v19, %v867_v0  ;;  %v1062_v19 = vld [vmem:[%s6922_s4 + $0x30] sm:$0xff] }
 0x174   : > { %v965_v51 = vpop.permute.xlu1 %964  ;;  %v970_v22 = vpop.permute.xlu0 %969  ;;  %v926_v30 = vadd.f32 %v918_v4, %v866_v61  ;;  %v925_v38 = vadd.f32 %v917_v53, %v865_v55  ;;  %v1568_v4 = vld [vmem:[%s6925_s7 + $0x1f0] sm:$0xff]  ;;  %v1068_v53 = vld [vmem:[%s6922_s4 + $0x60] sm:$0xff] }
 0x175   : > { %1816 = vperm.xlu1 %4627, %v1542_v20   ;;  %1821 = vperm.xlu0 %4626, %v1543_v50   ;;  %v983_v7 = vmul.f32 %v5317_v59, %v970_v22  ;;  %v982_v47 = vmul.f32 %v5317_v59, %v965_v51  ;;  %v928_v20 = vadd.f32 %v920_v9, %v868_v17  ;;  %v1562_v9 = vld [vmem:[%s6925_s7 + $0x1c0] sm:$0xff]  ;;  %v1565_v17 = vld [vmem:[%s6925_s7 + $0x1d8] sm:$0xff] }
 0x176   : > { %v989_v50 = vadd.f32 %v981_v39, %v929_v45  ;;  %v987_v36 = vadd.f32 %v979_v40, %v927_v23  ;;  %v1059_v39 = vld [vmem:[%s6922_s4 + $0x18] sm:$0xff]  ;;  %v1566_v45 = vld [vmem:[%s6925_s7 + $0x1e0] sm:$0xff]  ;;  %v1066_v40 = vld [vmem:[%s6922_s4 + $0x50] sm:$0xff] }
 0x177   : > { %v991_v18 = vadd.f32 %v983_v7, %v931_v57  ;;  %v990_v48 = vadd.f32 %v982_v47, %v930_v16  ;;  %v988_v3 = vadd.f32 %v980_v42, %v928_v20  ;;  %v1559_v47 = vld [vmem:[%s6925_s7 + $0x1a8] sm:$0xff]  ;;  %v1573_v23 = vld [vmem:[%s6925_s7 + $0x218] sm:$0xff] }
 0x178   : > { %v5303_v26 = vpop.permute.xlu1 %1002  ;;  %v5305_v27 = vpop.permute.xlu0 %1007  ;;  %v1057_v57 = vld [vmem:[%s6922_s4 + $0x8] sm:$0xff] }
 0x179   : > { %1826 = vperm.xlu1 %4627, %v1544_v25   ;;  %1831 = vperm.xlu0 %4626, %v1545_v52   ;;  %v978_v25 = vmul.f32 %v5317_v59, %v5273_v1  ;;  %v1554_v1 = vld [vmem:[%s6925_s7 + $0x180] sm:$0xff]  ;;  %v1563_v16 = vld [vmem:[%s6925_s7 + $0x1c8] sm:$0xff] }
 0x17a   : > { %v1567_v42 = vld [vmem:[%s6925_s7 + $0x1e8] sm:$0xff] }
 0x17b   : > { %v986_v21 = vadd.f32 %v978_v25, %v926_v30  ;;  %v1065_v20 = vld [vmem:[%s6922_s4 + $0x48] sm:$0xff] }
 0x17c   : > { %v5313_v35 = vpop.permute.xlu1 %1012  ;;  %v5315_v2 = vpop.permute.xlu0 %1017  ;;  %v1069_v25 = vld [vmem:[%s6922_s4 + $0x68] sm:$0xff] }
 0x17d   : > { %1836 = vperm.xlu1 %4627, %v1546_v60   ;;  %1841 = vperm.xlu0 %4626, %v1547_v31   ;;  %v864_v31 = vmul.f32 %v863_v37, %v5170_v33  ;;  %v1043_v34 = vadd.f32 %v5315_v2, %v987_v36  ;;  %v1042_v33 = vadd.f32 %v5313_v35, %v986_v21  ;;  %v1575_v30 = vld [vmem:[%s6925_s7 + $0x228] sm:$0xff]  ;;  %v1576_v36 = vld [vmem:[%s6925_s7 + $0x230] sm:$0xff] }
 0x17e   : > { %v1580_v21 = vld [vmem:[%s6925_s7 + $0x250] sm:$0xff] }
 0x17f   : > { %v1051_v7 = vmax.f32 %v1043_v34, 0.0  ;;  %v1050_v8 = vmax.f32 %v1042_v33, 0.0  ;;  %v1581_v34 = vld [vmem:[%s6925_s7 + $0x258] sm:$0xff] }
 0x180   : > { %v1023_v44 = vpop.permute.xlu1 %1022  ;;  %v1028_v14 = vpop.permute.xlu0 %1027 }
 0x181   : > { %1846 = vperm.xlu1 %4627, %v1548_v63   ;;  %1851 = vperm.xlu0 %4626, %v1549_v41   ;;  %v1045_v52 = vadd.f32 %v1028_v14, %v989_v50  ;;  %v1044_v60 = vadd.f32 %v1023_v44, %v988_v3  ;;  %v924_v63 = vadd.f32 %v916_v28, %v864_v31  ;;  %v1561_v14 = vld [vmem:[%s6925_s7 + $0x1b8] sm:$0xff]  ;;  %v1570_v50 = vld [vmem:[%s6925_s7 + $0x200] sm:$0xff]  ;;  %v1070_v3 = vld [vmem:[%s6922_s4 + $0x70] sm:$0xff] }
 0x182   : > { %v985_v41 = vadd.f32 %v977_v56, %v925_v38  ;;  %v1574_v28 = vld [vmem:[%s6925_s7 + $0x220] sm:$0xff]  ;;  %v1071_v56 = vld [vmem:[%s6922_s4 + $0x78] sm:$0xff]  ;;  %v1579_v38 = vld [vmem:[%s6925_s7 + $0x248] sm:$0xff] }
 0x183   : > { %v1053_v62 = vmax.f32 %v1045_v52, 0.0  ;;  %v1052_v37 = vmax.f32 %v1044_v60, 0.0  ;;  %v984_v2 = vadd.f32 %v976_v24, %v924_v63  ;;  %v1578_v31 = vld [vmem:[%s6925_s7 + $0x240] sm:$0xff] }
 0x184   : > { %v1033_v15 = vpop.permute.xlu1 %1032  ;;  %v1038_v49 = vpop.permute.xlu0 %1037  ;;  %v1041_v59 = vadd.f32 %v5305_v27, %v985_v41  ;;  %v1583_v41 = vld [vmem:[%s6925_s7 + $0x268] sm:$0xff] }
 0x185   : > { %v1047_v11 = vadd.f32 %v1038_v49, %v991_v18  ;;  %1856 = vperm.xlu1 %4627, %v1550_v5   ;;  %1861 = vperm.xlu0 %4626, %v1551_v54   ;;  %v1046_v51 = vadd.f32 %v1033_v15, %v990_v48  ;;  %v1040_v35 = vadd.f32 %v5303_v26, %v984_v2  ;;  %v1560_v26 = vld [vmem:[%s6925_s7 + $0x1b0] sm:$0xff]  ;;  %v1060_v5 = vld [vmem:[%s6922_s4 + $0x20] sm:$0xff]  ;;  %v1061_v18 = vld [vmem:[%s6922_s4 + $0x28] sm:$0xff] }
 0x186   : > { %v1049_v44 = vmax.f32 %v1041_v59, 0.0  ;;  %v1564_v54 = vld [vmem:[%s6925_s7 + $0x1d0] sm:$0xff]  ;;  %v1063_v15 = vld [vmem:[%s6922_s4 + $0x38] sm:$0xff]  ;;  %v1064_v48 = vld [vmem:[%s6922_s4 + $0x40] sm:$0xff] }
 0x187   : > { %v1055_v22 = vmax.f32 %v1047_v11, 0.0  ;;  %v1054_v29 = vmax.f32 %v1046_v51, 0.0  ;;  %v1048_v27 = vmax.f32 %v1040_v35, 0.0  ;;  %v1569_v11 = vld [vmem:[%s6925_s7 + $0x1f8] sm:$0xff]  ;;  %v1586_v59 = vld [vmem:[%s6925_s7 + $0x280] sm:$0xff]  ;;  %v1588_v35 = vld [vmem:[%s6925_s7 + $0x290] sm:$0xff] }
 0x188   : > { %v5439_v49 = vpop.permute.xlu1 %1090  ;;  %v5441_v0 = vpop.permute.xlu0 %1095 }
 0x189   : > { %1866 = vperm.xlu1 %4627, %v1552_v43   ;;  %1871 = vperm.xlu0 %4626, %v1553_v10   ;;  %v1571_v43 = vld [vmem:[%s6925_s7 + $0x208] sm:$0xff]  ;;  %v1067_v10 = vld [vmem:[%s6922_s4 + $0x58] sm:$0xff] }
 0x18a   : > { %4291 = vmatprep.subr.mxu0 %v1055_v22 }
 0x18b   : > { %4292 = vmatpush3.msra.mxu0 %v1055_v22  ;;  %v1572_v22 = vld [vmem:[%s6925_s7 + $0x210] sm:$0xff] }
 0x18c   : > { %4293 = vmatprep.subr.mxu0 %v1054_v29  ;;  %v5461_v51 = vpop.permute.xlu1 %1100  ;;  %v5470_v61 = vpop.permute.xlu0 %1105 }
 0x18d   : > { %4294 = vmatpush3.msra.mxu0 %v1054_v29  ;;  %1876 = vperm.xlu1 %4627, %v1554_v1   ;;  %v1577_v29 = vld [vmem:[%s6925_s7 + $0x238] sm:$0xff] }
 0x18e   : > { %1881 = vperm.xlu0 %4626, %v1555_v32   ;;  %4295 = vmatprep.subr.mxu0 %v1053_v62 }
 0x18f   : > { %4296 = vmatpush3.msra.mxu0 %v1053_v62  ;;  %v1582_v62 = vld [vmem:[%s6925_s7 + $0x260] sm:$0xff] }
 0x190   : > { %4297 = vmatprep.subr.mxu0 %v1052_v37  ;;  %v5489_v52 = vpop.permute.xlu1 %1110  ;;  %v5491_v55 = vpop.permute.xlu0 %1115 }
 0x191   : > { %4298 = vmatpush3.msra.mxu0 %v1052_v37  ;;  %1886 = vperm.xlu1 %4627, %v1556_v6   ;;  %v1584_v37 = vld [vmem:[%s6925_s7 + $0x270] sm:$0xff]  ;;  %v1585_v6 = vld [vmem:[%s6925_s7 + $0x278] sm:$0xff] }
 0x192   : > { %1891 = vperm.xlu0 %4626, %v1557_v46   ;;  %4299 = vmatprep.subr.mxu0 %v1051_v7 }
 0x193   : > { %4300 = vmatpush3.msra.mxu0 %v1051_v7  ;;  %v1587_v7 = vld [vmem:[%s6925_s7 + $0x288] sm:$0xff] }
 0x194   : > { %4301 = vmatprep.subr.mxu0 %v1050_v8  ;;  %v5508_v60 = vpop.permute.xlu1 %1120  ;;  %v5513_v1 = vpop.permute.xlu0 %1125 }
 0x195   : > { %4302 = vmatpush3.msra.mxu0 %v1050_v8  ;;  %1896 = vperm.xlu1 %4627, %v1558_v13   ;;  %v1589_v13 = vld [vmem:[%s6925_s7 + $0x298] sm:$0xff] }
 0x196   : > { %1901 = vperm.xlu0 %4626, %v1559_v47   ;;  %4303 = vmatprep.subr.mxu0 %v1049_v44 }
 0x197   : > { %4304 = vmatpush3.msra.mxu0 %v1049_v44  ;;  %v1590_v44 = vld [vmem:[%s6925_s7 + $0x2a0] sm:$0xff] }
 0x198   : > { %4305 = vmatprep.subr.mxu0 %v1048_v27  ;;  %v5521_v32 = vpop.permute.xlu1 %1130  ;;  %v5523_v24 = vpop.permute.xlu0 %1135 }
 0x199   : > { %4306 = vmatpush3.msra.mxu0 %v1048_v27  ;;  %1906 = vperm.xlu1 %4627, %v1560_v26   ;;  %v1591_v27 = vld [vmem:[%s6925_s7 + $0x2a8] sm:$0xff] }
 0x19a   : > { %1911 = vperm.xlu0 %4626, %v1561_v14   ;;  %4308 = vmatmul.mubr.msk.f32.vlgmr.msra.gmra.mxu0 %vm1168_vm0, %v1057_v57  ;;  %v1592_v57 = vld [vmem:[%s6925_s7 + $0x2b0] sm:$0xff] }
 0x19b   : > { %4310 = vmatprep.mubr.msk.f32.mxu0 %vm1168_vm0, %v1058_v58  ;;  %v1593_v58 = vld [vmem:[%s6925_s7 + $0x2b8] sm:$0xff] }
 0x19c   : > { %v5534_v63 = vpop.permute.xlu1 %1140  ;;  %v5539_v33 = vpop.permute.xlu0 %1145 }
 0x19d   : > { %1916 = vperm.xlu1 %4627, %v1562_v9   ;;  %v1594_v9 = vld [vmem:[%s6925_s7 + $0x2c0] sm:$0xff] }
 0x19e   : > { %1921 = vperm.xlu0 %4626, %v1563_v16   ;;  %4311 = vmatmul.mubr.msk.f32.gmra.mxu0 %vm1168_vm0, %v1059_v39  ;;  %v1595_v39 = vld [vmem:[%s6925_s7 + $0x2c8] sm:$0xff] }
 0x19f   : > { %4313 = vmatprep.mubr.msk.f32.mxu0 %vm1168_vm0, %v1060_v5 }
 0x1a0   : > { %v5547_v46 = vpop.permute.xlu1 %1150  ;;  %v5549_v2 = vpop.permute.xlu0 %1155 }
 0x1a1   : > { %1926 = vperm.xlu1 %4627, %v1564_v54   ;;  %v1596_v54 = vld [vmem:[%s6925_s7 + $0x2d0] sm:$0xff] }
 0x1a2   : > { %1931 = vperm.xlu0 %4626, %v1565_v17   ;;  %4314 = vmatmul.mubr.msk.f32.gmra.mxu0 %vm1168_vm0, %v1061_v18  ;;  %v1597_v17 = vld [vmem:[%s6925_s7 + $0x2d8] sm:$0xff] }
 0x1a3   : > { %4316 = vmatprep.mubr.msk.f32.mxu0 %vm1168_vm0, %v1062_v19 }
 0x1a4   : > { %v5560_v8 = vpop.permute.xlu1 %1160  ;;  %v5565_v47 = vpop.permute.xlu0 %1165 }
 0x1a5   : > { %1936 = vperm.xlu1 %4627, %v1566_v45   ;;  %v1598_v45 = vld [vmem:[%s6925_s7 + $0x2e0] sm:$0xff] }
 0x1a6   : > { %1941 = vperm.xlu0 %4626, %v1567_v42   ;;  %4317 = vmatmul.mubr.msk.f32.gmra.mxu0 %vm1168_vm0, %v1063_v15  ;;  %v1599_v42 = vld [vmem:[%s6925_s7 + $0x2e8] sm:$0xff]  ;;  %v1600_v15 = vld [vmem:[%s6925_s7 + $0x2f0] sm:$0xff] }
 0x1a7   : > { %4319 = vmatprep.mubr.msk.f32.mxu0 %vm1168_vm0, %v1064_v48 }
 0x1a8   : > { %v5573_v26 = vpop.permute.xlu1 %1636  ;;  %v5575_v14 = vpop.permute.xlu0 %1641 }
 0x1a9   : > { %1946 = vperm.xlu1 %4627, %v1568_v4   ;;  %v1601_v4 = vld [vmem:[%s6925_s7 + $0x2f8] sm:$0xff] }
 0x1aa   : > { %1951 = vperm.xlu0 %4626, %v1569_v11   ;;  %4320 = vmatmul.mubr.msk.f32.gmra.mxu0 %vm1168_vm0, %v1065_v20  ;;  %v1602_v20 = vld [vmem:[%s6925_s7 + $0x300] sm:$0xff] }
 0x1ab   : > { %4322 = vmatprep.mubr.msk.f32.mxu0 %vm1168_vm0, %v1066_v40  ;;  %v1603_v40 = vld [vmem:[%s6925_s7 + $0x308] sm:$0xff] }
 0x1ac   : > { %v5586_v16 = vpop.permute.xlu1 %1646  ;;  %v5591_v5 = vpop.permute.xlu0 %1651 }
 0x1ad   : > { %1956 = vperm.xlu1 %4627, %v1570_v50  }
 0x1ae   : > { %1961 = vperm.xlu0 %4626, %v1571_v43   ;;  %4323 = vmatmul.mubr.msk.f32.gmra.mxu0 %vm1168_vm0, %v1067_v10  ;;  %v1604_v10 = vld [vmem:[%s6925_s7 + $0x310] sm:$0xff] }
 0x1af   : > { %4325 = vmatprep.mubr.msk.f32.mxu0 %vm1168_vm0, %v1068_v53  ;;  %v1605_v53 = vld [vmem:[%s6925_s7 + $0x318] sm:$0xff] }
 0x1b0   : > { %v5599_v18 = vpop.permute.xlu1 %1656  ;;  %v5601_v19 = vpop.permute.xlu0 %1661 }
 0x1b1   : > { %1966 = vperm.xlu1 %4627, %v1572_v22   ;;  %v1606_v22 = vld [vmem:[%s6925_s7 + $0x320] sm:$0xff] }
 0x1b2   : > { %1971 = vperm.xlu0 %4626, %v1573_v23   ;;  %4326 = vmatmul.mubr.msk.f32.gmra.mxu0 %vm1168_vm0, %v1069_v25  ;;  %v1607_v25 = vld [vmem:[%s6925_s7 + $0x328] sm:$0xff] }
 0x1b3   : > { %4328 = vmatprep.mubr.msk.f32.mxu0 %vm1168_vm0, %v1070_v3 }
 0x1b4   : > { %v5612_v48 = vpop.permute.xlu1 %1666  ;;  %v5617_v11 = vpop.permute.xlu0 %1671 }
 0x1b5   : > { %1976 = vperm.xlu1 %4627, %v1574_v28   ;;  %v1608_v28 = vld [vmem:[%s6925_s7 + $0x330] sm:$0xff] }
 0x1b6   : > { %1981 = vperm.xlu0 %4626, %v1575_v30   ;;  %4329 = vmatmul.mubr.msk.f32.gmra.mxu0 %vm1168_vm0, %v1071_v56  ;;  %v1609_v30 = vld [vmem:[%s6925_s7 + $0x338] sm:$0xff] }
 0x1b8   : > { %v5625_v50 = vpop.permute.xlu1 %1676  ;;  %v5627_v43 = vpop.permute.xlu0 %1681 }
 0x1b9   : > { %1986 = vperm.xlu1 %4627, %v1576_v36  }
 0x1ba   : > { %1991 = vperm.xlu0 %4626, %v1577_v29   ;;  %v1610_v29 = vld [vmem:[%s6925_s7 + $0x340] sm:$0xff] }
 0x1bc   : > { %v5638_v23 = vpop.permute.xlu1 %1686  ;;  %v5643_v3 = vpop.permute.xlu0 %1691 }
 0x1bd   : > { %1996 = vperm.xlu1 %4627, %v1578_v31   ;;  %v1611_v31 = vld [vmem:[%s6925_s7 + $0x348] sm:$0xff] }
 0x1be   : > { %2001 = vperm.xlu0 %4626, %v1579_v38   ;;  %v1612_v38 = vld [vmem:[%s6925_s7 + $0x350] sm:$0xff] }
 0x1c0   : > { %v5651_v56 = vpop.permute.xlu1 %1696  ;;  %v5653_v36 = vpop.permute.xlu0 %1701 }
 0x1c1   : > { %2006 = vperm.xlu1 %4627, %v1580_v21  }
 0x1c2   : > { %2011 = vperm.xlu0 %4626, %v1581_v34   ;;  %v1613_v34 = vld [vmem:[%s6925_s7 + $0x358] sm:$0xff] }
 0x1c4   : > { %v5664_v21 = vpop.permute.xlu1 %1706 }
 0x1c5   : > { %2016 = vperm.xlu1 %4627, %v1582_v62   ;;  %v5669_v62 = vpop.permute.xlu0 %1711 }
 0x1c6   : > { %2021 = vperm.xlu0 %4626, %v1583_v41   ;;  %v1614_v41 = vld [vmem:[%s6925_s7 + $0x360] sm:$0xff] }
 0x1c9   : > { %2026 = vperm.xlu1 %4627, %v1584_v37   ;;  %v1615_v37 = vld [vmem:[%s6925_s7 + $0x368] sm:$0xff] }
 0x1ca   : > { %2031 = vperm.xlu0 %4626, %v1585_v6   ;;  %v5677_v6 = vpop.permute.xlu1 %1716 }
 0x1cd   : > { %2036 = vperm.xlu1 %4627, %v1586_v59   ;;  %v5679_v59 = vpop.permute.xlu0 %1721 }
 0x1ce   : > { %2041 = vperm.xlu0 %4626, %v1587_v7   ;;  %v1616_v7 = vld [vmem:[%s6925_s7 + $0x370] sm:$0xff] }
 0x1d1   : > { %2046 = vperm.xlu1 %4627, %v1588_v35   ;;  %v1617_v35 = vld [vmem:[%s6925_s7 + $0x378] sm:$0xff] }
 0x1d2   : > { %2051 = vperm.xlu0 %4626, %v1589_v13   ;;  %v1618_v13 = vld [vmem:[%s6925_s7 + $0x380] sm:$0xff] }
 0x1d5   : > { %2056 = vperm.xlu1 %4627, %v1590_v44   ;;  %v5690_v44 = vpop.permute.xlu1 %1726 }
 0x1d6   : > { %2061 = vperm.xlu0 %4626, %v1591_v27   ;;  %v1619_v27 = vld [vmem:[%s6925_s7 + $0x388] sm:$0xff] }
 0x1d9   : > { %2066 = vperm.xlu1 %4627, %v1592_v57   ;;  %v5695_v57 = vpop.permute.xlu0 %1731 }
 0x1da   : > { %2071 = vperm.xlu0 %4626, %v1593_v58   ;;  %v1620_v58 = vld [vmem:[%s6925_s7 + $0x390] sm:$0xff] }
 0x1dd   : > { %2076 = vperm.xlu1 %4627, %v1594_v9   ;;  %v1621_v9 = vld [vmem:[%s6925_s7 + $0x398] sm:$0xff] }
 0x1de   : > { %2081 = vperm.xlu0 %4626, %v1595_v39   ;;  %v5703_v39 = vpop.permute.xlu1 %1736 }
 0x1e1   : > { %2086 = vperm.xlu1 %4627, %v1596_v54   ;;  %v5705_v54 = vpop.permute.xlu0 %1741 }
 0x1e2   : > { %2091 = vperm.xlu0 %4626, %v1597_v17   ;;  %v1622_v17 = vld [vmem:[%s6925_s7 + $0x3a0] sm:$0xff] }
 0x1e5   : > { %2096 = vperm.xlu1 %4627, %v1598_v45   ;;  %v1623_v45 = vld [vmem:[%s6925_s7 + $0x3a8] sm:$0xff] }
 0x1e6   : > { %2101 = vperm.xlu0 %4626, %v1599_v42   ;;  %v1624_v42 = vld [vmem:[%s6925_s7 + $0x3b0] sm:$0xff] }
 0x1e9   : > { %2106 = vperm.xlu1 %4627, %v1600_v15   ;;  %v5716_v15 = vpop.permute.xlu1 %1746 }
 0x1ea   : > { %2111 = vperm.xlu0 %4626, %v1601_v4   ;;  %v1625_v4 = vld [vmem:[%s6925_s7 + $0x3b8] sm:$0xff] }
 0x1ed   : > { %2116 = vperm.xlu1 %4627, %v1602_v20   ;;  %v5721_v20 = vpop.permute.xlu0 %1751 }
 0x1ee   : > { %2121 = vperm.xlu0 %4626, %v1603_v40   ;;  %v1378_v40 = vld [vmem:[%s6924_s6] sm:$0xff] }
 0x1ef   : > { %4363 = vmatprep.mubr.f32.mxu0 %v1378_v40 }
 0x1f1   : > { %2126 = vperm.xlu1 %4627, %v1604_v10   ;;  %v1438_v10 = vld [vmem:[%s6924_s6 + $0x1e0] sm:$0xff] }
 0x1f2   : > { %2131 = vperm.xlu0 %4626, %v1605_v53   ;;  %v1626_v53 = vld [vmem:[%s6925_s7 + $0x3c0] sm:$0xff]  ;;  %4453 = vmatprep.mubr.f32.mxu1 %v1438_v10 }
 0x1f5   : > { %2136 = vperm.xlu1 %4627, %v1606_v22   ;;  %v1627_v22 = vld [vmem:[%s6925_s7 + $0x3c8] sm:$0xff] }
 0x1f6   : > { %2141 = vperm.xlu0 %4626, %v1607_v25   ;;  %v5735_v25 = vpop.permute.xlu1 %1756 }
 0x1f7   : > { %6930 = vst [vmem:[#allocation6_spill] sm:$0xff] %v5735_v25 }
 0x1f9   : > { %2146 = vperm.xlu1 %4627, %v1608_v28   ;;  %v5737_v28 = vpop.permute.xlu0 %1761 }
 0x1fa   : > { %2151 = vperm.xlu0 %4626, %v1609_v30   ;;  %6931 = vst [vmem:[#allocation7_spill] sm:$0xff] %v5737_v28  ;;  %v1628_v30 = vld [vmem:[%s6925_s7 + $0x3d0] sm:$0xff] }
 0x1fd   : > { %2156 = vperm.xlu1 %4627, %v1610_v29   ;;  %v1629_v29 = vld [vmem:[%s6925_s7 + $0x3d8] sm:$0xff] }
 0x1fe   : > { %2161 = vperm.xlu0 %4626, %v1611_v31   ;;  %v1630_v31 = vld [vmem:[%s6925_s7 + $0x3e0] sm:$0xff] }
 0x201   : > { %2166 = vperm.xlu1 %4627, %v1612_v38   ;;  %v5748_v38 = vpop.permute.xlu1 %1766 }
 0x202   : > { %2171 = vperm.xlu0 %4626, %v1613_v34   ;;  %6932 = vst [vmem:[#allocation8_spill] sm:$0xff] %v5748_v38  ;;  %v1631_v34 = vld [vmem:[%s6925_s7 + $0x3e8] sm:$0xff] }
 0x205   : > { %2176 = vperm.xlu1 %4627, %v1614_v41   ;;  %v5753_v41 = vpop.permute.xlu0 %1771 }
 0x206   : > { %2181 = vperm.xlu0 %4626, %v1615_v37   ;;  %6933 = vst [vmem:[#allocation9_spill] sm:$0xff] %v5753_v41  ;;  %v1632_v37 = vld [vmem:[%s6925_s7 + $0x3f0] sm:$0xff] }
 0x209   : > { %2186 = vperm.xlu1 %4627, %v1616_v7   ;;  %v1633_v7 = vld [vmem:[%s6925_s7 + $0x3f8] sm:$0xff] }
 0x20a   : > { %2191 = vperm.xlu0 %4626, %v1617_v35   ;;  %v5761_v35 = vpop.permute.xlu1 %1776 }
 0x20b   : > { %6934 = vst [vmem:[#allocation10_spill] sm:$0xff] %v5761_v35 }
 0x20d   : > { %2196 = vperm.xlu1 %4627, %v1618_v13   ;;  %v5763_v13 = vpop.permute.xlu0 %1781 }
 0x20e   : > { %2201 = vperm.xlu0 %4626, %v1619_v27   ;;  %6935 = vst [vmem:[#allocation11_spill] sm:$0xff] %v5763_v13 }
 0x211   : > { %2206 = vperm.xlu1 %4627, %v1620_v58  }
 0x212   : > { %2211 = vperm.xlu0 %4626, %v1621_v9  }
 0x215   : > { %2216 = vperm.xlu1 %4627, %v1622_v17  }
 0x216   : > { %2221 = vperm.xlu0 %4626, %v1623_v45  }
 0x219   : > { %2226 = vperm.xlu1 %4627, %v1624_v42  }
 0x21a   : > { %2231 = vperm.xlu0 %4626, %v1625_v4  }
 0x21d   : > { %2236 = vperm.xlu1 %4627, %v1626_v53  }
 0x21e   : > { %2241 = vperm.xlu0 %4626, %v1627_v22  }
 0x221   : > { %2246 = vperm.xlu1 %4627, %v1628_v30  }
 0x222   : > { %2251 = vperm.xlu0 %4626, %v1629_v29  }
 0x225   : > { %2256 = vperm.xlu1 %4627, %v1630_v31  }
 0x226   : > { %2261 = vperm.xlu0 %4626, %v1631_v34  }
 0x229   : > { %2266 = vperm.xlu1 %4627, %v1632_v37  }
 0x22a   : > { %2271 = vperm.xlu0 %4626, %v1633_v7  }
 0x25a   : > { %v5765_v27 = vpop.f32.mrf.mxu0 }
 0x25c   : > { %v5767_v58 = vpop.f32.mrf.mxu0 }
 0x25e   : > { %v5769_v9 = vpop.f32.mrf.mxu0 }
 0x260   : > { %v5771_v17 = vpop.f32.mrf.mxu0 }
 0x262   : > { %v4315_v45 = vpop.f32.mrf.mxu0 }
 0x264   : > { %v5773_v42 = vpop.f32.mrf.mxu0 }
 0x266   : > { %v4318_v4 = vpop.f32.mrf.mxu0 }
 0x268   : > { %v1313_v40 = vpop.f32.mrf.mxu0 }
 0x26a   : > { %v4321_v10 = vpop.f32.mrf.mxu0 }
 0x26c   : > { %v1323_v53 = vpop.f32.mrf.mxu0 }
 0x26e   : > { %v4324_v22 = vpop.f32.mrf.mxu0 }
 0x26f   : > { %v1339_v25 = vadd.f32 %v4324_v22, %v5539_v33  ;;  %v1443_v22 = vld [vmem:[%s6924_s6 + $0x208] sm:$0xff] }
 0x270   : > { %v1333_v30 = vpop.f32.mrf.mxu0 }
 0x272   : > { %v4327_v29 = vpop.f32.mrf.mxu0 }
 0x273   : > { %v1349_v12 = vadd.f32 %v4327_v29, %v5549_v2  ;;  %v1444_v29 = vld [vmem:[%s6924_s6 + $0x210] sm:$0xff] }
 0x274   : > { %v1343_v31 = vpop.f32.mrf.mxu0 }
 0x275   : > { %v1344_v38 = vadd.f32 %v1343_v31, %v5547_v46  ;;  %v1375_v28 = vmax.f32 %v1349_v12, 0.0  ;;  %v1329_v46 = vadd.f32 %v4321_v10, %v5523_v24  ;;  %v1324_v12 = vadd.f32 %v1323_v53, %v5521_v32  ;;  %v1442_v10 = vld [vmem:[%s6924_s6 + $0x200] sm:$0xff]  ;;  %v1383_v53 = vld [vmem:[%s6924_s6 + $0x28] sm:$0xff]  ;;  %v1385_v31 = vld [vmem:[%s6924_s6 + $0x38] sm:$0xff] }
 0x276   : > { %v4330_v34 = vpop.f32.mrf.mxu0  ;;  %v1314_v24 = vadd.f32 %v1313_v40, %v5508_v60  ;;  %v1309_v32 = vadd.f32 %v4315_v45, %v5491_v55  ;;  %v1299_v60 = vadd.f32 %v5769_v9, %v5470_v61  ;;  %v1294_v55 = vadd.f32 %v5771_v17, %v5461_v51  ;;  %v1382_v40 = vld [vmem:[%s6924_s6 + $0x20] sm:$0xff] }
 0x277   : > { %v1359_v37 = vadd.f32 %v4330_v34, %v5565_v47  ;;  %v1334_v47 = vadd.f32 %v1333_v30, %v5534_v63  ;;  %v1374_v2 = vmax.f32 %v1344_v38, 0.0  ;;  %v1319_v63 = vadd.f32 %v4318_v4, %v5513_v1  ;;  %v1441_v4 = vld [vmem:[%s6924_s6 + $0x1f8] sm:$0xff]  ;;  %v1384_v30 = vld [vmem:[%s6924_s6 + $0x30] sm:$0xff] }
 0x278   : > { %v1353_v7 = vpop.f32.mrf.mxu0  ;;  %v1371_v38 = vmax.f32 %v1329_v46, 0.0  ;;  %v1304_v1 = vadd.f32 %v5773_v42, %v5489_v52  ;;  %v1289_v52 = vadd.f32 %v5765_v27, %v5441_v0  ;;  %v1365_v45 = vmax.f32 %v1299_v60, 0.0  ;;  %v1379_v0 = vld [vmem:[%s6924_s6 + $0x8] sm:$0xff]  ;;  %v1380_v27 = vld [vmem:[%s6924_s6 + $0x10] sm:$0xff]  ;;  %v1381_v42 = vld [vmem:[%s6924_s6 + $0x18] sm:$0xff] }
 0x279   : > { %v1377_v35 = vmax.f32 %v1359_v37, 0.0  ;;  %v1354_v13 = vadd.f32 %v1353_v7, %v5560_v8  ;;  %v1373_v8 = vmax.f32 %v1339_v25, 0.0  ;;  %v1372_v33 = vmax.f32 %v1334_v47, 0.0  ;;  %v1445_v34 = vld [vmem:[%s6924_s6 + $0x218] sm:$0xff]  ;;  %v1386_v37 = vld [vmem:[%s6924_s6 + $0x40] sm:$0xff]  ;;  %v1387_v47 = vld [vmem:[%s6924_s6 + $0x48] sm:$0xff] }
 0x27a   : > { %v1370_v25 = vmax.f32 %v1324_v12, 0.0  ;;  %v1284_v61 = vadd.f32 %v5767_v58, %v5439_v49  ;;  %v1364_v9 = vmax.f32 %v1294_v55, 0.0  ;;  %v1363_v51 = vmax.f32 %v1289_v52, 0.0  ;;  %v1439_v49 = vld [vmem:[%s6924_s6 + $0x1e8] sm:$0xff]  ;;  %v1440_v58 = vld [vmem:[%s6924_s6 + $0x1f0] sm:$0xff]  ;;  %v1446_v7 = vld [vmem:[%s6924_s6 + $0x220] sm:$0xff] }
 0x27b   : > { %v1376_v41 = vmax.f32 %v1354_v13, 0.0  ;;  %4331 = vmatprep.subr.mxu0 %v1377_v35  ;;  %4555 = vmatprep.subr.mxu1 %v1377_v35  ;;  %v1366_v13 = vmax.f32 %v1304_v1, 0.0  ;;  %v1388_v46 = vld [vmem:[%s6924_s6 + $0x50] sm:$0xff]  ;;  %v1389_v12 = vld [vmem:[%s6924_s6 + $0x58] sm:$0xff]  ;;  %v1394_v60 = vld [vmem:[%s6924_s6 + $0x80] sm:$0xff] }
 0x27c   : > { %4332 = vmatpush3.msra.mxu0 %v1377_v35  ;;  %4571 = vmatpush3.msra.mxu1 %v1377_v35  ;;  %v1367_v35 = vmax.f32 %v1309_v32, 0.0  ;;  %v1362_v17 = vmax.f32 %v1284_v61, 0.0  ;;  %v1392_v32 = vld [vmem:[%s6924_s6 + $0x70] sm:$0xff]  ;;  %v1393_v1 = vld [vmem:[%s6924_s6 + $0x78] sm:$0xff]  ;;  %v1395_v55 = vld [vmem:[%s6924_s6 + $0x88] sm:$0xff] }
 0x27d   : > { %4333 = vmatprep.subr.mxu0 %v1376_v41  ;;  %4556 = vmatprep.subr.mxu1 %v1376_v41  ;;  %v1396_v52 = vld [vmem:[%s6924_s6 + $0x90] sm:$0xff]  ;;  %v1397_v61 = vld [vmem:[%s6924_s6 + $0x98] sm:$0xff] }
 0x27e   : > { %4334 = vmatpush3.msra.mxu0 %v1376_v41  ;;  %4572 = vmatpush3.msra.mxu1 %v1376_v41  ;;  %v1368_v41 = vmax.f32 %v1314_v24, 0.0  ;;  %v1391_v24 = vld [vmem:[%s6924_s6 + $0x68] sm:$0xff] }
 0x27f   : > { %4335 = vmatprep.subr.mxu0 %v1375_v28  ;;  %4557 = vmatprep.subr.mxu1 %v1375_v28 }
 0x280   : > { %4336 = vmatpush3.msra.mxu0 %v1375_v28  ;;  %4573 = vmatpush3.msra.mxu1 %v1375_v28  ;;  %v1369_v28 = vmax.f32 %v1319_v63, 0.0  ;;  %v1390_v63 = vld [vmem:[%s6924_s6 + $0x60] sm:$0xff] }
 0x281   : > { %4337 = vmatprep.subr.mxu0 %v1374_v2  ;;  %4558 = vmatprep.subr.mxu1 %v1374_v2 }
 0x282   : > { %4338 = vmatpush3.msra.mxu0 %v1374_v2  ;;  %4574 = vmatpush3.msra.mxu1 %v1374_v2  ;;  %v1447_v2 = vld [vmem:[%s6924_s6 + $0x228] sm:$0xff] }
 0x283   : > { %4339 = vmatprep.subr.mxu0 %v1373_v8  ;;  %4559 = vmatprep.subr.mxu1 %v1373_v8 }
 0x284   : > { %4340 = vmatpush3.msra.mxu0 %v1373_v8  ;;  %4575 = vmatpush3.msra.mxu1 %v1373_v8  ;;  %v1448_v8 = vld [vmem:[%s6924_s6 + $0x230] sm:$0xff] }
 0x285   : > { %4341 = vmatprep.subr.mxu0 %v1372_v33  ;;  %4560 = vmatprep.subr.mxu1 %v1372_v33 }
 0x286   : > { %4342 = vmatpush3.msra.mxu0 %v1372_v33  ;;  %4576 = vmatpush3.msra.mxu1 %v1372_v33  ;;  %v1449_v33 = vld [vmem:[%s6924_s6 + $0x238] sm:$0xff] }
 0x287   : > { %4343 = vmatprep.subr.mxu0 %v1371_v38  ;;  %4561 = vmatprep.subr.mxu1 %v1371_v38 }
 0x288   : > { %4344 = vmatpush3.msra.mxu0 %v1371_v38  ;;  %4577 = vmatpush3.msra.mxu1 %v1371_v38  ;;  %v1450_v38 = vld [vmem:[%s6924_s6 + $0x240] sm:$0xff] }
 0x289   : > { %4345 = vmatprep.subr.mxu0 %v1370_v25  ;;  %4562 = vmatprep.subr.mxu1 %v1370_v25 }
 0x28a   : > { %4346 = vmatpush3.msra.mxu0 %v1370_v25  ;;  %4578 = vmatpush3.msra.mxu1 %v1370_v25  ;;  %v1451_v25 = vld [vmem:[%s6924_s6 + $0x248] sm:$0xff] }
 0x28b   : > { %4347 = vmatprep.subr.mxu0 %v1369_v28  ;;  %4563 = vmatprep.subr.mxu1 %v1369_v28 }
 0x28c   : > { %4348 = vmatpush3.msra.mxu0 %v1369_v28  ;;  %4579 = vmatpush3.msra.mxu1 %v1369_v28  ;;  %v1452_v28 = vld [vmem:[%s6924_s6 + $0x250] sm:$0xff] }
 0x28d   : > { %4349 = vmatprep.subr.mxu0 %v1368_v41  ;;  %4564 = vmatprep.subr.mxu1 %v1368_v41 }
 0x28e   : > { %4350 = vmatpush3.msra.mxu0 %v1368_v41  ;;  %4580 = vmatpush3.msra.mxu1 %v1368_v41  ;;  %v1453_v41 = vld [vmem:[%s6924_s6 + $0x258] sm:$0xff] }
 0x28f   : > { %4351 = vmatprep.subr.mxu0 %v1367_v35  ;;  %4565 = vmatprep.subr.mxu1 %v1367_v35 }
 0x290   : > { %4352 = vmatpush3.msra.mxu0 %v1367_v35  ;;  %4581 = vmatpush3.msra.mxu1 %v1367_v35  ;;  %v1454_v35 = vld [vmem:[%s6924_s6 + $0x260] sm:$0xff] }
 0x291   : > { %4353 = vmatprep.subr.mxu0 %v1366_v13  ;;  %4566 = vmatprep.subr.mxu1 %v1366_v13 }
 0x292   : > { %4354 = vmatpush3.msra.mxu0 %v1366_v13  ;;  %4582 = vmatpush3.msra.mxu1 %v1366_v13  ;;  %v1455_v13 = vld [vmem:[%s6924_s6 + $0x268] sm:$0xff] }
 0x293   : > { %4355 = vmatprep.subr.mxu0 %v1365_v45  ;;  %4567 = vmatprep.subr.mxu1 %v1365_v45 }
 0x294   : > { %4356 = vmatpush3.msra.mxu0 %v1365_v45  ;;  %4583 = vmatpush3.msra.mxu1 %v1365_v45  ;;  %v1456_v45 = vld [vmem:[%s6924_s6 + $0x270] sm:$0xff] }
 0x295   : > { %4357 = vmatprep.subr.mxu0 %v1364_v9  ;;  %4568 = vmatprep.subr.mxu1 %v1364_v9 }
 0x296   : > { %4358 = vmatpush3.msra.mxu0 %v1364_v9  ;;  %4584 = vmatpush3.msra.mxu1 %v1364_v9  ;;  %v1457_v9 = vld [vmem:[%s6924_s6 + $0x278] sm:$0xff] }
 0x297   : > { %4359 = vmatprep.subr.mxu0 %v1363_v51  ;;  %4569 = vmatprep.subr.mxu1 %v1363_v51 }
 0x298   : > { %4360 = vmatpush3.msra.mxu0 %v1363_v51  ;;  %4585 = vmatpush3.msra.mxu1 %v1363_v51  ;;  %v1398_v51 = vld [vmem:[%s6924_s6 + $0xa0] sm:$0xff] }
 0x299   : > { %4361 = vmatprep.subr.mxu0 %v1362_v17  ;;  %4570 = vmatprep.subr.mxu1 %v1362_v17 }
 0x29a   : > { %4362 = vmatpush3.msra.mxu0 %v1362_v17  ;;  %4586 = vmatpush3.msra.mxu1 %v1362_v17  ;;  %v1458_v17 = vld [vmem:[%s6924_s6 + $0x280] sm:$0xff] }
 0x29b   : > { %4364 = vmatmul.mubr.f32.vlgmr.msra.gmra.mxu0 %v1379_v0  ;;  %4454 = vmatmul.mubr.f32.vlgmr.msra.gmra.mxu1 %v1439_v49  ;;  %v1399_v0 = vld [vmem:[%s6924_s6 + $0xa8] sm:$0xff] }
 0x29c   : > { %4366 = vmatprep.mubr.f32.mxu0 %v1380_v27  ;;  %4456 = vmatprep.mubr.f32.mxu1 %v1440_v58  ;;  %v1459_v49 = vld [vmem:[%s6924_s6 + $0x288] sm:$0xff]  ;;  %v1400_v27 = vld [vmem:[%s6924_s6 + $0xb0] sm:$0xff] }
 0x29d   : > { %v1460_v58 = vld [vmem:[%s6924_s6 + $0x290] sm:$0xff] }
 0x29f   : > { %4367 = vmatmul.mubr.f32.gmra.mxu0 %v1381_v42  ;;  %4457 = vmatmul.mubr.f32.gmra.mxu1 %v1441_v4  ;;  %v5928_v42 = vpop.permute.xlu1 %1786  ;;  %v5930_v4 = vpop.permute.xlu0 %1791 }
 0x2a0   : > { %4369 = vmatprep.mubr.f32.mxu0 %v1382_v40  ;;  %4459 = vmatprep.mubr.f32.mxu1 %v1442_v10  ;;  %6936 = vst [vmem:[#allocation12_spill] sm:$0xff] %v5928_v42  ;;  %v1401_v40 = vld [vmem:[%s6924_s6 + $0xb8] sm:$0xff] }
 0x2a1   : > { %v1461_v10 = vld [vmem:[%s6924_s6 + $0x298] sm:$0xff] }
 0x2a3   : > { %4370 = vmatmul.mubr.f32.gmra.mxu0 %v1383_v53  ;;  %4460 = vmatmul.mubr.f32.gmra.mxu1 %v1443_v22  ;;  %v1402_v53 = vld [vmem:[%s6924_s6 + $0xc0] sm:$0xff] }
 0x2a4   : > { %4372 = vmatprep.mubr.f32.mxu0 %v1384_v30  ;;  %4462 = vmatprep.mubr.f32.mxu1 %v1444_v29  ;;  %v1462_v22 = vld [vmem:[%s6924_s6 + $0x2a0] sm:$0xff]  ;;  %v1403_v30 = vld [vmem:[%s6924_s6 + $0xc8] sm:$0xff] }
 0x2a5   : > { %v1463_v29 = vld [vmem:[%s6924_s6 + $0x2a8] sm:$0xff] }
 0x2a7   : > { %4373 = vmatmul.mubr.f32.gmra.mxu0 %v1385_v31  ;;  %4463 = vmatmul.mubr.f32.gmra.mxu1 %v1445_v34  ;;  %v1404_v31 = vld [vmem:[%s6924_s6 + $0xd0] sm:$0xff] }
 0x2a8   : > { %4375 = vmatprep.mubr.f32.mxu0 %v1386_v37  ;;  %4465 = vmatprep.mubr.f32.mxu1 %v1446_v7  ;;  %v1464_v34 = vld [vmem:[%s6924_s6 + $0x2b0] sm:$0xff]  ;;  %v5956_v37 = vpop.permute.xlu1 %1796  ;;  %v5958_v7 = vpop.permute.xlu0 %1801 }
 0x2a9   : > { %6937 = vst [vmem:[#allocation13_spill] sm:$0xff] %v5956_v37  ;;  %6938 = vst [vmem:[#allocation14_spill] sm:$0xff] %v5958_v7 }
 0x2ab   : > { %4376 = vmatmul.mubr.f32.gmra.mxu0 %v1387_v47  ;;  %4466 = vmatmul.mubr.f32.gmra.mxu1 %v1447_v2  ;;  %v1405_v47 = vld [vmem:[%s6924_s6 + $0xd8] sm:$0xff] }
 0x2ac   : > { %4378 = vmatprep.mubr.f32.mxu0 %v1388_v46  ;;  %4468 = vmatprep.mubr.f32.mxu1 %v1448_v8  ;;  %v1465_v2 = vld [vmem:[%s6924_s6 + $0x2b8] sm:$0xff]  ;;  %v1406_v46 = vld [vmem:[%s6924_s6 + $0xe0] sm:$0xff] }
 0x2ad   : > { %v1466_v8 = vld [vmem:[%s6924_s6 + $0x2c0] sm:$0xff] }
 0x2af   : > { %4379 = vmatmul.mubr.f32.gmra.mxu0 %v1389_v12  ;;  %4469 = vmatmul.mubr.f32.gmra.mxu1 %v1449_v33  ;;  %v5972_v12 = vpop.permute.xlu1 %1806  ;;  %v5974_v33 = vpop.permute.xlu0 %1811 }
 0x2b0   : > { %4381 = vmatprep.mubr.f32.mxu0 %v1390_v63  ;;  %4471 = vmatprep.mubr.f32.mxu1 %v1450_v38  ;;  %6939 = vst [vmem:[#allocation15_spill] sm:$0xff] %v5972_v12  ;;  %6940 = vst [vmem:[#allocation16_spill] sm:$0xff] %v5974_v33  ;;  %v1407_v63 = vld [vmem:[%s6924_s6 + $0xe8] sm:$0xff] }
 0x2b1   : > { %v1467_v38 = vld [vmem:[%s6924_s6 + $0x2c8] sm:$0xff] }
 0x2b3   : > { %4382 = vmatmul.mubr.f32.gmra.mxu0 %v1391_v24  ;;  %4472 = vmatmul.mubr.f32.gmra.mxu1 %v1451_v25  ;;  %v1408_v24 = vld [vmem:[%s6924_s6 + $0xf0] sm:$0xff] }
 0x2b4   : > { %4384 = vmatprep.mubr.f32.mxu0 %v1392_v32  ;;  %4474 = vmatprep.mubr.f32.mxu1 %v1452_v28  ;;  %v1468_v25 = vld [vmem:[%s6924_s6 + $0x2d0] sm:$0xff]  ;;  %v1409_v32 = vld [vmem:[%s6924_s6 + $0xf8] sm:$0xff] }
 0x2b5   : > { %v1469_v28 = vld [vmem:[%s6924_s6 + $0x2d8] sm:$0xff] }
 0x2b7   : > { %4385 = vmatmul.mubr.f32.gmra.mxu0 %v1393_v1  ;;  %4475 = vmatmul.mubr.f32.gmra.mxu1 %v1453_v41  ;;  %v1410_v1 = vld [vmem:[%s6924_s6 + $0x100] sm:$0xff] }
 0x2b8   : > { %4387 = vmatprep.mubr.f32.mxu0 %v1394_v60  ;;  %4477 = vmatprep.mubr.f32.mxu1 %v1454_v35  ;;  %v1470_v41 = vld [vmem:[%s6924_s6 + $0x2e0] sm:$0xff]  ;;  %v6000_v60 = vpop.permute.xlu1 %1816  ;;  %v6002_v35 = vpop.permute.xlu0 %1821 }
 0x2b9   : > { %6941 = vst [vmem:[#allocation17_spill] sm:$0xff] %v6000_v60  ;;  %6942 = vst [vmem:[#allocation18_spill] sm:$0xff] %v6002_v35 }
 0x2bb   : > { %4388 = vmatmul.mubr.f32.gmra.mxu0 %v1395_v55  ;;  %4478 = vmatmul.mubr.f32.gmra.mxu1 %v1455_v13  ;;  %v1411_v55 = vld [vmem:[%s6924_s6 + $0x108] sm:$0xff] }
 0x2bc   : > { %4390 = vmatprep.mubr.f32.mxu0 %v1396_v52  ;;  %4480 = vmatprep.mubr.f32.mxu1 %v1456_v45  ;;  %v1471_v13 = vld [vmem:[%s6924_s6 + $0x2e8] sm:$0xff]  ;;  %v1412_v52 = vld [vmem:[%s6924_s6 + $0x110] sm:$0xff] }
 0x2bd   : > { %v1472_v45 = vld [vmem:[%s6924_s6 + $0x2f0] sm:$0xff] }
 0x2bf   : > { %4391 = vmatmul.mubr.f32.gmra.mxu0 %v1397_v61  ;;  %4481 = vmatmul.mubr.f32.gmra.mxu1 %v1457_v9  ;;  %v6016_v61 = vpop.permute.xlu1 %1826  ;;  %v6018_v9 = vpop.permute.xlu0 %1831 }
 0x2c0   : > { %4393 = vmatprep.mubr.f32.mxu0 %v1398_v51  ;;  %4483 = vmatprep.mubr.f32.mxu1 %v1458_v17  ;;  %6943 = vst [vmem:[#allocation19_spill] sm:$0xff] %v6016_v61  ;;  %6944 = vst [vmem:[#allocation20_spill] sm:$0xff] %v6018_v9  ;;  %v1413_v51 = vld [vmem:[%s6924_s6 + $0x118] sm:$0xff] }
 0x2c1   : > { %v1473_v17 = vld [vmem:[%s6924_s6 + $0x2f8] sm:$0xff] }
 0x2c3   : > { %4394 = vmatmul.mubr.f32.gmra.mxu0 %v1399_v0  ;;  %4484 = vmatmul.mubr.f32.gmra.mxu1 %v1459_v49  ;;  %v1414_v0 = vld [vmem:[%s6924_s6 + $0x120] sm:$0xff] }
 0x2c4   : > { %4396 = vmatprep.mubr.f32.mxu0 %v1400_v27  ;;  %4486 = vmatprep.mubr.f32.mxu1 %v1460_v58  ;;  %v1474_v49 = vld [vmem:[%s6924_s6 + $0x300] sm:$0xff]  ;;  %v1415_v27 = vld [vmem:[%s6924_s6 + $0x128] sm:$0xff] }
 0x2c5   : > { %v1475_v58 = vld [vmem:[%s6924_s6 + $0x308] sm:$0xff] }
 0x2c7   : > { %4397 = vmatmul.mubr.f32.gmra.mxu0 %v1401_v40  ;;  %4487 = vmatmul.mubr.f32.gmra.mxu1 %v1461_v10  ;;  %v1416_v40 = vld [vmem:[%s6924_s6 + $0x130] sm:$0xff] }
 0x2c8   : > { %4399 = vmatprep.mubr.f32.mxu0 %v1402_v53  ;;  %4489 = vmatprep.mubr.f32.mxu1 %v1462_v22  ;;  %v1476_v10 = vld [vmem:[%s6924_s6 + $0x310] sm:$0xff]  ;;  %v6044_v53 = vpop.permute.xlu1 %1836  ;;  %v6046_v22 = vpop.permute.xlu0 %1841 }
 0x2c9   : > { %6945 = vst [vmem:[#allocation21_spill] sm:$0xff] %v6044_v53  ;;  %6946 = vst [vmem:[#allocation22_spill] sm:$0xff] %v6046_v22 }
 0x2cb   : > { %4400 = vmatmul.mubr.f32.gmra.mxu0 %v1403_v30  ;;  %4490 = vmatmul.mubr.f32.gmra.mxu1 %v1463_v29  ;;  %v1417_v30 = vld [vmem:[%s6924_s6 + $0x138] sm:$0xff] }
 0x2cc   : > { %4402 = vmatprep.mubr.f32.mxu0 %v1404_v31  ;;  %4492 = vmatprep.mubr.f32.mxu1 %v1464_v34  ;;  %v1477_v29 = vld [vmem:[%s6924_s6 + $0x318] sm:$0xff]  ;;  %v1418_v31 = vld [vmem:[%s6924_s6 + $0x140] sm:$0xff] }
 0x2cd   : > { %v1478_v34 = vld [vmem:[%s6924_s6 + $0x320] sm:$0xff] }
 0x2cf   : > { %4403 = vmatmul.mubr.f32.gmra.mxu0 %v1405_v47  ;;  %4493 = vmatmul.mubr.f32.gmra.mxu1 %v1465_v2  ;;  %v6060_v47 = vpop.permute.xlu1 %1846  ;;  %v6062_v2 = vpop.permute.xlu0 %1851 }
 0x2d0   : > { %4405 = vmatprep.mubr.f32.mxu0 %v1406_v46  ;;  %4495 = vmatprep.mubr.f32.mxu1 %v1466_v8  ;;  %6947 = vst [vmem:[#allocation23_spill] sm:$0xff] %v6060_v47  ;;  %6948 = vst [vmem:[#allocation24_spill] sm:$0xff] %v6062_v2  ;;  %v1419_v46 = vld [vmem:[%s6924_s6 + $0x148] sm:$0xff] }
 0x2d1   : > { %v1479_v8 = vld [vmem:[%s6924_s6 + $0x328] sm:$0xff] }
 0x2d3   : > { %4406 = vmatmul.mubr.f32.gmra.mxu0 %v1407_v63  ;;  %4496 = vmatmul.mubr.f32.gmra.mxu1 %v1467_v38  ;;  %v1420_v63 = vld [vmem:[%s6924_s6 + $0x150] sm:$0xff] }
 0x2d4   : > { %4408 = vmatprep.mubr.f32.mxu0 %v1408_v24  ;;  %4498 = vmatprep.mubr.f32.mxu1 %v1468_v25  ;;  %v1480_v38 = vld [vmem:[%s6924_s6 + $0x330] sm:$0xff]  ;;  %v1421_v24 = vld [vmem:[%s6924_s6 + $0x158] sm:$0xff] }
 0x2d5   : > { %v1481_v25 = vld [vmem:[%s6924_s6 + $0x338] sm:$0xff] }
 0x2d7   : > { %4409 = vmatmul.mubr.f32.gmra.mxu0 %v1409_v32  ;;  %4499 = vmatmul.mubr.f32.gmra.mxu1 %v1469_v28  ;;  %v1422_v32 = vld [vmem:[%s6924_s6 + $0x160] sm:$0xff] }
 0x2d8   : > { %4411 = vmatprep.mubr.f32.mxu0 %v1410_v1  ;;  %4501 = vmatprep.mubr.f32.mxu1 %v1470_v41  ;;  %v1482_v28 = vld [vmem:[%s6924_s6 + $0x340] sm:$0xff]  ;;  %v6088_v1 = vpop.permute.xlu1 %1856  ;;  %v6090_v41 = vpop.permute.xlu0 %1861 }
 0x2d9   : > { %6949 = vst [vmem:[#allocation25_spill] sm:$0xff] %v6088_v1  ;;  %6950 = vst [vmem:[#allocation26_spill] sm:$0xff] %v6090_v41  ;;  %v4675_v1 = vmov -inf  }
 0x2db   : > { %4412 = vmatmul.mubr.f32.gmra.mxu0 %v1411_v55  ;;  %4502 = vmatmul.mubr.f32.gmra.mxu1 %v1471_v13  ;;  %v1423_v55 = vld [vmem:[%s6924_s6 + $0x168] sm:$0xff] }
 0x2dc   : > { %4414 = vmatprep.mubr.f32.mxu0 %v1412_v52  ;;  %4504 = vmatprep.mubr.f32.mxu1 %v1472_v45  ;;  %v1483_v13 = vld [vmem:[%s6924_s6 + $0x348] sm:$0xff]  ;;  %v1424_v52 = vld [vmem:[%s6924_s6 + $0x170] sm:$0xff] }
 0x2dd   : > { %v1484_v45 = vld [vmem:[%s6924_s6 + $0x350] sm:$0xff] }
 0x2df   : > { %4415 = vmatmul.mubr.f32.gmra.mxu0 %v1413_v51  ;;  %4505 = vmatmul.mubr.f32.gmra.mxu1 %v1473_v17  ;;  %v6104_v51 = vpop.permute.xlu1 %1866  ;;  %v6106_v17 = vpop.permute.xlu0 %1871 }
 0x2e0   : > { %4417 = vmatprep.mubr.f32.mxu0 %v1414_v0  ;;  %4507 = vmatprep.mubr.f32.mxu1 %v1474_v49  ;;  %6951 = vst [vmem:[#allocation27_spill] sm:$0xff] %v6104_v51  ;;  %6952 = vst [vmem:[#allocation28_spill] sm:$0xff] %v6106_v17  ;;  %v1425_v0 = vld [vmem:[%s6924_s6 + $0x178] sm:$0xff] }
 0x2e1   : > { %v1485_v49 = vld [vmem:[%s6924_s6 + $0x358] sm:$0xff] }
 0x2e3   : > { %4418 = vmatmul.mubr.f32.gmra.mxu0 %v1415_v27  ;;  %4508 = vmatmul.mubr.f32.gmra.mxu1 %v1475_v58  ;;  %v1426_v27 = vld [vmem:[%s6924_s6 + $0x180] sm:$0xff] }
 0x2e4   : > { %4420 = vmatprep.mubr.f32.mxu0 %v1416_v40  ;;  %4510 = vmatprep.mubr.f32.mxu1 %v1476_v10  ;;  %v1486_v58 = vld [vmem:[%s6924_s6 + $0x360] sm:$0xff]  ;;  %v1427_v40 = vld [vmem:[%s6924_s6 + $0x188] sm:$0xff] }
 0x2e5   : > { %v1487_v10 = vld [vmem:[%s6924_s6 + $0x368] sm:$0xff] }
 0x2e7   : > { %4421 = vmatmul.mubr.f32.gmra.mxu0 %v1417_v30  ;;  %4511 = vmatmul.mubr.f32.gmra.mxu1 %v1477_v29  ;;  %v1428_v30 = vld [vmem:[%s6924_s6 + $0x190] sm:$0xff] }
 0x2e8   : > { %4423 = vmatprep.mubr.f32.mxu0 %v1418_v31  ;;  %4513 = vmatprep.mubr.f32.mxu1 %v1478_v34  ;;  %v1488_v29 = vld [vmem:[%s6924_s6 + $0x370] sm:$0xff]  ;;  %v6132_v31 = vpop.permute.xlu1 %1876  ;;  %v6134_v34 = vpop.permute.xlu0 %1881 }
 0x2e9   : > { %6953 = vst [vmem:[#allocation29_spill] sm:$0xff] %v6132_v31  ;;  %6954 = vst [vmem:[#allocation30_spill] sm:$0xff] %v6134_v34 }
 0x2eb   : > { %4424 = vmatmul.mubr.f32.gmra.mxu0 %v1419_v46  ;;  %4514 = vmatmul.mubr.f32.gmra.mxu1 %v1479_v8  ;;  %v1429_v46 = vld [vmem:[%s6924_s6 + $0x198] sm:$0xff] }
 0x2ec   : > { %4426 = vmatprep.mubr.f32.mxu0 %v1420_v63  ;;  %4516 = vmatprep.mubr.f32.mxu1 %v1480_v38  ;;  %v1489_v8 = vld [vmem:[%s6924_s6 + $0x378] sm:$0xff]  ;;  %v1430_v63 = vld [vmem:[%s6924_s6 + $0x1a0] sm:$0xff] }
 0x2ed   : > { %v1490_v38 = vld [vmem:[%s6924_s6 + $0x380] sm:$0xff] }
 0x2ef   : > { %4427 = vmatmul.mubr.f32.gmra.mxu0 %v1421_v24  ;;  %4517 = vmatmul.mubr.f32.gmra.mxu1 %v1481_v25  ;;  %v6148_v24 = vpop.permute.xlu1 %1886  ;;  %v6150_v25 = vpop.permute.xlu0 %1891 }
 0x2f0   : > { %4429 = vmatprep.mubr.f32.mxu0 %v1422_v32  ;;  %4519 = vmatprep.mubr.f32.mxu1 %v1482_v28  ;;  %6955 = vst [vmem:[#allocation31_spill] sm:$0xff] %v6148_v24  ;;  %6956 = vst [vmem:[#allocation32_spill] sm:$0xff] %v6150_v25  ;;  %v1431_v32 = vld [vmem:[%s6924_s6 + $0x1a8] sm:$0xff]  ;;  %v6965_v24 = vlaneseq }
 0x2f1   : > { %v1491_v28 = vld [vmem:[%s6924_s6 + $0x388] sm:$0xff] }
 0x2f2   : > { %v2981_v25 = vand.u32 127, %v6965_v24 }
 0x2f3   : > { %4430 = vmatmul.mubr.f32.gmra.mxu0 %v1423_v55  ;;  %4520 = vmatmul.mubr.f32.gmra.mxu1 %v1483_v13  ;;  %v1432_v55 = vld [vmem:[%s6924_s6 + $0x1b0] sm:$0xff] }
 0x2f4   : > { %4432 = vmatprep.mubr.f32.mxu0 %v1424_v52  ;;  %4522 = vmatprep.mubr.f32.mxu1 %v1484_v45  ;;  %v1492_v13 = vld [vmem:[%s6924_s6 + $0x390] sm:$0xff]  ;;  %v1433_v52 = vld [vmem:[%s6924_s6 + $0x1b8] sm:$0xff]  ;;  %vm2984_vm1 = vcmp.lt.s32.totalorder %v2981_v25, 32 }
 0x2f5   : > { %v1493_v45 = vld [vmem:[%s6924_s6 + $0x398] sm:$0xff]  ;;  %v6271_v41 = vsel %vm2984_vm1, 0.0, %v4675_v1 }
 0x2f7   : > { %4433 = vmatmul.mubr.f32.gmra.mxu0 %v1425_v0  ;;  %4523 = vmatmul.mubr.f32.gmra.mxu1 %v1485_v49  ;;  %v1434_v0 = vld [vmem:[%s6924_s6 + $0x1c0] sm:$0xff] }
 0x2f8   : > { %4435 = vmatprep.mubr.f32.mxu0 %v1426_v27  ;;  %4525 = vmatprep.mubr.f32.mxu1 %v1486_v58  ;;  %v1494_v49 = vld [vmem:[%s6924_s6 + $0x3a0] sm:$0xff]  ;;  %v6176_v27 = vpop.permute.xlu1 %1896  ;;  %v6178_v58 = vpop.permute.xlu0 %1901 }
 0x2f9   : > { %6957 = vst [vmem:[#allocation33_spill] sm:$0xff] %v6176_v27  ;;  %6958 = vst [vmem:[#allocation34_spill] sm:$0xff] %v6178_v58 }
 0x2fb   : > { %4436 = vmatmul.mubr.f32.gmra.mxu0 %v1427_v40  ;;  %4526 = vmatmul.mubr.f32.gmra.mxu1 %v1487_v10  ;;  %v1435_v40 = vld [vmem:[%s6924_s6 + $0x1c8] sm:$0xff] }
 0x2fc   : > { %4438 = vmatprep.mubr.f32.mxu0 %v1428_v30  ;;  %4528 = vmatprep.mubr.f32.mxu1 %v1488_v29  ;;  %v1495_v10 = vld [vmem:[%s6924_s6 + $0x3a8] sm:$0xff]  ;;  %v1436_v30 = vld [vmem:[%s6924_s6 + $0x1d0] sm:$0xff] }
 0x2fd   : > { %v1496_v29 = vld [vmem:[%s6924_s6 + $0x3b0] sm:$0xff] }
 0x2ff   : > { %4439 = vmatmul.mubr.f32.gmra.mxu0 %v1429_v46  ;;  %4529 = vmatmul.mubr.f32.gmra.mxu1 %v1489_v8  ;;  %v6192_v46 = vpop.permute.xlu1 %1906  ;;  %v6194_v8 = vpop.permute.xlu0 %1911 }
 0x300   : > { %4441 = vmatprep.mubr.f32.mxu0 %v1430_v63  ;;  %4531 = vmatprep.mubr.f32.mxu1 %v1490_v38  ;;  %6959 = vst [vmem:[#allocation35_spill] sm:$0xff] %v6192_v46  ;;  %6960 = vst [vmem:[#allocation36_spill] sm:$0xff] %v6194_v8  ;;  %v1437_v63 = vld [vmem:[%s6924_s6 + $0x1d8] sm:$0xff] }
 0x301   : > { %v1497_v38 = vld [vmem:[%s6924_s6 + $0x3b8] sm:$0xff] }
 0x303   : > { %4442 = vmatmul.mubr.f32.gmra.mxu0 %v1431_v32  ;;  %4532 = vmatmul.mubr.f32.gmra.mxu1 %v1491_v28  ;;  %v1498_v32 = vld [vmem:[%s6924_s6 + $0x3c0] sm:$0xff]  ;;  %v1499_v28 = vld [vmem:[%s6924_s6 + $0x3c8] sm:$0xff] }
 0x304   : > { %4444 = vmatprep.mubr.f32.mxu0 %v1432_v55  ;;  %4534 = vmatprep.mubr.f32.mxu1 %v1492_v13  ;;  %v1500_v55 = vld [vmem:[%s6924_s6 + $0x3d0] sm:$0xff]  ;;  %v6211_v13 = vpop.permute.xlu1 %1916 }
 0x305   : > { %6961 = vst [vmem:[#allocation37_spill] sm:$0xff] %v6211_v13 }
 0x307   : > { %4445 = vmatmul.mubr.f32.gmra.mxu0 %v1433_v52  ;;  %4535 = vmatmul.mubr.f32.gmra.mxu1 %v1493_v45  ;;  %v6213_v52 = vpop.permute.xlu0 %1921  ;;  %v1501_v45 = vld [vmem:[%s6924_s6 + $0x3d8] sm:$0xff] }
 0x308   : > { %4447 = vmatprep.mubr.f32.mxu0 %v1434_v0  ;;  %4537 = vmatprep.mubr.f32.mxu1 %v1494_v49  ;;  %6962 = vst [vmem:[#allocation38_spill] sm:$0xff] %v6213_v52  ;;  %v1502_v0 = vld [vmem:[%s6924_s6 + $0x3e0] sm:$0xff]  ;;  %v6221_v49 = vpop.permute.xlu1 %1926 }
 0x309   : > { %6963 = vst [vmem:[#allocation39_spill] sm:$0xff] %v6221_v49 }
 0x30b   : > { %4448 = vmatmul.mubr.f32.gmra.mxu0 %v1435_v40  ;;  %4538 = vmatmul.mubr.f32.gmra.mxu1 %v1495_v10  ;;  %v6223_v40 = vpop.permute.xlu0 %1931  ;;  %v1503_v10 = vld [vmem:[%s6924_s6 + $0x3e8] sm:$0xff] }
 0x30c   : > { %4450 = vmatprep.mubr.f32.mxu0 %v1436_v30  ;;  %4540 = vmatprep.mubr.f32.mxu1 %v1496_v29  ;;  %6964 = vst [vmem:[#allocation40_spill] sm:$0xff] %v6223_v40  ;;  %v1504_v30 = vld [vmem:[%s6924_s6 + $0x3f0] sm:$0xff]  ;;  %v1505_v29 = vld [vmem:[%s6924_s6 + $0x3f8] sm:$0xff] }
 0x30f   : > { %4451 = vmatmul.mubr.f32.gmra.mxu0 %v1437_v63  ;;  %4541 = vmatmul.mubr.f32.gmra.mxu1 %v1497_v38  ;;  %v1937_v63 = vpop.permute.xlu1 %1936  ;;  %v1942_v38 = vpop.permute.xlu0 %1941 }
 0x310   : > { %4543 = vmatprep.mubr.f32.mxu1 %v1498_v32 }
 0x313   : > { %4544 = vmatmul.mubr.f32.gmra.mxu1 %v1499_v28  ;;  %v1947_v32 = vpop.permute.xlu1 %1946  ;;  %v1952_v28 = vpop.permute.xlu0 %1951 }
 0x314   : > { %4546 = vmatprep.mubr.f32.mxu1 %v1500_v55 }
 0x317   : > { %4547 = vmatmul.mubr.f32.gmra.mxu1 %v1501_v45  ;;  %v6234_v55 = vpop.permute.xlu1 %1956  ;;  %v6236_v45 = vpop.permute.xlu0 %1961 }
 0x318   : > { %4549 = vmatprep.mubr.f32.mxu1 %v1502_v0 }
 0x31b   : > { %4550 = vmatmul.mubr.f32.gmra.mxu1 %v1503_v10  ;;  %v6238_v0 = vpop.permute.xlu1 %1966  ;;  %v6240_v49 = vpop.permute.xlu0 %1971 }
 0x31c   : > { %4552 = vmatprep.mubr.f32.mxu1 %v1504_v30 }
 0x31f   : > { %4553 = vmatmul.mubr.f32.gmra.mxu1 %v1505_v29  ;;  %v6242_v40 = vpop.permute.xlu1 %1976  ;;  %v6244_v10 = vpop.permute.xlu0 %1981 }
 0x323   : > { %v6246_v30 = vpop.permute.xlu1 %1986  ;;  %v6248_v13 = vpop.permute.xlu0 %1991 }
 0x327   : > { %v6250_v52 = vpop.permute.xlu1 %1996  ;;  %v6252_v29 = vpop.permute.xlu0 %2001 }
 0x32b   : > { %v6254_v46 = vpop.permute.xlu1 %2006  ;;  %v6256_v8 = vpop.permute.xlu0 %2011 }
 0x32f   : > { %v6258_v27 = vpop.permute.xlu1 %2016  ;;  %v6260_v58 = vpop.permute.xlu0 %2021 }
 0x333   : > { %v6263_v31 = vpop.permute.xlu1 %2026  ;;  %v6265_v34 = vpop.permute.xlu0 %2031 }
 0x337   : > { %v6267_v51 = vpop.permute.xlu1 %2036  ;;  %v6269_v17 = vpop.permute.xlu0 %2041 }
 0x33b   : > { %v6277_v37 = vpop.permute.xlu1 %2046  ;;  %v6279_v1 = vpop.permute.xlu0 %2051 }
 0x35b   : > { %v4365_v47 = vpop.f32.mrf.mxu0  ;;  %v4455_v2 = vpop.f32.mrf.mxu1 }
 0x35c   : > { %v2346_v53 = vadd.f32 %v4365_v47, %v5575_v14  ;;  %v2646_v22 = vadd.f32 %v4455_v2, %v1942_v38 }
 0x35d   : > { %v2340_v61 = vpop.f32.mrf.mxu0  ;;  %v2640_v9 = vpop.f32.mrf.mxu1 }
 0x35e   : > { %v2987_v24 = vadd.f32 %v6271_v41, %v2346_v53  ;;  %v3047_v60 = vadd.f32 %v6271_v41, %v2646_v22  ;;  %v2341_v25 = vadd.f32 %v2340_v61, %v5573_v26  ;;  %v2641_v35 = vadd.f32 %v2640_v9, %v1937_v63  ;;  %v6285_v63 = vpop.permute.xlu1 %2056 }
 0x35f   : > { %v4368_v12 = vpop.f32.mrf.mxu0  ;;  %v4458_v33 = vpop.f32.mrf.mxu1 }
 0x360   : > { %3751 = vmax.xlane.f32.xlu1 %v3047_v60  ;;  %3631 = vmax.xlane.f32.xlu0 %v2987_v24  ;;  %v2986_v47 = vadd.f32 %v6271_v41, %v2341_v25  ;;  %v2356_v2 = vadd.f32 %v4368_v12, %v5591_v5  ;;  %v3046_v53 = vadd.f32 %v6271_v41, %v2641_v35  ;;  %v6288_v24 = vpop.permute.xlu0 %2061 }
 0x361   : > { %v2350_v7 = vpop.f32.mrf.mxu0  ;;  %v2650_v14 = vpop.f32.mrf.mxu1  ;;  %v2656_v38 = vadd.f32 %v4458_v33, %v1952_v28 }
 0x362   : > { %v2351_v22 = vadd.f32 %v2350_v7, %v5586_v16  ;;  %v2989_v60 = vadd.f32 %v6271_v41, %v2356_v2  ;;  %v2651_v42 = vadd.f32 %v2650_v14, %v1947_v32  ;;  %v6295_v33 = vpop.permute.xlu1 %2066 }
 0x363   : > { %v4461_v26 = vpop.f32.mrf.mxu1  ;;  %v4371_v61 = vpop.f32.mrf.mxu0  ;;  %v3049_v7 = vadd.f32 %v6271_v41, %v2656_v38 }
 0x364   : > { %3629 = vmax.xlane.f32.xlu1 %v2986_v47  ;;  %3749 = vmax.xlane.f32.xlu0 %v3046_v53  ;;  %v2988_v25 = vadd.f32 %v6271_v41, %v2351_v22  ;;  %v2366_v35 = vadd.f32 %v4371_v61, %v5601_v19  ;;  %v3048_v47 = vadd.f32 %v6271_v41, %v2651_v42  ;;  %v6297_v22 = vpop.permute.xlu0 %2071 }
 0x365   : > { %v2660_v9 = vpop.f32.mrf.mxu1  ;;  %v2360_v12 = vpop.f32.mrf.mxu0 }
 0x366   : > { %v2361_v53 = vadd.f32 %v2360_v12, %v5599_v18  ;;  %v2991_v14 = vadd.f32 %v6271_v41, %v2366_v35  ;;  %v2661_v19 = vadd.f32 %v2660_v9, %v6234_v55  ;;  %v6305_v12 = vpop.permute.xlu1 %2076 }
 0x367   : > { %v4464_v5 = vpop.f32.mrf.mxu1  ;;  %v4374_v28 = vpop.f32.mrf.mxu0 }
 0x368   : > { %3635 = vmax.xlane.f32.xlu1 %v2989_v60  ;;  %3633 = vmax.xlane.f32.xlu0 %v2988_v25  ;;  %v2666_v60 = vadd.f32 %v4461_v26, %v6236_v45  ;;  %v2990_v38 = vadd.f32 %v6271_v41, %v2361_v53  ;;  %v2376_v25 = vadd.f32 %v4374_v28, %v5617_v11 }
 0x369   : > { %v2670_v16 = vpop.f32.mrf.mxu1  ;;  %v2370_v42 = vpop.f32.mrf.mxu0  ;;  %v3050_v35 = vadd.f32 %v6271_v41, %v2661_v19  ;;  %v2676_v9 = vadd.f32 %v4464_v5, %v6240_v49 }
 0x36a   : > { %v3051_v18 = vadd.f32 %v6271_v41, %v2666_v60  ;;  %v2371_v45 = vadd.f32 %v2370_v42, %v5612_v48  ;;  %v2993_v55 = vadd.f32 %v6271_v41, %v2376_v25  ;;  %v2671_v11 = vadd.f32 %v2670_v16, %v6238_v0  ;;  %v6315_v60 = vpop.permute.xlu1 %2086 }
 0x36b   : > { %v4467_v2 = vpop.f32.mrf.mxu1  ;;  %v4377_v26 = vpop.f32.mrf.mxu0  ;;  %v3053_v48 = vadd.f32 %v6271_v41, %v2676_v9 }
 0x36c   : > { %3755 = vmax.xlane.f32.xlu1 %v3049_v7  ;;  %3753 = vmax.xlane.f32.xlu0 %v3048_v47  ;;  %v6307_v7 = vpop.permute.xlu0 %2081  ;;  %v2992_v53 = vadd.f32 %v6271_v41, %v2371_v45  ;;  %v2386_v19 = vadd.f32 %v4377_v26, %v5627_v43  ;;  %v3052_v42 = vadd.f32 %v6271_v41, %v2671_v11 }
 0x36d   : > { %v2680_v32 = vpop.f32.mrf.mxu1  ;;  %v2380_v28 = vpop.f32.mrf.mxu0  ;;  %v2686_v16 = vadd.f32 %v4467_v2, %v6244_v10 }
 0x36e   : > { %v2381_v49 = vadd.f32 %v2380_v28, %v5625_v50  ;;  %v2995_v0 = vadd.f32 %v6271_v41, %v2386_v19  ;;  %v6325_v25 = vpop.permute.xlu1 %2096  ;;  %v2681_v43 = vadd.f32 %v2680_v32, %v6242_v40 }
 0x36f   : > { %v4470_v61 = vpop.f32.mrf.mxu1  ;;  %v4380_v5 = vpop.f32.mrf.mxu0  ;;  %v3055_v50 = vadd.f32 %v6271_v41, %v2686_v16 }
 0x370   : > { %3639 = vmax.xlane.f32.xlu1 %v2991_v14  ;;  %3637 = vmax.xlane.f32.xlu0 %v2990_v38  ;;  %v6317_v38 = vpop.permute.xlu0 %2091  ;;  %v2994_v45 = vadd.f32 %v6271_v41, %v2381_v49  ;;  %v2396_v9 = vadd.f32 %v4380_v5, %v5643_v3  ;;  %v2696_v32 = vadd.f32 %v4470_v61, %v6248_v13 }
 0x371   : > { %v2690_v47 = vpop.f32.mrf.mxu1  ;;  %v2390_v26 = vpop.f32.mrf.mxu0 }
 0x372   : > { %v2391_v10 = vadd.f32 %v2390_v26, %v5638_v23  ;;  %v6335_v28 = vpop.permute.xlu1 %2106  ;;  %v2997_v40 = vadd.f32 %v6271_v41, %v2396_v9  ;;  %v2691_v3 = vadd.f32 %v2690_v47, %v6246_v30  ;;  %v3057_v23 = vadd.f32 %v6271_v41, %v2696_v32 }
 0x373   : > { %v4473_v14 = vpop.f32.mrf.mxu1  ;;  %v4383_v2 = vpop.f32.mrf.mxu0 }
 0x374   : > { %3759 = vmax.xlane.f32.xlu1 %v3051_v18  ;;  %3757 = vmax.xlane.f32.xlu0 %v3050_v35  ;;  %v6327_v35 = vpop.permute.xlu0 %2101  ;;  %v2996_v19 = vadd.f32 %v6271_v41, %v2391_v10  ;;  %v2406_v5 = vadd.f32 %v4383_v2, %v5653_v36  ;;  %v2706_v47 = vadd.f32 %v4473_v14, %v6252_v29 }
 0x375   : > { %v2700_v18 = vpop.f32.mrf.mxu1 }
 0x376   : > { %v2999_v30 = vadd.f32 %v6271_v41, %v2406_v5  ;;  %v2701_v36 = vadd.f32 %v2700_v18, %v6250_v52 }
 0x378   : > { %3643 = vmax.xlane.f32.xlu1 %v2993_v55  ;;  %3641 = vmax.xlane.f32.xlu0 %v2992_v53  ;;  %v4476_v55 = vpop.f32.mrf.mxu1  ;;  %v3054_v53 = vadd.f32 %v6271_v41, %v2681_v43 }
 0x379   : > { %v2716_v18 = vadd.f32 %v4476_v55, %v6256_v8 }
 0x37a   : > { %v2710_v11 = vpop.f32.mrf.mxu1 }
 0x37c   : > { %3763 = vmax.xlane.f32.xlu1 %v3053_v48  ;;  %3761 = vmax.xlane.f32.xlu0 %v3052_v42  ;;  %v6337_v48 = vpop.permute.xlu0 %2111  ;;  %v2400_v42 = vpop.f32.mrf.mxu0 }
 0x37d   : > { %v4479_v49 = vpop.f32.mrf.mxu1  ;;  %v2401_v13 = vadd.f32 %v2400_v42, %v5651_v56  ;;  %v3059_v56 = vadd.f32 %v6271_v41, %v2706_v47 }
 0x37e   : > { %v4386_v61 = vpop.f32.mrf.mxu0 }
 0x37f   : > { %v2720_v43 = vpop.f32.mrf.mxu1  ;;  %v2998_v26 = vadd.f32 %v6271_v41, %v2401_v13  ;;  %v2416_v2 = vadd.f32 %v4386_v61, %v5669_v62  ;;  %v2711_v62 = vadd.f32 %v2710_v11, %v6254_v46  ;;  %v2726_v11 = vadd.f32 %v4479_v49, %v6260_v58 }
 0x380   : > { %3647 = vmax.xlane.f32.xlu1 %v2995_v0  ;;  %3645 = vmax.xlane.f32.xlu0 %v2994_v45  ;;  %v6345_v0 = vpop.permute.xlu1 %2116  ;;  %v6347_v16 = vpop.permute.xlu0 %2121  ;;  %v3056_v45 = vadd.f32 %v6271_v41, %v2691_v3 }
 0x381   : > { %v4482_v9 = vpop.f32.mrf.mxu1  ;;  %v3001_v52 = vadd.f32 %v6271_v41, %v2416_v2  ;;  %v3060_v13 = vadd.f32 %v6271_v41, %v2711_v62 }
 0x383   : > { %v2730_v32 = vpop.f32.mrf.mxu1 }
 0x384   : > { %3767 = vmax.xlane.f32.xlu1 %v3055_v50  ;;  %3765 = vmax.xlane.f32.xlu0 %v3054_v53  ;;  %v2410_v50 = vpop.f32.mrf.mxu0  ;;  %v6355_v53 = vpop.permute.xlu1 %2126 }
 0x385   : > { %v6357_v10 = vpop.permute.xlu0 %2131  ;;  %v2411_v29 = vadd.f32 %v2410_v50, %v5664_v21  ;;  %v4485_v5 = vpop.f32.mrf.mxu1  ;;  %v3061_v21 = vadd.f32 %v6271_v41, %v2716_v18 }
 0x386   : > { %v4389_v14 = vpop.f32.mrf.mxu0 }
 0x387   : > { %v3000_v42 = vadd.f32 %v6271_v41, %v2411_v29  ;;  %v2740_v61 = vpop.f32.mrf.mxu1 }
 0x388   : > { %3651 = vmax.xlane.f32.xlu1 %v2997_v40  ;;  %3649 = vmax.xlane.f32.xlu0 %v2996_v19  ;;  %v3058_v40 = vadd.f32 %v6271_v41, %v2701_v36  ;;  %v6365_v19 = vpop.permute.xlu1 %2136 }
 0x389   : > { %v6367_v3 = vpop.permute.xlu0 %2141  ;;  %v4488_v50 = vpop.f32.mrf.mxu1 }
 0x38c   : > { %3771 = vmax.xlane.f32.xlu1 %v3057_v23  ;;  %3769 = vmax.xlane.f32.xlu0 %v3056_v45  ;;  %v2420_v23 = vpop.f32.mrf.mxu0  ;;  %v2426_v45 = vadd.f32 %v4389_v14, %v5679_v59  ;;  %v2721_v59 = vadd.f32 %v2720_v43, %v6258_v27  ;;  %v2750_v14 = vpop.f32.mrf.mxu1  ;;  %v2736_v43 = vadd.f32 %v4482_v9, %v6265_v34 }
 0x38d   : > { %v2421_v8 = vadd.f32 %v2420_v23, %v5677_v6  ;;  %v6377_v47 = vpop.permute.xlu0 %2151  ;;  %v3063_v6 = vadd.f32 %v6271_v41, %v2726_v11 }
 0x38e   : > { %v4392_v55 = vpop.f32.mrf.mxu0  ;;  %v3003_v46 = vadd.f32 %v6271_v41, %v2426_v45  ;;  %v3062_v29 = vadd.f32 %v6271_v41, %v2721_v59 }
 0x390   : > { %3655 = vmax.xlane.f32.xlu1 %v2999_v30  ;;  %3653 = vmax.xlane.f32.xlu0 %v2998_v26  ;;  %v6375_v30 = vpop.permute.xlu1 %2146  ;;  %v3002_v26 = vadd.f32 %v6271_v41, %v2421_v8  ;;  %v2430_v36 = vpop.f32.mrf.mxu0 }
 0x391   : > { %v2431_v58 = vadd.f32 %v2430_v36, %v5690_v44  ;;  %v3065_v44 = vadd.f32 %v6271_v41, %v2736_v43  ;;  %v6966_v43 = vld [vmem:[#allocation7_spill] sm:$0xff] }
 0x392   : > { %v4395_v49 = vpop.f32.mrf.mxu0 }
 0x394   : > { %3775 = vmax.xlane.f32.xlu1 %v3059_v56  ;;  %3773 = vmax.xlane.f32.xlu0 %v3058_v40  ;;  %v2436_v56 = vadd.f32 %v4392_v55, %v5695_v57  ;;  %v6385_v2 = vpop.permute.xlu1 %2156  ;;  %v6387_v40 = vpop.permute.xlu0 %2161  ;;  %v2731_v57 = vadd.f32 %v2730_v32, %v6263_v31  ;;  %v2746_v32 = vadd.f32 %v4485_v5, %v6269_v17 }
 0x395   : > { %v2440_v18 = vpop.f32.mrf.mxu0 }
 0x396   : > { %v3005_v27 = vadd.f32 %v6271_v41, %v2436_v56  ;;  %v3064_v45 = vadd.f32 %v6271_v41, %v2731_v57  ;;  %v2441_v34 = vadd.f32 %v2440_v18, %v5703_v39  ;;  %v3067_v39 = vadd.f32 %v6271_v41, %v2746_v32 }
 0x397   : > { %v4398_v9 = vpop.f32.mrf.mxu0 }
 0x398   : > { %3659 = vmax.xlane.f32.xlu1 %v3001_v52  ;;  %3657 = vmax.xlane.f32.xlu0 %v3000_v42  ;;  %v3004_v52 = vadd.f32 %v6271_v41, %v2431_v58  ;;  %v4491_v42 = vpop.f32.mrf.mxu1  ;;  %v6395_v62 = vpop.permute.xlu1 %2166  ;;  %v2456_v59 = vadd.f32 %v4398_v9, %v5721_v20  ;;  %v2751_v20 = vadd.f32 %v2750_v14, %v6277_v37 }
 0x399   : > { %v6397_v23 = vpop.permute.xlu0 %2171  ;;  %v2450_v11 = vpop.f32.mrf.mxu0  ;;  %v2766_v14 = vadd.f32 %v4491_v42, %v6288_v24 }
 0x39a   : > { %v2451_v17 = vadd.f32 %v2450_v11, %v5716_v15 }
 0x39b   : > { %v4401_v5 = vpop.f32.mrf.mxu0  ;;  %v3071_v11 = vadd.f32 %v6271_v41, %v2766_v14 }
 0x39c   : > { %3779 = vmax.xlane.f32.xlu1 %v3061_v21  ;;  %3777 = vmax.xlane.f32.xlu0 %v3060_v13  ;;  %v2446_v21 = vadd.f32 %v4395_v49, %v5705_v54  ;;  %v2760_v13 = vpop.f32.mrf.mxu1  ;;  %v6405_v8 = vpop.permute.xlu1 %2176  ;;  %v2741_v54 = vadd.f32 %v2740_v61, %v6267_v51  ;;  %v3009_v51 = vadd.f32 %v6271_v41, %v2456_v59 }
 0x39d   : > { %v6407_v55 = vpop.permute.xlu0 %2181  ;;  %v2756_v61 = vadd.f32 %v4488_v50, %v6279_v1  ;;  %v3008_v58 = vadd.f32 %v6271_v41, %v2451_v17  ;;  %v2460_v49 = vpop.f32.mrf.mxu0  ;;  %v2761_v9 = vadd.f32 %v2760_v13, %v6285_v63  ;;  %v6969_v17 = vld [vmem:[#allocation8_spill] sm:$0xff] }
 0x39e   : > { %v3007_v31 = vadd.f32 %v6271_v41, %v2446_v21  ;;  %v3066_v36 = vadd.f32 %v6271_v41, %v2741_v54  ;;  %v6967_v21 = vld [vmem:[#allocation6_spill] sm:$0xff] }
 0x39f   : > { %v3069_v15 = vadd.f32 %v6271_v41, %v2756_v61  ;;  %v2461_v1 = vadd.f32 %v2460_v49, %v6967_v21  ;;  %v4404_v50 = vpop.f32.mrf.mxu0 }
 0x3a0   : > { %3663 = vmax.xlane.f32.xlu1 %v3003_v46  ;;  %3661 = vmax.xlane.f32.xlu0 %v3002_v26  ;;  %v3006_v46 = vadd.f32 %v6271_v41, %v2441_v34  ;;  %v4494_v26 = vpop.f32.mrf.mxu1  ;;  %v6415_v56 = vpop.permute.xlu1 %2186 }
 0x3a1   : > { %v3010_v34 = vadd.f32 %v6271_v41, %v2461_v1  ;;  %v2776_v13 = vadd.f32 %v4494_v26, %v6297_v22  ;;  %v6971_v1 = vld [vmem:[#allocation10_spill] sm:$0xff] }
 0x3a4   : > { %3783 = vmax.xlane.f32.xlu1 %v3063_v6  ;;  %3781 = vmax.xlane.f32.xlu0 %v3062_v29  ;;  %v2770_v6 = vpop.f32.mrf.mxu1  ;;  %v6417_v29 = vpop.permute.xlu0 %2191 }
 0x3a5   : > { %v6425_v57 = vpop.permute.xlu1 %2196 }
 0x3a8   : > { %3667 = vmax.xlane.f32.xlu1 %v3005_v27  ;;  %3665 = vmax.xlane.f32.xlu0 %v3004_v52  ;;  %v4497_v27 = vpop.f32.mrf.mxu1  ;;  %v2466_v52 = vadd.f32 %v4401_v5, %v6966_v43  ;;  %v6427_v18 = vpop.permute.xlu0 %2201  ;;  %v3073_v43 = vadd.f32 %v6271_v41, %v2776_v13 }
 0x3aa   : > { %v3011_v37 = vadd.f32 %v6271_v41, %v2466_v52  ;;  %v6970_v52 = vld [vmem:[#allocation11_spill] sm:$0xff] }
 0x3ac   : > { %3787 = vmax.xlane.f32.xlu1 %v3065_v44  ;;  %3785 = vmax.xlane.f32.xlu0 %v3064_v45  ;;  %v3068_v44 = vadd.f32 %v6271_v41, %v2751_v20  ;;  %v2780_v45 = vpop.f32.mrf.mxu1  ;;  %v6437_v54 = vpop.permute.xlu0 %2211  ;;  %v2771_v20 = vadd.f32 %v2770_v6, %v6295_v33  ;;  %v2786_v6 = vadd.f32 %v4497_v27, %v6307_v7 }
 0x3ae   : > { %v4500_v32 = vpop.f32.mrf.mxu1  ;;  %v3072_v21 = vadd.f32 %v6271_v41, %v2771_v20 }
 0x3b0   : > { %3671 = vmax.xlane.f32.xlu1 %v3007_v31  ;;  %3669 = vmax.xlane.f32.xlu0 %v3006_v46  ;;  %v2470_v31 = vpop.f32.mrf.mxu0  ;;  %v6435_v46 = vpop.permute.xlu1 %2206 }
 0x3b1   : > { %v2471_v24 = vadd.f32 %v2470_v31, %v6969_v17  ;;  %v2790_v5 = vpop.f32.mrf.mxu1  ;;  %v6447_v61 = vpop.permute.xlu0 %2221 }
 0x3b2   : > { %v4407_v42 = vpop.f32.mrf.mxu0 }
 0x3b4   : > { %3791 = vmax.xlane.f32.xlu1 %v3067_v39  ;;  %3789 = vmax.xlane.f32.xlu0 %v3066_v36  ;;  %v6968_v39 = vld [vmem:[#allocation9_spill] sm:$0xff]  ;;  %v3070_v36 = vadd.f32 %v6271_v41, %v2761_v9  ;;  %v2480_v49 = vpop.f32.mrf.mxu0  ;;  %v2781_v9 = vadd.f32 %v2780_v45, %v6305_v12  ;;  %v2796_v45 = vadd.f32 %v4500_v32, %v6317_v38 }
 0x3b5   : > { %v2476_v59 = vadd.f32 %v4404_v50, %v6968_v39  ;;  %v2481_v22 = vadd.f32 %v2480_v49, %v6971_v1  ;;  %v6457_v14 = vpop.permute.xlu0 %2231  ;;  %v3075_v39 = vadd.f32 %v6271_v41, %v2786_v6 }
 0x3b6   : > { %v4410_v26 = vpop.f32.mrf.mxu0 }
 0x3b7   : > { %v3013_v63 = vadd.f32 %v6271_v41, %v2476_v59  ;;  %v2496_v59 = vadd.f32 %v4410_v26, %v5930_v4  ;;  %v2791_v4 = vadd.f32 %v2790_v5, %v6315_v60 }
 0x3b8   : > { %3675 = vmax.xlane.f32.xlu1 %v3009_v51  ;;  %3673 = vmax.xlane.f32.xlu0 %v3008_v58  ;;  %v6445_v51 = vpop.permute.xlu1 %2216  ;;  %v3012_v58 = vadd.f32 %v6271_v41, %v2471_v24  ;;  %v2490_v31 = vpop.f32.mrf.mxu0  ;;  %v3074_v24 = vadd.f32 %v6271_v41, %v2781_v9 }
 0x3b9   : > { %v6467_v17 = vpop.permute.xlu0 %2241  ;;  %v3017_v12 = vadd.f32 %v6271_v41, %v2496_v59  ;;  %v3076_v1 = vadd.f32 %v6271_v41, %v2791_v4 }
 0x3ba   : > { %v4413_v27 = vpop.f32.mrf.mxu0 }
 0x3bc   : > { %3795 = vmax.xlane.f32.xlu1 %v3069_v15  ;;  %3793 = vmax.xlane.f32.xlu0 %v3068_v44  ;;  %v4503_v15 = vpop.f32.mrf.mxu1  ;;  %v2486_v44 = vadd.f32 %v4407_v42, %v6970_v52  ;;  %v6972_v42 = vld [vmem:[#allocation12_spill] sm:$0xff]  ;;  %v3077_v52 = vadd.f32 %v6271_v41, %v2796_v45 }
 0x3bd   : > { %v2491_v7 = vadd.f32 %v2490_v31, %v6972_v42  ;;  %v2806_v5 = vadd.f32 %v4503_v15, %v6327_v35  ;;  %v6976_v35 = vld [vmem:[#allocation15_spill] sm:$0xff] }
 0x3be   : > { %v2800_v50 = vpop.f32.mrf.mxu1  ;;  %v3015_v33 = vadd.f32 %v6271_v41, %v2486_v44  ;;  %v6973_v44 = vld [vmem:[#allocation14_spill] sm:$0xff] }
 0x3bf   : > { %v3016_v13 = vadd.f32 %v6271_v41, %v2491_v7  ;;  %v2801_v9 = vadd.f32 %v2800_v50, %v6325_v25  ;;  %v3079_v59 = vadd.f32 %v6271_v41, %v2806_v5 }
 0x3c0   : > { %3679 = vmax.xlane.f32.xlu1 %v3011_v37  ;;  %3677 = vmax.xlane.f32.xlu0 %v3010_v34  ;;  %v6455_v37 = vpop.permute.xlu1 %2226  ;;  %v3014_v34 = vadd.f32 %v6271_v41, %v2481_v22  ;;  %v6974_v22 = vld [vmem:[#allocation13_spill] sm:$0xff] }
 0x3c1   : > { %v3078_v7 = vadd.f32 %v6271_v41, %v2801_v9 }
 0x3c4   : > { %3799 = vmax.xlane.f32.xlu1 %v3071_v11  ;;  %3797 = vmax.xlane.f32.xlu0 %v3070_v36  ;;  %v4506_v11 = vpop.f32.mrf.mxu1  ;;  %v6465_v36 = vpop.permute.xlu1 %2236 }
 0x3c8   : > { %3683 = vmax.xlane.f32.xlu1 %v3013_v63  ;;  %3681 = vmax.xlane.f32.xlu0 %v3012_v58  ;;  %v2810_v63 = vpop.f32.mrf.mxu1  ;;  %v2500_v58 = vpop.f32.mrf.mxu0 }
 0x3c9   : > { %v6475_v49 = vpop.permute.xlu1 %2246  ;;  %v2501_v38 = vadd.f32 %v2500_v58, %v6974_v22  ;;  %v2811_v58 = vadd.f32 %v2810_v63, %v6335_v28  ;;  %v6978_v22 = vld [vmem:[#allocation17_spill] sm:$0xff] }
 0x3ca   : > { %v4509_v20 = vpop.f32.mrf.mxu1  ;;  %v4416_v32 = vpop.f32.mrf.mxu0 }
 0x3cb   : > { %v3080_v63 = vadd.f32 %v6271_v41, %v2811_v58  ;;  %v2826_v9 = vadd.f32 %v4509_v20, %v6347_v16  ;;  %v6979_v16 = vld [vmem:[#allocation20_spill] sm:$0xff] }
 0x3cc   : > { %3803 = vmax.xlane.f32.xlu1 %v3073_v43  ;;  %3801 = vmax.xlane.f32.xlu0 %v3072_v21  ;;  %v6477_v43 = vpop.permute.xlu0 %2251  ;;  %v2506_v21 = vadd.f32 %v4413_v27, %v6973_v44  ;;  %v2820_v26 = vpop.f32.mrf.mxu1 }
 0x3cd   : > { %v2510_v31 = vpop.f32.mrf.mxu0 }
 0x3ce   : > { %v3019_v60 = vadd.f32 %v6271_v41, %v2506_v21  ;;  %v2511_v15 = vadd.f32 %v2510_v31, %v6976_v35 }
 0x3cf   : > { %v4419_v27 = vpop.f32.mrf.mxu0 }
 0x3d0   : > { %3687 = vmax.xlane.f32.xlu1 %v3015_v33  ;;  %3685 = vmax.xlane.f32.xlu0 %v3014_v34  ;;  %v6485_v33 = vpop.permute.xlu1 %2256  ;;  %v6487_v6 = vpop.permute.xlu0 %2261  ;;  %v3018_v34 = vadd.f32 %v6271_v41, %v2501_v38  ;;  %v3020_v4 = vadd.f32 %v6271_v41, %v2511_v15  ;;  %v3083_v15 = vadd.f32 %v6271_v41, %v2826_v9 }
 0x3d4   : > { %3807 = vmax.xlane.f32.xlu1 %v3075_v39  ;;  %3805 = vmax.xlane.f32.xlu0 %v3074_v24  ;;  %v4512_v39 = vpop.f32.mrf.mxu1  ;;  %v6975_v24 = vld [vmem:[#allocation16_spill] sm:$0xff]  ;;  %v6496_v45 = vpop.permute.xlu1 %2266 }
 0x3d5   : > { %v2516_v42 = vadd.f32 %v4416_v32, %v6975_v24  ;;  %v6498_v25 = vpop.permute.xlu0 %2271  ;;  %v2821_v24 = vadd.f32 %v2820_v26, %v6345_v0  ;;  %v6980_v0 = vld [vmem:[#allocation19_spill] sm:$0xff] }
 0x3d7   : > { %v3021_v50 = vadd.f32 %v6271_v41, %v2516_v42 }
 0x3d8   : > { %3691 = vmax.xlane.f32.xlu1 %v3017_v12  ;;  %3689 = vmax.xlane.f32.xlu0 %v3016_v13  ;;  %v2830_v12 = vpop.f32.mrf.mxu1  ;;  %v2816_v13 = vadd.f32 %v4506_v11, %v6337_v48  ;;  %v6977_v11 = vld [vmem:[#allocation18_spill] sm:$0xff] }
 0x3da   : > { %v6509_v44 = vpop.f32.mrf.mxu1  ;;  %v3081_v48 = vadd.f32 %v6271_v41, %v2816_v13 }
 0x3dc   : > { %3811 = vmax.xlane.f32.xlu1 %v3077_v52  ;;  %3809 = vmax.xlane.f32.xlu0 %v3076_v1  ;;  %v2520_v52 = vpop.f32.mrf.mxu0  ;;  %v2526_v1 = vadd.f32 %v4419_v27, %v6977_v11 }
 0x3dd   : > { %v2521_v38 = vadd.f32 %v2520_v52, %v6978_v22 }
 0x3de   : > { %v4422_v32 = vpop.f32.mrf.mxu0 }
 0x3df   : > { %v2536_v20 = vadd.f32 %v4422_v32, %v6979_v16 }
 0x3e0   : > { %3695 = vmax.xlane.f32.xlu1 %v3019_v60  ;;  %3693 = vmax.xlane.f32.xlu0 %v3018_v34  ;;  %v2840_v60 = vpop.f32.mrf.mxu1  ;;  %v3023_v34 = vadd.f32 %v6271_v41, %v2526_v1  ;;  %v2530_v42 = vpop.f32.mrf.mxu0  ;;  %v2831_v1 = vadd.f32 %v2830_v12, %v6355_v53  ;;  %v6982_v53 = vld [vmem:[#allocation21_spill] sm:$0xff] }
 0x3e1   : > { %v2531_v26 = vadd.f32 %v2530_v42, %v6980_v0  ;;  %v3025_v52 = vadd.f32 %v6271_v41, %v2536_v20 }
 0x3e2   : > { %v4425_v13 = vpop.f32.mrf.mxu0 }
 0x3e3   : > { %v3024_v11 = vadd.f32 %v6271_v41, %v2531_v26 }
 0x3e4   : > { %3815 = vmax.xlane.f32.xlu1 %v3079_v59  ;;  %3813 = vmax.xlane.f32.xlu0 %v3078_v7  ;;  %v3022_v59 = vadd.f32 %v6271_v41, %v2521_v38  ;;  %v6527_v7 = vpop.f32.mrf.mxu1 }
 0x3e8   : > { %3699 = vmax.xlane.f32.xlu1 %v3021_v50  ;;  %3697 = vmax.xlane.f32.xlu0 %v3020_v4  ;;  %v3082_v50 = vadd.f32 %v6271_v41, %v2821_v24  ;;  %v2850_v4 = vpop.f32.mrf.mxu1  ;;  %v2846_v24 = vadd.f32 %v6509_v44, %v6367_v3  ;;  %v6983_v3 = vld [vmem:[#allocation24_spill] sm:$0xff] }
 0x3e9   : > { %v3752_v21 = vpop.xlane.xlu1 %3751  ;;  %v3632_v28 = vpop.xlane.xlu0 %3631 }
 0x3ea   : > { %3947 = vst.msk [vmem:[%s6507_s23 + $0x1e8] sm:$0xff] %vm3885_vm2, %v3752_v21  ;;  %3887 = vst.msk [vmem:[%s6507_s23 + $0x8] sm:$0xff] %vm3885_vm2, %v3632_v28  ;;  %v2836_v21 = vadd.f32 %v4512_v39, %v6357_v10  ;;  %v2540_v28 = vpop.f32.mrf.mxu0  ;;  %v6981_v10 = vld [vmem:[#allocation22_spill] sm:$0xff] }
 0x3eb   : > { %v2546_v39 = vadd.f32 %v4425_v13, %v6981_v10  ;;  %v2541_v12 = vadd.f32 %v2540_v28, %v6982_v53  ;;  %v2851_v28 = vadd.f32 %v2850_v4, %v6375_v30  ;;  %v6986_v30 = vld [vmem:[#allocation25_spill] sm:$0xff] }
 0x3ec   : > { %3819 = vmax.xlane.f32.xlu1 %v3081_v48  ;;  %3817 = vmax.xlane.f32.xlu0 %v3080_v63  ;;  %v6545_v63 = vpop.f32.mrf.mxu1  ;;  %v3085_v38 = vadd.f32 %v6271_v41, %v2836_v21 }
 0x3ed   : > { %v3630_v5 = vpop.xlane.xlu1 %3629  ;;  %v3750_v31 = vpop.xlane.xlu0 %3749 }
 0x3ee   : > { %3886 = vst.msk [vmem:[%s6507_s23] sm:$0xff] %vm3885_vm2, %v3630_v5  ;;  %3946 = vst.msk [vmem:[%s6507_s23 + $0x1e0] sm:$0xff] %vm3885_vm2, %v3750_v31  ;;  %v3084_v5 = vadd.f32 %v6271_v41, %v2831_v1  ;;  %v2860_v9 = vpop.f32.mrf.mxu1 }
 0x3f0   : > { %3703 = vmax.xlane.f32.xlu1 %v3023_v34  ;;  %3701 = vmax.xlane.f32.xlu0 %v3022_v59  ;;  %v4428_v34 = vpop.f32.mrf.mxu0  ;;  %v3027_v59 = vadd.f32 %v6271_v41, %v2546_v39  ;;  %v6564_v20 = vpop.f32.mrf.mxu1 }
 0x3f1   : > { %v3636_v35 = vpop.xlane.xlu1 %3635  ;;  %v3634_v27 = vpop.xlane.xlu0 %3633  ;;  %v2556_v44 = vadd.f32 %v4428_v34, %v6983_v3 }
 0x3f2   : > { %3889 = vst.msk [vmem:[%s6507_s23 + $0x18] sm:$0xff] %vm3885_vm2, %v3636_v35  ;;  %3888 = vst.msk [vmem:[%s6507_s23 + $0x10] sm:$0xff] %vm3885_vm2, %v3634_v27  ;;  %v3026_v35 = vadd.f32 %v6271_v41, %v2541_v12  ;;  %v2550_v16 = vpop.f32.mrf.mxu0 }
 0x3f3   : > { %v3029_v21 = vadd.f32 %v6271_v41, %v2556_v44 }
 0x3f4   : > { %3823 = vmax.xlane.f32.xlu1 %v3083_v15  ;;  %3821 = vmax.xlane.f32.xlu0 %v3082_v50  ;;  %v2841_v15 = vadd.f32 %v2840_v60, %v6365_v19  ;;  %v3087_v50 = vadd.f32 %v6271_v41, %v2846_v24  ;;  %v6984_v19 = vld [vmem:[#allocation23_spill] sm:$0xff]  ;;  %v4431_v13 = vpop.f32.mrf.mxu0 }
 0x3f5   : > { %v3756_v58 = vpop.xlane.xlu1 %3755  ;;  %v3754_v48 = vpop.xlane.xlu0 %3753  ;;  %v2551_v60 = vadd.f32 %v2550_v16, %v6984_v19 }
 0x3f6   : > { %3949 = vst.msk [vmem:[%s6507_s23 + $0x1f8] sm:$0xff] %vm3885_vm2, %v3756_v58  ;;  %3948 = vst.msk [vmem:[%s6507_s23 + $0x1f0] sm:$0xff] %vm3885_vm2, %v3754_v48  ;;  %v3086_v26 = vadd.f32 %v6271_v41, %v2841_v15  ;;  %v2870_v58 = vpop.f32.mrf.mxu1  ;;  %v2856_v48 = vadd.f32 %v6527_v7, %v6377_v47  ;;  %v6985_v47 = vld [vmem:[#allocation26_spill] sm:$0xff] }
 0x3f7   : > { %v3028_v1 = vadd.f32 %v6271_v41, %v2551_v60  ;;  %v2566_v7 = vadd.f32 %v4431_v13, %v6985_v47  ;;  %v2876_v13 = vadd.f32 %v6564_v20, %v6397_v23  ;;  %v6989_v23 = vld [vmem:[#allocation30_spill] sm:$0xff] }
 0x3f8   : > { %3707 = vmax.xlane.f32.xlu1 %v3025_v52  ;;  %3705 = vmax.xlane.f32.xlu0 %v3024_v11  ;;  %v3089_v39 = vadd.f32 %v6271_v41, %v2856_v48  ;;  %v2871_v48 = vadd.f32 %v2870_v58, %v6395_v62  ;;  %v6990_v62 = vld [vmem:[#allocation29_spill] sm:$0xff] }
 0x3f9   : > { %v3640_v22 = vpop.xlane.xlu1 %3639  ;;  %v3638_v32 = vpop.xlane.xlu0 %3637 }
 0x3fa   : > { %3891 = vst.msk [vmem:[%s6507_s23 + $0x28] sm:$0xff] %vm3885_vm2, %v3640_v22  ;;  %3890 = vst.msk [vmem:[%s6507_s23 + $0x20] sm:$0xff] %vm3885_vm2, %v3638_v32  ;;  %v2560_v22 = vpop.f32.mrf.mxu0 }
 0x3fb   : > { %v2561_v4 = vadd.f32 %v2560_v22, %v6986_v30  ;;  %v3093_v22 = vadd.f32 %v6271_v41, %v2876_v13 }
 0x3fc   : > { %3827 = vmax.xlane.f32.xlu1 %v3085_v38  ;;  %3825 = vmax.xlane.f32.xlu0 %v3084_v5  ;;  %v6583_v38 = vpop.f32.mrf.mxu1  ;;  %v3088_v5 = vadd.f32 %v6271_v41, %v2851_v28  ;;  %v4434_v53 = vpop.f32.mrf.mxu0 }
 0x3fd   : > { %v3760_v31 = vpop.xlane.xlu1 %3759  ;;  %v3758_v42 = vpop.xlane.xlu0 %3757  ;;  %v2886_v30 = vadd.f32 %v6583_v38, %v6407_v55  ;;  %v6991_v55 = vld [vmem:[#allocation32_spill] sm:$0xff] }
 0x3fe   : > { %3951 = vst.msk [vmem:[%s6507_s23 + $0x208] sm:$0xff] %vm3885_vm2, %v3760_v31  ;;  %3950 = vst.msk [vmem:[%s6507_s23 + $0x200] sm:$0xff] %vm3885_vm2, %v3758_v42  ;;  %v2880_v12 = vpop.f32.mrf.mxu1  ;;  %v3031_v31 = vadd.f32 %v6271_v41, %v2566_v7  ;;  %v3030_v42 = vadd.f32 %v6271_v41, %v2561_v4  ;;  %v2570_v15 = vpop.f32.mrf.mxu0 }
 0x400   : > { %3711 = vmax.xlane.f32.xlu1 %v3027_v59  ;;  %3709 = vmax.xlane.f32.xlu0 %v3026_v35  ;;  %v2866_v59 = vadd.f32 %v6545_v63, %v6387_v40  ;;  %v2861_v35 = vadd.f32 %v2860_v9, %v6385_v2  ;;  %v6602_v16 = vpop.f32.mrf.mxu1  ;;  %v6987_v40 = vld [vmem:[#allocation28_spill] sm:$0xff]  ;;  %v6988_v2 = vld [vmem:[#allocation27_spill] sm:$0xff] }
 0x401   : > { %v3644_v27 = vpop.xlane.xlu1 %3643  ;;  %v3642_v0 = vpop.xlane.xlu0 %3641  ;;  %v2576_v63 = vadd.f32 %v4434_v53, %v6987_v40  ;;  %v2571_v9 = vadd.f32 %v2570_v15, %v6988_v2 }
 0x402   : > { %3893 = vst.msk [vmem:[%s6507_s23 + $0x38] sm:$0xff] %vm3885_vm2, %v3644_v27  ;;  %3892 = vst.msk [vmem:[%s6507_s23 + $0x30] sm:$0xff] %vm3885_vm2, %v3642_v0  ;;  %v3090_v44 = vadd.f32 %v6271_v41, %v2861_v35  ;;  %v4437_v0 = vpop.f32.mrf.mxu0 }
 0x403   : > { %v3033_v60 = vadd.f32 %v6271_v41, %v2576_v63  ;;  %v2586_v20 = vadd.f32 %v4437_v0, %v6989_v23 }
 0x404   : > { %3831 = vmax.xlane.f32.xlu1 %v3087_v50  ;;  %3829 = vmax.xlane.f32.xlu0 %v3086_v26  ;;  %v3091_v50 = vadd.f32 %v6271_v41, %v2866_v59  ;;  %v2890_v26 = vpop.f32.mrf.mxu1 }
 0x405   : > { %v3764_v52 = vpop.xlane.xlu1 %3763  ;;  %v3762_v11 = vpop.xlane.xlu0 %3761 }
 0x406   : > { %3953 = vst.msk [vmem:[%s6507_s23 + $0x218] sm:$0xff] %vm3885_vm2, %v3764_v52  ;;  %3952 = vst.msk [vmem:[%s6507_s23 + $0x210] sm:$0xff] %vm3885_vm2, %v3762_v11  ;;  %v2580_v11 = vpop.f32.mrf.mxu0 }
 0x407   : > { %v2581_v58 = vadd.f32 %v2580_v11, %v6990_v62 }
 0x408   : > { %3715 = vmax.xlane.f32.xlu1 %v3029_v21  ;;  %3713 = vmax.xlane.f32.xlu0 %v3028_v1  ;;  %v3032_v21 = vadd.f32 %v6271_v41, %v2571_v9  ;;  %v6621_v1 = vpop.f32.mrf.mxu1  ;;  %v4440_v47 = vpop.f32.mrf.mxu0  ;;  %v2891_v9 = vadd.f32 %v2890_v26, %v6415_v56  ;;  %v6994_v56 = vld [vmem:[#allocation33_spill] sm:$0xff] }
 0x409   : > { %v3648_v10 = vpop.xlane.xlu1 %3647  ;;  %v3646_v32 = vpop.xlane.xlu0 %3645  ;;  %v3034_v53 = vadd.f32 %v6271_v41, %v2581_v58  ;;  %v2596_v38 = vadd.f32 %v4440_v47, %v6991_v55  ;;  %v2906_v23 = vadd.f32 %v6621_v1, %v6427_v18  ;;  %v6995_v18 = vld [vmem:[#allocation36_spill] sm:$0xff] }
 0x40a   : > { %3895 = vst.msk [vmem:[%s6507_s23 + $0x48] sm:$0xff] %vm3885_vm2, %v3648_v10  ;;  %3894 = vst.msk [vmem:[%s6507_s23 + $0x40] sm:$0xff] %vm3885_vm2, %v3646_v32  ;;  %v2900_v7 = vpop.f32.mrf.mxu1 }
 0x40b   : > { %v3037_v63 = vadd.f32 %v6271_v41, %v2596_v38 }
 0x40c   : > { %3835 = vmax.xlane.f32.xlu1 %v3089_v39  ;;  %3833 = vmax.xlane.f32.xlu0 %v3088_v5  ;;  %v3092_v39 = vadd.f32 %v6271_v41, %v2871_v48  ;;  %v3035_v5 = vadd.f32 %v6271_v41, %v2586_v20  ;;  %v6640_v59 = vpop.f32.mrf.mxu1 }
 0x40d   : > { %v3768_v34 = vpop.xlane.xlu1 %3767  ;;  %v3766_v24 = vpop.xlane.xlu0 %3765 }
 0x40e   : > { %3955 = vst.msk [vmem:[%s6507_s23 + $0x228] sm:$0xff] %vm3885_vm2, %v3768_v34  ;;  %3954 = vst.msk [vmem:[%s6507_s23 + $0x220] sm:$0xff] %vm3885_vm2, %v3766_v24  ;;  %v2881_v34 = vadd.f32 %v2880_v12, %v6405_v8  ;;  %v6992_v8 = vld [vmem:[#allocation31_spill] sm:$0xff] }
 0x410   : > { %3719 = vmax.xlane.f32.xlu1 %v3031_v31  ;;  %3717 = vmax.xlane.f32.xlu0 %v3030_v42  ;;  %v2590_v31 = vpop.f32.mrf.mxu0  ;;  %v3095_v42 = vadd.f32 %v6271_v41, %v2886_v30  ;;  %v3094_v15 = vadd.f32 %v6271_v41, %v2881_v34 }
 0x411   : > { %v3652_v27 = vpop.xlane.xlu1 %3651  ;;  %v3650_v3 = vpop.xlane.xlu0 %3649  ;;  %v2591_v12 = vadd.f32 %v2590_v31, %v6992_v8 }
 0x412   : > { %3897 = vst.msk [vmem:[%s6507_s23 + $0x58] sm:$0xff] %vm3885_vm2, %v3652_v27  ;;  %3896 = vst.msk [vmem:[%s6507_s23 + $0x50] sm:$0xff] %vm3885_vm2, %v3650_v3  ;;  %v4443_v27 = vpop.f32.mrf.mxu0  ;;  %v2896_v3 = vadd.f32 %v6602_v16, %v6417_v29  ;;  %v6993_v29 = vld [vmem:[#allocation34_spill] sm:$0xff] }
 0x413   : > { %v3036_v2 = vadd.f32 %v6271_v41, %v2591_v12  ;;  %v2606_v16 = vadd.f32 %v4443_v27, %v6993_v29  ;;  %v6997_v27 = vld [vmem:[#allocation38_spill] sm:$0xff] }
 0x414   : > { %3839 = vmax.xlane.f32.xlu1 %v3091_v50  ;;  %3837 = vmax.xlane.f32.xlu0 %v3090_v44  ;;  %v2910_v50 = vpop.f32.mrf.mxu1  ;;  %v2600_v0 = vpop.f32.mrf.mxu0  ;;  %v3097_v13 = vadd.f32 %v6271_v41, %v2896_v3 }
 0x415   : > { %v3772_v19 = vpop.xlane.xlu1 %3771  ;;  %v3770_v52 = vpop.xlane.xlu0 %3769  ;;  %v2601_v26 = vadd.f32 %v2600_v0, %v6994_v56  ;;  %v2911_v38 = vadd.f32 %v2910_v50, %v6435_v46  ;;  %v6999_v56 = vld [vmem:[#allocation40_spill] sm:$0xff] }
 0x416   : > { %3957 = vst.msk [vmem:[%s6507_s23 + $0x238] sm:$0xff] %vm3885_vm2, %v3772_v19  ;;  %3956 = vst.msk [vmem:[%s6507_s23 + $0x230] sm:$0xff] %vm3885_vm2, %v3770_v52  ;;  %v6659_v19 = vpop.f32.mrf.mxu1  ;;  %v4446_v48 = vpop.f32.mrf.mxu0 }
 0x417   : > { %v2616_v1 = vadd.f32 %v4446_v48, %v6995_v18  ;;  %v7000_v48 = vld [vmem:[#allocation39_spill] sm:$0xff] }
 0x418   : > { %3723 = vmax.xlane.f32.xlu1 %v3033_v60  ;;  %3721 = vmax.xlane.f32.xlu0 %v3032_v21  ;;  %v3096_v21 = vadd.f32 %v6271_v41, %v2891_v9  ;;  %v2920_v11 = vpop.f32.mrf.mxu1  ;;  %v2610_v62 = vpop.f32.mrf.mxu0  ;;  %v2926_v9 = vadd.f32 %v6659_v19, %v6447_v61 }
 0x419   : > { %v3656_v28 = vpop.xlane.xlu1 %3655  ;;  %v3654_v10 = vpop.xlane.xlu0 %3653  ;;  %v3041_v31 = vadd.f32 %v6271_v41, %v2616_v1 }
 0x41a   : > { %3899 = vst.msk [vmem:[%s6507_s23 + $0x68] sm:$0xff] %vm3885_vm2, %v3656_v28  ;;  %3898 = vst.msk [vmem:[%s6507_s23 + $0x60] sm:$0xff] %vm3885_vm2, %v3654_v10  ;;  %v3038_v10 = vadd.f32 %v6271_v41, %v2601_v26  ;;  %v6678_v58 = vpop.f32.mrf.mxu1 }
 0x41c   : > { %3843 = vmax.xlane.f32.xlu1 %v3093_v22  ;;  %3841 = vmax.xlane.f32.xlu0 %v3092_v39  ;;  %v3039_v22 = vadd.f32 %v6271_v41, %v2606_v16  ;;  %v2901_v39 = vadd.f32 %v2900_v7, %v6425_v57  ;;  %v6996_v57 = vld [vmem:[#allocation35_spill] sm:$0xff] }
 0x41d   : > { %v3776_v32 = vpop.xlane.xlu1 %3775  ;;  %v3774_v4 = vpop.xlane.xlu0 %3773  ;;  %v2611_v7 = vadd.f32 %v2610_v62, %v6996_v57 }
 0x41e   : > { %3959 = vst.msk [vmem:[%s6507_s23 + $0x248] sm:$0xff] %vm3885_vm2, %v3776_v32  ;;  %3958 = vst.msk [vmem:[%s6507_s23 + $0x240] sm:$0xff] %vm3885_vm2, %v3774_v4  ;;  %v3099_v32 = vadd.f32 %v6271_v41, %v2906_v23  ;;  %v3098_v30 = vadd.f32 %v6271_v41, %v2901_v39  ;;  %v4449_v4 = vpop.f32.mrf.mxu0  ;;  %v2936_v23 = vadd.f32 %v6678_v58, %v6457_v14 }
 0x41f   : > { %v3040_v55 = vadd.f32 %v6271_v41, %v2611_v7 }
 0x420   : > { %3727 = vmax.xlane.f32.xlu1 %v3035_v5  ;;  %3725 = vmax.xlane.f32.xlu0 %v3034_v53  ;;  %v2930_v53 = vpop.f32.mrf.mxu1 }
 0x421   : > { %v3660_v24 = vpop.xlane.xlu1 %3659  ;;  %v3658_v35 = vpop.xlane.xlu0 %3657  ;;  %v2931_v39 = vadd.f32 %v2930_v53, %v6455_v37 }
 0x422   : > { %3901 = vst.msk [vmem:[%s6507_s23 + $0x78] sm:$0xff] %vm3885_vm2, %v3660_v24  ;;  %3900 = vst.msk [vmem:[%s6507_s23 + $0x70] sm:$0xff] %vm3885_vm2, %v3658_v35  ;;  %v2916_v24 = vadd.f32 %v6640_v59, %v6437_v54  ;;  %v2620_v35 = vpop.f32.mrf.mxu0  ;;  %v2626_v54 = vadd.f32 %v4449_v4, %v6997_v27 }
 0x423   : > { %v3104_v58 = vadd.f32 %v6271_v41, %v2931_v39 }
 0x424   : > { %3847 = vmax.xlane.f32.xlu1 %v3095_v42  ;;  %3845 = vmax.xlane.f32.xlu0 %v3094_v15  ;;  %v4545_v15 = vpop.f32.mrf.mxu1  ;;  %v3101_v12 = vadd.f32 %v6271_v41, %v2916_v24  ;;  %v4452_v50 = vpop.f32.mrf.mxu0 }
 0x425   : > { %v3780_v40 = vpop.xlane.xlu1 %3779  ;;  %v3778_v44 = vpop.xlane.xlu0 %3777  ;;  %v2636_v61 = vadd.f32 %v4452_v50, %v6999_v56  ;;  %v2946_v18 = vadd.f32 %v4545_v15, %v6467_v17 }
 0x426   : > { %3961 = vst.msk [vmem:[%s6507_s23 + $0x258] sm:$0xff] %vm3885_vm2, %v3780_v40  ;;  %3960 = vst.msk [vmem:[%s6507_s23 + $0x250] sm:$0xff] %vm3885_vm2, %v3778_v44  ;;  %v3100_v40 = vadd.f32 %v6271_v41, %v2911_v38  ;;  %v2940_v3 = vpop.f32.mrf.mxu1  ;;  %v2630_v29 = vpop.f32.mrf.mxu0 }
 0x427   : > { %v2941_v1 = vadd.f32 %v2940_v3, %v6465_v36 }
 0x428   : > { %3731 = vmax.xlane.f32.xlu1 %v3037_v63  ;;  %3729 = vmax.xlane.f32.xlu0 %v3036_v2  ;;  %v6998_v63 = vld [vmem:[#allocation37_spill] sm:$0xff]  ;;  %v3043_v2 = vadd.f32 %v6271_v41, %v2626_v54  ;;  %v4548_v16 = vpop.f32.mrf.mxu1 }
 0x429   : > { %v3664_v60 = vpop.xlane.xlu1 %3663  ;;  %v3662_v52 = vpop.xlane.xlu0 %3661  ;;  %v2621_v46 = vadd.f32 %v2620_v35, %v6998_v63  ;;  %v2956_v57 = vadd.f32 %v4548_v16, %v6477_v43  ;;  %v3106_v7 = vadd.f32 %v6271_v41, %v2941_v1 }
 0x42a   : > { %3903 = vst.msk [vmem:[%s6507_s23 + $0x88] sm:$0xff] %vm3885_vm2, %v3664_v60  ;;  %3902 = vst.msk [vmem:[%s6507_s23 + $0x80] sm:$0xff] %vm3885_vm2, %v3662_v52 }
 0x42b   : > { %v3042_v60 = vadd.f32 %v6271_v41, %v2621_v46 }
 0x42c   : > { %3851 = vmax.xlane.f32.xlu1 %v3097_v13  ;;  %3849 = vmax.xlane.f32.xlu0 %v3096_v21  ;;  %v2921_v13 = vadd.f32 %v2920_v11, %v6445_v51  ;;  %v3103_v21 = vadd.f32 %v6271_v41, %v2926_v9  ;;  %v2631_v51 = vadd.f32 %v2630_v29, %v7000_v48  ;;  %v2950_v11 = vpop.f32.mrf.mxu1 }
 0x42d   : > { %v3784_v28 = vpop.xlane.xlu1 %3783  ;;  %v3782_v20 = vpop.xlane.xlu0 %3781  ;;  %v2951_v4 = vadd.f32 %v2950_v11, %v6475_v49 }
 0x42e   : > { %3963 = vst.msk [vmem:[%s6507_s23 + $0x268] sm:$0xff] %vm3885_vm2, %v3784_v28  ;;  %3962 = vst.msk [vmem:[%s6507_s23 + $0x260] sm:$0xff] %vm3885_vm2, %v3782_v20  ;;  %v3102_v26 = vadd.f32 %v6271_v41, %v2921_v13  ;;  %v4551_v62 = vpop.f32.mrf.mxu1 }
 0x42f   : > { %v3108_v24 = vadd.f32 %v6271_v41, %v2951_v4 }
 0x430   : > { %3735 = vmax.xlane.f32.xlu1 %v3039_v22  ;;  %3733 = vmax.xlane.f32.xlu0 %v3038_v10  ;;  %v3045_v22 = vadd.f32 %v6271_v41, %v2636_v61  ;;  %v3044_v10 = vadd.f32 %v6271_v41, %v2631_v51  ;;  %v2960_v37 = vpop.f32.mrf.mxu1 }
 0x431   : > { %v3668_v47 = vpop.xlane.xlu1 %3667  ;;  %v3666_v5 = vpop.xlane.xlu0 %3665 }
 0x432   : > { %3905 = vst.msk [vmem:[%s6507_s23 + $0x98] sm:$0xff] %vm3885_vm2, %v3668_v47  ;;  %3904 = vst.msk [vmem:[%s6507_s23 + $0x90] sm:$0xff] %vm3885_vm2, %v3666_v5  ;;  %v4554_v36 = vpop.f32.mrf.mxu1 }
 0x434   : > { %3855 = vmax.xlane.f32.xlu1 %v3099_v32  ;;  %3853 = vmax.xlane.f32.xlu0 %v3098_v30  ;;  %v3105_v32 = vadd.f32 %v6271_v41, %v2936_v23  ;;  %v3107_v30 = vadd.f32 %v6271_v41, %v2946_v18  ;;  %v2970_v49 = vpop.f32.mrf.mxu1 }
 0x435   : > { %v3788_v34 = vpop.xlane.xlu1 %3787  ;;  %v3786_v42 = vpop.xlane.xlu0 %3785 }
 0x436   : > { %3965 = vst.msk [vmem:[%s6507_s23 + $0x278] sm:$0xff] %vm3885_vm2, %v3788_v34  ;;  %3964 = vst.msk [vmem:[%s6507_s23 + $0x270] sm:$0xff] %vm3885_vm2, %v3786_v42  ;;  %v3109_v34 = vadd.f32 %v6271_v41, %v2956_v57  ;;  %v2961_v42 = vadd.f32 %v2960_v37, %v6485_v33  ;;  %v2971_v33 = vadd.f32 %v2970_v49, %v6496_v45 }
 0x438   : > { %3739 = vmax.xlane.f32.xlu1 %v3041_v31  ;;  %3737 = vmax.xlane.f32.xlu0 %v3040_v55  ;;  %v2966_v31 = vadd.f32 %v4551_v62, %v6487_v6  ;;  %v2976_v6 = vadd.f32 %v4554_v36, %v6498_v25  ;;  %v3110_v15 = vadd.f32 %v6271_v41, %v2961_v42 }
 0x439   : > { %v3672_v8 = vpop.xlane.xlu1 %3671  ;;  %v3670_v59 = vpop.xlane.xlu0 %3669  ;;  %v3112_v25 = vadd.f32 %v6271_v41, %v2971_v33 }
 0x43a   : > { %3907 = vst.msk [vmem:[%s6507_s23 + $0xa8] sm:$0xff] %vm3885_vm2, %v3672_v8  ;;  %3906 = vst.msk [vmem:[%s6507_s23 + $0xa0] sm:$0xff] %vm3885_vm2, %v3670_v59  ;;  %v3111_v38 = vadd.f32 %v6271_v41, %v2966_v31 }
 0x43c   : > { %3859 = vmax.xlane.f32.xlu1 %v3101_v12  ;;  %3857 = vmax.xlane.f32.xlu0 %v3100_v40  ;;  %v3113_v12 = vadd.f32 %v6271_v41, %v2976_v6 }
 0x43d   : > { %v3792_v44 = vpop.xlane.xlu1 %3791  ;;  %v3790_v0 = vpop.xlane.xlu0 %3789 }
 0x43e   : > { %3967 = vst.msk [vmem:[%s6507_s23 + $0x288] sm:$0xff] %vm3885_vm2, %v3792_v44  ;;  %3966 = vst.msk [vmem:[%s6507_s23 + $0x280] sm:$0xff] %vm3885_vm2, %v3790_v0 }
 0x440   : > { %3743 = vmax.xlane.f32.xlu1 %v3043_v2  ;;  %3741 = vmax.xlane.f32.xlu0 %v3042_v60 }
 0x441   : > { %v3676_v52 = vpop.xlane.xlu1 %3675  ;;  %v3674_v19 = vpop.xlane.xlu0 %3673 }
 0x442   : > { %3909 = vst.msk [vmem:[%s6507_s23 + $0xb8] sm:$0xff] %vm3885_vm2, %v3676_v52  ;;  %3908 = vst.msk [vmem:[%s6507_s23 + $0xb0] sm:$0xff] %vm3885_vm2, %v3674_v19 }
 0x444   : > { %3863 = vmax.xlane.f32.xlu1 %v3103_v21  ;;  %3861 = vmax.xlane.f32.xlu0 %v3102_v26 }
 0x445   : > { %v3796_v28 = vpop.xlane.xlu1 %3795  ;;  %v3794_v20 = vpop.xlane.xlu0 %3793 }
 0x446   : > { %3969 = vst.msk [vmem:[%s6507_s23 + $0x298] sm:$0xff] %vm3885_vm2, %v3796_v28  ;;  %3968 = vst.msk [vmem:[%s6507_s23 + $0x290] sm:$0xff] %vm3885_vm2, %v3794_v20 }
 0x448   : > { %3747 = vmax.xlane.f32.xlu1 %v3045_v22  ;;  %3745 = vmax.xlane.f32.xlu0 %v3044_v10 }
 0x449   : > { %v3680_v47 = vpop.xlane.xlu1 %3679  ;;  %v3678_v14 = vpop.xlane.xlu0 %3677 }
 0x44a   : > { %3911 = vst.msk [vmem:[%s6507_s23 + $0xc8] sm:$0xff] %vm3885_vm2, %v3680_v47  ;;  %3910 = vst.msk [vmem:[%s6507_s23 + $0xc0] sm:$0xff] %vm3885_vm2, %v3678_v14 }
 0x44c   : > { %3867 = vmax.xlane.f32.xlu1 %v3105_v32  ;;  %3865 = vmax.xlane.f32.xlu0 %v3104_v58 }
 0x44d   : > { %v3800_v5 = vpop.xlane.xlu1 %3799  ;;  %v3798_v17 = vpop.xlane.xlu0 %3797 }
 0x44e   : > { %3971 = vst.msk [vmem:[%s6507_s23 + $0x2a8] sm:$0xff] %vm3885_vm2, %v3800_v5  ;;  %3970 = vst.msk [vmem:[%s6507_s23 + $0x2a0] sm:$0xff] %vm3885_vm2, %v3798_v17 }
 0x450   : > { %3871 = vmax.xlane.f32.xlu1 %v3107_v30  ;;  %3869 = vmax.xlane.f32.xlu0 %v3106_v7 }
 0x451   : > { %v3684_v53 = vpop.xlane.xlu1 %3683  ;;  %v3682_v43 = vpop.xlane.xlu0 %3681 }
 0x452   : > { %3913 = vst.msk [vmem:[%s6507_s23 + $0xd8] sm:$0xff] %vm3885_vm2, %v3684_v53  ;;  %3912 = vst.msk [vmem:[%s6507_s23 + $0xd0] sm:$0xff] %vm3885_vm2, %v3682_v43 }
 0x454   : > { %3875 = vmax.xlane.f32.xlu1 %v3109_v34  ;;  %3873 = vmax.xlane.f32.xlu0 %v3108_v24 }
 0x455   : > { %v3804_v55 = vpop.xlane.xlu1 %3803  ;;  %v3802_v35 = vpop.xlane.xlu0 %3801 }
 0x456   : > { %3973 = vst.msk [vmem:[%s6507_s23 + $0x2b8] sm:$0xff] %vm3885_vm2, %v3804_v55  ;;  %3972 = vst.msk [vmem:[%s6507_s23 + $0x2b0] sm:$0xff] %vm3885_vm2, %v3802_v35 }
 0x458   : > { %3879 = vmax.xlane.f32.xlu1 %v3111_v38  ;;  %3877 = vmax.xlane.f32.xlu0 %v3110_v15 }
 0x459   : > { %v3688_v8 = vpop.xlane.xlu1 %3687  ;;  %v3686_v27 = vpop.xlane.xlu0 %3685 }
 0x45a   : > { %3915 = vst.msk [vmem:[%s6507_s23 + $0xe8] sm:$0xff] %vm3885_vm2, %v3688_v8  ;;  %3914 = vst.msk [vmem:[%s6507_s23 + $0xe0] sm:$0xff] %vm3885_vm2, %v3686_v27 }
 0x45c   : > { %3883 = vmax.xlane.f32.xlu1 %v3113_v12  ;;  %3881 = vmax.xlane.f32.xlu0 %v3112_v25 }
 0x45d   : > { %v3808_v45 = vpop.xlane.xlu1 %3807  ;;  %v3806_v54 = vpop.xlane.xlu0 %3805 }
 0x45e   : > { %3975 = vst.msk [vmem:[%s6507_s23 + $0x2c8] sm:$0xff] %vm3885_vm2, %v3808_v45  ;;  %3974 = vst.msk [vmem:[%s6507_s23 + $0x2c0] sm:$0xff] %vm3885_vm2, %v3806_v54 }
 0x461   : > { %v3692_v59 = vpop.xlane.xlu1 %3691  ;;  %v3690_v40 = vpop.xlane.xlu0 %3689 }
 0x462   : > { %3917 = vst.msk [vmem:[%s6507_s23 + $0xf8] sm:$0xff] %vm3885_vm2, %v3692_v59  ;;  %3916 = vst.msk [vmem:[%s6507_s23 + $0xf0] sm:$0xff] %vm3885_vm2, %v3690_v40 }
 0x465   : > { %v3812_v41 = vpop.xlane.xlu1 %3811  ;;  %v3810_v63 = vpop.xlane.xlu0 %3809 }
 0x466   : > { %3977 = vst.msk [vmem:[%s6507_s23 + $0x2d8] sm:$0xff] %vm3885_vm2, %v3812_v41  ;;  %3976 = vst.msk [vmem:[%s6507_s23 + $0x2d0] sm:$0xff] %vm3885_vm2, %v3810_v63 }
 0x469   : > { %v3696_v46 = vpop.xlane.xlu1 %3695  ;;  %v3694_v50 = vpop.xlane.xlu0 %3693 }
 0x46a   : > { %3919 = vst.msk [vmem:[%s6507_s23 + $0x108] sm:$0xff] %vm3885_vm2, %v3696_v46  ;;  %3918 = vst.msk [vmem:[%s6507_s23 + $0x100] sm:$0xff] %vm3885_vm2, %v3694_v50 }
 0x46d   : > { %v3816_v3 = vpop.xlane.xlu1 %3815  ;;  %v3814_v44 = vpop.xlane.xlu0 %3813 }
 0x46e   : > { %3979 = vst.msk [vmem:[%s6507_s23 + $0x2e8] sm:$0xff] %vm3885_vm2, %v3816_v3  ;;  %3978 = vst.msk [vmem:[%s6507_s23 + $0x2e0] sm:$0xff] %vm3885_vm2, %v3814_v44 }
 0x471   : > { %v3700_v2 = vpop.xlane.xlu1 %3699  ;;  %v3698_v9 = vpop.xlane.xlu0 %3697 }
 0x472   : > { %3921 = vst.msk [vmem:[%s6507_s23 + $0x118] sm:$0xff] %vm3885_vm2, %v3700_v2  ;;  %3920 = vst.msk [vmem:[%s6507_s23 + $0x110] sm:$0xff] %vm3885_vm2, %v3698_v9 }
 0x475   : > { %v3820_v0 = vpop.xlane.xlu1 %3819  ;;  %v3818_v60 = vpop.xlane.xlu0 %3817 }
 0x476   : > { %3981 = vst.msk [vmem:[%s6507_s23 + $0x2f8] sm:$0xff] %vm3885_vm2, %v3820_v0  ;;  %3980 = vst.msk [vmem:[%s6507_s23 + $0x2f0] sm:$0xff] %vm3885_vm2, %v3818_v60 }
 0x479   : > { %v3704_v13 = vpop.xlane.xlu1 %3703  ;;  %v3702_v29 = vpop.xlane.xlu0 %3701 }
 0x47a   : > { %3923 = vst.msk [vmem:[%s6507_s23 + $0x128] sm:$0xff] %vm3885_vm2, %v3704_v13  ;;  %3922 = vst.msk [vmem:[%s6507_s23 + $0x120] sm:$0xff] %vm3885_vm2, %v3702_v29 }
 0x47d   : > { %v3824_v16 = vpop.xlane.xlu1 %3823  ;;  %v3822_v52 = vpop.xlane.xlu0 %3821 }
 0x47e   : > { %3983 = vst.msk [vmem:[%s6507_s23 + $0x308] sm:$0xff] %vm3885_vm2, %v3824_v16  ;;  %3982 = vst.msk [vmem:[%s6507_s23 + $0x300] sm:$0xff] %vm3885_vm2, %v3822_v52 }
 0x481   : > { %v3708_v21 = vpop.xlane.xlu1 %3707  ;;  %v3706_v56 = vpop.xlane.xlu0 %3705 }
 0x482   : > { %3925 = vst.msk [vmem:[%s6507_s23 + $0x138] sm:$0xff] %vm3885_vm2, %v3708_v21  ;;  %3924 = vst.msk [vmem:[%s6507_s23 + $0x130] sm:$0xff] %vm3885_vm2, %v3706_v56 }
 0x485   : > { %v3828_v61 = vpop.xlane.xlu1 %3827  ;;  %v3826_v19 = vpop.xlane.xlu0 %3825 }
 0x486   : > { %3985 = vst.msk [vmem:[%s6507_s23 + $0x318] sm:$0xff] %vm3885_vm2, %v3828_v61  ;;  %3984 = vst.msk [vmem:[%s6507_s23 + $0x310] sm:$0xff] %vm3885_vm2, %v3826_v19 }
 0x489   : > { %v3712_v26 = vpop.xlane.xlu1 %3711  ;;  %v3710_v48 = vpop.xlane.xlu0 %3709 }
 0x48a   : > { %3927 = vst.msk [vmem:[%s6507_s23 + $0x148] sm:$0xff] %vm3885_vm2, %v3712_v26  ;;  %3926 = vst.msk [vmem:[%s6507_s23 + $0x140] sm:$0xff] %vm3885_vm2, %v3710_v48 }
 0x48d   : > { %v3832_v51 = vpop.xlane.xlu1 %3831  ;;  %v3830_v11 = vpop.xlane.xlu0 %3829 }
 0x48e   : > { %3987 = vst.msk [vmem:[%s6507_s23 + $0x328] sm:$0xff] %vm3885_vm2, %v3832_v51  ;;  %3986 = vst.msk [vmem:[%s6507_s23 + $0x320] sm:$0xff] %vm3885_vm2, %v3830_v11 }
 0x491   : > { %v3716_v28 = vpop.xlane.xlu1 %3715  ;;  %v3714_v22 = vpop.xlane.xlu0 %3713 }
 0x492   : > { %3929 = vst.msk [vmem:[%s6507_s23 + $0x158] sm:$0xff] %vm3885_vm2, %v3716_v28  ;;  %3928 = vst.msk [vmem:[%s6507_s23 + $0x150] sm:$0xff] %vm3885_vm2, %v3714_v22 }
 0x495   : > { %v3836_v23 = vpop.xlane.xlu1 %3835  ;;  %v3834_v20 = vpop.xlane.xlu0 %3833 }
 0x496   : > { %3989 = vst.msk [vmem:[%s6507_s23 + $0x338] sm:$0xff] %vm3885_vm2, %v3836_v23  ;;  %3988 = vst.msk [vmem:[%s6507_s23 + $0x330] sm:$0xff] %vm3885_vm2, %v3834_v20 }
 0x499   : > { %v3720_v10 = vpop.xlane.xlu1 %3719  ;;  %v3718_v39 = vpop.xlane.xlu0 %3717 }
 0x49a   : > { %3931 = vst.msk [vmem:[%s6507_s23 + $0x168] sm:$0xff] %vm3885_vm2, %v3720_v10  ;;  %3930 = vst.msk [vmem:[%s6507_s23 + $0x160] sm:$0xff] %vm3885_vm2, %v3718_v39 }
 0x49d   : > { %v3840_v62 = vpop.xlane.xlu1 %3839  ;;  %v3838_v47 = vpop.xlane.xlu0 %3837 }
 0x49e   : > { %3991 = vst.msk [vmem:[%s6507_s23 + $0x348] sm:$0xff] %vm3885_vm2, %v3840_v62  ;;  %3990 = vst.msk [vmem:[%s6507_s23 + $0x340] sm:$0xff] %vm3885_vm2, %v3838_v47 }
 0x4a1   : > { %v3724_v32 = vpop.xlane.xlu1 %3723  ;;  %v3722_v18 = vpop.xlane.xlu0 %3721 }
 0x4a2   : > { %3933 = vst.msk [vmem:[%s6507_s23 + $0x178] sm:$0xff] %vm3885_vm2, %v3724_v32  ;;  %3932 = vst.msk [vmem:[%s6507_s23 + $0x170] sm:$0xff] %vm3885_vm2, %v3722_v18 }
 0x4a5   : > { %v3844_v14 = vpop.xlane.xlu1 %3843  ;;  %v3842_v58 = vpop.xlane.xlu0 %3841 }
 0x4a6   : > { %3993 = vst.msk [vmem:[%s6507_s23 + $0x358] sm:$0xff] %vm3885_vm2, %v3844_v14  ;;  %3992 = vst.msk [vmem:[%s6507_s23 + $0x350] sm:$0xff] %vm3885_vm2, %v3842_v58 }
 0x4a9   : > { %v3728_v1 = vpop.xlane.xlu1 %3727  ;;  %v3726_v37 = vpop.xlane.xlu0 %3725 }
 0x4aa   : > { %3935 = vst.msk [vmem:[%s6507_s23 + $0x188] sm:$0xff] %vm3885_vm2, %v3728_v1  ;;  %3934 = vst.msk [vmem:[%s6507_s23 + $0x180] sm:$0xff] %vm3885_vm2, %v3726_v37 }
 0x4ad   : > { %v3848_v5 = vpop.xlane.xlu1 %3847  ;;  %v3846_v30 = vpop.xlane.xlu0 %3845 }
 0x4ae   : > { %3995 = vst.msk [vmem:[%s6507_s23 + $0x368] sm:$0xff] %vm3885_vm2, %v3848_v5  ;;  %3994 = vst.msk [vmem:[%s6507_s23 + $0x360] sm:$0xff] %vm3885_vm2, %v3846_v30 }
 0x4b1   : > { %v3732_v57 = vpop.xlane.xlu1 %3731  ;;  %v3730_v17 = vpop.xlane.xlu0 %3729 }
 0x4b2   : > { %3937 = vst.msk [vmem:[%s6507_s23 + $0x198] sm:$0xff] %vm3885_vm2, %v3732_v57  ;;  %3936 = vst.msk [vmem:[%s6507_s23 + $0x190] sm:$0xff] %vm3885_vm2, %v3730_v17 }
 0x4b5   : > { %v3852_v7 = vpop.xlane.xlu1 %3851  ;;  %v3850_v4 = vpop.xlane.xlu0 %3849 }
 0x4b6   : > { %3997 = vst.msk [vmem:[%s6507_s23 + $0x378] sm:$0xff] %vm3885_vm2, %v3852_v7  ;;  %3996 = vst.msk [vmem:[%s6507_s23 + $0x370] sm:$0xff] %vm3885_vm2, %v3850_v4 }
 0x4b9   : > { %v3736_v36 = vpop.xlane.xlu1 %3735  ;;  %v3734_v53 = vpop.xlane.xlu0 %3733 }
 0x4ba   : > { %3939 = vst.msk [vmem:[%s6507_s23 + $0x1a8] sm:$0xff] %vm3885_vm2, %v3736_v36  ;;  %3938 = vst.msk [vmem:[%s6507_s23 + $0x1a0] sm:$0xff] %vm3885_vm2, %v3734_v53 }
 0x4bd   : > { %v3856_v34 = vpop.xlane.xlu1 %3855  ;;  %v3854_v31 = vpop.xlane.xlu0 %3853 }
 0x4be   : > { %3999 = vst.msk [vmem:[%s6507_s23 + $0x388] sm:$0xff] %vm3885_vm2, %v3856_v34  ;;  %3998 = vst.msk [vmem:[%s6507_s23 + $0x380] sm:$0xff] %vm3885_vm2, %v3854_v31 }
 0x4c1   : > { %v3740_v43 = vpop.xlane.xlu1 %3739  ;;  %v3738_v24 = vpop.xlane.xlu0 %3737 }
 0x4c2   : > { %3941 = vst.msk [vmem:[%s6507_s23 + $0x1b8] sm:$0xff] %vm3885_vm2, %v3740_v43  ;;  %3940 = vst.msk [vmem:[%s6507_s23 + $0x1b0] sm:$0xff] %vm3885_vm2, %v3738_v24 }
 0x4c5   : > { %v3860_v42 = vpop.xlane.xlu1 %3859  ;;  %v3858_v49 = vpop.xlane.xlu0 %3857 }
 0x4c6   : > { %4001 = vst.msk [vmem:[%s6507_s23 + $0x398] sm:$0xff] %vm3885_vm2, %v3860_v42  ;;  %4000 = vst.msk [vmem:[%s6507_s23 + $0x390] sm:$0xff] %vm3885_vm2, %v3858_v49 }
 0x4c9   : > { %v3744_v55 = vpop.xlane.xlu1 %3743  ;;  %v3742_v38 = vpop.xlane.xlu0 %3741 }
 0x4ca   : > { %3943 = vst.msk [vmem:[%s6507_s23 + $0x1c8] sm:$0xff] %vm3885_vm2, %v3744_v55  ;;  %3942 = vst.msk [vmem:[%s6507_s23 + $0x1c0] sm:$0xff] %vm3885_vm2, %v3742_v38 }
 0x4cd   : > { %v3864_v6 = vpop.xlane.xlu1 %3863  ;;  %v3862_v35 = vpop.xlane.xlu0 %3861 }
 0x4ce   : > { %4003 = vst.msk [vmem:[%s6507_s23 + $0x3a8] sm:$0xff] %vm3885_vm2, %v3864_v6  ;;  %4002 = vst.msk [vmem:[%s6507_s23 + $0x3a0] sm:$0xff] %vm3885_vm2, %v3862_v35 }
 0x4d1   : > { %v3748_v15 = vpop.xlane.xlu1 %3747  ;;  %v3746_v33 = vpop.xlane.xlu0 %3745 }
 0x4d2   : > { %3945 = vst.msk [vmem:[%s6507_s23 + $0x1d8] sm:$0xff] %vm3885_vm2, %v3748_v15  ;;  %3944 = vst.msk [vmem:[%s6507_s23 + $0x1d0] sm:$0xff] %vm3885_vm2, %v3746_v33 }
 0x4d5   : > { %v3868_v8 = vpop.xlane.xlu1 %3867  ;;  %v3866_v12 = vpop.xlane.xlu0 %3865 }
 0x4d6   : > { %4005 = vst.msk [vmem:[%s6507_s23 + $0x3b8] sm:$0xff] %vm3885_vm2, %v3868_v8  ;;  %4004 = vst.msk [vmem:[%s6507_s23 + $0x3b0] sm:$0xff] %vm3885_vm2, %v3866_v12 }
 0x4d9   : > { %v3872_v27 = vpop.xlane.xlu1 %3871  ;;  %v3870_v25 = vpop.xlane.xlu0 %3869 }
 0x4da   : > { %4007 = vst.msk [vmem:[%s6507_s23 + $0x3c8] sm:$0xff] %vm3885_vm2, %v3872_v27  ;;  %4006 = vst.msk [vmem:[%s6507_s23 + $0x3c0] sm:$0xff] %vm3885_vm2, %v3870_v25 }
 0x4dd   : > { %v3876_v45 = vpop.xlane.xlu1 %3875  ;;  %v3874_v54 = vpop.xlane.xlu0 %3873 }
 0x4de   : > { %4009 = vst.msk [vmem:[%s6507_s23 + $0x3d8] sm:$0xff] %vm3885_vm2, %v3876_v45  ;;  %4008 = vst.msk [vmem:[%s6507_s23 + $0x3d0] sm:$0xff] %vm3885_vm2, %v3874_v54 }
 0x4e1   : > { %v3880_v59 = vpop.xlane.xlu1 %3879  ;;  %v3878_v40 = vpop.xlane.xlu0 %3877 }
 0x4e2   : > { %4011 = vst.msk [vmem:[%s6507_s23 + $0x3e8] sm:$0xff] %vm3885_vm2, %v3880_v59  ;;  %4010 = vst.msk [vmem:[%s6507_s23 + $0x3e0] sm:$0xff] %vm3885_vm2, %v3878_v40 }
 0x4e5   : > { %v3884_v41 = vpop.xlane.xlu1 %3883  ;;  %v3882_v63 = vpop.xlane.xlu0 %3881 }
 0x4e6   : > { %4013 = vst.msk [vmem:[%s6507_s23 + $0x3f8] sm:$0xff] %vm3885_vm2, %v3884_v41  ;;  %4012 = vst.msk [vmem:[%s6507_s23 + $0x3f0] sm:$0xff] %vm3885_vm2, %v3882_v63 }
 0x4e7 PF: > { %s19_s29 = sadd.s32 1, %s4669_s29   ;;  %s7001_s27 = smov %s4665_s28 }
 0x4e8   : > { %p16_p2 = scmp.ge.s32.totalorder %s19_s29, 4   ;;  %s7002_s28 = smov %s7004_s9 }
 0x4ea   :  { %18 = sbr.rel (!%p16_p2) target bundleno = 2 (0x2), region = 95 }
 0x4ef   :  { %4035 = vsyncpa [#allocation4], 1 }
 0x4f0   :  { %4037 = vsyncpa [#allocation4 + $0x1], 1 }

</bundles_post_ra>
